<compile_context>
chip_gen: v6e
topology: v6e:2x2x1
jax: 0.10.0
libtpu: 0.0.40
codegen_flags: <defaults>
</compile_context>

<pallas_src>
import jax
import jax.numpy as jnp
from jax.experimental import pallas as pl
from jax.experimental.pallas import tpu as pltpu

LN_EPS = 1e-5   # PyTorch nn.LayerNorm default
LANES = 128


def _layernorm_tanh(h, gamma, beta):
    """tanh(LayerNorm(h)) over the last axis (PyTorch biased variance).

    Folded single-stats-pass form: var = E[h^2] - mean^2,
    out = tanh(h * (inv*gamma) + (beta - mean*inv*gamma)).
    """
    inv_f = 1.0 / h.shape[-1]
    mean = jnp.sum(h, axis=-1, keepdims=True) * inv_f
    ms = jnp.sum(h * h, axis=-1, keepdims=True) * inv_f
    var = ms - mean * mean
    inv = jax.lax.rsqrt(var + LN_EPS)
    scale = inv * gamma                    # (tile_b, F)
    shift = beta - mean * scale            # (tile_b, F)
    return jnp.tanh(h * scale + shift)


def _pinn_kernel(h1_ref, w2_ref, w3_ref, v64_ref, v128_ref, b4_ref, o_ref):
    # h1_ref  : (tile_b, 64) f32   layer-1 pre-activation x @ w1 + b1
    # w2_ref  : (64, 128)  f32,  w3_ref : (128, 128) f32
    # v64_ref : (2, 64)   rows = [gamma1, beta1]
    # v128_ref: (7, 128)  rows = [b2, g2, be2, b3, g3, be3, w4_row]
    # b4_ref  : (1,) f32 scalar in SMEM
    # o_ref   : (1, tile_b // 128, 128) f32  lane-dense packed outputs

    # ---- layer 1 tail: LayerNorm + tanh (linear part done by XLA wrapper) ----
    h = _layernorm_tanh(h1_ref[...], v64_ref[0:1, :], v64_ref[1:2, :])
    # dropout1: identity in eval mode

    # ---- layer 2: 64 -> 128 (MXU, f32) ----
    h = jnp.dot(h, w2_ref[...], preferred_element_type=jnp.float32) + v128_ref[0:1, :]
    h = _layernorm_tanh(h, v128_ref[1:2, :], v128_ref[2:3, :])
    # dropout2: identity in eval mode

    # ---- layer 3: 128 -> 128 (MXU, f32) ----
    h = jnp.dot(h, w3_ref[...], preferred_element_type=jnp.float32) + v128_ref[3:4, :]
    h = _layernorm_tanh(h, v128_ref[4:5, :], v128_ref[5:6, :])
    # dropout3: identity in eval mode

    # ---- output: 128 -> 1 as VPU multiply + lane reduce, lane-dense store ----
    # (profile-gated A/B per review: alternative is jnp.dot(h, w4) on the
    #  idle MXU with a (tile_b, 1) out block; keep full-vreg stores here.)
    prod = h * v128_ref[6:7, :]                                   # (tile_b, 128)
    prod = prod.reshape(o_ref.shape[1], o_ref.shape[2], prod.shape[-1])
    o_ref[0, :, :] = jnp.sum(prod, axis=-1) + b4_ref[0]


def _cdiv(a, b):
    return -(-a // b)


def _round_up(a, b):
    return _cdiv(a, b) * b


def _pick_tiling(n_rows, *, max_tile, cores):
    """128-multiple tile with num_tiles a multiple of `cores` (v7x megacore)."""
    num_tiles = cores * _cdiv(n_rows, cores * max_tile)
    tile_b = _round_up(_cdiv(n_rows, num_tiles), LANES)
    return num_tiles, tile_b


def pinn_forward(x, params, *, max_tile=4096, cores=2):
    """x: [N, 3] float32 -> [N, 1] float32 (Network.forward in eval mode)."""
    assert max_tile % LANES == 0
    N = x.shape[0]
    num_tiles, tile_b = _pick_tiling(N, max_tile=max_tile, cores=cores)
    padded = num_tiles * tile_b
    rows_per_tile = tile_b // LANES

    # Layer-1 linear (K=3) in plain XLA: avoids a 3-lane-wide kernel input
    # block (strided DMA + lane broadcasts); the extra HBM read of the (N,64)
    # activation hides behind per-tile compute.  Padded rows are zeros.
    x_pad = jnp.pad(x.astype(jnp.float32), ((0, padded - N), (0, 0)))
    h1 = x_pad @ params["w1"].astype(jnp.float32) + params["b1"].astype(jnp.float32)

    # Pack the small per-layer vectors into two slabs + one SMEM scalar.
    v64 = jnp.concatenate([params["g1"], params["be1"]],
                          axis=0).astype(jnp.float32)             # (2, 64)
    v128 = jnp.concatenate(
        [params["b2"], params["g2"], params["be2"],
         params["b3"], params["g3"], params["be3"],
         params["w4"].reshape(1, -1)], axis=0).astype(jnp.float32)  # (7, 128)
    w2 = params["w2"].astype(jnp.float32)
    w3 = params["w3"].astype(jnp.float32)
    b4 = params["b4"].reshape(-1).astype(jnp.float32)             # (1,)

    full = lambda shape: pl.BlockSpec(shape, lambda i: (0, 0))
    out = pl.pallas_call(
        _pinn_kernel,
        out_shape=jax.ShapeDtypeStruct((num_tiles, rows_per_tile, LANES),
                                       jnp.float32),
        grid_spec=pltpu.PrefetchScalarGridSpec(
            num_scalar_prefetch=0,
            grid=(num_tiles,),
            in_specs=[
                pl.BlockSpec((tile_b, 64), lambda i: (i, 0)),       # h1 tile
                full((64, 128)),                                    # w2
                full((128, 128)),                                   # w3
                full((2, 64)),                                      # ln1 slab
                full((7, 128)),                                     # 128-wide slab
                pl.BlockSpec(memory_space=pltpu.MemorySpace.SMEM),  # b4 scalar
            ],
            out_specs=pl.BlockSpec((1, rows_per_tile, LANES),
                                   lambda i: (i, 0, 0)),
        ),
        compiler_params=pltpu.CompilerParams(
            dimension_semantics=("parallel",)),
    )(h1, w2, w3, v64, v128, b4)

    return out.reshape(-1)[:N].reshape(N, 1)


def init_params(key):
    """Deterministic PyTorch-style init. Weights stored as (in, out)."""
    def linear(key, fan_in, fan_out):
        kw, kb = jax.random.split(key)
        bound = 1.0 / jnp.sqrt(fan_in)
        w = jax.random.uniform(kw, (fan_in, fan_out), jnp.float32, -bound, bound)
        b = jax.random.uniform(kb, (1, fan_out), jnp.float32, -bound, bound)
        return w, b

    k1, k2, k3, k4 = jax.random.split(key, 4)
    w1, b1 = linear(k1, 3, 64)
    w2, b2 = linear(k2, 64, 128)
    w3, b3 = linear(k3, 128, 128)
    w4, b4 = linear(k4, 128, 1)
    ones = lambda n: jnp.ones((1, n), jnp.float32)
    zeros = lambda n: jnp.zeros((1, n), jnp.float32)
    return {
        "w1": w1, "b1": b1, "g1": ones(64), "be1": zeros(64),
        "w2": w2, "b2": b2, "g2": ones(128), "be2": zeros(128),
        "w3": w3, "b3": b3, "g3": ones(128), "be3": zeros(128),
        "w4": w4, "b4": b4,
    }


def reference_forward(x, p):
    """Pure-JAX reference matching the PyTorch module in eval mode."""
    def ln(h, g, b):
        m = jnp.mean(h, -1, keepdims=True)
        v = jnp.mean((h - m) ** 2, -1, keepdims=True)
        return (h - m) / jnp.sqrt(v + LN_EPS) * g + b
    h = jnp.tanh(ln(x @ p["w1"] + p["b1"], p["g1"], p["be1"]))
    h = jnp.tanh(ln(h @ p["w2"] + p["b2"], p["g2"], p["be2"]))
    h = jnp.tanh(ln(h @ p["w3"] + p["b3"], p["g3"], p["be3"]))
    return h @ p["w4"] + p["b4"]


if __name__ == "__main__":
    key = jax.random.PRNGKey(0)
    kx, kp = jax.random.split(key)
    params = init_params(kp)

    # Small batches of (x, y, t) collocation points; the second size exercises
    # odd padding plus the even-num_tiles (megacore) tiling policy.
    for n in (1000, 4099):
        x = jax.random.normal(jax.random.fold_in(kx, n), (n, 3), jnp.float32)
        out = jax.block_until_ready(pinn_forward(x, params))
        ref = reference_forward(x, params)
        assert out.shape == (n, 1)
        assert jnp.allclose(out, ref, atol=1e-4, rtol=1e-4), f"mismatch at N={n}"

    print("KERNEL_OK")
</pallas_src>

<mosaic_0001>
module attributes {stable_mosaic.version = 11 : i64} {
  func.func @_pinn_kernel(%arg0: i32, %arg1: memref<512x64xf32, #tpu.memory_space<vmem>>, %arg2: memref<64x128xf32, #tpu.memory_space<vmem>>, %arg3: memref<128x128xf32, #tpu.memory_space<vmem>>, %arg4: memref<2x64xf32, #tpu.memory_space<vmem>>, %arg5: memref<7x128xf32, #tpu.memory_space<vmem>>, %arg6: memref<1xf32, #tpu.memory_space<smem>>, %arg7: memref<1x4x128xf32, #tpu.memory_space<vmem>>) attributes {dimension_semantics = [#tpu.dimension_semantics<parallel>], iteration_bounds = array<i64: 2>, scalar_prefetch = 0 : i64, scratch_operands = 0 : i64, tpu.core_type = #tpu.core_type<tc>, window_params = [{transform_indices = @transform_0, window_bounds = array<i64: 512, 64>}, {pipeline_mode = #tpu.pipeline_mode<synchronous>, transform_indices = @transform_1, window_bounds = array<i64: 64, 128>}, {pipeline_mode = #tpu.pipeline_mode<synchronous>, transform_indices = @transform_2, window_bounds = array<i64: 128, 128>}, {pipeline_mode = #tpu.pipeline_mode<synchronous>, transform_indices = @transform_3, window_bounds = array<i64: 2, 64>}, {pipeline_mode = #tpu.pipeline_mode<synchronous>, transform_indices = @transform_4, window_bounds = array<i64: 7, 128>}, {transform_indices = @transform_5, window_bounds = array<i64: 1>}, {transform_indices = @transform_6, window_bounds = array<i64: 1, 4, 128>}]} {
    %c0 = arith.constant 0 : index
    %c0_0 = arith.constant 0 : index
    %0 = vector.load %arg1[%c0, %c0_0] : memref<512x64xf32, #tpu.memory_space<vmem>>, vector<512x64xf32>
    %c0_1 = arith.constant 0 : index
    %c0_2 = arith.constant 0 : index
    %1 = vector.load %arg4[%c0_1, %c0_2] : memref<2x64xf32, #tpu.memory_space<vmem>>, vector<1x64xf32>
    %c1 = arith.constant 1 : index
    %c0_3 = arith.constant 0 : index
    %2 = vector.load %arg4[%c1, %c0_3] : memref<2x64xf32, #tpu.memory_space<vmem>>, vector<1x64xf32>
    %cst = arith.constant dense<0.000000e+00> : vector<512xf32>
    %3 = vector.multi_reduction <add>, %0, %cst [1] : vector<512x64xf32> to vector<512xf32>
    %4 = vector.shape_cast %3 : vector<512xf32> to vector<512x1xf32>
    %cst_4 = arith.constant 1.562500e-02 : f32
    %5 = vector.broadcast %cst_4 : f32 to vector<512x1xf32>
    %6 = arith.mulf %4, %5 : vector<512x1xf32>
    %7 = arith.mulf %0, %0 : vector<512x64xf32>
    %cst_5 = arith.constant dense<0.000000e+00> : vector<512xf32>
    %8 = vector.multi_reduction <add>, %7, %cst_5 [1] : vector<512x64xf32> to vector<512xf32>
    %9 = vector.shape_cast %8 : vector<512xf32> to vector<512x1xf32>
    %cst_6 = arith.constant 1.562500e-02 : f32
    %10 = vector.broadcast %cst_6 : f32 to vector<512x1xf32>
    %11 = arith.mulf %9, %10 : vector<512x1xf32>
    %12 = arith.mulf %6, %6 : vector<512x1xf32>
    %13 = arith.subf %11, %12 : vector<512x1xf32>
    %cst_7 = arith.constant 9.99999974E-6 : f32
    %14 = vector.broadcast %cst_7 : f32 to vector<512x1xf32>
    %15 = arith.addf %13, %14 : vector<512x1xf32>
    %16 = math.rsqrt %15 : vector<512x1xf32>
    %17 = vector.broadcast %16 : vector<512x1xf32> to vector<512x64xf32>
    %18 = vector.broadcast %1 : vector<1x64xf32> to vector<512x64xf32>
    %19 = arith.mulf %17, %18 : vector<512x64xf32>
    %20 = vector.broadcast %6 : vector<512x1xf32> to vector<512x64xf32>
    %21 = arith.mulf %20, %19 : vector<512x64xf32>
    %22 = vector.broadcast %2 : vector<1x64xf32> to vector<512x64xf32>
    %23 = arith.subf %22, %21 : vector<512x64xf32>
    %24 = arith.mulf %0, %19 : vector<512x64xf32>
    %25 = arith.addf %24, %23 : vector<512x64xf32>
    %26 = math.tanh %25 : vector<512x64xf32>
    %c0_8 = arith.constant 0 : index
    %c0_9 = arith.constant 0 : index
    %27 = vector.load %arg2[%c0_8, %c0_9] : memref<64x128xf32, #tpu.memory_space<vmem>>, vector<64x128xf32>
    %cst_10 = arith.constant dense<0.000000e+00> : vector<512x128xf32>
    %28 = tpu.matmul %26, %27, %cst_10 {dimension_numbers = #tpu.dot_dimension_numbers<[1], [0], [0], [1], [0, 0, 1, 1], [], []>} : vector<512x64xf32>, vector<64x128xf32>, vector<512x128xf32> -> vector<512x128xf32>
    %c0_11 = arith.constant 0 : index
    %c0_12 = arith.constant 0 : index
    %29 = vector.load %arg5[%c0_11, %c0_12] : memref<7x128xf32, #tpu.memory_space<vmem>>, vector<1x128xf32>
    %30 = vector.broadcast %29 : vector<1x128xf32> to vector<512x128xf32>
    %31 = arith.addf %28, %30 : vector<512x128xf32>
    %c1_13 = arith.constant 1 : index
    %c0_14 = arith.constant 0 : index
    %32 = vector.load %arg5[%c1_13, %c0_14] : memref<7x128xf32, #tpu.memory_space<vmem>>, vector<1x128xf32>
    %c2 = arith.constant 2 : index
    %c0_15 = arith.constant 0 : index
    %33 = vector.load %arg5[%c2, %c0_15] : memref<7x128xf32, #tpu.memory_space<vmem>>, vector<1x128xf32>
    %cst_16 = arith.constant dense<0.000000e+00> : vector<512xf32>
    %34 = vector.multi_reduction <add>, %31, %cst_16 [1] : vector<512x128xf32> to vector<512xf32>
    %35 = vector.shape_cast %34 : vector<512xf32> to vector<512x1xf32>
    %cst_17 = arith.constant 7.812500e-03 : f32
    %36 = vector.broadcast %cst_17 : f32 to vector<512x1xf32>
    %37 = arith.mulf %35, %36 : vector<512x1xf32>
    %38 = arith.mulf %31, %31 : vector<512x128xf32>
    %cst_18 = arith.constant dense<0.000000e+00> : vector<512xf32>
    %39 = vector.multi_reduction <add>, %38, %cst_18 [1] : vector<512x128xf32> to vector<512xf32>
    %40 = vector.shape_cast %39 : vector<512xf32> to vector<512x1xf32>
    %cst_19 = arith.constant 7.812500e-03 : f32
    %41 = vector.broadcast %cst_19 : f32 to vector<512x1xf32>
    %42 = arith.mulf %40, %41 : vector<512x1xf32>
    %43 = arith.mulf %37, %37 : vector<512x1xf32>
    %44 = arith.subf %42, %43 : vector<512x1xf32>
    %cst_20 = arith.constant 9.99999974E-6 : f32
    %45 = vector.broadcast %cst_20 : f32 to vector<512x1xf32>
    %46 = arith.addf %44, %45 : vector<512x1xf32>
    %47 = math.rsqrt %46 : vector<512x1xf32>
    %48 = vector.broadcast %47 : vector<512x1xf32> to vector<512x128xf32>
    %49 = vector.broadcast %32 : vector<1x128xf32> to vector<512x128xf32>
    %50 = arith.mulf %48, %49 : vector<512x128xf32>
    %51 = vector.broadcast %37 : vector<512x1xf32> to vector<512x128xf32>
    %52 = arith.mulf %51, %50 : vector<512x128xf32>
    %53 = vector.broadcast %33 : vector<1x128xf32> to vector<512x128xf32>
    %54 = arith.subf %53, %52 : vector<512x128xf32>
    %55 = arith.mulf %31, %50 : vector<512x128xf32>
    %56 = arith.addf %55, %54 : vector<512x128xf32>
    %57 = math.tanh %56 : vector<512x128xf32>
    %c0_21 = arith.constant 0 : index
    %c0_22 = arith.constant 0 : index
    %58 = vector.load %arg3[%c0_21, %c0_22] : memref<128x128xf32, #tpu.memory_space<vmem>>, vector<128x128xf32>
    %cst_23 = arith.constant dense<0.000000e+00> : vector<512x128xf32>
    %59 = tpu.matmul %57, %58, %cst_23 {dimension_numbers = #tpu.dot_dimension_numbers<[1], [0], [0], [1], [0, 0, 1, 1], [], []>} : vector<512x128xf32>, vector<128x128xf32>, vector<512x128xf32> -> vector<512x128xf32>
    %c3 = arith.constant 3 : index
    %c0_24 = arith.constant 0 : index
    %60 = vector.load %arg5[%c3, %c0_24] : memref<7x128xf32, #tpu.memory_space<vmem>>, vector<1x128xf32>
    %61 = vector.broadcast %60 : vector<1x128xf32> to vector<512x128xf32>
    %62 = arith.addf %59, %61 : vector<512x128xf32>
    %c4 = arith.constant 4 : index
    %c0_25 = arith.constant 0 : index
    %63 = vector.load %arg5[%c4, %c0_25] : memref<7x128xf32, #tpu.memory_space<vmem>>, vector<1x128xf32>
    %c5 = arith.constant 5 : index
    %c0_26 = arith.constant 0 : index
    %64 = vector.load %arg5[%c5, %c0_26] : memref<7x128xf32, #tpu.memory_space<vmem>>, vector<1x128xf32>
    %cst_27 = arith.constant dense<0.000000e+00> : vector<512xf32>
    %65 = vector.multi_reduction <add>, %62, %cst_27 [1] : vector<512x128xf32> to vector<512xf32>
    %66 = vector.shape_cast %65 : vector<512xf32> to vector<512x1xf32>
    %cst_28 = arith.constant 7.812500e-03 : f32
    %67 = vector.broadcast %cst_28 : f32 to vector<512x1xf32>
    %68 = arith.mulf %66, %67 : vector<512x1xf32>
    %69 = arith.mulf %62, %62 : vector<512x128xf32>
    %cst_29 = arith.constant dense<0.000000e+00> : vector<512xf32>
    %70 = vector.multi_reduction <add>, %69, %cst_29 [1] : vector<512x128xf32> to vector<512xf32>
    %71 = vector.shape_cast %70 : vector<512xf32> to vector<512x1xf32>
    %cst_30 = arith.constant 7.812500e-03 : f32
    %72 = vector.broadcast %cst_30 : f32 to vector<512x1xf32>
    %73 = arith.mulf %71, %72 : vector<512x1xf32>
    %74 = arith.mulf %68, %68 : vector<512x1xf32>
    %75 = arith.subf %73, %74 : vector<512x1xf32>
    %cst_31 = arith.constant 9.99999974E-6 : f32
    %76 = vector.broadcast %cst_31 : f32 to vector<512x1xf32>
    %77 = arith.addf %75, %76 : vector<512x1xf32>
    %78 = math.rsqrt %77 : vector<512x1xf32>
    %79 = vector.broadcast %78 : vector<512x1xf32> to vector<512x128xf32>
    %80 = vector.broadcast %63 : vector<1x128xf32> to vector<512x128xf32>
    %81 = arith.mulf %79, %80 : vector<512x128xf32>
    %82 = vector.broadcast %68 : vector<512x1xf32> to vector<512x128xf32>
    %83 = arith.mulf %82, %81 : vector<512x128xf32>
    %84 = vector.broadcast %64 : vector<1x128xf32> to vector<512x128xf32>
    %85 = arith.subf %84, %83 : vector<512x128xf32>
    %86 = arith.mulf %62, %81 : vector<512x128xf32>
    %87 = arith.addf %86, %85 : vector<512x128xf32>
    %88 = math.tanh %87 : vector<512x128xf32>
    %c6 = arith.constant 6 : index
    %c0_32 = arith.constant 0 : index
    %89 = vector.load %arg5[%c6, %c0_32] : memref<7x128xf32, #tpu.memory_space<vmem>>, vector<1x128xf32>
    %90 = vector.broadcast %89 : vector<1x128xf32> to vector<512x128xf32>
    %91 = arith.mulf %88, %90 : vector<512x128xf32>
    %92 = vector.shape_cast %91 : vector<512x128xf32> to vector<4x128x128xf32>
    %cst_33 = arith.constant dense<0.000000e+00> : vector<4x128xf32>
    %93 = vector.multi_reduction <add>, %92, %cst_33 [2] : vector<4x128x128xf32> to vector<4x128xf32>
    %c0_34 = arith.constant 0 : index
    %94 = memref.load %arg6[%c0_34] : memref<1xf32, #tpu.memory_space<smem>>
    %95 = vector.broadcast %94 : f32 to vector<4x128xf32>
    %96 = arith.addf %93, %95 : vector<4x128xf32>
    %c0_35 = arith.constant 0 : index
    %c0_36 = arith.constant 0 : index
    %c0_37 = arith.constant 0 : index
    %97 = vector.load %arg7[%c0_35, %c0_36, %c0_37] : memref<1x4x128xf32, #tpu.memory_space<vmem>>, vector<1x4x128xf32>
    %98 = vector.shape_cast %97 : vector<1x4x128xf32> to vector<4x128xf32>
    %99 = vector.shape_cast %96 : vector<4x128xf32> to vector<1x4x128xf32>
    tpu.vector_store %arg7[%c0_35, %c0_36, %c0_37], %99 {strides = array<i32>} : memref<1x4x128xf32, #tpu.memory_space<vmem>>, vector<1x4x128xf32>,
    return
  }
  func.func @transform_0(%arg0: i32) -> (i32, i32) {
    %c0_i32 = arith.constant 0 : i32
    %c0_i32_0 = arith.constant 0 : i32
    return %arg0, %c0_i32 : i32, i32
  }
  func.func @transform_1(%arg0: i32) -> (i32, i32) {
    %c0_i32 = arith.constant 0 : i32
    %c0_i32_0 = arith.constant 0 : i32
    %c0_i32_1 = arith.constant 0 : i32
    return %c0_i32, %c0_i32_0 : i32, i32
  }
  func.func @transform_2(%arg0: i32) -> (i32, i32) {
    %c0_i32 = arith.constant 0 : i32
    %c0_i32_0 = arith.constant 0 : i32
    %c0_i32_1 = arith.constant 0 : i32
    return %c0_i32, %c0_i32_0 : i32, i32
  }
  func.func @transform_3(%arg0: i32) -> (i32, i32) {
    %c0_i32 = arith.constant 0 : i32
    %c0_i32_0 = arith.constant 0 : i32
    %c0_i32_1 = arith.constant 0 : i32
    return %c0_i32, %c0_i32_0 : i32, i32
  }
  func.func @transform_4(%arg0: i32) -> (i32, i32) {
    %c0_i32 = arith.constant 0 : i32
    %c0_i32_0 = arith.constant 0 : i32
    %c0_i32_1 = arith.constant 0 : i32
    return %c0_i32, %c0_i32_0 : i32, i32
  }
  func.func @transform_5(%arg0: i32) -> i32 {
    %c0_i32 = arith.constant 0 : i32
    %c0_i32_0 = arith.constant 0 : i32
    return %c0_i32 : i32
  }
  func.func @transform_6(%arg0: i32) -> (i32, i32, i32) {
    %c0_i32 = arith.constant 0 : i32
    %c0_i32_0 = arith.constant 0 : i32
    %c0_i32_1 = arith.constant 0 : i32
    return %arg0, %c0_i32, %c0_i32_0 : i32, i32, i32
  }
}

</mosaic_0001>

<bundles_post_ra>
// kernel: tpu_custom_call.1
= control target key start
LH: loop header
LB: loop body
LE: loop exit
PB: predicated region body
PF: predicated region fallthrough
CT: control target
= control target key end

     0   :  { %s10412_s0 = inlined_call_operand.vmem [shape: f32[1024,64], index: 0, kind: input, shape index: {}]   ;;  %s10413_s1 = inlined_call_operand.vmem [shape: f32[64,128], index: 1, kind: input, shape index: {}]   ;;  %s10414_s2 = inlined_call_operand.vmem [shape: f32[128,128], index: 2, kind: input, shape index: {}]   ;;  %s10415_s3 = inlined_call_operand.vmem [shape: f32[2,64], index: 3, kind: input, shape index: {}]   ;;  %s10416_s4 = inlined_call_operand.vmem [shape: f32[7,128], index: 4, kind: input, shape index: {}]   ;;  %s10417_s5 = inlined_call_operand.<no memory space> [shape: f32[1], index: 5, kind: input, shape index: {}]   ;;  %s10418_s6 = inlined_call_operand.hbm [shape: f32[2,4,128], index: 6, kind: output, shape index: {}]  }
   0x1   :  { %11 = sst [smem:[#allocation2]] %s10417_s5 }
   0x2   :  { %12 = vsyncpa [#allocation4], 0 }
   0x3   :  { %14 = vsyncpa [#allocation4 + $0x1], 0  ;;  %s6976_s23 = smov 0   ;;  %s6978_s24 = smov 0  }
   0x4   :  { %s6980_s25 = smov 0   ;;  %s6982_s26 = smov 0  }
   0x5 LB: > { %s5491_s5 = sadd.s32 4294967295, %s6935_s26   ;;  %s5492_s27 = sadd.s32 4294967294, %s6935_s26   ;;  %s6935_s26 = sphi %s6982_s26, %s10580_s26   ;;  %s6931_s25 = sphi %s6980_s25, %s10579_s25   ;;  %s6927_s24 = sphi %s6978_s24, %s10578_s24   ;;  %s6923_s23 = sphi %s6976_s23, %s10577_s23  }
   0x6   : > { %s6999_s28 = sadd.s32 1, %s6935_s26   ;;  %s158_s29 = sadd.s32 1, %s6931_s25 }
   0x7   : > { %s155_s30 = ssub.s32 %s6935_s26, %s6999_s28  ;;  %p168_p0 = scmp.ne.s32.totalorder %s6931_s25, %s6927_s24 }
   0x8   : > { %p156_p1 = scmp.eq.s32.totalorder %s155_s30, 0  ;;  %p169_p2 = scmp.eq.s32.totalorder %s5491_s5, 1 }
   0x9   : > { %p174_p3 = scmp.ne.s32.totalorder %s6927_s24, %s6923_s23  ;;  %p175_p4 = scmp.eq.s32.totalorder %s5492_s27, 1 }
   0xa   : > { %s7009_s7 = scalar_select %p156_p1, %s6931_s25, %s158_s29  }
   0xb   : > { %p7011_p5 = por %p169_p2, %p168_p0  ;;  %p7015_p6 = por %p175_p4, %p174_p3 }
   0xc   : > { %p5495_p7 = scmp.ge.s32.totalorder %s6935_s26, 1  ;;  %p217_p8 = scmp.lt.s32.totalorder %s6935_s26, 3 }
   0xe   : > { %p218_p9 = pnand %p5495_p7, %p217_p8 }
  0x10   : > { %221 = sbr.rel (%p218_p9) target bundleno = 1410 (0x582), region = 44 }
  0x15   : > { %s7021_s10 = sshll.u32 %s5491_s5, 6  ;;  %vm319_vm0 = vcmask 523264   ;;  %v1551_v50 = vld [vmem:[%s10413_s1 + $0x38] sm:$0xff]  ;;  %v1550_v55 = vld [vmem:[%s10413_s1 + $0x30] sm:$0xff]  ;;  %v1549_v56 = vld [vmem:[%s10413_s1 + $0x28] sm:$0xff]  ;;  %s9974_s17 = sld [smem:[#allocation2]] }
  0x16   : > { %p248_p10 = scmp.lt.s32.totalorder %s7021_s10, 127  ;;  %5728 = vmatprep.subr.mxu0 %v1551_v50  ;;  %v1548_v61 = vld [vmem:[%s10413_s1 + $0x20] sm:$0xff]  ;;  %v1547_v62 = vld [vmem:[%s10413_s1 + $0x18] sm:$0xff]  ;;  %vm5074_vm1 = vcmask 130112   ;;  %vm5081_vm2 = vcmask 195712   ;;  %vm5088_vm3 = vcmask 261312  }
  0x17   : > { %5729 = vmatpush3.msra.mxu0 %v1551_v50  ;;  %vm5095_vm4 = vcmask 326912   ;;  %vm5102_vm5 = vcmask 392512   ;;  %vm5109_vm6 = vcmask 458112   ;;  %vm5116_vm7 = vcmask 523712   ;;  %s244_s21 = sand.u32 1, %s6927_s24   ;;  %s6937_s14 = smov [#allocation3]  }
  0x18   : > { %s249_s11 = scalar_select %p248_p10, %s7021_s10, 127  ;;  %5730 = vmatprep.subr.mxu0 %v1550_v55  ;;  %vm5123_vm8 = vcmask 589312   ;;  %vm5130_vm9 = vcmask 654912   ;;  %vm5137_vm10 = vcmask 720512   ;;  %vm5144_vm11 = vcmask 786112  }
  0x19   : > { %5731 = vmatpush3.msra.mxu0 %v1550_v55  ;;  %vm5151_vm12 = vcmask 851712   ;;  %vm5158_vm13 = vcmask 917312   ;;  %vm5165_vm14 = vcmask 982912   ;;  %vm5172_vm15 = vcmask 1048512   ;;  %s5496_s22 = sshll.u32 %s244_s21, 2  ;;  %s6879_s16 = sshll.u32 %s6937_s14, 4  ;;  %s6880_s16 = int_to_ptr.vmem [resolvable:$false] %s6879_s16 }
  0x1a   : > { %s5498_s12 = sshll.u32 %s249_s11, 3  ;;  %5732 = vmatprep.subr.mxu0 %v1549_v56  ;;  %s246_s5 = scalar_lea.vmem [#allocation3], %s5496_s22 }
  0x1b   : > { %s7028_s15 = scalar_lea.vmem %s10412_s0, %s5498_s12  ;;  %5733 = vmatpush3.msra.mxu0 %v1549_v56  ;;  %s5433_s27 = sshll.u32 %s246_s5, 4  ;;  %s5434_s27 = int_to_ptr.vmem [resolvable:$true] %s5433_s27 }
  0x1c   : > { %v7031_v0 = vld [vmem:[%s7028_s15 + $0x18] sm:$0xff]  ;;  %v7034_v1 = vld [vmem:[%s7028_s15] sm:$0xff]  ;;  %v7037_v2 = vld [vmem:[%s7028_s15 + $0x8] sm:$0xff]  ;;  %5734 = vmatprep.subr.mxu0 %v1548_v61  ;;  %s10375_s11 = scalar_lea.hbm %s10418_s6, %s7021_s10  ;;  %s5420_s12 = scalar_lea.sflag [#allocation4], %s244_s21 }
  0x1d   : > { %v329_v3 = vsel %vm319_vm0, %v7031_v0, 0.0  ;;  %v320_v4 = vsel %vm319_vm0, %v7034_v1, 0.0  ;;  %v576_v5 = vmul.f32 %v7034_v1, %v7034_v1  ;;  %v323_v7 = vsel %vm319_vm0, %v7037_v2, 0.0  ;;  %v7051_v9 = vld [vmem:[%s7028_s15 + $0x10] sm:$0xff]  ;;  %v7063_v16 = vld [vmem:[%s7028_s15 + $0x28] sm:$0xff]  ;;  %v7066_v17 = vld [vmem:[%s7028_s15 + $0x20] sm:$0xff]  ;;  %5735 = vmatpush3.msra.mxu0 %v1548_v61  ;;  %p6882_p0 = scmp.lt.s32.totalorder %s5434_s27, %s6880_s16 }
  0x1e   : > { %330 = vadd.xlane.f32.xlu1 %v329_v3  ;;  %321 = vadd.xlane.f32.xlu0 %v320_v4  ;;  %v577_v8 = vmul.f32 %v7037_v2, %v7037_v2  ;;  %v326_v11 = vsel %vm319_vm0, %v7051_v9, 0.0  ;;  %v579_v12 = vmul.f32 %v7031_v0, %v7031_v0  ;;  %v578_v13 = vmul.f32 %v7051_v9, %v7051_v9  ;;  %v7079_v24 = vld [vmem:[%s7028_s15 + $0x38] sm:$0xff]  ;;  %v7082_v25 = vld [vmem:[%s7028_s15 + $0x30] sm:$0xff]  ;;  %v7095_v32 = vld [vmem:[%s7028_s15 + $0x48] sm:$0xff]  ;;  %s6875_s13 = scalar_lea.vmem %s5434_s27, 64 }
  0x1f   : > { %v640_v6 = vsel %vm319_vm0, %v576_v5, 0.0  ;;  %v335_v18 = vsel %vm319_vm0, %v7063_v16, 0.0  ;;  %v332_v19 = vsel %vm319_vm0, %v7066_v17, 0.0  ;;  %v581_v20 = vmul.f32 %v7063_v16, %v7063_v16  ;;  %v7098_v33 = vld [vmem:[%s7028_s15 + $0x40] sm:$0xff]  ;;  %v7111_v40 = vld [vmem:[%s7028_s15 + $0x58] sm:$0xff]  ;;  %v7114_v41 = vld [vmem:[%s7028_s15 + $0x50] sm:$0xff]  ;;  %5736 = vmatprep.subr.mxu0 %v1547_v62  ;;  %p6876_p11 = scmp.ne.s32.totalorder %s5434_s27, %s6875_s13 }
  0x20   : > { %v643_v10 = vsel %vm319_vm0, %v577_v8, 0.0  ;;  %v649_v14 = vsel %vm319_vm0, %v579_v12, 0.0  ;;  %v646_v15 = vsel %vm319_vm0, %v578_v13, 0.0  ;;  %v580_v21 = vmul.f32 %v7066_v17, %v7066_v17  ;;  %v266_v48 = vld [vmem:[%s7028_s15 + $0x68] sm:$0xff]  ;;  %v265_v49 = vld [vmem:[%s7028_s15 + $0x60] sm:$0xff]  ;;  %v268_v59 = vld [vmem:[%s7028_s15 + $0x78] sm:$0xff]  ;;  %5737 = vmatpush3.msra.mxu0 %v1547_v62 }
  0x21   : > { %v655_v22 = vsel %vm319_vm0, %v581_v20, 0.0  ;;  %v341_v26 = vsel %vm319_vm0, %v7079_v24, 0.0  ;;  %v338_v27 = vsel %vm319_vm0, %v7082_v25, 0.0  ;;  %v583_v28 = vmul.f32 %v7079_v24, %v7079_v24  ;;  %v267_v60 = vld [vmem:[%s7028_s15 + $0x70] sm:$0xff]  ;;  %v1545_v12 = vld [vmem:[%s10413_s1 + $0x8] sm:$0xff]  ;;  %v1544_v13 = vld [vmem:[%s10413_s1] sm:$0xff]  ;;  %p6877_p12 = pnand %p6876_p11, %p7011_p5 }
  0x22   : > { %641 = vadd.xlane.f32.xlu1 %v640_v6  ;;  %324 = vadd.xlane.f32.xlu0 %v323_v7  ;;  %v652_v23 = vsel %vm319_vm0, %v580_v21, 0.0  ;;  %v582_v29 = vmul.f32 %v7082_v25, %v7082_v25  ;;  %v347_v34 = vsel %vm319_vm0, %v7095_v32, 0.0  ;;  %v344_v35 = vsel %vm319_vm0, %v7098_v33, 0.0  ;;  %v1546_v6 = vld [vmem:[%s10413_s1 + $0x10] sm:$0xff] }
  0x23   : > { %v661_v30 = vsel %vm319_vm0, %v583_v28, 0.0  ;;  %v585_v36 = vmul.f32 %v7095_v32, %v7095_v32  ;;  %v584_v37 = vmul.f32 %v7098_v33, %v7098_v33  ;;  %v353_v42 = vsel %vm319_vm0, %v7111_v40, 0.0  ;;  %5738 = vmatprep.subr.mxu0 %v1546_v6  ;;  %v279_v61 = vld [vmem:[%s7028_s15 + $0xd0] sm:$0xff]  ;;  %p6878_p13 = pneg %p6877_p12 }
  0x24   : > { %v658_v31 = vsel %vm319_vm0, %v582_v29, 0.0  ;;  %v350_v43 = vsel %vm319_vm0, %v7114_v41, 0.0  ;;  %v587_v44 = vmul.f32 %v7111_v40, %v7111_v40  ;;  %v586_v45 = vmul.f32 %v7114_v41, %v7114_v41  ;;  %5739 = vmatpush3.msra.mxu0 %v1546_v6 }
  0x25   : > { %v667_v38 = vsel %vm319_vm0, %v585_v36, 0.0  ;;  %v664_v39 = vsel %vm319_vm0, %v584_v37, 0.0  ;;  %v359_v51 = vsel %vm319_vm0, %v266_v48, 0.0  ;;  %v356_v52 = vsel %vm319_vm0, %v265_v49, 0.0  ;;  %5740 = vmatprep.subr.mxu0 %v1545_v12 }
  0x26   : > { %644 = vadd.xlane.f32.xlu1 %v643_v10  ;;  %327 = vadd.xlane.f32.xlu0 %v326_v11  ;;  %v673_v46 = vsel %vm319_vm0, %v587_v44, 0.0  ;;  %v670_v47 = vsel %vm319_vm0, %v586_v45, 0.0  ;;  %v589_v53 = vmul.f32 %v266_v48, %v266_v48  ;;  %v588_v54 = vmul.f32 %v265_v49, %v265_v49  ;;  %v270_v10 = vld [vmem:[%s7028_s15 + $0x88] sm:$0xff]  ;;  %v269_v11 = vld [vmem:[%s7028_s15 + $0x80] sm:$0xff]  ;;  %v276_v44 = vld [vmem:[%s7028_s15 + $0xb8] sm:$0xff] }
  0x27   : > { %v365_v63 = vsel %vm319_vm0, %v268_v59, 0.0  ;;  %v362_v3 = vsel %vm319_vm0, %v267_v60, 0.0  ;;  %v591_v4 = vmul.f32 %v268_v59, %v268_v59  ;;  %v590_v5 = vmul.f32 %v267_v60, %v267_v60  ;;  %5741 = vmatpush3.msra.mxu0 %v1545_v12  ;;  %v275_v45 = vld [vmem:[%s7028_s15 + $0xb0] sm:$0xff]  ;;  %v280_v60 = vld [vmem:[%s7028_s15 + $0xd8] sm:$0xff] }
  0x28   : > { %v679_v57 = vsel %vm319_vm0, %v589_v53, 0.0  ;;  %v676_v58 = vsel %vm319_vm0, %v588_v54, 0.0  ;;  %5742 = vmatprep.subr.mxu0 %v1544_v13  ;;  %v599_v48 = vmul.f32 %v276_v44, %v276_v44  ;;  %v598_v49 = vmul.f32 %v275_v45, %v275_v45  ;;  %v277_v53 = vld [vmem:[%s7028_s15 + $0xc0] sm:$0xff] }
  0x29   : > { %v685_v7 = vsel %vm319_vm0, %v591_v4, 0.0  ;;  %v682_v8 = vsel %vm319_vm0, %v590_v5, 0.0  ;;  %5743 = vmatpush3.msra.mxu0 %v1544_v13  ;;  %v392_v55 = vsel %vm319_vm0, %v277_v53, 0.0  ;;  %v401_v62 = vsel %vm319_vm0, %v280_v60, 0.0 }
  0x2a   : > { %650 = vadd.xlane.f32.xlu1 %v649_v14  ;;  %647 = vadd.xlane.f32.xlu0 %v646_v15  ;;  %v371_v14 = vsel %vm319_vm0, %v270_v10, 0.0  ;;  %v368_v15 = vsel %vm319_vm0, %v269_v11, 0.0  ;;  %v709_v50 = vsel %vm319_vm0, %v599_v48, 0.0  ;;  %v602_v4 = vmul.f32 %v279_v61, %v279_v61 }
  0x2c   : > { %v718_v6 = vsel %vm319_vm0, %v602_v4, 0.0 }
  0x2e   : > { %336 = vadd.xlane.f32.xlu1 %v335_v18  ;;  %333 = vadd.xlane.f32.xlu0 %v332_v19  ;;  %v593_v18 = vmul.f32 %v270_v10, %v270_v10  ;;  %v592_v19 = vmul.f32 %v269_v11, %v269_v11 }
  0x30   : > { %v691_v20 = vsel %vm319_vm0, %v593_v18, 0.0  ;;  %v688_v21 = vsel %vm319_vm0, %v592_v19, 0.0  ;;  %v284_v18 = vld [vmem:[%s7028_s15 + $0xf8] sm:$0xff]  ;;  %v283_v19 = vld [vmem:[%s7028_s15 + $0xf0] sm:$0xff] }
  0x32   : > { %656 = vadd.xlane.f32.xlu1 %v655_v22  ;;  %653 = vadd.xlane.f32.xlu0 %v652_v23  ;;  %v272_v22 = vld [vmem:[%s7028_s15 + $0x98] sm:$0xff]  ;;  %v271_v23 = vld [vmem:[%s7028_s15 + $0x90] sm:$0xff] }
  0x33   : > { %v595_v28 = vmul.f32 %v272_v22, %v272_v22  ;;  %v594_v29 = vmul.f32 %v271_v23, %v271_v23 }
  0x36   : > { %342 = vadd.xlane.f32.xlu1 %v341_v26  ;;  %339 = vadd.xlane.f32.xlu0 %v338_v27  ;;  %v377_v26 = vsel %vm319_vm0, %v272_v22, 0.0  ;;  %v374_v27 = vsel %vm319_vm0, %v271_v23, 0.0  ;;  %v607_v22 = vmul.f32 %v284_v18, %v284_v18  ;;  %v606_v23 = vmul.f32 %v283_v19, %v283_v19 }
  0x3a   : > { %662 = vadd.xlane.f32.xlu1 %v661_v30  ;;  %659 = vadd.xlane.f32.xlu0 %v658_v31  ;;  %v697_v30 = vsel %vm319_vm0, %v595_v28, 0.0  ;;  %v694_v31 = vsel %vm319_vm0, %v594_v29, 0.0  ;;  %v286_v28 = vld [vmem:[%s7028_s15 + $0x108] sm:$0xff]  ;;  %v285_v29 = vld [vmem:[%s7028_s15 + $0x100] sm:$0xff] }
  0x3e   : > { %348 = vadd.xlane.f32.xlu1 %v347_v34  ;;  %345 = vadd.xlane.f32.xlu0 %v344_v35  ;;  %v274_v34 = vld [vmem:[%s7028_s15 + $0xa8] sm:$0xff]  ;;  %v273_v35 = vld [vmem:[%s7028_s15 + $0xa0] sm:$0xff] }
  0x3f   : > { %v383_v36 = vsel %vm319_vm0, %v274_v34, 0.0  ;;  %v380_v37 = vsel %vm319_vm0, %v273_v35, 0.0 }
  0x42   : > { %668 = vadd.xlane.f32.xlu1 %v667_v38  ;;  %665 = vadd.xlane.f32.xlu0 %v664_v39  ;;  %v597_v38 = vmul.f32 %v274_v34, %v274_v34  ;;  %v596_v39 = vmul.f32 %v273_v35, %v273_v35  ;;  %v609_v34 = vmul.f32 %v286_v28, %v286_v28 }
  0x43   : > { %v608_v35 = vmul.f32 %v285_v29, %v285_v29 }
  0x46   : > { %354 = vadd.xlane.f32.xlu1 %v353_v42  ;;  %351 = vadd.xlane.f32.xlu0 %v350_v43  ;;  %v703_v42 = vsel %vm319_vm0, %v597_v38, 0.0  ;;  %v700_v43 = vsel %vm319_vm0, %v596_v39, 0.0  ;;  %v288_v38 = vld [vmem:[%s7028_s15 + $0x118] sm:$0xff]  ;;  %v287_v39 = vld [vmem:[%s7028_s15 + $0x110] sm:$0xff] }
  0x4a   : > { %674 = vadd.xlane.f32.xlu1 %v673_v46  ;;  %671 = vadd.xlane.f32.xlu0 %v670_v47  ;;  %v389_v46 = vsel %vm319_vm0, %v276_v44, 0.0  ;;  %v386_v47 = vsel %vm319_vm0, %v275_v45, 0.0  ;;  %v611_v44 = vmul.f32 %v288_v38, %v288_v38  ;;  %v610_v45 = vmul.f32 %v287_v39, %v287_v39 }
  0x4c   : > { %v745_v48 = vsel %vm319_vm0, %v611_v44, 0.0 }
  0x4e   : > { %360 = vadd.xlane.f32.xlu1 %v359_v51  ;;  %357 = vadd.xlane.f32.xlu0 %v356_v52  ;;  %v706_v51 = vsel %vm319_vm0, %v598_v49, 0.0  ;;  %v278_v52 = vld [vmem:[%s7028_s15 + $0xc8] sm:$0xff]  ;;  %v742_v49 = vsel %vm319_vm0, %v610_v45, 0.0 }
  0x4f   : > { %v395_v54 = vsel %vm319_vm0, %v278_v52, 0.0  ;;  %v601_v56 = vmul.f32 %v278_v52, %v278_v52  ;;  %v289_v52 = vld [vmem:[%s7028_s15 + $0x120] sm:$0xff] }
  0x52   : > { %680 = vadd.xlane.f32.xlu1 %v679_v57  ;;  %677 = vadd.xlane.f32.xlu0 %v676_v58  ;;  %v600_v57 = vmul.f32 %v277_v53, %v277_v53  ;;  %v715_v58 = vsel %vm319_vm0, %v601_v56, 0.0 }
  0x54   : > { %v712_v59 = vsel %vm319_vm0, %v600_v57, 0.0  ;;  %v428_v57 = vsel %vm319_vm0, %v289_v52, 0.0 }
  0x56   : > { %366 = vadd.xlane.f32.xlu1 %v365_v63  ;;  %363 = vadd.xlane.f32.xlu0 %v362_v3  ;;  %v398_v63 = vsel %vm319_vm0, %v279_v61, 0.0  ;;  %v603_v3 = vmul.f32 %v280_v60, %v280_v60 }
  0x58   : > { %v721_v5 = vsel %vm319_vm0, %v603_v3, 0.0 }
  0x5a   : > { %686 = vadd.xlane.f32.xlu1 %v685_v7  ;;  %683 = vadd.xlane.f32.xlu0 %v682_v8  ;;  %v282_v7 = vld [vmem:[%s7028_s15 + $0xe8] sm:$0xff]  ;;  %v281_v8 = vld [vmem:[%s7028_s15 + $0xe0] sm:$0xff] }
  0x5b   : > { %v407_v10 = vsel %vm319_vm0, %v282_v7, 0.0  ;;  %v404_v11 = vsel %vm319_vm0, %v281_v8, 0.0  ;;  %v605_v12 = vmul.f32 %v282_v7, %v282_v7  ;;  %v604_v13 = vmul.f32 %v281_v8, %v281_v8  ;;  %v292_v7 = vld [vmem:[%s7028_s15 + $0x138] sm:$0xff] }
  0x5e   : > { %372 = vadd.xlane.f32.xlu1 %v371_v14  ;;  %369 = vadd.xlane.f32.xlu0 %v368_v15  ;;  %v727_v14 = vsel %vm319_vm0, %v605_v12, 0.0  ;;  %v724_v15 = vsel %vm319_vm0, %v604_v13, 0.0  ;;  %v291_v13 = vld [vmem:[%s7028_s15 + $0x130] sm:$0xff] }
  0x62   : > { %692 = vadd.xlane.f32.xlu1 %v691_v20  ;;  %689 = vadd.xlane.f32.xlu0 %v688_v21  ;;  %v413_v20 = vsel %vm319_vm0, %v284_v18, 0.0  ;;  %v410_v21 = vsel %vm319_vm0, %v283_v19, 0.0 }
  0x66   : > { %378 = vadd.xlane.f32.xlu1 %v377_v26  ;;  %375 = vadd.xlane.f32.xlu0 %v374_v27  ;;  %v733_v26 = vsel %vm319_vm0, %v607_v22, 0.0  ;;  %v730_v27 = vsel %vm319_vm0, %v606_v23, 0.0  ;;  %v615_v22 = vmul.f32 %v292_v7, %v292_v7  ;;  %v614_v23 = vmul.f32 %v291_v13, %v291_v13 }
  0x6a   : > { %698 = vadd.xlane.f32.xlu1 %v697_v30  ;;  %695 = vadd.xlane.f32.xlu0 %v694_v31  ;;  %v419_v30 = vsel %vm319_vm0, %v286_v28, 0.0  ;;  %v416_v31 = vsel %vm319_vm0, %v285_v29, 0.0 }
  0x6e   : > { %384 = vadd.xlane.f32.xlu1 %v383_v36  ;;  %381 = vadd.xlane.f32.xlu0 %v380_v37  ;;  %v739_v36 = vsel %vm319_vm0, %v609_v34, 0.0  ;;  %v736_v37 = vsel %vm319_vm0, %v608_v35, 0.0 }
  0x72   : > { %704 = vadd.xlane.f32.xlu1 %v703_v42  ;;  %701 = vadd.xlane.f32.xlu0 %v700_v43  ;;  %v425_v42 = vsel %vm319_vm0, %v288_v38, 0.0  ;;  %v422_v43 = vsel %vm319_vm0, %v287_v39, 0.0  ;;  %v294_v38 = vld [vmem:[%s7028_s15 + $0x148] sm:$0xff]  ;;  %v293_v39 = vld [vmem:[%s7028_s15 + $0x140] sm:$0xff] }
  0x76   : > { %390 = vadd.xlane.f32.xlu1 %v389_v46  ;;  %387 = vadd.xlane.f32.xlu0 %v386_v47 }
  0x7a   : > { %710 = vadd.xlane.f32.xlu1 %v709_v50  ;;  %707 = vadd.xlane.f32.xlu0 %v706_v51  ;;  %v290_v51 = vld [vmem:[%s7028_s15 + $0x128] sm:$0xff] }
  0x7b   : > { %v431_v56 = vsel %vm319_vm0, %v290_v51, 0.0 }
  0x7e   : > { %396 = vadd.xlane.f32.xlu1 %v395_v54  ;;  %393 = vadd.xlane.f32.xlu0 %v392_v55 }
  0x82   : > { %716 = vadd.xlane.f32.xlu1 %v715_v58  ;;  %713 = vadd.xlane.f32.xlu0 %v712_v59  ;;  %v613_v58 = vmul.f32 %v290_v51, %v290_v51  ;;  %v612_v59 = vmul.f32 %v289_v52, %v289_v52  ;;  %v440_v52 = vsel %vm319_vm0, %v293_v39, 0.0 }
  0x86   : > { %402 = vadd.xlane.f32.xlu1 %v401_v62  ;;  %399 = vadd.xlane.f32.xlu0 %v398_v63 }
  0x8a   : > { %722 = vadd.xlane.f32.xlu1 %v721_v5  ;;  %719 = vadd.xlane.f32.xlu0 %v718_v6  ;;  %v751_v5 = vsel %vm319_vm0, %v613_v58, 0.0  ;;  %v748_v6 = vsel %vm319_vm0, %v612_v59, 0.0 }
  0x8e   : > { %408 = vadd.xlane.f32.xlu1 %v407_v10  ;;  %405 = vadd.xlane.f32.xlu0 %v404_v11 }
  0x92   : > { %728 = vadd.xlane.f32.xlu1 %v727_v14  ;;  %725 = vadd.xlane.f32.xlu0 %v724_v15 }
  0x96   : > { %414 = vadd.xlane.f32.xlu1 %v413_v20  ;;  %411 = vadd.xlane.f32.xlu0 %v410_v21  ;;  %v437_v20 = vsel %vm319_vm0, %v292_v7, 0.0  ;;  %v434_v21 = vsel %vm319_vm0, %v291_v13, 0.0 }
  0x9a   : > { %734 = vadd.xlane.f32.xlu1 %v733_v26  ;;  %731 = vadd.xlane.f32.xlu0 %v730_v27 }
  0x9e   : > { %420 = vadd.xlane.f32.xlu1 %v419_v30  ;;  %417 = vadd.xlane.f32.xlu0 %v416_v31 }
  0xa2   : > { %740 = vadd.xlane.f32.xlu1 %v739_v36  ;;  %737 = vadd.xlane.f32.xlu0 %v736_v37  ;;  %v757_v36 = vsel %vm319_vm0, %v615_v22, 0.0  ;;  %v754_v37 = vsel %vm319_vm0, %v614_v23, 0.0  ;;  %v298_v22 = vld [vmem:[%s7028_s15 + $0x168] sm:$0xff] }
  0xa6   : > { %426 = vadd.xlane.f32.xlu1 %v425_v42  ;;  %423 = vadd.xlane.f32.xlu0 %v422_v43 }
  0xa7   : > { %v331_v46 = vpop.xlane.xlu1 %330  ;;  %v322_v47 = vpop.xlane.xlu0 %321 }
  0xa8   : > { %v7222_v50 = vmul.f32 0.015625, %v322_v47  ;;  %v7237_v8 = vmul.f32 0.015625, %v331_v46 }
  0xaa   : > { %v896_v53 = vmul.f32 %v7222_v50, %v7222_v50  ;;  %746 = vadd.xlane.f32.xlu1 %v745_v48  ;;  %743 = vadd.xlane.f32.xlu0 %v742_v49  ;;  %v899_v26 = vmul.f32 %v7237_v8, %v7237_v8  ;;  %v443_v48 = vsel %vm319_vm0, %v294_v38, 0.0 }
  0xab   : > { %v642_v54 = vpop.xlane.xlu1 %641  ;;  %v325_v55 = vpop.xlane.xlu0 %324 }
  0xac   : > { %v832_v60 = vmul.f32 0.015625, %v642_v54  ;;  %v7230_v61 = vmul.f32 0.015625, %v325_v55  ;;  %v616_v54 = vmul.f32 %v293_v39, %v293_v39  ;;  %v455_v39 = vsel %vm319_vm0, %v298_v22, 0.0 }
  0xae   : > { %v960_v62 = vsub.f32 %v832_v60, %v896_v53  ;;  %v897_v63 = vmul.f32 %v7230_v61, %v7230_v61  ;;  %432 = vadd.xlane.f32.xlu1 %v431_v56  ;;  %429 = vadd.xlane.f32.xlu0 %v428_v57  ;;  %v617_v53 = vmul.f32 %v294_v38, %v294_v38  ;;  %v7265_v57 = vld [vmem:[%s10415_s3] ss:$0 sm:$0xff]  ;;  %v296_v60 = vld [vmem:[%s7028_s15 + $0x158] sm:$0xff] }
  0xaf   : > { %v645_v3 = vpop.xlane.xlu1 %644  ;;  %v328_v4 = vpop.xlane.xlu0 %327  ;;  %v619_v7 = vmul.f32 %v296_v60, %v296_v60 }
  0xb0   : > { %v1024_v10 = vadd.f32 1e-05, %v960_v62  ;;  %v833_v11 = vmul.f32 0.015625, %v645_v3  ;;  %v7239_v12 = vmul.f32 0.015625, %v328_v4  ;;  %v763_v4 = vsel %vm319_vm0, %v617_v53, 0.0 }
  0xb2   : > { %6039 = vrsqrt.f32 %v1024_v10  ;;  %v961_v14 = vsub.f32 %v833_v11, %v897_v63  ;;  %v898_v15 = vmul.f32 %v7239_v12, %v7239_v12  ;;  %752 = vadd.xlane.f32.xlu1 %v751_v5  ;;  %749 = vadd.xlane.f32.xlu0 %v748_v6  ;;  %v760_v5 = vsel %vm319_vm0, %v616_v54, 0.0  ;;  %v295_v6 = vld [vmem:[%s7028_s15 + $0x150] sm:$0xff] }
  0xb3   : > { %v651_v18 = vpop.xlane.xlu1 %650  ;;  %v648_v19 = vpop.xlane.xlu0 %647  ;;  %v621_v54 = vmul.f32 %v298_v22, %v298_v22 }
  0xb4   : > { %v1025_v27 = vadd.f32 1e-05, %v961_v14  ;;  %v835_v28 = vmul.f32 0.015625, %v651_v18  ;;  %v834_v29 = vmul.f32 0.015625, %v648_v19  ;;  %v7279_v19 = vld [vmem:[%s10415_s3 + $0x1] ss:$0 sm:$0xff] }
  0xb6   : > { %6041 = vrsqrt.f32 %v1025_v27  ;;  %v963_v30 = vsub.f32 %v835_v28, %v899_v26  ;;  %v962_v31 = vsub.f32 %v834_v29, %v898_v15  ;;  %438 = vadd.xlane.f32.xlu1 %v437_v20  ;;  %435 = vadd.xlane.f32.xlu0 %v434_v21  ;;  %v618_v15 = vmul.f32 %v295_v6, %v295_v6 }
  0xb7   : > { %v337_v34 = vpop.xlane.xlu1 %336  ;;  %v334_v35 = vpop.xlane.xlu0 %333  ;;  %v449_v28 = vsel %vm319_vm0, %v296_v60, 0.0  ;;  %v446_v29 = vsel %vm319_vm0, %v295_v6, 0.0 }
  0xb8   : > { %v1027_v42 = vadd.f32 1e-05, %v963_v30  ;;  %v1026_v43 = vadd.f32 1e-05, %v962_v31  ;;  %v7252_v44 = vmul.f32 0.015625, %v337_v34  ;;  %v7254_v45 = vmul.f32 0.015625, %v334_v35 }
  0xb9   : > { %v297_v30 = vld [vmem:[%s7028_s15 + $0x160] sm:$0xff]  ;;  %v766_v38 = vsel %vm319_vm0, %v618_v15, 0.0 }
  0xba   : > { %6043 = vrsqrt.f32 %v1027_v42  ;;  %v901_v46 = vmul.f32 %v7252_v44, %v7252_v44  ;;  %v900_v47 = vmul.f32 %v7254_v45, %v7254_v45  ;;  %758 = vadd.xlane.f32.xlu1 %v757_v36  ;;  %755 = vadd.xlane.f32.xlu0 %v754_v37  ;;  %v769_v37 = vsel %vm319_vm0, %v619_v7, 0.0 }
  0xbb   : > { %6045 = vrsqrt.f32 %v1026_v43  ;;  %v657_v49 = vpop.xlane.xlu1 %656  ;;  %v654_v51 = vpop.xlane.xlu0 %653 }
  0xbc   : > { %v837_v55 = vmul.f32 0.015625, %v657_v49  ;;  %v836_v56 = vmul.f32 0.015625, %v654_v51 }
  0xbe   : > { %v965_v58 = vsub.f32 %v837_v55, %v901_v46  ;;  %v964_v59 = vsub.f32 %v836_v56, %v900_v47  ;;  %444 = vadd.xlane.f32.xlu1 %v443_v48  ;;  %441 = vadd.xlane.f32.xlu0 %v440_v52  ;;  %v620_v55 = vmul.f32 %v297_v30, %v297_v30 }
  0xbf   : > { %v6040_v62 = vpop.eup %6039  ;;  %v343_v63 = vpop.xlane.xlu1 %342 }
  0xc0   : > { %v340_v3 = vpop.xlane.xlu0 %339  ;;  %v1029_v10 = vadd.f32 1e-05, %v965_v58  ;;  %v1028_v11 = vadd.f32 1e-05, %v964_v59  ;;  %v7271_v13 = vmul.f32 0.015625, %v343_v63  ;;  %v1156_v18 = vmul.f32 %v6040_v62, %v7265_v57 }
  0xc1   : > { %v7273_v14 = vmul.f32 0.015625, %v340_v3 }
  0xc2   : > { %6047 = vrsqrt.f32 %v1029_v10  ;;  %v903_v20 = vmul.f32 %v7271_v13, %v7271_v13  ;;  %764 = vadd.xlane.f32.xlu1 %v763_v4  ;;  %761 = vadd.xlane.f32.xlu0 %v760_v5  ;;  %v1220_v31 = vmul.f32 %v1156_v18, %v7222_v50  ;;  %v1352_v43 = vmul.f32 %v1156_v18, %v7034_v1  ;;  %v300_v18 = vld [vmem:[%s7028_s15 + $0x178] sm:$0xff] }
  0xc3   : > { %v902_v21 = vmul.f32 %v7273_v14, %v7273_v14  ;;  %v6042_v23 = vpop.eup %6041  ;;  %6049 = vrsqrt.f32 %v1028_v11  ;;  %v663_v26 = vpop.xlane.xlu1 %662  ;;  %v452_v50 = vsel %vm319_vm0, %v297_v30, 0.0 }
  0xc4   : > { %v660_v27 = vpop.xlane.xlu0 %659  ;;  %v1157_v34 = vmul.f32 %v6042_v23, %v7265_v57  ;;  %v839_v35 = vmul.f32 0.015625, %v663_v26  ;;  %v1288_v42 = vsub.f32 %v7279_v19, %v1220_v31  ;;  %v772_v26 = vsel %vm319_vm0, %v620_v55, 0.0 }
  0xc5   : > { %v838_v36 = vmul.f32 0.015625, %v660_v27  ;;  %v461_v27 = vsel %vm319_vm0, %v300_v18, 0.0 }
  0xc6   : > { %v1221_v46 = vmul.f32 %v1157_v34, %v7230_v61  ;;  %v967_v47 = vsub.f32 %v839_v35, %v903_v20  ;;  %450 = vadd.xlane.f32.xlu1 %v449_v28  ;;  %v1353_v51 = vmul.f32 %v1157_v34, %v7037_v2  ;;  %447 = vadd.xlane.f32.xlu0 %v446_v29  ;;  %v299_v28 = vld [vmem:[%s7028_s15 + $0x170] sm:$0xff] }
  0xc7   : > { %v966_v48 = vsub.f32 %v838_v36, %v902_v21  ;;  %v6044_v49 = vpop.eup %6043  ;;  %v349_v52 = vpop.xlane.xlu1 %348  ;;  %v1416_v56 = vadd.f32 %v1352_v43, %v1288_v42  ;;  %v623_v36 = vmul.f32 %v300_v18, %v300_v18 }
  0xc8   : > { %v346_v53 = vpop.xlane.xlu0 %345  ;;  %v6046_v58 = vpop.eup %6045  ;;  %v1289_v59 = vsub.f32 %v7279_v19, %v1221_v46  ;;  %v1159_v1 = vmul.f32 %v6044_v49, %v7265_v57  ;;  %v1031_v61 = vadd.f32 1e-05, %v967_v47  ;;  %v7302_v63 = vmul.f32 0.015625, %v349_v52 }
  0xc9   : > { %v1030_v60 = vadd.f32 1e-05, %v966_v48  ;;  %v1158_v62 = vmul.f32 %v6046_v58, %v7265_v57  ;;  %v7304_v3 = vmul.f32 0.015625, %v346_v53  ;;  %6051 = vtanh.f32 %v1416_v56 }
  0xca   : > { %v1417_v2 = vadd.f32 %v1353_v51, %v1289_v59  ;;  %v1223_v4 = vmul.f32 %v1159_v1, %v7237_v8  ;;  %v1355_v5 = vmul.f32 %v1159_v1, %v7031_v0  ;;  %6053 = vrsqrt.f32 %v1031_v61  ;;  %770 = vadd.xlane.f32.xlu1 %v769_v37  ;;  %767 = vadd.xlane.f32.xlu0 %v766_v38  ;;  %v302_v1 = vld [vmem:[%s7028_s15 + $0x188] sm:$0xff]  ;;  %v301_v61 = vld [vmem:[%s7028_s15 + $0x180] sm:$0xff] }
  0xcb   : > { %v1222_v6 = vmul.f32 %v1158_v62, %v7239_v12  ;;  %v1354_v7 = vmul.f32 %v1158_v62, %v7051_v9  ;;  %6055 = vrsqrt.f32 %v1030_v60  ;;  %v905_v10 = vmul.f32 %v7302_v63, %v7302_v63  ;;  %v669_v11 = vpop.xlane.xlu1 %668 }
  0xcc   : > { %v666_v15 = vpop.xlane.xlu0 %665  ;;  %6057 = vtanh.f32 %v1417_v2  ;;  %v1291_v8 = vsub.f32 %v7279_v19, %v1223_v4  ;;  %v904_v0 = vmul.f32 %v7304_v3, %v7304_v3  ;;  %v841_v20 = vmul.f32 0.015625, %v669_v11 }
  0xcd   : > { %v1290_v12 = vsub.f32 %v7279_v19, %v1222_v6  ;;  %v840_v21 = vmul.f32 0.015625, %v666_v15  ;;  %v775_v9 = vsel %vm319_vm0, %v621_v54, 0.0  ;;  %v622_v37 = vmul.f32 %v299_v28, %v299_v28 }
  0xce   : > { %v1419_v22 = vadd.f32 %v1355_v5, %v1291_v8  ;;  %v969_v23 = vsub.f32 %v841_v20, %v905_v10  ;;  %456 = vadd.xlane.f32.xlu1 %v455_v39  ;;  %453 = vadd.xlane.f32.xlu0 %v452_v50  ;;  %v458_v59 = vsel %vm319_vm0, %v299_v28, 0.0  ;;  %v467_v15 = vsel %vm319_vm0, %v302_v1, 0.0 }
  0xcf   : > { %v6048_v29 = vpop.eup %6047  ;;  %v1418_v30 = vadd.f32 %v1354_v7, %v1290_v12  ;;  %v968_v31 = vsub.f32 %v840_v21, %v904_v0  ;;  %v355_v34 = vpop.xlane.xlu1 %354  ;;  %v778_v5 = vsel %vm319_vm0, %v622_v37, 0.0  ;;  %v464_v18 = vsel %vm319_vm0, %v301_v61, 0.0 }
  0xd0   : > { %v352_v35 = vpop.xlane.xlu0 %351  ;;  %v6050_v38 = vpop.eup %6049  ;;  %6059 = vtanh.f32 %v1419_v22  ;;  %v1161_v42 = vmul.f32 %v6048_v29, %v7265_v57  ;;  %v1033_v43 = vadd.f32 1e-05, %v969_v23  ;;  %v7322_v46 = vmul.f32 0.015625, %v355_v34 }
  0xd1   : > { %6061 = vtanh.f32 %v1418_v30  ;;  %v1160_v39 = vmul.f32 %v6050_v38, %v7265_v57  ;;  %v1032_v47 = vadd.f32 1e-05, %v968_v31  ;;  %v7325_v48 = vmul.f32 0.015625, %v352_v35 }
  0xd2   : > { %v1225_v49 = vmul.f32 %v1161_v42, %v7252_v44  ;;  %v1357_v50 = vmul.f32 %v1161_v42, %v7063_v16  ;;  %6063 = vrsqrt.f32 %v1033_v43  ;;  %v907_v51 = vmul.f32 %v7322_v46, %v7322_v46  ;;  %776 = vadd.xlane.f32.xlu1 %v775_v9  ;;  %773 = vadd.xlane.f32.xlu0 %v772_v26  ;;  %v304_v42 = vld [vmem:[%s7028_s15 + $0x198] sm:$0xff]  ;;  %v303_v43 = vld [vmem:[%s7028_s15 + $0x190] sm:$0xff] }
  0xd3   : > { %v1224_v52 = vmul.f32 %v1160_v39, %v7254_v45  ;;  %v1356_v53 = vmul.f32 %v1160_v39, %v7066_v17  ;;  %6065 = vrsqrt.f32 %v1032_v47  ;;  %v906_v54 = vmul.f32 %v7325_v48, %v7325_v48  ;;  %v675_v55 = vpop.xlane.xlu1 %674 }
  0xd4   : > { %v672_v44 = vpop.xlane.xlu0 %671  ;;  %v1293_v56 = vsub.f32 %v7279_v19, %v1225_v49  ;;  %v843_v16 = vmul.f32 0.015625, %v675_v55  ;;  %v781_v45 = vsel %vm319_vm0, %v623_v36, 0.0  ;;  %v625_v8 = vmul.f32 %v302_v1, %v302_v1 }
  0xd5   : > { %v842_v58 = vmul.f32 0.015625, %v672_v44  ;;  %v1292_v60 = vsub.f32 %v7279_v19, %v1224_v52  ;;  %v624_v29 = vmul.f32 %v301_v61, %v301_v61 }
  0xd6   : > { %v6052_v17 = vpop.eup %6051  ;;  %v1421_v62 = vadd.f32 %v1357_v50, %v1293_v56  ;;  %v971_v2 = vsub.f32 %v843_v16, %v907_v51  ;;  %462 = vadd.xlane.f32.xlu1 %v461_v27  ;;  %459 = vadd.xlane.f32.xlu0 %v458_v59  ;;  %v473_v56 = vsel %vm319_vm0, %v304_v42, 0.0  ;;  %v470_v16 = vsel %vm319_vm0, %v303_v43, 0.0 }
  0xd7   : > { %v970_v4 = vsub.f32 %v842_v58, %v906_v54  ;;  %v6054_v6 = vpop.eup %6053  ;;  %v1420_v7 = vadd.f32 %v1356_v53, %v1292_v60  ;;  %5744 = vmatprep.mubr.msk.f32.mxu0 %vm319_vm0, %v6052_v17  ;;  %v361_v10 = vpop.xlane.xlu1 %360  ;;  %v784_v52 = vsel %vm319_vm0, %v624_v29, 0.0  ;;  %v627_v58 = vmul.f32 %v304_v42, %v304_v42 }
  0xd8   : > { %v358_v11 = vpop.xlane.xlu0 %357  ;;  %v6056_v0 = vpop.eup %6055  ;;  %6067 = vtanh.f32 %v1421_v62  ;;  %v1163_v20 = vmul.f32 %v6054_v6, %v7265_v57  ;;  %v1035_v12 = vadd.f32 1e-05, %v971_v2  ;;  %v7347_v23 = vmul.f32 0.015625, %v361_v10 }
  0xd9   : > { %v1034_v21 = vadd.f32 1e-05, %v970_v4  ;;  %v6058_v9 = vpop.eup %6057  ;;  %6069 = vtanh.f32 %v1420_v7  ;;  %v1162_v22 = vmul.f32 %v6056_v0, %v7265_v57  ;;  %v7349_v26 = vmul.f32 0.015625, %v358_v11  ;;  %v306_v0 = vld [vmem:[%s7028_s15 + $0x1a8] sm:$0xff] }
  0xda   : > { %v1227_v27 = vmul.f32 %v1163_v20, %v7271_v13  ;;  %v1359_v28 = vmul.f32 %v1163_v20, %v7079_v24  ;;  %6071 = vrsqrt.f32 %v1035_v12  ;;  %782 = vadd.xlane.f32.xlu1 %v781_v45  ;;  %5745 = vmatmul.mubr.msk.f32.vlgmr.msra.gmra.mxu0 %vm319_vm0, %v6058_v9  ;;  %v909_v34 = vmul.f32 %v7347_v23, %v7347_v23  ;;  %v305_v20 = vld [vmem:[%s7028_s15 + $0x1a0] sm:$0xff] }
  0xdb   : > { %v1226_v30 = vmul.f32 %v1162_v22, %v7273_v14  ;;  %v1358_v31 = vmul.f32 %v1162_v22, %v7082_v25  ;;  %6073 = vrsqrt.f32 %v1034_v21  ;;  %779 = vadd.xlane.f32.xlu0 %v778_v5  ;;  %v681_v35 = vpop.xlane.xlu1 %680  ;;  %v908_v36 = vmul.f32 %v7349_v26, %v7349_v26 }
  0xdc   : > { %v678_v13 = vpop.xlane.xlu0 %677  ;;  %v1295_v24 = vsub.f32 %v7279_v19, %v1227_v27  ;;  %v845_v37 = vmul.f32 0.015625, %v681_v35  ;;  %v787_v25 = vsel %vm319_vm0, %v625_v8, 0.0  ;;  %v626_v5 = vmul.f32 %v303_v43, %v303_v43 }
  0xdd   : > { %v844_v38 = vmul.f32 0.015625, %v678_v13  ;;  %v6060_v39 = vpop.eup %6059  ;;  %v1294_v14 = vsub.f32 %v7279_v19, %v1226_v30  ;;  %v479_v35 = vsel %vm319_vm0, %v306_v0, 0.0  ;;  %v476_v13 = vsel %vm319_vm0, %v305_v20, 0.0 }
  0xde   : > { %v6062_v47 = vpop.eup %6061  ;;  %v1423_v49 = vadd.f32 %v1359_v28, %v1295_v24  ;;  %v973_v50 = vsub.f32 %v845_v37, %v909_v34  ;;  %468 = vadd.xlane.f32.xlu1 %v467_v15  ;;  %v790_v28 = vsel %vm319_vm0, %v626_v5, 0.0  ;;  %v629_v24 = vmul.f32 %v306_v0, %v306_v0 }
  0xdf   : > { %v972_v51 = vsub.f32 %v844_v38, %v908_v36  ;;  %v6064_v53 = vpop.eup %6063  ;;  %v1422_v54 = vadd.f32 %v1358_v31, %v1294_v14  ;;  %465 = vadd.xlane.f32.xlu0 %v464_v18  ;;  %5747 = vmatprep.mubr.msk.f32.mxu0 %vm319_vm0, %v6062_v47  ;;  %v367_v55 = vpop.xlane.xlu1 %366 }
  0xe0   : > { %v364_v44 = vpop.xlane.xlu0 %363  ;;  %v6066_v59 = vpop.eup %6065  ;;  %6075 = vtanh.f32 %v1423_v49  ;;  %v1165_v1 = vmul.f32 %v6064_v53, %v7265_v57  ;;  %v1037_v61 = vadd.f32 1e-05, %v973_v50  ;;  %5748 = vmatmul.mubr.msk.f32.gmra.mxu0 %vm319_vm0, %v6060_v39  ;;  %v7372_v17 = vmul.f32 0.015625, %v367_v55 }
  0xe1   : > { %v1036_v60 = vadd.f32 1e-05, %v972_v51  ;;  %6077 = vtanh.f32 %v1422_v54  ;;  %v1164_v45 = vmul.f32 %v6066_v59, %v7265_v57  ;;  %v7374_v62 = vmul.f32 0.015625, %v364_v44 }
  0xe2   : > { %v1229_v2 = vmul.f32 %v1165_v1, %v7302_v63  ;;  %v1361_v4 = vmul.f32 %v1165_v1, %v7095_v32  ;;  %6079 = vrsqrt.f32 %v1037_v61  ;;  %788 = vadd.xlane.f32.xlu1 %v787_v25  ;;  %v911_v10 = vmul.f32 %v7372_v17, %v7372_v17 }
  0xe3   : > { %v1228_v6 = vmul.f32 %v1164_v45, %v7304_v3  ;;  %v1360_v7 = vmul.f32 %v1164_v45, %v7098_v33  ;;  %6081 = vrsqrt.f32 %v1036_v60  ;;  %785 = vadd.xlane.f32.xlu0 %v784_v52  ;;  %v687_v11 = vpop.xlane.xlu1 %686  ;;  %v910_v32 = vmul.f32 %v7374_v62, %v7374_v62 }
  0xe4   : > { %v684_v15 = vpop.xlane.xlu0 %683  ;;  %v1297_v63 = vsub.f32 %v7279_v19, %v1229_v2  ;;  %v847_v18 = vmul.f32 0.015625, %v687_v11  ;;  %v793_v33 = vsel %vm319_vm0, %v627_v58, 0.0  ;;  %v628_v49 = vmul.f32 %v305_v20, %v305_v20 }
  0xe5   : > { %v846_v8 = vmul.f32 0.015625, %v684_v15  ;;  %v6068_v12 = vpop.eup %6067  ;;  %v1296_v3 = vsub.f32 %v7279_v19, %v1228_v6 }
  0xe6   : > { %v6070_v21 = vpop.eup %6069  ;;  %v1425_v9 = vadd.f32 %v1361_v4, %v1297_v63  ;;  %v975_v22 = vsub.f32 %v847_v18, %v911_v10  ;;  %474 = vadd.xlane.f32.xlu1 %v473_v56  ;;  %v308_v56 = vld [vmem:[%s7028_s15 + $0x1b8] sm:$0xff]  ;;  %v796_v45 = vsel %vm319_vm0, %v628_v49, 0.0 }
  0xe7   : > { %v974_v27 = vsub.f32 %v846_v8, %v910_v32  ;;  %v6072_v29 = vpop.eup %6071  ;;  %v1424_v30 = vadd.f32 %v1360_v7, %v1296_v3  ;;  %471 = vadd.xlane.f32.xlu0 %v470_v16  ;;  %5750 = vmatprep.mubr.msk.f32.mxu0 %vm319_vm0, %v6070_v21  ;;  %v373_v31 = vpop.xlane.xlu1 %372  ;;  %v307_v16 = vld [vmem:[%s7028_s15 + $0x1b0] sm:$0xff]  ;;  %v485_v7 = vsel %vm319_vm0, %v308_v56, 0.0  ;;  %v631_v11 = vmul.f32 %v308_v56, %v308_v56  ;;  %v6807_v3 = vld [vmem:[%s7028_s15 + $0x68] sm:$0xff] }
  0xe8   : > { %v370_v34 = vpop.xlane.xlu0 %369  ;;  %v6074_v36 = vpop.eup %6073  ;;  %6083 = vtanh.f32 %v1425_v9  ;;  %v1167_v37 = vmul.f32 %v6072_v29, %v7265_v57  ;;  %v1039_v38 = vadd.f32 1e-05, %v975_v22  ;;  %5751 = vmatmul.mubr.msk.f32.gmra.mxu0 %vm319_vm0, %v6068_v12  ;;  %v7396_v39 = vmul.f32 0.015625, %v373_v31  ;;  %v6808_v22 = vld [vmem:[%s7028_s15 + $0x60] sm:$0xff] }
  0xe9   : > { %v1038_v42 = vadd.f32 1e-05, %v974_v27  ;;  %6085 = vtanh.f32 %v1424_v30  ;;  %v1166_v43 = vmul.f32 %v6074_v36, %v7265_v57  ;;  %v7398_v14 = vmul.f32 0.015625, %v370_v34 }
  0xea   : > { %v1231_v25 = vmul.f32 %v1167_v37, %v7322_v46  ;;  %v1363_v47 = vmul.f32 %v1167_v37, %v7111_v40  ;;  %6087 = vrsqrt.f32 %v1039_v38  ;;  %794 = vadd.xlane.f32.xlu1 %v793_v33  ;;  %v913_v52 = vmul.f32 %v7396_v39, %v7396_v39 }
  0xeb   : > { %v1230_v50 = vmul.f32 %v1166_v43, %v7325_v48  ;;  %v1362_v51 = vmul.f32 %v1166_v43, %v7114_v41  ;;  %6089 = vrsqrt.f32 %v1038_v42  ;;  %791 = vadd.xlane.f32.xlu0 %v790_v28  ;;  %v693_v53 = vpop.xlane.xlu1 %692  ;;  %v912_v40 = vmul.f32 %v7398_v14, %v7398_v14 }
  0xec   : > { %v690_v54 = vpop.xlane.xlu0 %689  ;;  %v1299_v46 = vsub.f32 %v7279_v19, %v1231_v25  ;;  %v849_v55 = vmul.f32 0.015625, %v693_v53  ;;  %v799_v41 = vsel %vm319_vm0, %v629_v24, 0.0  ;;  %v482_v10 = vsel %vm319_vm0, %v307_v16, 0.0  ;;  %v309_v24 = vld [vmem:[%s7028_s15 + $0x1c0] sm:$0xff] }
  0xed   : > { %v848_v44 = vmul.f32 0.015625, %v690_v54  ;;  %v6076_v58 = vpop.eup %6075  ;;  %v1298_v48 = vsub.f32 %v7279_v19, %v1230_v50  ;;  %v630_v21 = vmul.f32 %v307_v16, %v307_v16  ;;  %v805_v37 = vsel %vm319_vm0, %v631_v11, 0.0 }
  0xee   : > { %v6078_v59 = vpop.eup %6077  ;;  %v1427_v1 = vadd.f32 %v1363_v47, %v1299_v46  ;;  %v977_v61 = vsub.f32 %v849_v55, %v913_v52  ;;  %480 = vadd.xlane.f32.xlu1 %v479_v35  ;;  %v488_v54 = vsel %vm319_vm0, %v309_v24, 0.0 }
  0xef   : > { %v976_v60 = vsub.f32 %v848_v44, %v912_v40  ;;  %v6080_v2 = vpop.eup %6079  ;;  %v1426_v4 = vadd.f32 %v1362_v51, %v1298_v48  ;;  %477 = vadd.xlane.f32.xlu0 %v476_v13  ;;  %5753 = vmatprep.mubr.msk.f32.mxu0 %vm319_vm0, %v6078_v59  ;;  %v379_v5 = vpop.xlane.xlu1 %378  ;;  %v310_v13 = vld [vmem:[%s7028_s15 + $0x1c8] sm:$0xff]  ;;  %v802_v47 = vsel %vm319_vm0, %v630_v21, 0.0  ;;  %v6809_v59 = vld [vmem:[%s7028_s15 + $0x78] sm:$0xff] }
  0xf0   : > { %v376_v6 = vpop.xlane.xlu0 %375  ;;  %v6082_v15 = vpop.eup %6081  ;;  %6091 = vtanh.f32 %v1427_v1  ;;  %v1169_v63 = vmul.f32 %v6080_v2, %v7265_v57  ;;  %v1041_v32 = vadd.f32 1e-05, %v977_v61  ;;  %5754 = vmatmul.mubr.msk.f32.gmra.mxu0 %vm319_vm0, %v6076_v58  ;;  %v7420_v0 = vmul.f32 0.015625, %v379_v5 }
  0xf1   : > { %v1040_v18 = vadd.f32 1e-05, %v976_v60  ;;  %6093 = vtanh.f32 %v1426_v4  ;;  %v1168_v8 = vmul.f32 %v6082_v15, %v7265_v57  ;;  %v7422_v20 = vmul.f32 0.015625, %v376_v6  ;;  %v312_v15 = vld [vmem:[%s7028_s15 + $0x1d8] sm:$0xff] }
  0xf2   : > { %v1233_v12 = vmul.f32 %v1169_v63, %v7347_v23  ;;  %v1365_v33 = vmul.f32 %v6807_v3, %v1169_v63  ;;  %6095 = vrsqrt.f32 %v1041_v32  ;;  %800 = vadd.xlane.f32.xlu1 %v799_v41  ;;  %v915_v28 = vmul.f32 %v7420_v0, %v7420_v0  ;;  %v311_v63 = vld [vmem:[%s7028_s15 + $0x1d0] sm:$0xff] }
  0xf3   : > { %v1232_v9 = vmul.f32 %v1168_v8, %v7349_v26  ;;  %v1364_v27 = vmul.f32 %v6808_v22, %v1168_v8  ;;  %6097 = vrsqrt.f32 %v1040_v18  ;;  %797 = vadd.xlane.f32.xlu0 %v796_v45  ;;  %v699_v29 = vpop.xlane.xlu1 %698  ;;  %v914_v31 = vmul.f32 %v7422_v20, %v7422_v20  ;;  %v6810_v45 = vld [vmem:[%s7028_s15 + $0x70] sm:$0xff] }
  0xf4   : > { %v696_v30 = vpop.xlane.xlu0 %695  ;;  %v1301_v23 = vsub.f32 %v7279_v19, %v1233_v12  ;;  %v851_v34 = vmul.f32 0.015625, %v699_v29  ;;  %v491_v53 = vsel %vm319_vm0, %v310_v13, 0.0  ;;  %v633_v46 = vmul.f32 %v310_v13, %v310_v13 }
  0xf5   : > { %v850_v35 = vmul.f32 0.015625, %v696_v30  ;;  %v6084_v36 = vpop.eup %6083  ;;  %v1300_v26 = vsub.f32 %v7279_v19, %v1232_v9  ;;  %v632_v61 = vmul.f32 %v309_v24, %v309_v24  ;;  %v497_v29 = vsel %vm319_vm0, %v312_v15, 0.0 }
  0xf6   : > { %v6086_v38 = vpop.eup %6085  ;;  %v1429_v42 = vadd.f32 %v1365_v33, %v1301_v23  ;;  %v979_v43 = vsub.f32 %v851_v34, %v915_v28  ;;  %486 = vadd.xlane.f32.xlu1 %v485_v7  ;;  %v811_v18 = vsel %vm319_vm0, %v633_v46, 0.0  ;;  %v494_v30 = vsel %vm319_vm0, %v311_v63, 0.0 }
  0xf7   : > { %v978_v25 = vsub.f32 %v850_v35, %v914_v31  ;;  %v6088_v49 = vpop.eup %6087  ;;  %v1428_v50 = vadd.f32 %v1364_v27, %v1300_v26  ;;  %483 = vadd.xlane.f32.xlu0 %v482_v10  ;;  %5756 = vmatprep.mubr.msk.f32.mxu0 %vm319_vm0, %v6086_v38  ;;  %v385_v51 = vpop.xlane.xlu1 %384  ;;  %v808_v21 = vsel %vm319_vm0, %v632_v61, 0.0  ;;  %v635_v23 = vmul.f32 %v312_v15, %v312_v15  ;;  %v6811_v38 = vld [vmem:[%s7028_s15 + $0x88] sm:$0xff] }
  0xf8   : > { %v382_v52 = vpop.xlane.xlu0 %381  ;;  %v6090_v40 = vpop.eup %6089  ;;  %6099 = vtanh.f32 %v1429_v42  ;;  %v1171_v55 = vmul.f32 %v6088_v49, %v7265_v57  ;;  %v1043_v44 = vadd.f32 1e-05, %v979_v43  ;;  %5757 = vmatmul.mubr.msk.f32.gmra.mxu0 %vm319_vm0, %v6084_v36  ;;  %v7444_v58 = vmul.f32 0.015625, %v385_v51 }
  0xf9   : > { %v1042_v56 = vadd.f32 1e-05, %v978_v25  ;;  %6101 = vtanh.f32 %v1428_v50  ;;  %v1170_v16 = vmul.f32 %v6090_v40, %v7265_v57  ;;  %v7446_v48 = vmul.f32 0.015625, %v382_v52  ;;  %v314_v40 = vld [vmem:[%s7028_s15 + $0x1e8] sm:$0xff] }
  0xfa   : > { %v1235_v41 = vmul.f32 %v1171_v55, %v7372_v17  ;;  %v1367_v1 = vmul.f32 %v6809_v59, %v1171_v55  ;;  %6103 = vrsqrt.f32 %v1043_v44  ;;  %806 = vadd.xlane.f32.xlu1 %v805_v37  ;;  %v917_v4 = vmul.f32 %v7444_v58, %v7444_v58  ;;  %v313_v55 = vld [vmem:[%s7028_s15 + $0x1e0] sm:$0xff] }
  0xfb   : > { %v1234_v60 = vmul.f32 %v1170_v16, %v7374_v62  ;;  %v1366_v2 = vmul.f32 %v6810_v45, %v1170_v16  ;;  %6105 = vrsqrt.f32 %v1042_v56  ;;  %803 = vadd.xlane.f32.xlu0 %v802_v47  ;;  %v705_v5 = vpop.xlane.xlu1 %704  ;;  %v916_v7 = vmul.f32 %v7446_v48, %v7446_v48  ;;  %v6812_v47 = vld [vmem:[%s7028_s15 + $0x80] sm:$0xff] }
  0xfc   : > { %v702_v6 = vpop.xlane.xlu0 %701  ;;  %v1303_v17 = vsub.f32 %v7279_v19, %v1235_v41  ;;  %v853_v10 = vmul.f32 0.015625, %v705_v5  ;;  %v634_v43 = vmul.f32 %v311_v63, %v311_v63  ;;  %v817_v56 = vsel %vm319_vm0, %v635_v23, 0.0 }
  0xfd   : > { %v852_v11 = vmul.f32 0.015625, %v702_v6  ;;  %v6092_v32 = vpop.eup %6091  ;;  %v1302_v62 = vsub.f32 %v7279_v19, %v1234_v60  ;;  %v503_v5 = vsel %vm319_vm0, %v314_v40, 0.0  ;;  %v500_v6 = vsel %vm319_vm0, %v313_v55, 0.0 }
  0xfe   : > { %v6094_v8 = vpop.eup %6093  ;;  %v1431_v12 = vadd.f32 %v1367_v1, %v1303_v17  ;;  %v981_v3 = vsub.f32 %v853_v10, %v917_v4  ;;  %492 = vadd.xlane.f32.xlu1 %v491_v53  ;;  %v814_v61 = vsel %vm319_vm0, %v634_v43, 0.0  ;;  %v637_v17 = vmul.f32 %v314_v40, %v314_v40 }
  0xff   : > { %v980_v33 = vsub.f32 %v852_v11, %v916_v7  ;;  %v6096_v9 = vpop.eup %6095  ;;  %v1430_v22 = vadd.f32 %v1366_v2, %v1302_v62  ;;  %489 = vadd.xlane.f32.xlu0 %v488_v54  ;;  %5759 = vmatprep.mubr.msk.f32.mxu0 %vm319_vm0, %v6094_v8  ;;  %v391_v27 = vpop.xlane.xlu1 %390  ;;  %v6813_v8 = vld [vmem:[%s7028_s15 + $0x98] sm:$0xff] }
 0x100   : > { %v388_v28 = vpop.xlane.xlu0 %387  ;;  %v6098_v31 = vpop.eup %6097  ;;  %6107 = vtanh.f32 %v1431_v12  ;;  %v1173_v34 = vmul.f32 %v6096_v9, %v7265_v57  ;;  %v1045_v35 = vadd.f32 1e-05, %v981_v3  ;;  %5760 = vmatmul.mubr.msk.f32.gmra.mxu0 %vm319_vm0, %v6092_v32  ;;  %v7468_v36 = vmul.f32 0.015625, %v391_v27 }
 0x101   : > { %v1044_v13 = vadd.f32 1e-05, %v980_v33  ;;  %6109 = vtanh.f32 %v1430_v22  ;;  %v1172_v24 = vmul.f32 %v6098_v31, %v7265_v57  ;;  %v7470_v26 = vmul.f32 0.015625, %v388_v28  ;;  %v316_v31 = vld [vmem:[%s7028_s15 + $0x1f8] sm:$0xff] }
 0x102   : > { %v1237_v37 = vmul.f32 %v1173_v34, %v7396_v39  ;;  %v1369_v42 = vmul.f32 %v6811_v38, %v1173_v34  ;;  %6111 = vrsqrt.f32 %v1045_v35  ;;  %812 = vadd.xlane.f32.xlu1 %v811_v18  ;;  %v919_v50 = vmul.f32 %v7468_v36, %v7468_v36  ;;  %v315_v34 = vld [vmem:[%s7028_s15 + $0x1f0] sm:$0xff] }
 0x103   : > { %v1236_v25 = vmul.f32 %v1172_v24, %v7398_v14  ;;  %v1368_v49 = vmul.f32 %v6812_v47, %v1172_v24  ;;  %6113 = vrsqrt.f32 %v1044_v13  ;;  %809 = vadd.xlane.f32.xlu0 %v808_v21  ;;  %v711_v51 = vpop.xlane.xlu1 %710  ;;  %v918_v53 = vmul.f32 %v7470_v26, %v7470_v26  ;;  %v6814_v21 = vld [vmem:[%s7028_s15 + $0x90] sm:$0xff] }
 0x104   : > { %v708_v52 = vpop.xlane.xlu0 %707  ;;  %v1305_v39 = vsub.f32 %v7279_v19, %v1237_v37  ;;  %v855_v54 = vmul.f32 0.015625, %v711_v51  ;;  %v636_v3 = vmul.f32 %v313_v55, %v313_v55  ;;  %v823_v13 = vsel %vm319_vm0, %v637_v17, 0.0 }
 0x105   : > { %v854_v46 = vmul.f32 0.015625, %v708_v52  ;;  %v6100_v44 = vpop.eup %6099  ;;  %v1304_v14 = vsub.f32 %v7279_v19, %v1236_v25  ;;  %v509_v51 = vsel %vm319_vm0, %v316_v31, 0.0  ;;  %v506_v52 = vsel %vm319_vm0, %v315_v34, 0.0 }
 0x106   : > { %v6102_v16 = vpop.eup %6101  ;;  %v1433_v41 = vadd.f32 %v1369_v42, %v1305_v39  ;;  %v983_v59 = vsub.f32 %v855_v54, %v919_v50  ;;  %498 = vadd.xlane.f32.xlu1 %v497_v29  ;;  %v820_v43 = vsel %vm319_vm0, %v636_v3, 0.0  ;;  %v639_v39 = vmul.f32 %v316_v31, %v316_v31 }
 0x107   : > { %v982_v1 = vsub.f32 %v854_v46, %v918_v53  ;;  %v6104_v60 = vpop.eup %6103  ;;  %v1432_v45 = vadd.f32 %v1368_v49, %v1304_v14  ;;  %495 = vadd.xlane.f32.xlu0 %v494_v30  ;;  %5762 = vmatprep.mubr.msk.f32.mxu0 %vm319_vm0, %v6102_v16  ;;  %v397_v2 = vpop.xlane.xlu1 %396  ;;  %v6815_v16 = vld [vmem:[%s7028_s15 + $0xa8] sm:$0xff] }
 0x108   : > { %v394_v4 = vpop.xlane.xlu0 %393  ;;  %v6106_v7 = vpop.eup %6105  ;;  %6115 = vtanh.f32 %v1433_v41  ;;  %v1175_v10 = vmul.f32 %v6104_v60, %v7265_v57  ;;  %v1047_v11 = vadd.f32 1e-05, %v983_v59  ;;  %5763 = vmatmul.mubr.msk.f32.gmra.mxu0 %vm319_vm0, %v6100_v44  ;;  %v7492_v32 = vmul.f32 0.015625, %v397_v2 }
 0x109   : > { %v1046_v15 = vadd.f32 1e-05, %v982_v1  ;;  %6117 = vtanh.f32 %v1432_v45  ;;  %v1174_v63 = vmul.f32 %v6106_v7, %v7265_v57  ;;  %v7494_v62 = vmul.f32 0.015625, %v394_v4 }
 0x10a   : > { %v1239_v18 = vmul.f32 %v1175_v10, %v7420_v0  ;;  %v1371_v12 = vmul.f32 %v6813_v8, %v1175_v10  ;;  %6119 = vrsqrt.f32 %v1047_v11  ;;  %818 = vadd.xlane.f32.xlu1 %v817_v56  ;;  %v921_v22 = vmul.f32 %v7492_v32, %v7492_v32 }
 0x10b   : > { %v1238_v33 = vmul.f32 %v1174_v63, %v7422_v20  ;;  %v1370_v9 = vmul.f32 %v6814_v21, %v1174_v63  ;;  %6121 = vrsqrt.f32 %v1046_v15  ;;  %815 = vadd.xlane.f32.xlu0 %v814_v61  ;;  %v717_v27 = vpop.xlane.xlu1 %716  ;;  %v920_v29 = vmul.f32 %v7494_v62, %v7494_v62  ;;  %v6816_v61 = vld [vmem:[%s7028_s15 + $0xa0] sm:$0xff] }
 0x10c   : > { %v714_v28 = vpop.xlane.xlu0 %713  ;;  %v1307_v0 = vsub.f32 %v7279_v19, %v1239_v18  ;;  %v857_v30 = vmul.f32 0.015625, %v717_v27  ;;  %v638_v59 = vmul.f32 %v315_v34, %v315_v34  ;;  %v6818_v34 = vld [vmem:[%s7028_s15 + $0xb8] sm:$0xff] }
 0x10d   : > { %v856_v23 = vmul.f32 0.015625, %v714_v28  ;;  %v6108_v35 = vpop.eup %6107  ;;  %v1306_v20 = vsub.f32 %v7279_v19, %v1238_v33  ;;  %v829_v33 = vsel %vm319_vm0, %v639_v39, 0.0 }
 0x10e   : > { %v6110_v24 = vpop.eup %6109  ;;  %v1435_v37 = vadd.f32 %v1371_v12, %v1307_v0  ;;  %v985_v38 = vsub.f32 %v857_v30, %v921_v22  ;;  %504 = vadd.xlane.f32.xlu1 %v503_v5  ;;  %v826_v21 = vsel %vm319_vm0, %v638_v59, 0.0  ;;  %v7538_v0 = vld [vmem:[%s10415_s3] ss:$0 sm:$0xff] }
 0x10f   : > { %v984_v42 = vsub.f32 %v856_v23, %v920_v29  ;;  %v6112_v25 = vpop.eup %6111  ;;  %v1434_v47 = vadd.f32 %v1370_v9, %v1306_v20  ;;  %501 = vadd.xlane.f32.xlu0 %v500_v6  ;;  %5765 = vmatprep.mubr.msk.f32.mxu0 %vm319_vm0, %v6110_v24  ;;  %v403_v49 = vpop.xlane.xlu1 %402  ;;  %v6819_v20 = vld [vmem:[%s7028_s15 + $0xb0] sm:$0xff] }
 0x110   : > { %v400_v50 = vpop.xlane.xlu0 %399  ;;  %v6114_v53 = vpop.eup %6113  ;;  %6123 = vtanh.f32 %v1435_v37  ;;  %v1177_v54 = vmul.f32 %v6112_v25, %v7265_v57  ;;  %v1049_v46 = vadd.f32 1e-05, %v985_v38  ;;  %5766 = vmatmul.mubr.msk.f32.gmra.mxu0 %vm319_vm0, %v6108_v35  ;;  %v7516_v44 = vmul.f32 0.015625, %v403_v49 }
 0x111   : > { %v1048_v40 = vadd.f32 1e-05, %v984_v42  ;;  %6125 = vtanh.f32 %v1434_v47  ;;  %v1176_v55 = vmul.f32 %v6114_v53, %v7265_v57  ;;  %v7518_v14 = vmul.f32 0.015625, %v400_v50 }
 0x112   : > { %v1241_v56 = vmul.f32 %v1177_v54, %v7444_v58  ;;  %v1373_v41 = vmul.f32 %v6815_v16, %v1177_v54  ;;  %6127 = vrsqrt.f32 %v1049_v46  ;;  %824 = vadd.xlane.f32.xlu1 %v823_v13  ;;  %v923_v45 = vmul.f32 %v7516_v44, %v7516_v44 }
 0x113   : > { %v1240_v1 = vmul.f32 %v1176_v55, %v7446_v48  ;;  %v1372_v60 = vmul.f32 %v6816_v61, %v1176_v55  ;;  %6129 = vrsqrt.f32 %v1048_v40  ;;  %821 = vadd.xlane.f32.xlu0 %v820_v43  ;;  %v723_v2 = vpop.xlane.xlu1 %722  ;;  %v922_v58 = vmul.f32 %v7518_v14, %v7518_v14 }
 0x114   : > { %v720_v4 = vpop.xlane.xlu0 %719  ;;  %v1309_v5 = vsub.f32 %v7279_v19, %v1241_v56  ;;  %v859_v6 = vmul.f32 0.015625, %v723_v2 }
 0x115   : > { %v858_v17 = vmul.f32 0.015625, %v720_v4  ;;  %v6116_v7 = vpop.eup %6115  ;;  %v1308_v10 = vsub.f32 %v7279_v19, %v1240_v1  ;;  %v6822_v4 = vld [vmem:[%s7028_s15 + $0xc0] sm:$0xff] }
 0x116   : > { %v6118_v48 = vpop.eup %6117  ;;  %v1437_v11 = vadd.f32 %v1373_v41, %v1309_v5  ;;  %v987_v15 = vsub.f32 %v859_v6, %v923_v45  ;;  %510 = vadd.xlane.f32.xlu1 %v509_v51 }
 0x117   : > { %v986_v63 = vsub.f32 %v858_v17, %v922_v58  ;;  %v6120_v18 = vpop.eup %6119  ;;  %v1436_v8 = vadd.f32 %v1372_v60, %v1308_v10  ;;  %507 = vadd.xlane.f32.xlu0 %v506_v52  ;;  %5768 = vmatprep.mubr.msk.f32.mxu0 %vm319_vm0, %v6118_v48  ;;  %v409_v12 = vpop.xlane.xlu1 %408  ;;  %v6821_v60 = vld [vmem:[%s7028_s15 + $0xc8] sm:$0xff] }
 0x118   : > { %v406_v3 = vpop.xlane.xlu0 %405  ;;  %v6122_v9 = vpop.eup %6121  ;;  %6131 = vtanh.f32 %v1437_v11  ;;  %v1179_v22 = vmul.f32 %v6120_v18, %v7265_v57  ;;  %v1051_v27 = vadd.f32 1e-05, %v987_v15  ;;  %5769 = vmatmul.mubr.msk.f32.gmra.mxu0 %vm319_vm0, %v6116_v7  ;;  %v7541_v30 = vmul.f32 0.015625, %v409_v12 }
 0x119   : > { %v1050_v28 = vadd.f32 1e-05, %v986_v63  ;;  %6133 = vtanh.f32 %v1436_v8  ;;  %v1178_v29 = vmul.f32 %v7538_v0, %v6122_v9  ;;  %v7543_v23 = vmul.f32 0.015625, %v406_v3 }
 0x11a   : > { %v1243_v31 = vmul.f32 %v1179_v22, %v7468_v36  ;;  %v1375_v57 = vmul.f32 %v6818_v34, %v1179_v22  ;;  %6135 = vrsqrt.f32 %v1051_v27  ;;  %830 = vadd.xlane.f32.xlu1 %v829_v33  ;;  %v925_v24 = vmul.f32 %v7541_v30, %v7541_v30 }
 0x11b   : > { %v1242_v35 = vmul.f32 %v1178_v29, %v7470_v26  ;;  %v1374_v13 = vmul.f32 %v6819_v20, %v1178_v29  ;;  %6137 = vrsqrt.f32 %v1050_v28  ;;  %827 = vadd.xlane.f32.xlu0 %v826_v21  ;;  %v729_v37 = vpop.xlane.xlu1 %728  ;;  %v924_v36 = vmul.f32 %v7543_v23, %v7543_v23  ;;  %v7557_v26 = vld [vmem:[%s10415_s3 + $0x1] ss:$0 sm:$0xff] }
 0x11c   : > { %v726_v38 = vpop.xlane.xlu0 %725  ;;  %v1311_v42 = vsub.f32 %v7279_v19, %v1243_v31  ;;  %v861_v43 = vmul.f32 0.015625, %v729_v37 }
 0x11d   : > { %v860_v25 = vmul.f32 0.015625, %v726_v38  ;;  %v6124_v47 = vpop.eup %6123  ;;  %v1310_v49 = vsub.f32 %v7557_v26, %v1242_v35  ;;  %v6823_v35 = vld [vmem:[%s7028_s15 + $0xd8] sm:$0xff] }
 0x11e   : > { %v6126_v50 = vpop.eup %6125  ;;  %v1439_v51 = vadd.f32 %v1375_v57, %v1311_v42  ;;  %v989_v52 = vsub.f32 %v861_v43, %v925_v24  ;;  %v6824_v24 = vld [vmem:[%s7028_s15 + $0xd0] sm:$0xff] }
 0x11f   : > { %v988_v39 = vsub.f32 %v860_v25, %v924_v36  ;;  %v6128_v53 = vpop.eup %6127  ;;  %v1438_v19 = vadd.f32 %v1374_v13, %v1310_v49  ;;  %5771 = vmatprep.mubr.msk.f32.mxu0 %vm319_vm0, %v6126_v50  ;;  %v415_v54 = vpop.xlane.xlu1 %414 }
 0x120   : > { %v412_v46 = vpop.xlane.xlu0 %411  ;;  %v6130_v40 = vpop.eup %6129  ;;  %6139 = vtanh.f32 %v1439_v51  ;;  %v1181_v55 = vmul.f32 %v7538_v0, %v6128_v53  ;;  %v1053_v56 = vadd.f32 1e-05, %v989_v52  ;;  %5772 = vmatmul.mubr.msk.f32.gmra.mxu0 %vm319_vm0, %v6124_v47  ;;  %v7564_v59 = vmul.f32 0.015625, %v415_v54 }
 0x121   : > { %v1052_v16 = vadd.f32 1e-05, %v988_v39  ;;  %6141 = vtanh.f32 %v1438_v19  ;;  %v1180_v41 = vmul.f32 %v7538_v0, %v6130_v40  ;;  %v7566_v1 = vmul.f32 0.015625, %v412_v46 }
 0x122   : > { %v1245_v61 = vmul.f32 %v1181_v55, %v7492_v32  ;;  %v1377_v45 = vmul.f32 %v6821_v60, %v1181_v55  ;;  %6143 = vrsqrt.f32 %v1053_v56  ;;  %v927_v58 = vmul.f32 %v7564_v59, %v7564_v59 }
 0x123   : > { %v1244_v2 = vmul.f32 %v1180_v41, %v7494_v62  ;;  %v1376_v5 = vmul.f32 %v6822_v4, %v1180_v41  ;;  %6145 = vrsqrt.f32 %v1052_v16  ;;  %v735_v6 = vpop.xlane.xlu1 %734  ;;  %v926_v10 = vmul.f32 %v7566_v1, %v7566_v1 }
 0x124   : > { %v732_v17 = vpop.xlane.xlu0 %731  ;;  %v1313_v7 = vsub.f32 %v7557_v26, %v1245_v61  ;;  %v863_v48 = vmul.f32 0.015625, %v735_v6 }
 0x125   : > { %v862_v32 = vmul.f32 0.015625, %v732_v17  ;;  %v6132_v11 = vpop.eup %6131  ;;  %v1312_v15 = vsub.f32 %v7557_v26, %v1244_v2  ;;  %v6825_v2 = vld [vmem:[%s7028_s15 + $0xe8] sm:$0xff] }
 0x126   : > { %v6134_v63 = vpop.eup %6133  ;;  %v1441_v62 = vadd.f32 %v1377_v45, %v1313_v7  ;;  %v991_v18 = vsub.f32 %v863_v48, %v927_v58  ;;  %v6826_v58 = vld [vmem:[%s7028_s15 + $0xe0] sm:$0xff] }
 0x127   : > { %v990_v8 = vsub.f32 %v862_v32, %v926_v10  ;;  %v6136_v12 = vpop.eup %6135  ;;  %v1440_v3 = vadd.f32 %v1376_v5, %v1312_v15  ;;  %5774 = vmatprep.mubr.msk.f32.mxu0 %vm319_vm0, %v6134_v63  ;;  %v421_v33 = vpop.xlane.xlu1 %420 }
 0x128   : > { %v418_v21 = vpop.xlane.xlu0 %417  ;;  %v6138_v9 = vpop.eup %6137  ;;  %6147 = vtanh.f32 %v1441_v62  ;;  %v1183_v22 = vmul.f32 %v7538_v0, %v6136_v12  ;;  %v1055_v27 = vadd.f32 1e-05, %v991_v18  ;;  %5775 = vmatmul.mubr.msk.f32.gmra.mxu0 %vm319_vm0, %v6132_v11  ;;  %v7582_v31 = vmul.f32 0.015625, %v421_v33 }
 0x129   : > { %v1054_v28 = vadd.f32 1e-05, %v990_v8  ;;  %6149 = vtanh.f32 %v1440_v3  ;;  %v1182_v29 = vmul.f32 %v7538_v0, %v6138_v9  ;;  %v7584_v34 = vmul.f32 0.015625, %v418_v21 }
 0x12a   : > { %v1247_v57 = vmul.f32 %v1183_v22, %v7516_v44  ;;  %v1379_v20 = vmul.f32 %v6823_v35, %v1183_v22  ;;  %6151 = vrsqrt.f32 %v1055_v27  ;;  %v929_v38 = vmul.f32 %v7582_v31, %v7582_v31 }
 0x12b   : > { %v1246_v13 = vmul.f32 %v1182_v29, %v7518_v14  ;;  %v1378_v37 = vmul.f32 %v6824_v24, %v1182_v29  ;;  %6153 = vrsqrt.f32 %v1054_v28  ;;  %v741_v42 = vpop.xlane.xlu1 %740  ;;  %v928_v25 = vmul.f32 %v7584_v34, %v7584_v34 }
 0x12c   : > { %v738_v36 = vpop.xlane.xlu0 %737  ;;  %v1315_v43 = vsub.f32 %v7557_v26, %v1247_v57  ;;  %v865_v47 = vmul.f32 0.015625, %v741_v42 }
 0x12d   : > { %v864_v44 = vmul.f32 0.015625, %v738_v36  ;;  %v6140_v49 = vpop.eup %6139  ;;  %v1314_v50 = vsub.f32 %v7557_v26, %v1246_v13  ;;  %v6827_v13 = vld [vmem:[%s7028_s15 + $0xf8] sm:$0xff] }
 0x12e   : > { %v6142_v51 = vpop.eup %6141  ;;  %v1443_v14 = vadd.f32 %v1379_v20, %v1315_v43  ;;  %v993_v52 = vsub.f32 %v865_v47, %v929_v38  ;;  %v6828_v38 = vld [vmem:[%s7028_s15 + $0xf0] sm:$0xff] }
 0x12f   : > { %v992_v39 = vsub.f32 %v864_v44, %v928_v25  ;;  %v6144_v53 = vpop.eup %6143  ;;  %v1442_v19 = vadd.f32 %v1378_v37, %v1314_v50  ;;  %5777 = vmatprep.mubr.msk.f32.mxu0 %vm319_vm0, %v6142_v51  ;;  %v427_v54 = vpop.xlane.xlu1 %426 }
 0x130   : > { %v424_v46 = vpop.xlane.xlu0 %423  ;;  %v6146_v40 = vpop.eup %6145  ;;  %6155 = vtanh.f32 %v1443_v14  ;;  %v1185_v55 = vmul.f32 %v7538_v0, %v6144_v53  ;;  %v1057_v56 = vadd.f32 1e-05, %v993_v52  ;;  %5778 = vmatmul.mubr.msk.f32.gmra.mxu0 %vm319_vm0, %v6140_v49  ;;  %v7600_v61 = vmul.f32 0.015625, %v427_v54 }
 0x131   : > { %v1056_v16 = vadd.f32 1e-05, %v992_v39  ;;  %6157 = vtanh.f32 %v1442_v19  ;;  %v1184_v41 = vmul.f32 %v7538_v0, %v6146_v40  ;;  %v7602_v60 = vmul.f32 0.015625, %v424_v46 }
 0x132   : > { %v1249_v45 = vmul.f32 %v1185_v55, %v7541_v30  ;;  %v1381_v4 = vmul.f32 %v6825_v2, %v1185_v55  ;;  %6159 = vrsqrt.f32 %v1057_v56  ;;  %v931_v17 = vmul.f32 %v7600_v61, %v7600_v61 }
 0x133   : > { %v1248_v5 = vmul.f32 %v1184_v41, %v7543_v23  ;;  %v1380_v6 = vmul.f32 %v6826_v58, %v1184_v41  ;;  %6161 = vrsqrt.f32 %v1056_v16  ;;  %v747_v7 = vpop.xlane.xlu1 %746  ;;  %v930_v32 = vmul.f32 %v7602_v60, %v7602_v60 }
 0x134   : > { %v744_v10 = vpop.xlane.xlu0 %743  ;;  %v1317_v48 = vsub.f32 %v7557_v26, %v1249_v45  ;;  %v867_v11 = vmul.f32 0.015625, %v747_v7 }
 0x135   : > { %v866_v30 = vmul.f32 0.015625, %v744_v10  ;;  %v6148_v15 = vpop.eup %6147  ;;  %v1316_v63 = vsub.f32 %v7557_v26, %v1248_v5  ;;  %v6829_v5 = vld [vmem:[%s7028_s15 + $0x108] sm:$0xff] }
 0x136   : > { %v6150_v62 = vpop.eup %6149  ;;  %v1445_v23 = vadd.f32 %v1381_v4, %v1317_v48  ;;  %v995_v18 = vsub.f32 %v867_v11, %v931_v17  ;;  %v6830_v17 = vld [vmem:[%s7028_s15 + $0x100] sm:$0xff] }
 0x137   : > { %v994_v8 = vsub.f32 %v866_v30, %v930_v32  ;;  %v6152_v12 = vpop.eup %6151  ;;  %v1444_v3 = vadd.f32 %v1380_v6, %v1316_v63  ;;  %5780 = vmatprep.mubr.msk.f32.mxu0 %vm319_vm0, %v6150_v62  ;;  %v433_v33 = vpop.xlane.xlu1 %432 }
 0x138   : > { %v430_v21 = vpop.xlane.xlu0 %429  ;;  %v6154_v9 = vpop.eup %6153  ;;  %6163 = vtanh.f32 %v1445_v23  ;;  %v1187_v22 = vmul.f32 %v7538_v0, %v6152_v12  ;;  %v1059_v27 = vadd.f32 1e-05, %v995_v18  ;;  %5781 = vmatmul.mubr.msk.f32.gmra.mxu0 %vm319_vm0, %v6148_v15  ;;  %v7618_v57 = vmul.f32 0.015625, %v433_v33 }
 0x139   : > { %v1058_v28 = vadd.f32 1e-05, %v994_v8  ;;  %6165 = vtanh.f32 %v1444_v3  ;;  %v1186_v29 = vmul.f32 %v7538_v0, %v6154_v9  ;;  %v7620_v35 = vmul.f32 0.015625, %v430_v21 }
 0x13a   : > { %v1251_v20 = vmul.f32 %v1187_v22, %v7564_v59  ;;  %v1383_v24 = vmul.f32 %v6827_v13, %v1187_v22  ;;  %6167 = vrsqrt.f32 %v1059_v27  ;;  %v933_v36 = vmul.f32 %v7618_v57, %v7618_v57 }
 0x13b   : > { %v1250_v37 = vmul.f32 %v1186_v29, %v7566_v1  ;;  %v1382_v42 = vmul.f32 %v6828_v38, %v1186_v29  ;;  %6169 = vrsqrt.f32 %v1058_v28  ;;  %v753_v43 = vpop.xlane.xlu1 %752  ;;  %v932_v44 = vmul.f32 %v7620_v35, %v7620_v35 }
 0x13c   : > { %v750_v25 = vpop.xlane.xlu0 %749  ;;  %v1319_v47 = vsub.f32 %v7557_v26, %v1251_v20  ;;  %v869_v49 = vmul.f32 0.015625, %v753_v43 }
 0x13d   : > { %v868_v59 = vmul.f32 0.015625, %v750_v25  ;;  %v6156_v50 = vpop.eup %6155  ;;  %v1318_v51 = vsub.f32 %v7557_v26, %v1250_v37  ;;  %v6831_v37 = vld [vmem:[%s7028_s15 + $0x118] sm:$0xff] }
 0x13e   : > { %v6158_v14 = vpop.eup %6157  ;;  %v1447_v1 = vadd.f32 %v1383_v24, %v1319_v47  ;;  %v997_v52 = vsub.f32 %v869_v49, %v933_v36  ;;  %v6832_v36 = vld [vmem:[%s7028_s15 + $0x110] sm:$0xff] }
 0x13f   : > { %v996_v39 = vsub.f32 %v868_v59, %v932_v44  ;;  %v6160_v53 = vpop.eup %6159  ;;  %v1446_v19 = vadd.f32 %v1382_v42, %v1318_v51  ;;  %5783 = vmatprep.mubr.msk.f32.mxu0 %vm319_vm0, %v6158_v14  ;;  %v439_v54 = vpop.xlane.xlu1 %438 }
 0x140   : > { %v436_v46 = vpop.xlane.xlu0 %435  ;;  %v6162_v40 = vpop.eup %6161  ;;  %6171 = vtanh.f32 %v1447_v1  ;;  %v1189_v55 = vmul.f32 %v7538_v0, %v6160_v53  ;;  %v1061_v56 = vadd.f32 1e-05, %v997_v52  ;;  %5784 = vmatmul.mubr.msk.f32.gmra.mxu0 %vm319_vm0, %v6156_v50  ;;  %v7636_v45 = vmul.f32 0.015625, %v439_v54 }
 0x141   : > { %v1060_v16 = vadd.f32 1e-05, %v996_v39  ;;  %6173 = vtanh.f32 %v1446_v19  ;;  %v1188_v41 = vmul.f32 %v7538_v0, %v6162_v40  ;;  %v7638_v2 = vmul.f32 0.015625, %v436_v46 }
 0x142   : > { %v1253_v4 = vmul.f32 %v1189_v55, %v7582_v31  ;;  %v1385_v58 = vmul.f32 %v6829_v5, %v1189_v55  ;;  %6175 = vrsqrt.f32 %v1061_v56  ;;  %v935_v10 = vmul.f32 %v7636_v45, %v7636_v45 }
 0x143   : > { %v1252_v6 = vmul.f32 %v1188_v41, %v7584_v34  ;;  %v1384_v7 = vmul.f32 %v6830_v17, %v1188_v41  ;;  %6177 = vrsqrt.f32 %v1060_v16  ;;  %v759_v48 = vpop.xlane.xlu1 %758  ;;  %v934_v30 = vmul.f32 %v7638_v2, %v7638_v2 }
 0x144   : > { %v756_v32 = vpop.xlane.xlu0 %755  ;;  %v1321_v11 = vsub.f32 %v7557_v26, %v1253_v4  ;;  %v871_v15 = vmul.f32 0.015625, %v759_v48 }
 0x145   : > { %v870_v31 = vmul.f32 0.015625, %v756_v32  ;;  %v6164_v63 = vpop.eup %6163  ;;  %v1320_v62 = vsub.f32 %v7557_v26, %v1252_v6  ;;  %v6833_v6 = vld [vmem:[%s7028_s15 + $0x128] sm:$0xff] }
 0x146   : > { %v6166_v23 = vpop.eup %6165  ;;  %v1449_v34 = vadd.f32 %v1385_v58, %v1321_v11  ;;  %v999_v18 = vsub.f32 %v871_v15, %v935_v10  ;;  %v6834_v10 = vld [vmem:[%s7028_s15 + $0x120] sm:$0xff] }
 0x147   : > { %v998_v8 = vsub.f32 %v870_v31, %v934_v30  ;;  %v6168_v12 = vpop.eup %6167  ;;  %v1448_v3 = vadd.f32 %v1384_v7, %v1320_v62  ;;  %5786 = vmatprep.mubr.msk.f32.mxu0 %vm319_vm0, %v6166_v23  ;;  %v445_v33 = vpop.xlane.xlu1 %444 }
 0x148   : > { %v442_v21 = vpop.xlane.xlu0 %441  ;;  %v6170_v9 = vpop.eup %6169  ;;  %6179 = vtanh.f32 %v1449_v34  ;;  %v1191_v22 = vmul.f32 %v7538_v0, %v6168_v12  ;;  %v1063_v27 = vadd.f32 1e-05, %v999_v18  ;;  %5787 = vmatmul.mubr.msk.f32.gmra.mxu0 %vm319_vm0, %v6164_v63  ;;  %v7654_v20 = vmul.f32 0.015625, %v445_v33 }
 0x149   : > { %v1062_v28 = vadd.f32 1e-05, %v998_v8  ;;  %6181 = vtanh.f32 %v1448_v3  ;;  %v1190_v29 = vmul.f32 %v7538_v0, %v6170_v9  ;;  %v7656_v13 = vmul.f32 0.015625, %v442_v21 }
 0x14a   : > { %v1255_v24 = vmul.f32 %v1191_v22, %v7600_v61  ;;  %v1387_v38 = vmul.f32 %v6831_v37, %v1191_v22  ;;  %6183 = vrsqrt.f32 %v1063_v27  ;;  %v937_v25 = vmul.f32 %v7654_v20, %v7654_v20 }
 0x14b   : > { %v1254_v42 = vmul.f32 %v1190_v29, %v7602_v60  ;;  %v1386_v43 = vmul.f32 %v6832_v36, %v1190_v29  ;;  %6185 = vrsqrt.f32 %v1062_v28  ;;  %v765_v47 = vpop.xlane.xlu1 %764  ;;  %v936_v59 = vmul.f32 %v7656_v13, %v7656_v13 }
 0x14c   : > { %v762_v44 = vpop.xlane.xlu0 %761  ;;  %v1323_v49 = vsub.f32 %v7557_v26, %v1255_v24  ;;  %v873_v50 = vmul.f32 0.015625, %v765_v47  ;;  %v6836_v47 = vld [vmem:[%s7028_s15 + $0x130] sm:$0xff] }
 0x14d   : > { %v872_v61 = vmul.f32 0.015625, %v762_v44  ;;  %v6172_v51 = vpop.eup %6171  ;;  %v1322_v14 = vsub.f32 %v7557_v26, %v1254_v42  ;;  %v6835_v42 = vld [vmem:[%s7028_s15 + $0x138] sm:$0xff] }
 0x14e   : > { %v6174_v1 = vpop.eup %6173  ;;  %v1451_v60 = vadd.f32 %v1387_v38, %v1323_v49  ;;  %v1001_v52 = vsub.f32 %v873_v50, %v937_v25 }
 0x14f   : > { %v1000_v39 = vsub.f32 %v872_v61, %v936_v59  ;;  %v6176_v53 = vpop.eup %6175  ;;  %v1450_v19 = vadd.f32 %v1386_v43, %v1322_v14  ;;  %5789 = vmatprep.mubr.msk.f32.mxu0 %vm319_vm0, %v6174_v1  ;;  %v451_v54 = vpop.xlane.xlu1 %450 }
 0x150   : > { %v6178_v46 = vpop.eup %6177  ;;  %6187 = vtanh.f32 %v1451_v60  ;;  %v1193_v40 = vmul.f32 %v7538_v0, %v6176_v53  ;;  %v1065_v55 = vadd.f32 1e-05, %v1001_v52  ;;  %5790 = vmatmul.mubr.msk.f32.gmra.mxu0 %vm319_vm0, %v6172_v51  ;;  %v448_v16 = vpop.xlane.xlu0 %447  ;;  %v7672_v4 = vmul.f32 0.015625, %v451_v54 }
 0x151   : > { %v1064_v56 = vadd.f32 1e-05, %v1000_v39  ;;  %6189 = vtanh.f32 %v1450_v19  ;;  %v1192_v41 = vmul.f32 %v7538_v0, %v6178_v46  ;;  %v7674_v5 = vmul.f32 0.015625, %v448_v16 }
 0x152   : > { %v1257_v58 = vmul.f32 %v1193_v40, %v7618_v57  ;;  %v1389_v17 = vmul.f32 %v6833_v6, %v1193_v40  ;;  %6191 = vrsqrt.f32 %v1065_v55  ;;  %v939_v32 = vmul.f32 %v7672_v4, %v7672_v4 }
 0x153   : > { %v1256_v7 = vmul.f32 %v1192_v41, %v7620_v35  ;;  %v1388_v48 = vmul.f32 %v6834_v10, %v1192_v41  ;;  %6193 = vrsqrt.f32 %v1064_v56  ;;  %v771_v11 = vpop.xlane.xlu1 %770  ;;  %v938_v15 = vmul.f32 %v7674_v5, %v7674_v5 }
 0x154   : > { %v1325_v30 = vsub.f32 %v7557_v26, %v1257_v58  ;;  %v875_v31 = vmul.f32 0.015625, %v771_v11  ;;  %v768_v63 = vpop.xlane.xlu0 %767  ;;  %v6838_v11 = vld [vmem:[%s7028_s15 + $0x140] sm:$0xff] }
 0x155   : > { %v6180_v57 = vpop.eup %6179  ;;  %v1324_v62 = vsub.f32 %v7557_v26, %v1256_v7  ;;  %v874_v23 = vmul.f32 0.015625, %v768_v63  ;;  %v6837_v7 = vld [vmem:[%s7028_s15 + $0x148] sm:$0xff] }
 0x156   : > { %v6182_v34 = vpop.eup %6181  ;;  %v1453_v35 = vadd.f32 %v1389_v17, %v1325_v30  ;;  %v1003_v18 = vsub.f32 %v875_v31, %v939_v32 }
 0x157   : > { %v6184_v8 = vpop.eup %6183  ;;  %v1452_v12 = vadd.f32 %v1388_v48, %v1324_v62  ;;  %v1002_v3 = vsub.f32 %v874_v23, %v938_v15  ;;  %5792 = vmatprep.mubr.msk.f32.mxu0 %vm319_vm0, %v6182_v34  ;;  %v457_v33 = vpop.xlane.xlu1 %456 }
 0x158   : > { %v6186_v21 = vpop.eup %6185  ;;  %6195 = vtanh.f32 %v1453_v35  ;;  %v1195_v9 = vmul.f32 %v7538_v0, %v6184_v8  ;;  %v1067_v22 = vadd.f32 1e-05, %v1003_v18  ;;  %v7688_v27 = vmul.f32 0.015625, %v457_v33  ;;  %5793 = vmatmul.mubr.msk.f32.gmra.mxu0 %vm319_vm0, %v6180_v57  ;;  %v454_v28 = vpop.xlane.xlu0 %453 }
 0x159   : > { %6197 = vtanh.f32 %v1452_v12  ;;  %v1194_v29 = vmul.f32 %v7538_v0, %v6186_v21  ;;  %v1066_v24 = vadd.f32 1e-05, %v1002_v3  ;;  %v7692_v37 = vmul.f32 0.015625, %v454_v28 }
 0x15a   : > { %v1259_v38 = vmul.f32 %v1195_v9, %v7636_v45  ;;  %v1391_v36 = vmul.f32 %v6835_v42, %v1195_v9  ;;  %6199 = vrsqrt.f32 %v1067_v22  ;;  %v941_v43 = vmul.f32 %v7688_v27, %v7688_v27 }
 0x15b   : > { %v1258_v25 = vmul.f32 %v1194_v29, %v7638_v2  ;;  %v1390_v44 = vmul.f32 %v6836_v47, %v1194_v29  ;;  %6201 = vrsqrt.f32 %v1066_v24  ;;  %v940_v49 = vmul.f32 %v7692_v37, %v7692_v37  ;;  %v777_v59 = vpop.xlane.xlu1 %776 }
 0x15c   : > { %v1327_v50 = vsub.f32 %v7557_v26, %v1259_v38  ;;  %v877_v61 = vmul.f32 0.015625, %v777_v59  ;;  %v774_v51 = vpop.xlane.xlu0 %773  ;;  %v6840_v59 = vld [vmem:[%s7028_s15 + $0x150] sm:$0xff] }
 0x15d   : > { %v6188_v45 = vpop.eup %6187  ;;  %v1326_v14 = vsub.f32 %v7557_v26, %v1258_v25  ;;  %v876_v1 = vmul.f32 0.015625, %v774_v51  ;;  %v6839_v25 = vld [vmem:[%s7028_s15 + $0x158] sm:$0xff] }
 0x15e   : > { %v6190_v60 = vpop.eup %6189  ;;  %v1455_v52 = vadd.f32 %v1391_v36, %v1327_v50  ;;  %v1005_v39 = vsub.f32 %v877_v61, %v941_v43  ;;  %v3247_v36 = vld [vmem:[%s10414_s2 + $0x78] sm:$0xff] }
 0x15f   : > { %v6192_v53 = vpop.eup %6191  ;;  %v1454_v2 = vadd.f32 %v1390_v44, %v1326_v14  ;;  %v1004_v19 = vsub.f32 %v876_v1, %v940_v49  ;;  %5795 = vmatprep.mubr.msk.f32.mxu0 %vm319_vm0, %v6190_v60  ;;  %v463_v54 = vpop.xlane.xlu1 %462  ;;  %5840 = vmatprep.subr.mxu0 %v3247_v36 }
 0x160   : > { %v6194_v46 = vpop.eup %6193  ;;  %6203 = vtanh.f32 %v1455_v52  ;;  %v1197_v40 = vmul.f32 %v7538_v0, %v6192_v53  ;;  %v1069_v55 = vadd.f32 1e-05, %v1005_v39  ;;  %v7706_v56 = vmul.f32 0.015625, %v463_v54  ;;  %5796 = vmatmul.mubr.msk.f32.gmra.mxu0 %vm319_vm0, %v6188_v45  ;;  %v460_v16 = vpop.xlane.xlu0 %459  ;;  %5968 = vmatprep.subr.mxu1 %v3247_v36 }
 0x161   : > { %6205 = vtanh.f32 %v1454_v2  ;;  %v1196_v41 = vmul.f32 %v7538_v0, %v6194_v46  ;;  %v1068_v58 = vadd.f32 1e-05, %v1004_v19  ;;  %v7710_v6 = vmul.f32 0.015625, %v460_v16  ;;  %5841 = vmatpush3.msra.mxu0 %v3247_v36  ;;  %5984 = vmatpush3.msra.mxu1 %v3247_v36 }
 0x162   : > { %v1261_v17 = vmul.f32 %v1197_v40, %v7654_v20  ;;  %v1393_v10 = vmul.f32 %v6837_v7, %v1197_v40  ;;  %6207 = vrsqrt.f32 %v1069_v55  ;;  %v943_v48 = vmul.f32 %v7706_v56, %v7706_v56 }
 0x163   : > { %v1260_v32 = vmul.f32 %v1196_v41, %v7656_v13  ;;  %v1392_v30 = vmul.f32 %v6838_v11, %v1196_v41  ;;  %6209 = vrsqrt.f32 %v1068_v58  ;;  %v942_v15 = vmul.f32 %v7710_v6, %v7710_v6  ;;  %v783_v31 = vpop.xlane.xlu1 %782  ;;  %v6841_v11 = vld [vmem:[%s7028_s15 + $0x168] sm:$0xff] }
 0x164   : > { %v1329_v63 = vsub.f32 %v7557_v26, %v1261_v17  ;;  %v879_v57 = vmul.f32 0.015625, %v783_v31  ;;  %v780_v62 = vpop.xlane.xlu0 %779 }
 0x165   : > { %v6196_v20 = vpop.eup %6195  ;;  %v1328_v23 = vsub.f32 %v7557_v26, %v1260_v32  ;;  %v878_v34 = vmul.f32 0.015625, %v780_v62 }
 0x166   : > { %v6198_v35 = vpop.eup %6197  ;;  %v1457_v18 = vadd.f32 %v1393_v10, %v1329_v63  ;;  %v1007_v8 = vsub.f32 %v879_v57, %v943_v48  ;;  %v3246_v48 = vld [vmem:[%s10414_s2 + $0x70] sm:$0xff]  ;;  %v6842_v63 = vld [vmem:[%s7028_s15 + $0x160] sm:$0xff] }
 0x167   : > { %v6200_v12 = vpop.eup %6199  ;;  %v1456_v13 = vadd.f32 %v1392_v30, %v1328_v23  ;;  %v1006_v3 = vsub.f32 %v878_v34, %v942_v15  ;;  %5798 = vmatprep.mubr.msk.f32.mxu0 %vm319_vm0, %v6198_v35  ;;  %v469_v33 = vpop.xlane.xlu1 %468  ;;  %5842 = vmatprep.subr.mxu0 %v3246_v48 }
 0x168   : > { %v6202_v21 = vpop.eup %6201  ;;  %6211 = vtanh.f32 %v1457_v18  ;;  %v1199_v9 = vmul.f32 %v7538_v0, %v6200_v12  ;;  %v1071_v22 = vadd.f32 1e-05, %v1007_v8  ;;  %v7724_v28 = vmul.f32 0.015625, %v469_v33  ;;  %5799 = vmatmul.mubr.msk.f32.gmra.mxu0 %vm319_vm0, %v6196_v20  ;;  %v466_v29 = vpop.xlane.xlu0 %465  ;;  %5969 = vmatprep.subr.mxu1 %v3246_v48 }
 0x169   : > { %6213 = vtanh.f32 %v1456_v13  ;;  %v1198_v24 = vmul.f32 %v7538_v0, %v6202_v21  ;;  %v1070_v38 = vadd.f32 1e-05, %v1006_v3  ;;  %v7728_v42 = vmul.f32 0.015625, %v466_v29  ;;  %5843 = vmatpush3.msra.mxu0 %v3246_v48  ;;  %5985 = vmatpush3.msra.mxu1 %v3246_v48 }
 0x16a   : > { %v1263_v43 = vmul.f32 %v1199_v9, %v7672_v4  ;;  %v1395_v47 = vmul.f32 %v6839_v25, %v1199_v9  ;;  %6215 = vrsqrt.f32 %v1071_v22  ;;  %v945_v44 = vmul.f32 %v7724_v28, %v7724_v28 }
 0x16b   : > { %v1262_v49 = vmul.f32 %v1198_v24, %v7674_v5  ;;  %v1394_v50 = vmul.f32 %v6840_v59, %v1198_v24  ;;  %6217 = vrsqrt.f32 %v1070_v38  ;;  %v944_v61 = vmul.f32 %v7728_v42, %v7728_v42  ;;  %v789_v51 = vpop.xlane.xlu1 %788  ;;  %v6843_v59 = vld [vmem:[%s7028_s15 + $0x178] sm:$0xff] }
 0x16c   : > { %v1331_v4 = vsub.f32 %v7557_v26, %v1263_v43  ;;  %v881_v45 = vmul.f32 0.015625, %v789_v51  ;;  %v786_v14 = vpop.xlane.xlu0 %785 }
 0x16d   : > { %v6204_v1 = vpop.eup %6203  ;;  %v1330_v60 = vsub.f32 %v7557_v26, %v1262_v49  ;;  %v880_v52 = vmul.f32 0.015625, %v786_v14 }
 0x16e   : > { %v6206_v39 = vpop.eup %6205  ;;  %v1459_v53 = vadd.f32 %v1395_v47, %v1331_v4  ;;  %v1009_v5 = vsub.f32 %v881_v45, %v945_v44  ;;  %v3245_v44 = vld [vmem:[%s10414_s2 + $0x68] sm:$0xff]  ;;  %v6844_v4 = vld [vmem:[%s7028_s15 + $0x170] sm:$0xff] }
 0x16f   : > { %v6208_v2 = vpop.eup %6207  ;;  %v1458_v19 = vadd.f32 %v1394_v50, %v1330_v60  ;;  %v1008_v54 = vsub.f32 %v880_v52, %v944_v61  ;;  %5801 = vmatprep.mubr.msk.f32.mxu0 %vm319_vm0, %v6206_v39  ;;  %v475_v46 = vpop.xlane.xlu1 %474  ;;  %5844 = vmatprep.subr.mxu0 %v3245_v44 }
 0x170   : > { %v6210_v40 = vpop.eup %6209  ;;  %6219 = vtanh.f32 %v1459_v53  ;;  %v1201_v55 = vmul.f32 %v7538_v0, %v6208_v2  ;;  %v1073_v16 = vadd.f32 1e-05, %v1009_v5  ;;  %v7745_v41 = vmul.f32 0.015625, %v475_v46  ;;  %5802 = vmatmul.mubr.msk.f32.gmra.mxu0 %vm319_vm0, %v6204_v1  ;;  %v472_v58 = vpop.xlane.xlu0 %471  ;;  %5970 = vmatprep.subr.mxu1 %v3245_v44 }
 0x171   : > { %6221 = vtanh.f32 %v1458_v19  ;;  %v1200_v17 = vmul.f32 %v7538_v0, %v6210_v40  ;;  %v1072_v7 = vadd.f32 1e-05, %v1008_v54  ;;  %v7749_v10 = vmul.f32 0.015625, %v472_v58  ;;  %5845 = vmatpush3.msra.mxu0 %v3245_v44  ;;  %5986 = vmatpush3.msra.mxu1 %v3245_v44 }
 0x172   : > { %v1265_v32 = vmul.f32 %v1201_v55, %v7688_v27  ;;  %v1397_v30 = vmul.f32 %v6841_v11, %v1201_v55  ;;  %6223 = vrsqrt.f32 %v1073_v16  ;;  %v947_v15 = vmul.f32 %v7745_v41, %v7745_v41 }
 0x173   : > { %v1264_v31 = vmul.f32 %v1200_v17, %v7692_v37  ;;  %v1396_v57 = vmul.f32 %v6842_v63, %v1200_v17  ;;  %6225 = vrsqrt.f32 %v1072_v7  ;;  %v946_v62 = vmul.f32 %v7749_v10, %v7749_v10  ;;  %v795_v20 = vpop.xlane.xlu1 %794  ;;  %v6845_v63 = vld [vmem:[%s7028_s15 + $0x188] sm:$0xff] }
 0x174   : > { %v1333_v27 = vsub.f32 %v7557_v26, %v1265_v32  ;;  %v883_v23 = vmul.f32 0.015625, %v795_v20  ;;  %v792_v34 = vpop.xlane.xlu0 %791 }
 0x175   : > { %v6212_v35 = vpop.eup %6211  ;;  %v1332_v18 = vsub.f32 %v7557_v26, %v1264_v31  ;;  %v882_v8 = vmul.f32 0.015625, %v792_v34 }
 0x176   : > { %v6214_v12 = vpop.eup %6213  ;;  %v1461_v13 = vadd.f32 %v1397_v30, %v1333_v27  ;;  %v1011_v37 = vsub.f32 %v883_v23, %v947_v15  ;;  %v3244_v15 = vld [vmem:[%s10414_s2 + $0x60] sm:$0xff] }
 0x177   : > { %v6216_v3 = vpop.eup %6215  ;;  %v1460_v33 = vadd.f32 %v1396_v57, %v1332_v18  ;;  %v1010_v21 = vsub.f32 %v882_v8, %v946_v62  ;;  %5804 = vmatprep.mubr.msk.f32.mxu0 %vm319_vm0, %v6214_v12  ;;  %v481_v9 = vpop.xlane.xlu1 %480  ;;  %5846 = vmatprep.subr.mxu0 %v3244_v15  ;;  %v6846_v27 = vld [vmem:[%s7028_s15 + $0x180] sm:$0xff] }
 0x178   : > { %v6218_v22 = vpop.eup %6217  ;;  %6227 = vtanh.f32 %v1461_v13  ;;  %v1203_v29 = vmul.f32 %v7538_v0, %v6216_v3  ;;  %v1075_v24 = vadd.f32 1e-05, %v1011_v37  ;;  %v7766_v38 = vmul.f32 0.015625, %v481_v9  ;;  %5805 = vmatmul.mubr.msk.f32.gmra.mxu0 %vm319_vm0, %v6212_v35  ;;  %v478_v36 = vpop.xlane.xlu0 %477  ;;  %5971 = vmatprep.subr.mxu1 %v3244_v15 }
 0x179   : > { %6229 = vtanh.f32 %v1460_v33  ;;  %v1202_v43 = vmul.f32 %v7538_v0, %v6218_v22  ;;  %v1074_v25 = vadd.f32 1e-05, %v1010_v21  ;;  %v7770_v47 = vmul.f32 0.015625, %v478_v36  ;;  %5847 = vmatpush3.msra.mxu0 %v3244_v15  ;;  %5987 = vmatpush3.msra.mxu1 %v3244_v15 }
 0x17a   : > { %v1267_v49 = vmul.f32 %v1203_v29, %v7706_v56  ;;  %v1399_v50 = vmul.f32 %v6843_v59, %v1203_v29  ;;  %6231 = vrsqrt.f32 %v1075_v24  ;;  %v949_v61 = vmul.f32 %v7766_v38, %v7766_v38 }
 0x17b   : > { %v1266_v51 = vmul.f32 %v1202_v43, %v7710_v6  ;;  %v1398_v45 = vmul.f32 %v6844_v4, %v1202_v43  ;;  %6233 = vrsqrt.f32 %v1074_v25  ;;  %v948_v14 = vmul.f32 %v7770_v47, %v7770_v47  ;;  %v801_v1 = vpop.xlane.xlu1 %800  ;;  %v6847_v4 = vld [vmem:[%s7028_s15 + $0x198] sm:$0xff] }
 0x17c   : > { %v1335_v56 = vsub.f32 %v7557_v26, %v1267_v49  ;;  %v885_v60 = vmul.f32 0.015625, %v801_v1  ;;  %v798_v52 = vpop.xlane.xlu0 %797 }
 0x17d   : > { %v6220_v39 = vpop.eup %6219  ;;  %v1334_v53 = vsub.f32 %v7557_v26, %v1266_v51  ;;  %v884_v5 = vmul.f32 0.015625, %v798_v52 }
 0x17e   : > { %v6222_v2 = vpop.eup %6221  ;;  %v1463_v19 = vadd.f32 %v1399_v50, %v1335_v56  ;;  %v1013_v6 = vsub.f32 %v885_v60, %v949_v61  ;;  %v3243_v61 = vld [vmem:[%s10414_s2 + $0x58] sm:$0xff] }
 0x17f   : > { %v6224_v54 = vpop.eup %6223  ;;  %v1462_v46 = vadd.f32 %v1398_v45, %v1334_v53  ;;  %v1012_v40 = vsub.f32 %v884_v5, %v948_v14  ;;  %5807 = vmatprep.mubr.msk.f32.mxu0 %vm319_vm0, %v6222_v2  ;;  %v487_v55 = vpop.xlane.xlu1 %486  ;;  %5848 = vmatprep.subr.mxu0 %v3243_v61 }
 0x180   : > { %v6226_v16 = vpop.eup %6225  ;;  %6235 = vtanh.f32 %v1463_v19  ;;  %v1205_v58 = vmul.f32 %v7538_v0, %v6224_v54  ;;  %v1077_v17 = vadd.f32 1e-05, %v1013_v6  ;;  %v7787_v7 = vmul.f32 0.015625, %v487_v55  ;;  %5808 = vmatmul.mubr.msk.f32.gmra.mxu0 %vm319_vm0, %v6220_v39  ;;  %v484_v48 = vpop.xlane.xlu0 %483  ;;  %5972 = vmatprep.subr.mxu1 %v3243_v61 }
 0x181   : > { %6237 = vtanh.f32 %v1462_v46  ;;  %v1204_v32 = vmul.f32 %v7538_v0, %v6226_v16  ;;  %v1076_v11 = vadd.f32 1e-05, %v1012_v40  ;;  %v7791_v30 = vmul.f32 0.015625, %v484_v48  ;;  %5849 = vmatpush3.msra.mxu0 %v3243_v61  ;;  %5988 = vmatpush3.msra.mxu1 %v3243_v61 }
 0x182   : > { %v1269_v31 = vmul.f32 %v1205_v58, %v7724_v28  ;;  %v1401_v57 = vmul.f32 %v6845_v63, %v1205_v58  ;;  %6239 = vrsqrt.f32 %v1077_v17  ;;  %v951_v62 = vmul.f32 %v7787_v7, %v7787_v7  ;;  %v7831_v17 = vld [vmem:[%s10415_s3] ss:$0 sm:$0xff] }
 0x183   : > { %v1268_v20 = vmul.f32 %v1204_v32, %v7728_v42  ;;  %v1400_v23 = vmul.f32 %v6846_v27, %v1204_v32  ;;  %6241 = vrsqrt.f32 %v1076_v11  ;;  %v950_v34 = vmul.f32 %v7791_v30, %v7791_v30  ;;  %v807_v35 = vpop.xlane.xlu1 %806 }
 0x184   : > { %v1337_v28 = vsub.f32 %v7557_v26, %v1269_v31  ;;  %v887_v18 = vmul.f32 0.015625, %v807_v35  ;;  %v804_v8 = vpop.xlane.xlu0 %803  ;;  %v6851_v35 = vld [vmem:[%s7028_s15 + $0x1a0] sm:$0xff] }
 0x185   : > { %v6228_v12 = vpop.eup %6227  ;;  %v1336_v13 = vsub.f32 %v7557_v26, %v1268_v20  ;;  %v886_v37 = vmul.f32 0.015625, %v804_v8  ;;  %v6850_v20 = vld [vmem:[%s7028_s15 + $0x1a8] sm:$0xff] }
 0x186   : > { %v6230_v3 = vpop.eup %6229  ;;  %v1465_v33 = vadd.f32 %v1401_v57, %v1337_v28  ;;  %v1015_v42 = vsub.f32 %v887_v18, %v951_v62  ;;  %v3242_v57 = vld [vmem:[%s10414_s2 + $0x50] sm:$0xff] }
 0x187   : > { %v6232_v21 = vpop.eup %6231  ;;  %v1464_v9 = vadd.f32 %v1400_v23, %v1336_v13  ;;  %v1014_v22 = vsub.f32 %v886_v37, %v950_v34  ;;  %5810 = vmatprep.mubr.msk.f32.mxu0 %vm319_vm0, %v6230_v3  ;;  %v493_v29 = vpop.xlane.xlu1 %492  ;;  %5850 = vmatprep.subr.mxu0 %v3242_v57 }
 0x188   : > { %v6234_v24 = vpop.eup %6233  ;;  %6243 = vtanh.f32 %v1465_v33  ;;  %v1207_v36 = vmul.f32 %v7538_v0, %v6232_v21  ;;  %v1079_v43 = vadd.f32 1e-05, %v1015_v42  ;;  %v7808_v25 = vmul.f32 0.015625, %v493_v29  ;;  %5811 = vmatmul.mubr.msk.f32.gmra.mxu0 %vm319_vm0, %v6228_v12  ;;  %v490_v44 = vpop.xlane.xlu0 %489  ;;  %5973 = vmatprep.subr.mxu1 %v3242_v57 }
 0x189   : > { %6245 = vtanh.f32 %v1464_v9  ;;  %v1206_v49 = vmul.f32 %v7538_v0, %v6234_v24  ;;  %v1078_v59 = vadd.f32 1e-05, %v1014_v22  ;;  %v7812_v50 = vmul.f32 0.015625, %v490_v44  ;;  %v6848_v0 = vld [vmem:[%s7028_s15 + $0x190] sm:$0xff]  ;;  %5851 = vmatpush3.msra.mxu0 %v3242_v57  ;;  %5989 = vmatpush3.msra.mxu1 %v3242_v57 }
 0x18a   : > { %v1271_v51 = vmul.f32 %v1207_v36, %v7745_v41  ;;  %v1403_v45 = vmul.f32 %v6847_v4, %v1207_v36  ;;  %6247 = vrsqrt.f32 %v1079_v43  ;;  %v953_v14 = vmul.f32 %v7808_v25, %v7808_v25 }
 0x18b   : > { %v1270_v1 = vmul.f32 %v1206_v49, %v7749_v10  ;;  %v1402_v56 = vmul.f32 %v6848_v0, %v1206_v49  ;;  %6249 = vrsqrt.f32 %v1078_v59  ;;  %v952_v60 = vmul.f32 %v7812_v50, %v7812_v50  ;;  %v813_v52 = vpop.xlane.xlu1 %812 }
 0x18c   : > { %v1339_v41 = vsub.f32 %v7557_v26, %v1271_v51  ;;  %v889_v39 = vmul.f32 0.015625, %v813_v52  ;;  %v810_v53 = vpop.xlane.xlu0 %809 }
 0x18d   : > { %v6236_v5 = vpop.eup %6235  ;;  %v1338_v2 = vsub.f32 %v7557_v26, %v1270_v1  ;;  %v888_v19 = vmul.f32 0.015625, %v810_v53  ;;  %v3241_v1 = vld [vmem:[%s10414_s2 + $0x48] sm:$0xff]  ;;  %v6854_v53 = vld [vmem:[%s7028_s15 + $0x1b0] sm:$0xff] }
 0x18e   : > { %v6238_v6 = vpop.eup %6237  ;;  %v1467_v54 = vadd.f32 %v1403_v45, %v1339_v41  ;;  %v1017_v10 = vsub.f32 %v889_v39, %v953_v14  ;;  %v7869_v14 = vld [vmem:[%s10416_s4] ss:$0 sm:$0xff]  ;;  %5852 = vmatprep.subr.mxu0 %v3241_v1  ;;  %5974 = vmatprep.subr.mxu1 %v3241_v1 }
 0x18f   : > { %v6240_v46 = vpop.eup %6239  ;;  %v1466_v40 = vadd.f32 %v1402_v56, %v1338_v2  ;;  %v1016_v55 = vsub.f32 %v888_v19, %v952_v60  ;;  %5813 = vmatprep.mubr.msk.f32.mxu0 %vm319_vm0, %v6238_v6  ;;  %v499_v16 = vpop.xlane.xlu1 %498  ;;  %v6853_v56 = vld [vmem:[%s7028_s15 + $0x1b8] sm:$0xff]  ;;  %5853 = vmatpush3.msra.mxu0 %v3241_v1 }
 0x190   : > { %v6242_v58 = vpop.eup %6241  ;;  %6251 = vtanh.f32 %v1467_v54  ;;  %v1209_v26 = vmul.f32 %v7831_v17, %v6240_v46  ;;  %v1081_v48 = vadd.f32 1e-05, %v1017_v10  ;;  %v7834_v32 = vmul.f32 0.015625, %v499_v16  ;;  %5814 = vmatmul.mubr.msk.f32.gmra.mxu0 %vm319_vm0, %v6236_v5  ;;  %v496_v11 = vpop.xlane.xlu0 %495  ;;  %5990 = vmatpush3.msra.mxu1 %v3241_v1 }
 0x191   : > { %6253 = vtanh.f32 %v1466_v40  ;;  %v1208_v15 = vmul.f32 %v7831_v17, %v6242_v58  ;;  %v1080_v31 = vadd.f32 1e-05, %v1016_v55  ;;  %v7838_v63 = vmul.f32 0.015625, %v496_v11 }
 0x192   : > { %v1273_v62 = vmul.f32 %v1209_v26, %v7766_v38  ;;  %v1405_v27 = vmul.f32 %v6850_v20, %v1209_v26  ;;  %6255 = vrsqrt.f32 %v1081_v48  ;;  %v955_v23 = vmul.f32 %v7834_v32, %v7834_v32  ;;  %v7854_v38 = vld [vmem:[%s10415_s3 + $0x1] ss:$0 sm:$0xff] }
 0x193   : > { %v1272_v34 = vmul.f32 %v1208_v15, %v7770_v47  ;;  %v1404_v28 = vmul.f32 %v6851_v35, %v1208_v15  ;;  %6257 = vrsqrt.f32 %v1080_v31  ;;  %v954_v18 = vmul.f32 %v7838_v63, %v7838_v63  ;;  %v819_v8 = vpop.xlane.xlu1 %818 }
 0x194   : > { %v1341_v12 = vsub.f32 %v7854_v38, %v1273_v62  ;;  %v891_v13 = vmul.f32 0.015625, %v819_v8  ;;  %v816_v37 = vpop.xlane.xlu0 %815 }
 0x195   : > { %v6244_v3 = vpop.eup %6243  ;;  %v1340_v47 = vsub.f32 %v7854_v38, %v1272_v34  ;;  %v890_v33 = vmul.f32 0.015625, %v816_v37  ;;  %v6855_v37 = vld [vmem:[%s7028_s15 + $0x1c8] sm:$0xff] }
 0x196   : > { %v6246_v42 = vpop.eup %6245  ;;  %v1469_v21 = vadd.f32 %v1405_v27, %v1341_v12  ;;  %v1019_v9 = vsub.f32 %v891_v13, %v955_v23  ;;  %v3240_v12 = vld [vmem:[%s10414_s2 + $0x40] sm:$0xff] }
 0x197   : > { %v6248_v22 = vpop.eup %6247  ;;  %v1468_v29 = vadd.f32 %v1404_v28, %v1340_v47  ;;  %v1018_v24 = vsub.f32 %v890_v33, %v954_v18  ;;  %5816 = vmatprep.mubr.msk.f32.mxu0 %vm319_vm0, %v6246_v42  ;;  %v505_v36 = vpop.xlane.xlu1 %504  ;;  %5854 = vmatprep.subr.mxu0 %v3240_v12 }
 0x198   : > { %v6250_v43 = vpop.eup %6249  ;;  %6259 = vtanh.f32 %v1469_v21  ;;  %v1211_v44 = vmul.f32 %v7831_v17, %v6248_v22  ;;  %v1083_v49 = vadd.f32 1e-05, %v1019_v9  ;;  %v7860_v59 = vmul.f32 0.015625, %v505_v36  ;;  %5817 = vmatmul.mubr.msk.f32.gmra.mxu0 %vm319_vm0, %v6244_v3  ;;  %v502_v61 = vpop.xlane.xlu0 %501  ;;  %v6856_v21 = vld [vmem:[%s7028_s15 + $0x1c0] sm:$0xff]  ;;  %5975 = vmatprep.subr.mxu1 %v3240_v12 }
 0x199   : > { %6261 = vtanh.f32 %v1468_v29  ;;  %v1210_v51 = vmul.f32 %v7831_v17, %v6250_v43  ;;  %v1082_v4 = vadd.f32 1e-05, %v1018_v24  ;;  %v7864_v45 = vmul.f32 0.015625, %v502_v61  ;;  %5855 = vmatpush3.msra.mxu0 %v3240_v12  ;;  %5991 = vmatpush3.msra.mxu1 %v3240_v12 }
 0x19a   : > { %v1275_v0 = vmul.f32 %v1211_v44, %v7787_v7  ;;  %v1407_v60 = vmul.f32 %v6853_v56, %v1211_v44  ;;  %6263 = vrsqrt.f32 %v1083_v49  ;;  %v957_v52 = vmul.f32 %v7860_v59, %v7860_v59  ;;  %v5746_v41 = vpop.f32.mrf.mxu0 }
 0x19b   : > { %v1274_v39 = vmul.f32 %v1210_v51, %v7791_v30  ;;  %v1406_v5 = vmul.f32 %v6854_v53, %v1210_v51  ;;  %6265 = vrsqrt.f32 %v1082_v4  ;;  %v956_v2 = vmul.f32 %v7864_v45, %v7864_v45  ;;  %v825_v19 = vpop.xlane.xlu1 %824 }
 0x19c   : > { %v1343_v7 = vsub.f32 %v7854_v38, %v1275_v0  ;;  %v7884_v6 = vadd.f32 %v5746_v41, %v7869_v14  ;;  %v893_v54 = vmul.f32 0.015625, %v825_v19  ;;  %v822_v10 = vpop.xlane.xlu0 %821  ;;  %v1815_v46 = vpop.f32.mrf.mxu0 }
 0x19d   : > { %v6252_v40 = vpop.eup %6251  ;;  %v1342_v30 = vsub.f32 %v7854_v38, %v1274_v39  ;;  %v892_v55 = vmul.f32 0.015625, %v822_v10  ;;  %v7888_v16 = vadd.f32 %v7869_v14, %v1815_v46  ;;  %v6857_v10 = vld [vmem:[%s7028_s15 + $0x1d8] sm:$0xff] }
 0x19e   : > { %v6254_v58 = vpop.eup %6253  ;;  %v1471_v26 = vadd.f32 %v1407_v60, %v1343_v7  ;;  %v1021_v48 = vsub.f32 %v893_v54, %v957_v52  ;;  %2138 = vadd.xlane.f32.xlu1 %v7884_v6  ;;  %v2329_v62 = vmul.f32 %v7884_v6, %v7884_v6 }
 0x19f   : > { %v6256_v11 = vpop.eup %6255  ;;  %v1470_v15 = vadd.f32 %v1406_v5, %v1342_v30  ;;  %v1020_v31 = vsub.f32 %v892_v55, %v956_v2  ;;  %5819 = vmatprep.mubr.msk.f32.mxu0 %vm319_vm0, %v6254_v58  ;;  %v511_v57 = vpop.xlane.xlu1 %510  ;;  %2136 = vadd.xlane.f32.xlu0 %v7888_v16  ;;  %v2328_v2 = vmul.f32 %v7888_v16, %v7888_v16  ;;  %v6858_v55 = vld [vmem:[%s7028_s15 + $0x1d0] sm:$0xff] }
 0x1a0   : > { %v6258_v20 = vpop.eup %6257  ;;  %6267 = vtanh.f32 %v1471_v26  ;;  %v1213_v27 = vmul.f32 %v7831_v17, %v6256_v11  ;;  %v1085_v23 = vadd.f32 1e-05, %v1021_v48  ;;  %v7896_v34 = vmul.f32 0.015625, %v511_v57  ;;  %v5749_v35 = vpop.f32.mrf.mxu0  ;;  %5820 = vmatmul.mubr.msk.f32.gmra.mxu0 %vm319_vm0, %v6252_v40  ;;  %v3239_v48 = vld [vmem:[%s10414_s2 + $0x38] sm:$0xff] }
 0x1a1   : > { %v508_v28 = vpop.xlane.xlu0 %507  ;;  %6269 = vtanh.f32 %v1470_v15  ;;  %v1212_v18 = vmul.f32 %v7831_v17, %v6258_v20  ;;  %v1084_v8 = vadd.f32 1e-05, %v1020_v31  ;;  %v7913_v24 = vadd.f32 %v5749_v35, %v7869_v14  ;;  %5856 = vmatprep.subr.mxu0 %v3239_v48  ;;  %5976 = vmatprep.subr.mxu1 %v3239_v48 }
 0x1a2   : > { %v1277_v13 = vmul.f32 %v1213_v27, %v7808_v25  ;;  %v1409_v3 = vmul.f32 %v6855_v37, %v1213_v27  ;;  %6271 = vrsqrt.f32 %v1085_v23  ;;  %v959_v47 = vmul.f32 %v7896_v34, %v7896_v34  ;;  %2394 = vadd.xlane.f32.xlu1 %v2329_v62  ;;  %v1825_v33 = vpop.f32.mrf.mxu0  ;;  %5857 = vmatpush3.msra.mxu0 %v3239_v48 }
 0x1a3   : > { %v1276_v42 = vmul.f32 %v1212_v18, %v7812_v50  ;;  %v1408_v9 = vmul.f32 %v6856_v21, %v1212_v18  ;;  %6273 = vrsqrt.f32 %v1084_v8  ;;  %v7909_v22 = vmul.f32 0.015625, %v508_v28  ;;  %v831_v29 = vpop.xlane.xlu1 %830  ;;  %5992 = vmatpush3.msra.mxu1 %v3239_v48 }
 0x1a4   : > { %v1345_v25 = vsub.f32 %v7854_v38, %v1277_v13  ;;  %v7916_v36 = vadd.f32 %v7869_v14, %v1825_v33  ;;  %v895_v43 = vmul.f32 0.015625, %v831_v29  ;;  %v6859_v13 = vld [vmem:[%s7028_s15 + $0x1e8] sm:$0xff]  ;;  %v6860_v33 = vld [vmem:[%s7028_s15 + $0x1e0] sm:$0xff] }
 0x1a5   : > { %v828_v44 = vpop.xlane.xlu0 %827  ;;  %v6260_v50 = vpop.eup %6259  ;;  %v1344_v49 = vsub.f32 %v7854_v38, %v1276_v42  ;;  %v958_v61 = vmul.f32 %v7909_v22, %v7909_v22 }
 0x1a6   : > { %v894_v51 = vmul.f32 0.015625, %v828_v44  ;;  %v6262_v4 = vpop.eup %6261  ;;  %v1473_v1 = vadd.f32 %v1409_v3, %v1345_v25  ;;  %v1023_v0 = vsub.f32 %v895_v43, %v959_v47  ;;  %2140 = vadd.xlane.f32.xlu0 %v7916_v36  ;;  %2142 = vadd.xlane.f32.xlu1 %v7913_v24  ;;  %v2330_v29 = vmul.f32 %v7916_v36, %v7916_v36 }
 0x1a7   : > { %v6264_v56 = vpop.eup %6263  ;;  %v1472_v60 = vadd.f32 %v1408_v9, %v1344_v49  ;;  %5822 = vmatprep.mubr.msk.f32.mxu0 %vm319_vm0, %v6262_v4 }
 0x1a8   : > { %v1022_v52 = vsub.f32 %v894_v51, %v958_v61  ;;  %v6266_v41 = vpop.eup %6265  ;;  %6275 = vtanh.f32 %v1473_v1  ;;  %v1215_v39 = vmul.f32 %v7831_v17, %v6264_v56  ;;  %v1087_v53 = vadd.f32 1e-05, %v1023_v0  ;;  %v5752_v5 = vpop.f32.mrf.mxu0  ;;  %5823 = vmatmul.mubr.msk.f32.gmra.mxu0 %vm319_vm0, %v6260_v50 }
 0x1a9   : > { %6277 = vtanh.f32 %v1472_v60  ;;  %v1214_v19 = vmul.f32 %v7831_v17, %v6266_v41  ;;  %v7949_v28 = vadd.f32 %v5752_v5, %v7869_v14  ;;  %v6861_v60 = vld [vmem:[%s7028_s15 + $0x1f8] sm:$0xff] }
 0x1aa   : > { %v1086_v7 = vadd.f32 1e-05, %v1022_v52  ;;  %v1279_v54 = vmul.f32 %v1215_v39, %v7834_v32  ;;  %v1411_v46 = vmul.f32 %v6857_v10, %v1215_v39  ;;  %6279 = vrsqrt.f32 %v1087_v53  ;;  %2392 = vadd.xlane.f32.xlu1 %v2328_v2  ;;  %v1835_v40 = vpop.f32.mrf.mxu0  ;;  %v6862_v53 = vld [vmem:[%s7028_s15 + $0x1f0] sm:$0xff] }
 0x1ab   : > { %v1278_v30 = vmul.f32 %v1214_v19, %v7838_v63  ;;  %v1410_v58 = vmul.f32 %v6858_v55, %v1214_v19  ;;  %v7934_v26 = vadd.f32 %v7869_v14, %v1835_v40  ;;  %v2331_v32 = vmul.f32 %v7913_v24, %v7913_v24 }
 0x1ac   : > { %6281 = vrsqrt.f32 %v1086_v7  ;;  %v1347_v11 = vsub.f32 %v7854_v38, %v1279_v54  ;;  %v2333_v1 = vmul.f32 %v7949_v28, %v7949_v28 }
 0x1ad   : > { %v6268_v15 = vpop.eup %6267  ;;  %v1346_v63 = vsub.f32 %v7854_v38, %v1278_v30  ;;  %2144 = vadd.xlane.f32.xlu0 %v7934_v26  ;;  %v2332_v27 = vmul.f32 %v7934_v26, %v7934_v26 }
 0x1ae   : > { %v6270_v31 = vpop.eup %6269  ;;  %v1475_v57 = vadd.f32 %v1411_v46, %v1347_v11  ;;  %2398 = vadd.xlane.f32.xlu1 %v2331_v32 }
 0x1af   : > { %v6272_v62 = vpop.eup %6271  ;;  %v1474_v20 = vadd.f32 %v1410_v58, %v1346_v63  ;;  %5825 = vmatprep.mubr.msk.f32.mxu0 %vm319_vm0, %v6270_v31  ;;  %v3238_v31 = vld [vmem:[%s10414_s2 + $0x30] sm:$0xff] }
 0x1b0   : > { %v6274_v23 = vpop.eup %6273  ;;  %6283 = vtanh.f32 %v1475_v57  ;;  %v1217_v35 = vmul.f32 %v7831_v17, %v6272_v62  ;;  %v5755_v18 = vpop.f32.mrf.mxu0  ;;  %5826 = vmatmul.mubr.msk.f32.gmra.mxu0 %vm319_vm0, %v6268_v15  ;;  %5858 = vmatprep.subr.mxu0 %v3238_v31 }
 0x1b1   : > { %6285 = vtanh.f32 %v1474_v20  ;;  %v1216_v8 = vmul.f32 %v7831_v17, %v6274_v23  ;;  %2400 = vadd.xlane.f32.xlu0 %v2332_v27  ;;  %v7983_v7 = vadd.f32 %v5755_v18, %v7869_v14  ;;  %5859 = vmatpush3.msra.mxu0 %v3238_v31 }
 0x1b2   : > { %v1281_v12 = vmul.f32 %v1217_v35, %v7860_v59  ;;  %v1413_v37 = vmul.f32 %v6859_v13, %v1217_v35  ;;  %2146 = vadd.xlane.f32.xlu1 %v7949_v28  ;;  %v1845_v3 = vpop.f32.mrf.mxu0  ;;  %5977 = vmatprep.subr.mxu1 %v3238_v31 }
 0x1b3   : > { %v1280_v47 = vmul.f32 %v1216_v8, %v7864_v45  ;;  %v1412_v42 = vmul.f32 %v6860_v33, %v1216_v8  ;;  %v7959_v21 = vadd.f32 %v7869_v14, %v1845_v3  ;;  %v2335_v30 = vmul.f32 %v7983_v7, %v7983_v7  ;;  %5993 = vmatpush3.msra.mxu1 %v3238_v31 }
 0x1b4   : > { %v1349_v9 = vsub.f32 %v7854_v38, %v1281_v12 }
 0x1b5   : > { %v6276_v25 = vpop.eup %6275  ;;  %v1348_v59 = vsub.f32 %v7854_v38, %v1280_v47  ;;  %2148 = vadd.xlane.f32.xlu0 %v7959_v21  ;;  %v2334_v49 = vmul.f32 %v7959_v21, %v7959_v21  ;;  %v3236_v47 = vld [vmem:[%s10414_s2 + $0x20] sm:$0xff] }
 0x1b6   : > { %v6278_v43 = vpop.eup %6277  ;;  %v1477_v44 = vadd.f32 %v1413_v37, %v1349_v9  ;;  %2396 = vadd.xlane.f32.xlu1 %v2330_v29  ;;  %v3237_v37 = vld [vmem:[%s10414_s2 + $0x28] sm:$0xff] }
 0x1b7   : > { %v6280_v45 = vpop.eup %6279  ;;  %v1476_v50 = vadd.f32 %v1412_v42, %v1348_v59  ;;  %5828 = vmatprep.mubr.msk.f32.mxu0 %vm319_vm0, %v6278_v43  ;;  %5860 = vmatprep.subr.mxu0 %v3237_v37  ;;  %v3235_v42 = vld [vmem:[%s10414_s2 + $0x18] sm:$0xff] }
 0x1b8   : > { %6287 = vtanh.f32 %v1477_v44  ;;  %v1219_v51 = vmul.f32 %v7831_v17, %v6280_v45  ;;  %v5758_v4 = vpop.f32.mrf.mxu0  ;;  %5829 = vmatmul.mubr.msk.f32.gmra.mxu0 %vm319_vm0, %v6276_v25  ;;  %5978 = vmatprep.subr.mxu1 %v3237_v37  ;;  %v3234_v25 = vld [vmem:[%s10414_s2 + $0x10] sm:$0xff]  ;;  %v3233_v45 = vld [vmem:[%s10414_s2 + $0x8] sm:$0xff] }
 0x1b9   : > { %v6282_v61 = vpop.eup %6281  ;;  %6289 = vtanh.f32 %v1476_v50  ;;  %2404 = vadd.xlane.f32.xlu0 %v2334_v49  ;;  %v7998_v58 = vadd.f32 %v5758_v4, %v7869_v14  ;;  %5861 = vmatpush3.msra.mxu0 %v3237_v37  ;;  %v3232_v50 = vld [vmem:[%s10414_s2] sm:$0xff] }
 0x1ba   : > { %v1218_v0 = vmul.f32 %v7831_v17, %v6282_v61  ;;  %v1283_v56 = vmul.f32 %v1219_v51, %v7896_v34  ;;  %v1415_v52 = vmul.f32 %v6861_v60, %v1219_v51  ;;  %2402 = vadd.xlane.f32.xlu1 %v2333_v1  ;;  %v1855_v41 = vpop.f32.mrf.mxu0  ;;  %5862 = vmatprep.subr.mxu0 %v3236_v47 }
 0x1bb   : > { %v7979_v2 = vadd.f32 %v7869_v14, %v1855_v41  ;;  %v2337_v63 = vmul.f32 %v7998_v58, %v7998_v58  ;;  %5863 = vmatpush3.msra.mxu0 %v3236_v47  ;;  %5994 = vmatpush3.msra.mxu1 %v3237_v37 }
 0x1bc   : > { %v1282_v39 = vmul.f32 %v1218_v0, %v7909_v22  ;;  %v1414_v5 = vmul.f32 %v6862_v53, %v1218_v0  ;;  %v1351_v19 = vsub.f32 %v7854_v38, %v1283_v56  ;;  %5864 = vmatprep.subr.mxu0 %v3235_v42  ;;  %5979 = vmatprep.subr.mxu1 %v3236_v47 }
 0x1bd   : > { %v6284_v17 = vpop.eup %6283  ;;  %2152 = vadd.xlane.f32.xlu0 %v7979_v2  ;;  %v2336_v46 = vmul.f32 %v7979_v2, %v7979_v2  ;;  %5865 = vmatpush3.msra.mxu0 %v3235_v42 }
 0x1be   : > { %v1350_v54 = vsub.f32 %v7854_v38, %v1282_v39  ;;  %v6286_v34 = vpop.eup %6285  ;;  %v1479_v10 = vadd.f32 %v1415_v52, %v1351_v19  ;;  %2150 = vadd.xlane.f32.xlu1 %v7983_v7  ;;  %5866 = vmatprep.subr.mxu0 %v3234_v25 }
 0x1bf   : > { %5831 = vmatprep.mubr.msk.f32.mxu0 %vm319_vm0, %v6286_v34  ;;  %5867 = vmatpush3.msra.mxu0 %v3234_v25 }
 0x1c0   : > { %v1478_v22 = vadd.f32 %v1414_v5, %v1350_v54  ;;  %6291 = vtanh.f32 %v1479_v10  ;;  %v5761_v40 = vpop.f32.mrf.mxu0  ;;  %5832 = vmatmul.mubr.msk.f32.gmra.mxu0 %vm319_vm0, %v6284_v17  ;;  %5995 = vmatpush3.msra.mxu1 %v3236_v47 }
 0x1c1   : > { %2408 = vadd.xlane.f32.xlu0 %v2336_v46  ;;  %v8015_v20 = vadd.f32 %v5761_v40, %v7869_v14  ;;  %5980 = vmatprep.subr.mxu1 %v3235_v42 }
 0x1c2   : > { %6293 = vtanh.f32 %v1478_v22  ;;  %2406 = vadd.xlane.f32.xlu1 %v2335_v30  ;;  %v1865_v38 = vpop.f32.mrf.mxu0  ;;  %5868 = vmatprep.subr.mxu0 %v3233_v45 }
 0x1c3   : > { %v7995_v55 = vadd.f32 %v7869_v14, %v1865_v38  ;;  %v2339_v8 = vmul.f32 %v8015_v20, %v8015_v20  ;;  %5869 = vmatpush3.msra.mxu0 %v3233_v45  ;;  %5996 = vmatpush3.msra.mxu1 %v3235_v42 }
 0x1c4   : > { %5870 = vmatprep.subr.mxu0 %v3232_v50  ;;  %5981 = vmatprep.subr.mxu1 %v3234_v25 }
 0x1c5   : > { %v6288_v48 = vpop.eup %6287  ;;  %2156 = vadd.xlane.f32.xlu0 %v7995_v55  ;;  %v2338_v32 = vmul.f32 %v7995_v55, %v7995_v55  ;;  %5871 = vmatpush3.msra.mxu0 %v3232_v50 }
 0x1c6   : > { %v6290_v11 = vpop.eup %6289  ;;  %2154 = vadd.xlane.f32.xlu1 %v7998_v58  ;;  %5997 = vmatpush3.msra.mxu1 %v3234_v25 }
 0x1c7   : > { %5834 = vmatprep.mubr.msk.f32.mxu0 %vm319_vm0, %v6290_v11  ;;  %5982 = vmatprep.subr.mxu1 %v3233_v45 }
 0x1c8   : > { %v5764_v15 = vpop.f32.mrf.mxu0  ;;  %5835 = vmatmul.mubr.msk.f32.gmra.mxu0 %vm319_vm0, %v6288_v48  ;;  %5998 = vmatpush3.msra.mxu1 %v3233_v45 }
 0x1c9   : > { %2412 = vadd.xlane.f32.xlu0 %v2338_v32  ;;  %v8032_v3 = vadd.f32 %v5764_v15, %v7869_v14  ;;  %5983 = vmatprep.subr.mxu1 %v3232_v50 }
 0x1ca   : > { %2410 = vadd.xlane.f32.xlu1 %v2337_v63  ;;  %v1875_v57 = vpop.f32.mrf.mxu0  ;;  %5999 = vmatpush3.msra.mxu1 %v3232_v50 }
 0x1cb   : > { %v8012_v62 = vadd.f32 %v7869_v14, %v1875_v57  ;;  %v2341_v29 = vmul.f32 %v8032_v3, %v8032_v3 }
 0x1cd   : > { %v6292_v27 = vpop.eup %6291  ;;  %2160 = vadd.xlane.f32.xlu0 %v8012_v62  ;;  %v2340_v35 = vmul.f32 %v8012_v62, %v8012_v62 }
 0x1ce   : > { %2158 = vadd.xlane.f32.xlu1 %v8015_v20 }
 0x1cf   : > { %v6294_v23 = vpop.eup %6293 }
 0x1d0   : > { %5837 = vmatprep.mubr.msk.f32.mxu0 %vm319_vm0, %v6294_v23  ;;  %v5767_v18 = vpop.f32.mrf.mxu0 }
 0x1d1   : > { %5838 = vmatmul.mubr.msk.f32.gmra.mxu0 %vm319_vm0, %v6292_v27  ;;  %2416 = vadd.xlane.f32.xlu0 %v2340_v35  ;;  %v8053_v44 = vadd.f32 %v5767_v18, %v7869_v14  ;;  %vm5411_vm0 = vcmask 1041409  }
 0x1d2   : > { %2414 = vadd.xlane.f32.xlu1 %v2339_v8  ;;  %v1885_v12 = vpop.f32.mrf.mxu0 }
 0x1d3   : > { %v8026_v13 = vadd.f32 %v7869_v14, %v1885_v12  ;;  %v2343_v51 = vmul.f32 %v8053_v44, %v8053_v44 }
 0x1d5   : > { %2164 = vadd.xlane.f32.xlu0 %v8026_v13  ;;  %v2342_v33 = vmul.f32 %v8026_v13, %v8026_v13 }
 0x1d6   : > { %2162 = vadd.xlane.f32.xlu1 %v8032_v3 }
 0x1d8   : > { %v5770_v9 = vpop.f32.mrf.mxu0 }
 0x1d9   : > { %2420 = vadd.xlane.f32.xlu0 %v2342_v33  ;;  %v8071_v0 = vadd.f32 %v5770_v9, %v7869_v14 }
 0x1da   : > { %2418 = vadd.xlane.f32.xlu1 %v2341_v29  ;;  %v1895_v59 = vpop.f32.mrf.mxu0 }
 0x1db   : > { %v8050_v43 = vadd.f32 %v7869_v14, %v1895_v59  ;;  %v2345_v52 = vmul.f32 %v8071_v0, %v8071_v0 }
 0x1dd   : > { %2168 = vadd.xlane.f32.xlu0 %v8050_v43  ;;  %v2344_v49 = vmul.f32 %v8050_v43, %v8050_v43 }
 0x1de   : > { %2166 = vadd.xlane.f32.xlu1 %v8053_v44 }
 0x1e0   : > { %v5773_v61 = vpop.f32.mrf.mxu0 }
 0x1e1   : > { %2424 = vadd.xlane.f32.xlu0 %v2344_v49  ;;  %v8083_v53 = vadd.f32 %v5773_v61, %v7869_v14 }
 0x1e2   : > { %2422 = vadd.xlane.f32.xlu1 %v2343_v51  ;;  %v1905_v4 = vpop.f32.mrf.mxu0 }
 0x1e3   : > { %v8068_v1 = vadd.f32 %v7869_v14, %v1905_v4  ;;  %v2347_v17 = vmul.f32 %v8083_v53, %v8083_v53 }
 0x1e5   : > { %2172 = vadd.xlane.f32.xlu0 %v8068_v1  ;;  %v2346_v56 = vmul.f32 %v8068_v1, %v8068_v1 }
 0x1e6   : > { %2170 = vadd.xlane.f32.xlu1 %v8071_v0 }
 0x1e8   : > { %v5776_v60 = vpop.f32.mrf.mxu0 }
 0x1e9   : > { %2428 = vadd.xlane.f32.xlu0 %v2346_v56  ;;  %v8095_v10 = vadd.f32 %v5776_v60, %v7869_v14 }
 0x1ea   : > { %2426 = vadd.xlane.f32.xlu1 %v2345_v52  ;;  %v1915_v41 = vpop.f32.mrf.mxu0 }
 0x1eb   : > { %v8080_v39 = vadd.f32 %v7869_v14, %v1915_v41  ;;  %v2349_v40 = vmul.f32 %v8095_v10, %v8095_v10 }
 0x1ed   : > { %2176 = vadd.xlane.f32.xlu0 %v8080_v39  ;;  %v2348_v5 = vmul.f32 %v8080_v39, %v8080_v39 }
 0x1ee   : > { %2174 = vadd.xlane.f32.xlu1 %v8083_v53 }
 0x1f0   : > { %v5779_v19 = vpop.f32.mrf.mxu0 }
 0x1f1   : > { %2432 = vadd.xlane.f32.xlu0 %v2348_v5  ;;  %v8107_v48 = vadd.f32 %v5779_v19, %v7869_v14 }
 0x1f2   : > { %2430 = vadd.xlane.f32.xlu1 %v2347_v17  ;;  %v1925_v54 = vpop.f32.mrf.mxu0 }
 0x1f3   : > { %v8092_v34 = vadd.f32 %v7869_v14, %v1925_v54  ;;  %v2351_v15 = vmul.f32 %v8107_v48, %v8107_v48 }
 0x1f5   : > { %2180 = vadd.xlane.f32.xlu0 %v8092_v34  ;;  %v2350_v22 = vmul.f32 %v8092_v34, %v8092_v34 }
 0x1f6   : > { %2178 = vadd.xlane.f32.xlu1 %v8095_v10 }
 0x1f8   : > { %v5782_v46 = vpop.f32.mrf.mxu0 }
 0x1f9   : > { %2436 = vadd.xlane.f32.xlu0 %v2350_v22  ;;  %v8119_v57 = vadd.f32 %v5782_v46, %v7869_v14 }
 0x1fa   : > { %2434 = vadd.xlane.f32.xlu1 %v2349_v40  ;;  %v1935_v30 = vpop.f32.mrf.mxu0 }
 0x1fb   : > { %v8104_v38 = vadd.f32 %v7869_v14, %v1935_v30  ;;  %v2353_v35 = vmul.f32 %v8119_v57, %v8119_v57 }
 0x1fd   : > { %2184 = vadd.xlane.f32.xlu0 %v8104_v38  ;;  %v2352_v11 = vmul.f32 %v8104_v38, %v8104_v38 }
 0x1fe   : > { %2182 = vadd.xlane.f32.xlu1 %v8107_v48 }
 0x200   : > { %v5785_v32 = vpop.f32.mrf.mxu0 }
 0x201   : > { %2440 = vadd.xlane.f32.xlu0 %v2352_v11  ;;  %v8131_v12 = vadd.f32 %v5785_v32, %v7869_v14 }
 0x202   : > { %2438 = vadd.xlane.f32.xlu1 %v2351_v15  ;;  %v1945_v63 = vpop.f32.mrf.mxu0 }
 0x203   : > { %v8116_v31 = vadd.f32 %v7869_v14, %v1945_v63  ;;  %v2355_v33 = vmul.f32 %v8131_v12, %v8131_v12 }
 0x205   : > { %2188 = vadd.xlane.f32.xlu0 %v8116_v31  ;;  %v2354_v27 = vmul.f32 %v8116_v31, %v8116_v31 }
 0x206   : > { %2186 = vadd.xlane.f32.xlu1 %v8119_v57 }
 0x208   : > { %v5788_v23 = vpop.f32.mrf.mxu0 }
 0x209   : > { %2444 = vadd.xlane.f32.xlu0 %v2354_v27  ;;  %v8143_v29 = vadd.f32 %v5788_v23, %v7869_v14 }
 0x20a   : > { %2442 = vadd.xlane.f32.xlu1 %v2353_v35  ;;  %v1955_v18 = vpop.f32.mrf.mxu0 }
 0x20b   : > { %v8128_v8 = vadd.f32 %v7869_v14, %v1955_v18  ;;  %v2357_v45 = vmul.f32 %v8143_v29, %v8143_v29 }
 0x20d   : > { %2192 = vadd.xlane.f32.xlu0 %v8128_v8  ;;  %v2356_v37 = vmul.f32 %v8128_v8, %v8128_v8 }
 0x20e   : > { %2190 = vadd.xlane.f32.xlu1 %v8131_v12 }
 0x210   : > { %v5791_v47 = vpop.f32.mrf.mxu0 }
 0x211   : > { %2448 = vadd.xlane.f32.xlu0 %v2356_v37  ;;  %v8155_v61 = vadd.f32 %v5791_v47, %v7869_v14 }
 0x212   : > { %2446 = vadd.xlane.f32.xlu1 %v2355_v33  ;;  %v1965_v42 = vpop.f32.mrf.mxu0 }
 0x213   : > { %v8140_v9 = vadd.f32 %v7869_v14, %v1965_v42  ;;  %v2359_v56 = vmul.f32 %v8155_v61, %v8155_v61 }
 0x215   : > { %2196 = vadd.xlane.f32.xlu0 %v8140_v9  ;;  %v2358_v25 = vmul.f32 %v8140_v9, %v8140_v9 }
 0x216   : > { %2194 = vadd.xlane.f32.xlu1 %v8143_v29 }
 0x218   : > { %v5794_v59 = vpop.f32.mrf.mxu0 }
 0x219   : > { %2452 = vadd.xlane.f32.xlu0 %v2358_v25  ;;  %v8167_v41 = vadd.f32 %v5794_v59, %v7869_v14 }
 0x21a   : > { %2450 = vadd.xlane.f32.xlu1 %v2357_v45  ;;  %v1975_v50 = vpop.f32.mrf.mxu0 }
 0x21b   : > { %v8152_v49 = vadd.f32 %v7869_v14, %v1975_v50  ;;  %10473 = vst [vmem:[#allocation6_spill] sm:$0xff] %v8167_v41  ;;  %v2361_v22 = vmul.f32 %v8167_v41, %v8167_v41 }
 0x21d   : > { %2200 = vadd.xlane.f32.xlu0 %v8152_v49  ;;  %v2360_v51 = vmul.f32 %v8152_v49, %v8152_v49 }
 0x21e   : > { %2198 = vadd.xlane.f32.xlu1 %v8155_v61 }
 0x220   : > { %v5797_v4 = vpop.f32.mrf.mxu0 }
 0x221   : > { %2456 = vadd.xlane.f32.xlu0 %v2360_v51  ;;  %v8181_v11 = vadd.f32 %v5797_v4, %v7869_v14 }
 0x222   : > { %2454 = vadd.xlane.f32.xlu1 %v2359_v56  ;;  %v1985_v60 = vpop.f32.mrf.mxu0 }
 0x223   : > { %v8164_v52 = vadd.f32 %v7869_v14, %v1985_v60  ;;  %10475 = vst [vmem:[#allocation8_spill] sm:$0xff] %v8181_v11  ;;  %v2363_v33 = vmul.f32 %v8181_v11, %v8181_v11 }
 0x225   : > { %2204 = vadd.xlane.f32.xlu0 %v8164_v52  ;;  %v2362_v19 = vmul.f32 %v8164_v52, %v8164_v52 }
 0x226   : > { %2202 = vadd.xlane.f32.xlu1 %v8167_v41 }
 0x227   : > { %v2139_v5 = vpop.xlane.xlu1 %2138 }
 0x228   : > { %v8173_v17 = vmul.f32 0.0078125, %v2139_v5  ;;  %v5800_v54 = vpop.f32.mrf.mxu0  ;;  %v2137_v15 = vpop.xlane.xlu0 %2136 }
 0x229   : > { %2460 = vadd.xlane.f32.xlu0 %v2362_v19  ;;  %v8189_v18 = vmul.f32 0.0078125, %v2137_v15  ;;  %v8197_v50 = vadd.f32 %v5800_v54, %v7869_v14 }
 0x22a   : > { %2458 = vadd.xlane.f32.xlu1 %v2361_v22  ;;  %v1995_v46 = vpop.f32.mrf.mxu0  ;;  %v2585_v32 = vmul.f32 %v8173_v17, %v8173_v17 }
 0x22b   : > { %v8178_v40 = vadd.f32 %v7869_v14, %v1995_v46  ;;  %v2395_v30 = vpop.xlane.xlu1 %2394  ;;  %10477 = vst [vmem:[#allocation10_spill] sm:$0xff] %v8197_v50  ;;  %v2584_v51 = vmul.f32 %v8189_v18, %v8189_v18 }
 0x22c   : > { %v2521_v63 = vmul.f32 0.0078125, %v2395_v30 }
 0x22d   : > { %10474 = vst [vmem:[#allocation7_spill] sm:$0xff] %v8178_v40  ;;  %2208 = vadd.xlane.f32.xlu0 %v8178_v40  ;;  %v2364_v35 = vmul.f32 %v8178_v40, %v8178_v40 }
 0x22e   : > { %v2649_v27 = vsub.f32 %v2521_v63, %v2585_v32  ;;  %2206 = vadd.xlane.f32.xlu1 %v8181_v11  ;;  %v2365_v63 = vmul.f32 %v8197_v50, %v8197_v50 }
 0x22f   : > { %v2143_v23 = vpop.xlane.xlu1 %2142  ;;  %v2141_v42 = vpop.xlane.xlu0 %2140 }
 0x230   : > { %v2713_v37 = vadd.f32 1e-05, %v2649_v27  ;;  %v5803_v47 = vpop.f32.mrf.mxu0  ;;  %v8201_v4 = vmul.f32 0.0078125, %v2143_v23 }
 0x231   : > { %2464 = vadd.xlane.f32.xlu0 %v2364_v35 }
 0x232   : > { %6295 = vrsqrt.f32 %v2713_v37  ;;  %2462 = vadd.xlane.f32.xlu1 %v2363_v33  ;;  %v2005_v25 = vpop.f32.mrf.mxu0  ;;  %v2587_v54 = vmul.f32 %v8201_v4, %v8201_v4  ;;  %v8213_v37 = vmul.f32 0.0078125, %v2141_v42 }
 0x233   : > { %v8194_v59 = vadd.f32 %v7869_v14, %v2005_v25  ;;  %v2393_v45 = vpop.xlane.xlu1 %2392 }
 0x234   : > { %v2520_v56 = vmul.f32 0.0078125, %v2393_v45 }
 0x235   : > { %10476 = vst [vmem:[#allocation9_spill] sm:$0xff] %v8194_v59  ;;  %2212 = vadd.xlane.f32.xlu0 %v8194_v59  ;;  %v2366_v46 = vmul.f32 %v8194_v59, %v8194_v59 }
 0x236   : > { %v2648_v60 = vsub.f32 %v2520_v56, %v2584_v51  ;;  %2210 = vadd.xlane.f32.xlu1 %v8197_v50  ;;  %v2145_v5 = vpop.xlane.xlu0 %2144  ;;  %v8221_v56 = vadd.f32 %v5803_v47, %v7869_v14 }
 0x237   : > { %v8205_v19 = vmul.f32 0.0078125, %v2145_v5  ;;  %v2399_v22 = vpop.xlane.xlu1 %2398  ;;  %v8226_v5 = vld [vmem:[%s10416_s4 + $0x1] ss:$0 sm:$0xff] }
 0x238   : > { %v2712_v30 = vadd.f32 1e-05, %v2648_v60  ;;  %v2523_v32 = vmul.f32 0.0078125, %v2399_v22  ;;  %v5806_v15 = vpop.f32.mrf.mxu0  ;;  %10479 = vst [vmem:[#allocation12_spill] sm:$0xff] %v8221_v56 }
 0x239   : > { %2468 = vadd.xlane.f32.xlu0 %v2366_v46  ;;  %v2588_v33 = vmul.f32 %v8205_v19, %v8205_v19 }
 0x23a   : > { %6297 = vrsqrt.f32 %v2712_v30  ;;  %v2651_v27 = vsub.f32 %v2523_v32, %v2587_v54  ;;  %2466 = vadd.xlane.f32.xlu1 %v2365_v63  ;;  %v2015_v23 = vpop.f32.mrf.mxu0  ;;  %v2401_v35 = vpop.xlane.xlu0 %2400  ;;  %v2586_v54 = vmul.f32 %v8213_v37, %v8213_v37 }
 0x23b   : > { %v8218_v25 = vadd.f32 %v7869_v14, %v2015_v23  ;;  %v2524_v45 = vmul.f32 0.0078125, %v2401_v35  ;;  %v2147_v51 = vpop.xlane.xlu1 %2146 }
 0x23c   : > { %v2715_v60 = vadd.f32 1e-05, %v2651_v27  ;;  %v8237_v23 = vmul.f32 0.0078125, %v2147_v51  ;;  %v8248_v51 = vadd.f32 %v5806_v15, %v7869_v14 }
 0x23d   : > { %10478 = vst [vmem:[#allocation11_spill] sm:$0xff] %v8218_v25  ;;  %v2652_v22 = vsub.f32 %v2524_v45, %v2588_v33  ;;  %2216 = vadd.xlane.f32.xlu0 %v8218_v25  ;;  %v2368_v63 = vmul.f32 %v8218_v25, %v8218_v25  ;;  %v2367_v45 = vmul.f32 %v8221_v56, %v8221_v56  ;;  %v8245_v25 = vld [vmem:[%s10416_s4 + $0x2] ss:$0 sm:$0xff] }
 0x23e   : > { %6299 = vrsqrt.f32 %v2715_v60  ;;  %2214 = vadd.xlane.f32.xlu1 %v8221_v56  ;;  %v2149_v42 = vpop.xlane.xlu0 %2148  ;;  %10480 = vst [vmem:[#allocation13_spill] sm:$0xff] %v8248_v51 }
 0x23f   : > { %v6296_v46 = vpop.eup %6295  ;;  %v2716_v30 = vadd.f32 1e-05, %v2652_v22  ;;  %v8232_v47 = vmul.f32 0.0078125, %v2149_v42  ;;  %v2397_v32 = vpop.xlane.xlu1 %2396 }
 0x240   : > { %v2845_v27 = vmul.f32 %v6296_v46, %v8226_v5  ;;  %v2522_v35 = vmul.f32 0.0078125, %v2397_v32  ;;  %v5809_v33 = vpop.f32.mrf.mxu0 }
 0x241   : > { %6301 = vrsqrt.f32 %v2716_v30  ;;  %2472 = vadd.xlane.f32.xlu0 %v2368_v63  ;;  %v2590_v46 = vmul.f32 %v8232_v47, %v8232_v47 }
 0x242   : > { %v2909_v60 = vmul.f32 %v2845_v27, %v8173_v17  ;;  %v2650_v22 = vsub.f32 %v2522_v35, %v2586_v54  ;;  %2470 = vadd.xlane.f32.xlu1 %v2367_v45  ;;  %v2025_v42 = vpop.f32.mrf.mxu0  ;;  %v2405_v50 = vpop.xlane.xlu0 %2404  ;;  %v2589_v54 = vmul.f32 %v8237_v23, %v8237_v23 }
 0x243   : > { %v8253_v30 = vadd.f32 %v7869_v14, %v2025_v42  ;;  %v2526_v32 = vmul.f32 0.0078125, %v2405_v50  ;;  %v2403_v17 = vpop.xlane.xlu1 %2402 }
 0x244   : > { %v2714_v63 = vadd.f32 1e-05, %v2650_v22  ;;  %v2525_v35 = vmul.f32 0.0078125, %v2403_v17  ;;  %v2977_v56 = vsub.f32 %v8245_v25, %v2909_v60  ;;  %v2369_v22 = vmul.f32 %v8248_v51, %v8248_v51 }
 0x245   : > { %10481 = vst [vmem:[#allocation14_spill] sm:$0xff] %v8253_v30  ;;  %v2654_v45 = vsub.f32 %v2526_v32, %v2590_v46  ;;  %2220 = vadd.xlane.f32.xlu0 %v8253_v30  ;;  %v2370_v41 = vmul.f32 %v8253_v30, %v8253_v30  ;;  %v3041_v46 = vmul.f32 %v2845_v27, %v7884_v6 }
 0x246   : > { %6303 = vrsqrt.f32 %v2714_v63  ;;  %v2653_v15 = vsub.f32 %v2525_v35, %v2589_v54  ;;  %2218 = vadd.xlane.f32.xlu1 %v8248_v51  ;;  %v2153_v59 = vpop.xlane.xlu0 %2152  ;;  %v8272_v51 = vadd.f32 %v5809_v33, %v7869_v14 }
 0x247   : > { %v6298_v11 = vpop.eup %6297  ;;  %v2718_v42 = vadd.f32 1e-05, %v2654_v45  ;;  %v8260_v40 = vmul.f32 0.0078125, %v2153_v59  ;;  %v2151_v50 = vpop.xlane.xlu1 %2150  ;;  %v3105_v63 = vadd.f32 %v3041_v46, %v2977_v56 }
 0x248   : > { %v2844_v60 = vmul.f32 %v6298_v11, %v8226_v5  ;;  %v2717_v32 = vadd.f32 1e-05, %v2653_v15  ;;  %v8268_v17 = vmul.f32 0.0078125, %v2151_v50  ;;  %v5812_v54 = vpop.f32.mrf.mxu0  ;;  %10482 = vst [vmem:[#allocation15_spill] sm:$0xff] %v8272_v51 }
 0x249   : > { %6305 = vrsqrt.f32 %v2718_v42  ;;  %2476 = vadd.xlane.f32.xlu0 %v2370_v41  ;;  %v2592_v6 = vmul.f32 %v8260_v40, %v8260_v40 }
 0x24a   : > { %v2908_v59 = vmul.f32 %v2844_v60, %v8189_v18  ;;  %6307 = vrsqrt.f32 %v2717_v32  ;;  %2474 = vadd.xlane.f32.xlu1 %v2369_v22  ;;  %v2035_v35 = vpop.f32.mrf.mxu0  ;;  %v2409_v45 = vpop.xlane.xlu0 %2408  ;;  %v3040_v18 = vmul.f32 %v2844_v60, %v7888_v16  ;;  %v2591_v56 = vmul.f32 %v8268_v17, %v8268_v17 }
 0x24b   : > { %v6300_v30 = vpop.eup %6299  ;;  %v8277_v11 = vadd.f32 %v7869_v14, %v2035_v35  ;;  %v2528_v27 = vmul.f32 0.0078125, %v2409_v45  ;;  %v2407_v15 = vpop.xlane.xlu1 %2406  ;;  %6309 = vtanh.f32 %v3105_v63  ;;  %v8286_v32 = vadd.f32 %v5812_v54, %v7869_v14 }
 0x24c   : > { %v2976_v41 = vsub.f32 %v8245_v25, %v2908_v59  ;;  %v2527_v42 = vmul.f32 0.0078125, %v2407_v15  ;;  %v2847_v50 = vmul.f32 %v6300_v30, %v8226_v5  ;;  %v2371_v54 = vmul.f32 %v8272_v51, %v8272_v51 }
 0x24d   : > { %10483 = vst [vmem:[#allocation16_spill] sm:$0xff] %v8277_v11  ;;  %v2656_v33 = vsub.f32 %v2528_v27, %v2592_v6  ;;  %2224 = vadd.xlane.f32.xlu0 %v8277_v11  ;;  %10484 = vst [vmem:[#allocation17_spill] sm:$0xff] %v8286_v32  ;;  %v2372_v30 = vmul.f32 %v8277_v11, %v8277_v11 }
 0x24e   : > { %v6302_v22 = vpop.eup %6301  ;;  %v3104_v46 = vadd.f32 %v3040_v18, %v2976_v41  ;;  %v2655_v35 = vsub.f32 %v2527_v42, %v2591_v56  ;;  %2222 = vadd.xlane.f32.xlu1 %v8272_v51  ;;  %v2157_v59 = vpop.xlane.xlu0 %2156  ;;  %v2911_v41 = vmul.f32 %v2847_v50, %v8201_v4 }
 0x24f   : > { %v2720_v16 = vadd.f32 1e-05, %v2656_v33  ;;  %v8289_v60 = vmul.f32 0.0078125, %v2157_v59  ;;  %v2155_v45 = vpop.xlane.xlu1 %2154  ;;  %v2848_v6 = vmul.f32 %v6302_v22, %v8226_v5  ;;  %v2373_v22 = vmul.f32 %v8286_v32, %v8286_v32 }
 0x250   : > { %6311 = vtanh.f32 %v3104_v46  ;;  %v2719_v27 = vadd.f32 1e-05, %v2655_v35  ;;  %v8294_v63 = vmul.f32 0.0078125, %v2155_v45  ;;  %v5815_v15 = vpop.f32.mrf.mxu0  ;;  %v3043_v45 = vmul.f32 %v2847_v50, %v7913_v24 }
 0x251   : > { %6313 = vrsqrt.f32 %v2720_v16  ;;  %2480 = vadd.xlane.f32.xlu0 %v2372_v30  ;;  %v2912_v18 = vmul.f32 %v2848_v6, %v8205_v19  ;;  %v2594_v56 = vmul.f32 %v8289_v60, %v8289_v60  ;;  %v3044_v19 = vmul.f32 %v2848_v6, %v7934_v26 }
 0x252   : > { %6315 = vrsqrt.f32 %v2719_v27  ;;  %2478 = vadd.xlane.f32.xlu1 %v2371_v54  ;;  %v2045_v42 = vpop.f32.mrf.mxu0  ;;  %v2413_v33 = vpop.xlane.xlu0 %2412  ;;  %v2593_v27 = vmul.f32 %v8294_v63, %v8294_v63  ;;  %v2979_v51 = vsub.f32 %v8245_v25, %v2911_v41 }
 0x253   : > { %v6304_v46 = vpop.eup %6303  ;;  %v8305_v35 = vadd.f32 %v7869_v14, %v2045_v42  ;;  %v2530_v59 = vmul.f32 0.0078125, %v2413_v33  ;;  %v2411_v4 = vpop.xlane.xlu1 %2410  ;;  %v2980_v16 = vsub.f32 %v8245_v25, %v2912_v18  ;;  %v8317_v14 = vld [vmem:[%s10416_s4] ss:$0 sm:$0xff] }
 0x254   : > { %v2846_v30 = vmul.f32 %v6304_v46, %v8226_v5  ;;  %v2529_v54 = vmul.f32 0.0078125, %v2411_v4  ;;  %v8320_v42 = vadd.f32 %v8317_v14, %v5815_v15 }
 0x255   : > { %v2658_v18 = vsub.f32 %v2530_v59, %v2594_v56  ;;  %2228 = vadd.xlane.f32.xlu0 %v8305_v35  ;;  %v3108_v24 = vadd.f32 %v3044_v19, %v2980_v16  ;;  %v2374_v46 = vmul.f32 %v8305_v35, %v8305_v35 }
 0x256   : > { %v6306_v26 = vpop.eup %6305  ;;  %v2910_v50 = vmul.f32 %v2846_v30, %v8213_v37  ;;  %v3042_v6 = vmul.f32 %v2846_v30, %v7916_v36  ;;  %v2657_v33 = vsub.f32 %v2529_v54, %v2593_v27  ;;  %2226 = vadd.xlane.f32.xlu1 %v8286_v32  ;;  %v2161_v41 = vpop.xlane.xlu0 %2160  ;;  %v3107_v27 = vadd.f32 %v3043_v45, %v2979_v51 }
 0x257   : > { %v6308_v4 = vpop.eup %6307  ;;  %v2850_v15 = vmul.f32 %v6306_v26, %v8226_v5  ;;  %v2722_v11 = vadd.f32 1e-05, %v2658_v18  ;;  %v8329_v56 = vmul.f32 0.0078125, %v2161_v41  ;;  %v2159_v59 = vpop.xlane.xlu1 %2158  ;;  %6317 = vtanh.f32 %v3108_v24 }
 0x258   : > { %v2978_v16 = vsub.f32 %v8245_v25, %v2910_v50  ;;  %v2849_v37 = vmul.f32 %v6308_v4, %v8226_v5  ;;  %v2721_v36 = vadd.f32 1e-05, %v2657_v33  ;;  %v8333_v19 = vmul.f32 0.0078125, %v2159_v59  ;;  %v5818_v30 = vpop.f32.mrf.mxu0  ;;  %v6310_v41 = vpop.eup %6309 }
 0x259   : > { %v2914_v54 = vmul.f32 %v2850_v15, %v8232_v47  ;;  %v3046_v32 = vmul.f32 %v2850_v15, %v7959_v21  ;;  %6319 = vrsqrt.f32 %v2722_v11  ;;  %2484 = vadd.xlane.f32.xlu0 %v2374_v46  ;;  %v2596_v24 = vmul.f32 %v8329_v56, %v8329_v56 }
 0x25a   : > { %v3106_v18 = vadd.f32 %v3042_v6, %v2978_v16  ;;  %v2913_v26 = vmul.f32 %v2849_v37, %v8237_v23  ;;  %6321 = vrsqrt.f32 %v2721_v36  ;;  %2482 = vadd.xlane.f32.xlu1 %v2373_v22  ;;  %v2055_v50 = vpop.f32.mrf.mxu0  ;;  %v2417_v33 = vpop.xlane.xlu0 %2416  ;;  %v3045_v51 = vmul.f32 %v2849_v37, %v7949_v28 }
 0x25b   : > { %v2982_v4 = vsub.f32 %v8245_v25, %v2914_v54  ;;  %v2595_v21 = vmul.f32 %v8333_v19, %v8333_v19  ;;  %v8345_v47 = vadd.f32 %v8317_v14, %v2055_v50  ;;  %v2415_v11 = vpop.xlane.xlu1 %2414  ;;  %v2532_v45 = vmul.f32 0.0078125, %v2417_v33 }
 0x25c   : > { %6323 = vtanh.f32 %v3106_v18  ;;  %v2981_v23 = vsub.f32 %v8245_v25, %v2913_v26  ;;  %v2531_v6 = vmul.f32 0.0078125, %v2415_v11 }
 0x25d   : > { %v6312_v22 = vpop.eup %6311  ;;  %6325 = vtanh.f32 %v3107_v27  ;;  %v3110_v46 = vadd.f32 %v3046_v32, %v2982_v4  ;;  %2232 = vadd.xlane.f32.xlu0 %v8345_v47  ;;  %v2660_v28 = vsub.f32 %v2532_v45, %v2596_v24  ;;  %v2376_v32 = vmul.f32 %v8345_v47, %v8345_v47 }
 0x25e   : > { %v6314_v15 = vpop.eup %6313  ;;  %v3109_v59 = vadd.f32 %v3045_v51, %v2981_v23  ;;  %v2659_v16 = vsub.f32 %v2531_v6, %v2595_v21  ;;  %2230 = vadd.xlane.f32.xlu1 %v8320_v42  ;;  %5872 = vmatprep.mubr.f32.mxu0 %v6312_v22  ;;  %v2165_v37 = vpop.xlane.xlu0 %2164  ;;  %v2375_v27 = vmul.f32 %v8320_v42, %v8320_v42 }
 0x25f   : > { %v6316_v36 = vpop.eup %6315  ;;  %v2852_v54 = vmul.f32 %v6314_v15, %v8226_v5  ;;  %v8351_v18 = vmul.f32 0.0078125, %v2165_v37  ;;  %v2163_v26 = vpop.xlane.xlu1 %2162  ;;  %5873 = vmatmul.mubr.f32.vlgmr.msra.gmra.mxu0 %v6310_v41  ;;  %v2724_v50 = vadd.f32 1e-05, %v2660_v28  ;;  %v8360_v21 = vadd.f32 %v8317_v14, %v5818_v30 }
 0x260   : > { %6327 = vtanh.f32 %v3109_v59  ;;  %v2851_v24 = vmul.f32 %v6316_v36, %v8226_v5  ;;  %v2723_v33 = vadd.f32 1e-05, %v2659_v16  ;;  %v5821_v4 = vpop.f32.mrf.mxu0  ;;  %v8362_v11 = vmul.f32 0.0078125, %v2163_v26 }
 0x261   : > { %6329 = vtanh.f32 %v3110_v46  ;;  %v2916_v51 = vmul.f32 %v2852_v54, %v8260_v40  ;;  %2488 = vadd.xlane.f32.xlu0 %v2376_v32  ;;  %v3048_v41 = vmul.f32 %v2852_v54, %v7979_v2  ;;  %v2598_v45 = vmul.f32 %v8351_v18, %v8351_v18 }
 0x262   : > { %v2915_v23 = vmul.f32 %v2851_v24, %v8268_v17  ;;  %6331 = vrsqrt.f32 %v2724_v50  ;;  %2486 = vadd.xlane.f32.xlu1 %v2375_v27  ;;  %v2065_v6 = vpop.f32.mrf.mxu0  ;;  %v2421_v22 = vpop.xlane.xlu0 %2420  ;;  %v3047_v40 = vmul.f32 %v2851_v24, %v7983_v7  ;;  %v2597_v17 = vmul.f32 %v8362_v11, %v8362_v11 }
 0x263   : > { %v2984_v46 = vsub.f32 %v8245_v25, %v2916_v51  ;;  %6333 = vrsqrt.f32 %v2723_v33  ;;  %v8371_v30 = vadd.f32 %v8317_v14, %v2065_v6  ;;  %v2419_v15 = vpop.xlane.xlu1 %2418  ;;  %v2534_v28 = vmul.f32 0.0078125, %v2421_v22 }
 0x264   : > { %v6318_v59 = vpop.eup %6317  ;;  %v2983_v2 = vsub.f32 %v8245_v25, %v2915_v23  ;;  %v2533_v16 = vmul.f32 0.0078125, %v2419_v15  ;;  %v8388_v15 = vadd.f32 %v8317_v14, %v5821_v4 }
 0x265   : > { %v3112_v37 = vadd.f32 %v3048_v41, %v2984_v46  ;;  %2236 = vadd.xlane.f32.xlu0 %v8371_v30  ;;  %5878 = vmatprep.mubr.f32.mxu1 %v6318_v59  ;;  %v2662_v7 = vsub.f32 %v2534_v28, %v2598_v45  ;;  %v2378_v51 = vmul.f32 %v8371_v30, %v8371_v30 }
 0x266   : > { %v6320_v36 = vpop.eup %6319  ;;  %v3111_v54 = vadd.f32 %v3047_v40, %v2983_v2  ;;  %v2661_v26 = vsub.f32 %v2533_v16, %v2597_v17  ;;  %2234 = vadd.xlane.f32.xlu1 %v8360_v21  ;;  %v2169_v32 = vpop.xlane.xlu0 %2168  ;;  %v2377_v41 = vmul.f32 %v8360_v21, %v8360_v21 }
 0x267   : > { %v6322_v27 = vpop.eup %6321  ;;  %v2854_v24 = vmul.f32 %v6320_v36, %v8226_v5  ;;  %v8379_v50 = vmul.f32 0.0078125, %v2169_v32  ;;  %v2167_v33 = vpop.xlane.xlu1 %2166  ;;  %v2726_v45 = vadd.f32 1e-05, %v2662_v7 }
 0x268   : > { %6335 = vtanh.f32 %v3111_v54  ;;  %v2853_v23 = vmul.f32 %v6322_v27, %v8226_v5  ;;  %v2725_v6 = vadd.f32 1e-05, %v2661_v26  ;;  %v5824_v22 = vpop.f32.mrf.mxu0  ;;  %v8390_v59 = vmul.f32 0.0078125, %v2167_v33 }
 0x269   : > { %v6324_v46 = vpop.eup %6323  ;;  %6337 = vtanh.f32 %v3112_v37  ;;  %v2918_v40 = vmul.f32 %v2854_v24, %v8289_v60  ;;  %2492 = vadd.xlane.f32.xlu0 %v2378_v51  ;;  %v3050_v17 = vmul.f32 %v2854_v24, %v7995_v55  ;;  %v2600_v16 = vmul.f32 %v8379_v50, %v8379_v50 }
 0x26a   : > { %v6326_v2 = vpop.eup %6325  ;;  %v2917_v28 = vmul.f32 %v2853_v23, %v8294_v63  ;;  %6339 = vrsqrt.f32 %v2726_v45  ;;  %2490 = vadd.xlane.f32.xlu1 %v2377_v41  ;;  %v2075_v36 = vpop.f32.mrf.mxu0  ;;  %5875 = vmatprep.mubr.f32.mxu0 %v6324_v46  ;;  %v3049_v4 = vmul.f32 %v2853_v23, %v7998_v58  ;;  %v2599_v63 = vmul.f32 %v8390_v59, %v8390_v59 }
 0x26b   : > { %v2425_v37 = vpop.xlane.xlu0 %2424  ;;  %v2986_v60 = vsub.f32 %v8245_v25, %v2918_v40  ;;  %6341 = vrsqrt.f32 %v2725_v6  ;;  %v8399_v54 = vadd.f32 %v8317_v14, %v2075_v36  ;;  %v2423_v7 = vpop.xlane.xlu1 %2422  ;;  %5876 = vmatmul.mubr.f32.gmra.mxu0 %v6326_v2  ;;  %v2379_v2 = vmul.f32 %v8388_v15, %v8388_v15 }
 0x26c   : > { %v2985_v55 = vsub.f32 %v8245_v25, %v2917_v28  ;;  %v2536_v26 = vmul.f32 0.0078125, %v2425_v37  ;;  %v2535_v32 = vmul.f32 0.0078125, %v2423_v7 }
 0x26d   : > { %v6328_v27 = vpop.eup %6327  ;;  %v3114_v24 = vadd.f32 %v3050_v17, %v2986_v60  ;;  %2240 = vadd.xlane.f32.xlu0 %v8399_v54  ;;  %v2380_v40 = vmul.f32 %v8399_v54, %v8399_v54 }
 0x26e   : > { %v6330_v33 = vpop.eup %6329  ;;  %v3113_v51 = vadd.f32 %v3049_v4, %v2985_v55  ;;  %v2664_v58 = vsub.f32 %v2536_v26, %v2600_v16  ;;  %v2663_v41 = vsub.f32 %v2535_v32, %v2599_v63  ;;  %2238 = vadd.xlane.f32.xlu1 %v8388_v15  ;;  %5879 = vmatmul.mubr.f32.vlgmr.msra.gmra.mxu1 %v6328_v27 }
 0x26f   : > { %v2173_v23 = vpop.xlane.xlu0 %2172  ;;  %v6332_v45 = vpop.eup %6331  ;;  %5881 = vmatprep.mubr.f32.mxu1 %v6330_v33  ;;  %v8418_v55 = vadd.f32 %v8317_v14, %v5824_v22 }
 0x270   : > { %v8406_v6 = vmul.f32 0.0078125, %v2173_v23  ;;  %v2171_v46 = vpop.xlane.xlu1 %2170  ;;  %v6334_v17 = vpop.eup %6333  ;;  %6343 = vtanh.f32 %v3113_v51  ;;  %v2856_v28 = vmul.f32 %v6332_v45, %v8226_v5  ;;  %v2728_v16 = vadd.f32 1e-05, %v2664_v58 }
 0x271   : > { %v2727_v36 = vadd.f32 1e-05, %v2663_v41  ;;  %v5827_v37 = vpop.f32.mrf.mxu0  ;;  %6345 = vtanh.f32 %v3114_v24  ;;  %v2855_v60 = vmul.f32 %v6334_v17, %v8226_v5  ;;  %v8414_v4 = vmul.f32 0.0078125, %v2171_v46  ;;  %2496 = vadd.xlane.f32.xlu0 %v2380_v40 }
 0x272   : > { %v2920_v7 = vmul.f32 %v2856_v28, %v8329_v56  ;;  %6347 = vrsqrt.f32 %v2728_v16  ;;  %v2602_v63 = vmul.f32 %v8406_v6, %v8406_v6  ;;  %2494 = vadd.xlane.f32.xlu1 %v2379_v2  ;;  %v3052_v27 = vmul.f32 %v2856_v28, %v8012_v62 }
 0x273   : > { %v2085_v26 = vpop.f32.mrf.mxu0  ;;  %v2429_v32 = vpop.xlane.xlu0 %2428  ;;  %v2919_v24 = vmul.f32 %v2855_v60, %v8333_v19  ;;  %6349 = vrsqrt.f32 %v2727_v36  ;;  %v8425_v33 = vadd.f32 %v8317_v14, %v5827_v37  ;;  %v2601_v22 = vmul.f32 %v8414_v4, %v8414_v4 }
 0x274   : > { %v2427_v51 = vpop.xlane.xlu1 %2426  ;;  %v2988_v56 = vsub.f32 %v8245_v25, %v2920_v7  ;;  %v2538_v58 = vmul.f32 0.0078125, %v2429_v32  ;;  %v3051_v46 = vmul.f32 %v2855_v60, %v8015_v20  ;;  %v8433_v62 = vadd.f32 %v8317_v14, %v2085_v26 }
 0x275   : > { %v2537_v41 = vmul.f32 0.0078125, %v2427_v51  ;;  %v6336_v23 = vpop.eup %6335  ;;  %v2987_v45 = vsub.f32 %v8245_v25, %v2919_v24  ;;  %2246 = vadd.xlane.f32.xlu0 %v8425_v33  ;;  %v2381_v20 = vmul.f32 %v8418_v55, %v8418_v55 }
 0x276   : > { %v6338_v19 = vpop.eup %6337  ;;  %v3116_v40 = vadd.f32 %v3052_v27, %v2988_v56  ;;  %v2666_v2 = vsub.f32 %v2538_v58, %v2602_v63  ;;  %2242 = vadd.xlane.f32.xlu1 %v8418_v55  ;;  %5882 = vmatmul.mubr.f32.gmra.mxu1 %v6336_v23  ;;  %v2383_v56 = vmul.f32 %v8425_v33, %v8425_v33 }
 0x277   : > { %v2665_v17 = vsub.f32 %v2537_v41, %v2601_v22  ;;  %v2177_v28 = vpop.xlane.xlu0 %2176  ;;  %v6340_v16 = vpop.eup %6339  ;;  %v3115_v36 = vadd.f32 %v3051_v46, %v2987_v45  ;;  %5884 = vmatprep.mubr.f32.mxu1 %v6338_v19  ;;  %v2382_v23 = vmul.f32 %v8433_v62, %v8433_v62 }
 0x278   : > { %v8437_v37 = vmul.f32 0.0078125, %v2177_v28  ;;  %v2175_v7 = vpop.xlane.xlu1 %2174  ;;  %v6342_v60 = vpop.eup %6341  ;;  %6351 = vtanh.f32 %v3116_v40  ;;  %v2858_v26 = vmul.f32 %v6340_v16, %v8226_v5  ;;  %v2730_v32 = vadd.f32 1e-05, %v2666_v2 }
 0x279   : > { %v2729_v63 = vadd.f32 1e-05, %v2665_v17  ;;  %v5830_v27 = vpop.f32.mrf.mxu0  ;;  %6353 = vtanh.f32 %v3115_v36  ;;  %v2857_v24 = vmul.f32 %v6342_v60, %v8226_v5  ;;  %v8443_v51 = vmul.f32 0.0078125, %v2175_v7  ;;  %2244 = vadd.xlane.f32.xlu0 %v8433_v62 }
 0x27a   : > { %v2922_v22 = vmul.f32 %v2858_v26, %v8351_v18  ;;  %6355 = vrsqrt.f32 %v2730_v32  ;;  %v2604_v58 = vmul.f32 %v8437_v37, %v8437_v37  ;;  %2498 = vadd.xlane.f32.xlu1 %v2381_v20  ;;  %v3054_v45 = vmul.f32 %v2858_v26, %v8026_v13 }
 0x27b   : > { %v2433_v41 = vpop.xlane.xlu0 %2432  ;;  %v2921_v46 = vmul.f32 %v2857_v24, %v8362_v11  ;;  %6357 = vrsqrt.f32 %v2729_v63  ;;  %v8456_v19 = vadd.f32 %v8317_v14, %v5830_v27  ;;  %v2603_v2 = vmul.f32 %v8443_v51, %v8443_v51  ;;  %v2095_v20 = vpop.f32.mrf.mxu0 }
 0x27c   : > { %v2431_v40 = vpop.xlane.xlu1 %2430  ;;  %v2990_v18 = vsub.f32 %v8245_v25, %v2922_v22  ;;  %v2540_v17 = vmul.f32 0.0078125, %v2433_v41  ;;  %v3053_v7 = vmul.f32 %v2857_v24, %v8032_v3 }
 0x27d   : > { %v2539_v28 = vmul.f32 0.0078125, %v2431_v40  ;;  %v6344_v16 = vpop.eup %6343  ;;  %v2989_v36 = vsub.f32 %v8245_v25, %v2921_v46  ;;  %2500 = vadd.xlane.f32.xlu0 %v2382_v23  ;;  %v2385_v46 = vmul.f32 %v8456_v19, %v8456_v19 }
 0x27e   : > { %v6346_v13 = vpop.eup %6345  ;;  %v3118_v11 = vadd.f32 %v3054_v45, %v2990_v18  ;;  %v2668_v60 = vsub.f32 %v2540_v17, %v2604_v58  ;;  %2502 = vadd.xlane.f32.xlu1 %v2383_v56  ;;  %5885 = vmatmul.mubr.f32.gmra.mxu1 %v6344_v16 }
 0x27f   : > { %v2667_v26 = vsub.f32 %v2539_v28, %v2603_v2  ;;  %v2181_v32 = vpop.xlane.xlu0 %2180  ;;  %v6348_v63 = vpop.eup %6347  ;;  %v3117_v27 = vadd.f32 %v3053_v7, %v2989_v36  ;;  %5887 = vmatprep.mubr.f32.mxu1 %v6346_v13  ;;  %v8474_v2 = vadd.f32 %v8317_v14, %v2095_v20 }
 0x280   : > { %v8463_v22 = vmul.f32 0.0078125, %v2181_v32  ;;  %v2179_v41 = vpop.xlane.xlu1 %2178  ;;  %v6350_v40 = vpop.eup %6349  ;;  %6359 = vtanh.f32 %v3118_v11  ;;  %v2860_v3 = vmul.f32 %v6348_v63, %v8226_v5  ;;  %v2732_v24 = vadd.f32 1e-05, %v2668_v60 }
 0x281   : > { %v2731_v23 = vadd.f32 1e-05, %v2667_v26  ;;  %v5833_v58 = vpop.f32.mrf.mxu0  ;;  %6361 = vtanh.f32 %v3117_v27  ;;  %v2859_v56 = vmul.f32 %v6350_v40, %v8226_v5  ;;  %v8469_v45 = vmul.f32 0.0078125, %v2179_v41  ;;  %2250 = vadd.xlane.f32.xlu0 %v8456_v19 }
 0x282   : > { %v2924_v18 = vmul.f32 %v2860_v3, %v8379_v50  ;;  %6363 = vrsqrt.f32 %v2732_v24  ;;  %v2606_v17 = vmul.f32 %v8463_v22, %v8463_v22  ;;  %2506 = vadd.xlane.f32.xlu1 %v2385_v46  ;;  %v3056_v16 = vmul.f32 %v2860_v3, %v8050_v43 }
 0x283   : > { %v2437_v28 = vpop.xlane.xlu0 %2436  ;;  %v2923_v36 = vmul.f32 %v2859_v56, %v8390_v59  ;;  %6365 = vrsqrt.f32 %v2731_v23  ;;  %v8481_v7 = vadd.f32 %v8317_v14, %v5833_v58  ;;  %v2605_v11 = vmul.f32 %v8469_v45, %v8469_v45  ;;  %v2105_v27 = vpop.f32.mrf.mxu0 }
 0x284   : > { %v2435_v13 = vpop.xlane.xlu1 %2434  ;;  %v2992_v50 = vsub.f32 %v8245_v25, %v2924_v18  ;;  %v2542_v20 = vmul.f32 0.0078125, %v2437_v28  ;;  %v3055_v63 = vmul.f32 %v2859_v56, %v8053_v44  ;;  %v2384_v18 = vmul.f32 %v8474_v2, %v8474_v2 }
 0x285   : > { %v2541_v60 = vmul.f32 0.0078125, %v2435_v13  ;;  %v6352_v26 = vpop.eup %6351  ;;  %v2991_v32 = vsub.f32 %v8245_v25, %v2923_v36  ;;  %2248 = vadd.xlane.f32.xlu0 %v8474_v2  ;;  %v2387_v44 = vmul.f32 %v8481_v7, %v8481_v7 }
 0x286   : > { %v6354_v43 = vpop.eup %6353  ;;  %v3120_v59 = vadd.f32 %v3056_v16, %v2992_v50  ;;  %v2670_v41 = vsub.f32 %v2542_v20, %v2606_v17  ;;  %2254 = vadd.xlane.f32.xlu1 %v8481_v7  ;;  %v8502_v20 = vadd.f32 %v8317_v14, %v2105_v27 }
 0x287   : > { %v2669_v46 = vsub.f32 %v2541_v60, %v2605_v11  ;;  %v2185_v40 = vpop.xlane.xlu0 %2184  ;;  %v6356_v3 = vpop.eup %6355  ;;  %v3119_v24 = vadd.f32 %v3055_v63, %v2991_v32  ;;  %5888 = vmatmul.mubr.f32.gmra.mxu1 %v6354_v43 }
 0x288   : > { %v8490_v23 = vmul.f32 0.0078125, %v2185_v40  ;;  %v2183_v58 = vpop.xlane.xlu1 %2182  ;;  %v6358_v56 = vpop.eup %6357  ;;  %6367 = vtanh.f32 %v3120_v59  ;;  %v2862_v17 = vmul.f32 %v6356_v3, %v8226_v5  ;;  %v2734_v28 = vadd.f32 1e-05, %v2670_v41  ;;  %5890 = vmatprep.mubr.f32.mxu1 %v6352_v26 }
 0x289   : > { %v2733_v16 = vadd.f32 1e-05, %v2669_v46  ;;  %v5836_v36 = vpop.f32.mrf.mxu0  ;;  %6369 = vtanh.f32 %v3119_v24  ;;  %v2861_v13 = vmul.f32 %v6358_v56, %v8226_v5  ;;  %v8498_v50 = vmul.f32 0.0078125, %v2183_v58  ;;  %2504 = vadd.xlane.f32.xlu0 %v2384_v18 }
 0x28a   : > { %v2926_v11 = vmul.f32 %v2862_v17, %v8406_v6  ;;  %6371 = vrsqrt.f32 %v2734_v28  ;;  %v2608_v60 = vmul.f32 %v8490_v23, %v8490_v23  ;;  %2510 = vadd.xlane.f32.xlu1 %v2387_v44  ;;  %v3058_v26 = vmul.f32 %v2862_v17, %v8068_v1 }
 0x28b   : > { %v2441_v32 = vpop.xlane.xlu0 %2440  ;;  %v2925_v63 = vmul.f32 %v2861_v13, %v8414_v4  ;;  %6373 = vrsqrt.f32 %v2733_v16  ;;  %v8509_v43 = vadd.f32 %v8317_v14, %v5836_v36  ;;  %v2607_v27 = vmul.f32 %v8498_v50, %v8498_v50  ;;  %v2115_v58 = vpop.f32.mrf.mxu0 }
 0x28c   : > { %v2439_v59 = vpop.xlane.xlu1 %2438  ;;  %v2994_v6 = vsub.f32 %v8245_v25, %v2926_v11  ;;  %v2544_v41 = vmul.f32 0.0078125, %v2441_v32  ;;  %v3057_v24 = vmul.f32 %v2861_v13, %v8071_v0  ;;  %v2386_v11 = vmul.f32 %v8502_v20, %v8502_v20 }
 0x28d   : > { %v2543_v46 = vmul.f32 0.0078125, %v2439_v59  ;;  %v6360_v40 = vpop.eup %6359  ;;  %v2993_v3 = vsub.f32 %v8245_v25, %v2925_v63  ;;  %2252 = vadd.xlane.f32.xlu0 %v8502_v20  ;;  %v2389_v0 = vmul.f32 %v8509_v43, %v8509_v43 }
 0x28e   : > { %v6362_v1 = vpop.eup %6361  ;;  %v3122_v4 = vadd.f32 %v3058_v26, %v2994_v6  ;;  %v2672_v18 = vsub.f32 %v2544_v41, %v2608_v60  ;;  %2258 = vadd.xlane.f32.xlu1 %v8509_v43  ;;  %v8530_v41 = vadd.f32 %v8317_v14, %v2115_v58 }
 0x28f   : > { %v2671_v44 = vsub.f32 %v2543_v46, %v2607_v27  ;;  %v2189_v56 = vpop.xlane.xlu0 %2188  ;;  %v6364_v17 = vpop.eup %6363  ;;  %v3121_v28 = vadd.f32 %v3057_v24, %v2993_v3  ;;  %5891 = vmatmul.mubr.f32.gmra.mxu1 %v6362_v1 }
 0x290   : > { %v8518_v16 = vmul.f32 0.0078125, %v2189_v56  ;;  %v2187_v36 = vpop.xlane.xlu1 %2186  ;;  %v6366_v13 = vpop.eup %6365  ;;  %6375 = vtanh.f32 %v3122_v4  ;;  %v2864_v60 = vmul.f32 %v6364_v17, %v8226_v5  ;;  %v2736_v32 = vadd.f32 1e-05, %v2672_v18  ;;  %5893 = vmatprep.mubr.f32.mxu1 %v6360_v40 }
 0x291   : > { %v2735_v26 = vadd.f32 1e-05, %v2671_v44  ;;  %v5839_v63 = vpop.f32.mrf.mxu0  ;;  %6377 = vtanh.f32 %v3121_v28  ;;  %v2863_v59 = vmul.f32 %v6366_v13, %v8226_v5  ;;  %v8526_v6 = vmul.f32 0.0078125, %v2187_v36  ;;  %2508 = vadd.xlane.f32.xlu0 %v2386_v11 }
 0x292   : > { %v2928_v27 = vmul.f32 %v2864_v60, %v8437_v37  ;;  %6379 = vrsqrt.f32 %v2736_v32  ;;  %v2610_v46 = vmul.f32 %v8518_v16, %v8518_v16  ;;  %2514 = vadd.xlane.f32.xlu1 %v2389_v0  ;;  %v3060_v40 = vmul.f32 %v2864_v60, %v8080_v39 }
 0x293   : > { %v2445_v3 = vpop.xlane.xlu0 %2444  ;;  %v2927_v24 = vmul.f32 %v2863_v59, %v8443_v51  ;;  %6381 = vrsqrt.f32 %v2735_v26  ;;  %v8537_v1 = vadd.f32 %v8317_v14, %v5839_v63  ;;  %v2609_v58 = vmul.f32 %v8526_v6, %v8526_v6  ;;  %v2125_v32 = vpop.f32.mrf.mxu0 }
 0x294   : > { %v2443_v4 = vpop.xlane.xlu1 %2442  ;;  %v2996_v37 = vsub.f32 %v8245_v25, %v2928_v27  ;;  %v2546_v18 = vmul.f32 0.0078125, %v2445_v3  ;;  %v3059_v28 = vmul.f32 %v2863_v59, %v8083_v53  ;;  %v2388_v27 = vmul.f32 %v8530_v41, %v8530_v41 }
 0x295   : > { %v2545_v44 = vmul.f32 0.0078125, %v2443_v4  ;;  %v6368_v56 = vpop.eup %6367  ;;  %v2995_v17 = vsub.f32 %v8245_v25, %v2927_v24  ;;  %2256 = vadd.xlane.f32.xlu0 %v8530_v41  ;;  %v2391_v53 = vmul.f32 %v8537_v1, %v8537_v1 }
 0x296   : > { %v6370_v39 = vpop.eup %6369  ;;  %v3124_v51 = vadd.f32 %v3060_v40, %v2996_v37  ;;  %v2674_v36 = vsub.f32 %v2546_v18, %v2610_v46  ;;  %2262 = vadd.xlane.f32.xlu1 %v8537_v1 }
 0x297   : > { %v2673_v11 = vsub.f32 %v2545_v44, %v2609_v58  ;;  %v2193_v0 = vpop.xlane.xlu0 %2192  ;;  %v6372_v13 = vpop.eup %6371  ;;  %v3123_v60 = vadd.f32 %v3059_v28, %v2995_v17  ;;  %5894 = vmatmul.mubr.f32.gmra.mxu1 %v6370_v39  ;;  %v8558_v58 = vadd.f32 %v8317_v14, %v2125_v32 }
 0x298   : > { %v8546_v26 = vmul.f32 0.0078125, %v2193_v0  ;;  %v2191_v63 = vpop.xlane.xlu1 %2190  ;;  %v6374_v59 = vpop.eup %6373  ;;  %6383 = vtanh.f32 %v3124_v51  ;;  %v2866_v46 = vmul.f32 %v6372_v13, %v8226_v5  ;;  %v2738_v3 = vadd.f32 1e-05, %v2674_v36  ;;  %5896 = vmatprep.mubr.f32.mxu1 %v6368_v56 }
 0x299   : > { %v2737_v40 = vadd.f32 1e-05, %v2673_v11  ;;  %6385 = vtanh.f32 %v3123_v60  ;;  %v2865_v24 = vmul.f32 %v6374_v59, %v8226_v5  ;;  %v8554_v4 = vmul.f32 0.0078125, %v2191_v63  ;;  %2512 = vadd.xlane.f32.xlu0 %v2388_v27 }
 0x29a   : > { %v2930_v37 = vmul.f32 %v2866_v46, %v8463_v22  ;;  %6387 = vrsqrt.f32 %v2738_v3  ;;  %2518 = vadd.xlane.f32.xlu1 %v2391_v53  ;;  %v3062_v44 = vmul.f32 %v2866_v46, %v8092_v34  ;;  %v2612_v56 = vmul.f32 %v8546_v26, %v8546_v26 }
 0x29b   : > { %v2449_v18 = vpop.xlane.xlu0 %2448  ;;  %v2929_v17 = vmul.f32 %v2865_v24, %v8469_v45  ;;  %6389 = vrsqrt.f32 %v2737_v40  ;;  %v2611_v22 = vmul.f32 %v8554_v4, %v8554_v4  ;;  %v3061_v11 = vmul.f32 %v2865_v24, %v8095_v10  ;;  %v8577_v10 = vld [vmem:[%s10416_s4 + $0x1] ss:$0 sm:$0xff] }
 0x29c   : > { %v2447_v5 = vpop.xlane.xlu1 %2446  ;;  %v2998_v28 = vsub.f32 %v8245_v25, %v2930_v37  ;;  %v2548_v39 = vmul.f32 0.0078125, %v2449_v18  ;;  %v2390_v59 = vmul.f32 %v8558_v58, %v8558_v58 }
 0x29d   : > { %v2547_v14 = vmul.f32 0.0078125, %v2447_v5  ;;  %v6376_v51 = vpop.eup %6375  ;;  %v2997_v36 = vsub.f32 %v8245_v25, %v2929_v17  ;;  %2260 = vadd.xlane.f32.xlu0 %v8558_v58 }
 0x29e   : > { %v6378_v34 = vpop.eup %6377  ;;  %v3126_v45 = vadd.f32 %v3062_v44, %v2998_v28  ;;  %v2676_v0 = vsub.f32 %v2548_v39, %v2612_v56 }
 0x29f   : > { %v2675_v13 = vsub.f32 %v2547_v14, %v2611_v22  ;;  %v2197_v60 = vpop.xlane.xlu0 %2196  ;;  %v6380_v32 = vpop.eup %6379  ;;  %v3125_v63 = vadd.f32 %v3061_v11, %v2997_v36  ;;  %5897 = vmatmul.mubr.f32.gmra.mxu1 %v6378_v34  ;;  %v8591_v22 = vld [vmem:[%s10416_s4 + $0x2] ss:$0 sm:$0xff] }
 0x2a0   : > { %v8570_v27 = vmul.f32 0.0078125, %v2197_v60  ;;  %v2195_v53 = vpop.xlane.xlu1 %2194  ;;  %v6382_v46 = vpop.eup %6381  ;;  %6391 = vtanh.f32 %v3126_v45  ;;  %v2868_v25 = vmul.f32 %v8577_v10, %v6380_v32  ;;  %v2740_v3 = vadd.f32 1e-05, %v2676_v0  ;;  %5899 = vmatprep.mubr.f32.mxu1 %v6376_v51 }
 0x2a1   : > { %v2739_v40 = vadd.f32 1e-05, %v2675_v13  ;;  %6393 = vtanh.f32 %v3125_v63  ;;  %v2867_v24 = vmul.f32 %v8577_v10, %v6382_v46  ;;  %v8581_v37 = vmul.f32 0.0078125, %v2195_v53  ;;  %2516 = vadd.xlane.f32.xlu0 %v2390_v59 }
 0x2a2   : > { %v2932_v18 = vmul.f32 %v2868_v25, %v8490_v23  ;;  %6395 = vrsqrt.f32 %v2740_v3  ;;  %v3064_v17 = vmul.f32 %v2868_v25, %v8104_v38  ;;  %v2614_v5 = vmul.f32 %v8570_v27, %v8570_v27 }
 0x2a3   : > { %v2453_v44 = vpop.xlane.xlu0 %2452  ;;  %v2931_v56 = vmul.f32 %v2867_v24, %v8498_v50  ;;  %6397 = vrsqrt.f32 %v2739_v40  ;;  %v2613_v23 = vmul.f32 %v8581_v37, %v8581_v37  ;;  %v3063_v36 = vmul.f32 %v2867_v24, %v8107_v48 }
 0x2a4   : > { %v2451_v28 = vpop.xlane.xlu1 %2450  ;;  %v3000_v39 = vsub.f32 %v8591_v22, %v2932_v18  ;;  %v2550_v14 = vmul.f32 0.0078125, %v2453_v44 }
 0x2a5   : > { %v2549_v51 = vmul.f32 0.0078125, %v2451_v28  ;;  %v6384_v38 = vpop.eup %6383  ;;  %v2999_v50 = vsub.f32 %v8591_v22, %v2931_v56 }
 0x2a6   : > { %v6386_v11 = vpop.eup %6385  ;;  %v3128_v34 = vadd.f32 %v3064_v17, %v3000_v39  ;;  %v2678_v45 = vsub.f32 %v2550_v14, %v2614_v5 }
 0x2a7   : > { %v2677_v0 = vsub.f32 %v2549_v51, %v2613_v23  ;;  %v2201_v13 = vpop.xlane.xlu0 %2200  ;;  %v6388_v60 = vpop.eup %6387  ;;  %v3127_v32 = vadd.f32 %v3063_v36, %v2999_v50  ;;  %5900 = vmatmul.mubr.f32.gmra.mxu1 %v6386_v11 }
 0x2a8   : > { %v8598_v63 = vmul.f32 0.0078125, %v2201_v13  ;;  %v2199_v53 = vpop.xlane.xlu1 %2198  ;;  %v6390_v59 = vpop.eup %6389  ;;  %6399 = vtanh.f32 %v3128_v34  ;;  %v2870_v46 = vmul.f32 %v8577_v10, %v6388_v60  ;;  %v2742_v25 = vadd.f32 1e-05, %v2678_v45  ;;  %5902 = vmatprep.mubr.f32.mxu1 %v6384_v38 }
 0x2a9   : > { %v2741_v3 = vadd.f32 1e-05, %v2677_v0  ;;  %6401 = vtanh.f32 %v3127_v32  ;;  %v2869_v48 = vmul.f32 %v8577_v10, %v6390_v59  ;;  %v8602_v40 = vmul.f32 0.0078125, %v2199_v53 }
 0x2aa   : > { %v2934_v24 = vmul.f32 %v2870_v46, %v8518_v16  ;;  %6403 = vrsqrt.f32 %v2742_v25  ;;  %v3066_v44 = vmul.f32 %v2870_v46, %v8116_v31  ;;  %v2616_v56 = vmul.f32 %v8598_v63, %v8598_v63 }
 0x2ab   : > { %v2457_v18 = vpop.xlane.xlu0 %2456  ;;  %v2933_v17 = vmul.f32 %v2869_v48, %v8526_v6  ;;  %6405 = vrsqrt.f32 %v2741_v3  ;;  %v2615_v39 = vmul.f32 %v8602_v40, %v8602_v40  ;;  %v3065_v38 = vmul.f32 %v2869_v48, %v8119_v57 }
 0x2ac   : > { %v2455_v5 = vpop.xlane.xlu1 %2454  ;;  %v3002_v28 = vsub.f32 %v8591_v22, %v2934_v24  ;;  %v2552_v23 = vmul.f32 0.0078125, %v2457_v18 }
 0x2ad   : > { %v2551_v14 = vmul.f32 0.0078125, %v2455_v5  ;;  %v6392_v51 = vpop.eup %6391  ;;  %v3001_v16 = vsub.f32 %v8591_v22, %v2933_v17 }
 0x2ae   : > { %v6394_v31 = vpop.eup %6393  ;;  %v3130_v50 = vadd.f32 %v3066_v44, %v3002_v28  ;;  %v2680_v6 = vsub.f32 %v2552_v23, %v2616_v56 }
 0x2af   : > { %v2679_v36 = vsub.f32 %v2551_v14, %v2615_v39  ;;  %v2205_v11 = vpop.xlane.xlu0 %2204  ;;  %v6396_v34 = vpop.eup %6395  ;;  %v3129_v45 = vadd.f32 %v3065_v38, %v3001_v16  ;;  %5903 = vmatmul.mubr.f32.gmra.mxu1 %v6394_v31 }
 0x2b0   : > { %v8614_v0 = vmul.f32 0.0078125, %v2205_v11  ;;  %v2203_v13 = vpop.xlane.xlu1 %2202  ;;  %v6398_v60 = vpop.eup %6397  ;;  %6407 = vtanh.f32 %v3130_v50  ;;  %v2872_v32 = vmul.f32 %v8577_v10, %v6396_v34  ;;  %v2744_v53 = vadd.f32 1e-05, %v2680_v6  ;;  %5905 = vmatprep.mubr.f32.mxu1 %v6392_v51 }
 0x2b1   : > { %v2743_v59 = vadd.f32 1e-05, %v2679_v36  ;;  %6409 = vtanh.f32 %v3129_v45  ;;  %v2871_v57 = vmul.f32 %v8577_v10, %v6398_v60  ;;  %v8618_v46 = vmul.f32 0.0078125, %v2203_v13 }
 0x2b2   : > { %v2936_v25 = vmul.f32 %v2872_v32, %v8546_v26  ;;  %6411 = vrsqrt.f32 %v2744_v53  ;;  %v3068_v48 = vmul.f32 %v2872_v32, %v8128_v8  ;;  %v2618_v18 = vmul.f32 %v8614_v0, %v8614_v0 }
 0x2b3   : > { %v2461_v3 = vpop.xlane.xlu0 %2460  ;;  %v2935_v24 = vmul.f32 %v2871_v57, %v8554_v4  ;;  %6413 = vrsqrt.f32 %v2743_v59  ;;  %v2617_v56 = vmul.f32 %v8618_v46, %v8618_v46  ;;  %v3067_v23 = vmul.f32 %v2871_v57, %v8131_v12 }
 0x2b4   : > { %v2459_v44 = vpop.xlane.xlu1 %2458  ;;  %v3004_v17 = vsub.f32 %v8591_v22, %v2936_v25  ;;  %v2554_v5 = vmul.f32 0.0078125, %v2461_v3 }
 0x2b5   : > { %v2553_v28 = vmul.f32 0.0078125, %v2459_v44  ;;  %v6400_v39 = vpop.eup %6399  ;;  %v3003_v26 = vsub.f32 %v8591_v22, %v2935_v24 }
 0x2b6   : > { %v6402_v8 = vpop.eup %6401  ;;  %v3132_v14 = vadd.f32 %v3068_v48, %v3004_v17  ;;  %v2682_v4 = vsub.f32 %v2554_v5, %v2618_v18 }
 0x2b7   : > { %v2681_v51 = vsub.f32 %v2553_v28, %v2617_v56  ;;  %v2209_v16 = vpop.xlane.xlu0 %2208  ;;  %v6404_v38 = vpop.eup %6403  ;;  %v3131_v31 = vadd.f32 %v3067_v23, %v3003_v26  ;;  %5906 = vmatmul.mubr.f32.gmra.mxu1 %v6402_v8 }
 0x2b8   : > { %v8630_v50 = vmul.f32 0.0078125, %v2209_v16  ;;  %v2207_v6 = vpop.xlane.xlu1 %2206  ;;  %v6406_v36 = vpop.eup %6405  ;;  %6415 = vtanh.f32 %v3132_v14  ;;  %v2874_v11 = vmul.f32 %v8577_v10, %v6404_v38  ;;  %v2746_v34 = vadd.f32 1e-05, %v2682_v4  ;;  %5908 = vmatprep.mubr.f32.mxu1 %v6400_v39 }
 0x2b9   : > { %v2745_v45 = vadd.f32 1e-05, %v2681_v51  ;;  %6417 = vtanh.f32 %v3131_v31  ;;  %v2873_v12 = vmul.f32 %v8577_v10, %v6406_v36  ;;  %v8634_v13 = vmul.f32 0.0078125, %v2207_v6 }
 0x2ba   : > { %v2938_v60 = vmul.f32 %v2874_v11, %v8570_v27  ;;  %6419 = vrsqrt.f32 %v2746_v34  ;;  %v3070_v53 = vmul.f32 %v2874_v11, %v8140_v9  ;;  %v2620_v57 = vmul.f32 %v8630_v50, %v8630_v50 }
 0x2bb   : > { %v2465_v32 = vpop.xlane.xlu0 %2464  ;;  %v2937_v59 = vmul.f32 %v2873_v12, %v8581_v37  ;;  %6421 = vrsqrt.f32 %v2745_v45  ;;  %v2619_v48 = vmul.f32 %v8634_v13, %v8634_v13  ;;  %v3069_v17 = vmul.f32 %v2873_v12, %v8143_v29 }
 0x2bc   : > { %v2463_v25 = vpop.xlane.xlu1 %2462  ;;  %v3006_v3 = vsub.f32 %v8591_v22, %v2938_v60  ;;  %v2556_v24 = vmul.f32 0.0078125, %v2465_v32 }
 0x2bd   : > { %v2555_v18 = vmul.f32 0.0078125, %v2463_v25  ;;  %v6408_v44 = vpop.eup %6407  ;;  %v3005_v27 = vsub.f32 %v8591_v22, %v2937_v59 }
 0x2be   : > { %v6410_v9 = vpop.eup %6409  ;;  %v3134_v56 = vadd.f32 %v3070_v53, %v3006_v3  ;;  %v2684_v37 = vsub.f32 %v2556_v24, %v2620_v57 }
 0x2bf   : > { %v2683_v5 = vsub.f32 %v2555_v18, %v2619_v48  ;;  %v2213_v28 = vpop.xlane.xlu0 %2212  ;;  %v6412_v39 = vpop.eup %6411  ;;  %v3133_v26 = vadd.f32 %v3069_v17, %v3005_v27  ;;  %5909 = vmatmul.mubr.f32.gmra.mxu1 %v6410_v9 }
 0x2c0   : > { %v8646_v23 = vmul.f32 0.0078125, %v2213_v28  ;;  %v2211_v8 = vpop.xlane.xlu1 %2210  ;;  %v6414_v14 = vpop.eup %6413  ;;  %6423 = vtanh.f32 %v3134_v56  ;;  %v2876_v4 = vmul.f32 %v8577_v10, %v6412_v39  ;;  %v2748_v51 = vadd.f32 1e-05, %v2684_v37  ;;  %5911 = vmatprep.mubr.f32.mxu1 %v6408_v44 }
 0x2c1   : > { %v2747_v16 = vadd.f32 1e-05, %v2683_v5  ;;  %6425 = vtanh.f32 %v3133_v26  ;;  %v2875_v29 = vmul.f32 %v8577_v10, %v6414_v14  ;;  %v8650_v38 = vmul.f32 0.0078125, %v2211_v8 }
 0x2c2   : > { %v2940_v31 = vmul.f32 %v2876_v4, %v8598_v63  ;;  %6427 = vrsqrt.f32 %v2748_v51  ;;  %v3072_v36 = vmul.f32 %v2876_v4, %v8152_v49  ;;  %v2622_v34 = vmul.f32 %v8646_v23, %v8646_v23 }
 0x2c3   : > { %v2469_v6 = vpop.xlane.xlu0 %2468  ;;  %v2939_v11 = vmul.f32 %v2875_v29, %v8602_v40  ;;  %6429 = vrsqrt.f32 %v2747_v16  ;;  %v2621_v60 = vmul.f32 %v8650_v38, %v8650_v38  ;;  %v3071_v57 = vmul.f32 %v2875_v29, %v8155_v61 }
 0x2c4   : > { %v2467_v45 = vpop.xlane.xlu1 %2466  ;;  %v3008_v12 = vsub.f32 %v8591_v22, %v2940_v31  ;;  %v2558_v32 = vmul.f32 0.0078125, %v2469_v6 }
 0x2c5   : > { %v2557_v53 = vmul.f32 0.0078125, %v2467_v45  ;;  %v6416_v59 = vpop.eup %6415  ;;  %v3007_v63 = vsub.f32 %v8591_v22, %v2939_v11 }
 0x2c6   : > { %v6418_v49 = vpop.eup %6417  ;;  %v3136_v25 = vadd.f32 %v3072_v36, %v3008_v12  ;;  %v2686_v40 = vsub.f32 %v2558_v32, %v2622_v34  ;;  %v10485_v36 = vld [vmem:[#allocation6_spill] sm:$0xff] }
 0x2c7   : > { %v2685_v3 = vsub.f32 %v2557_v53, %v2621_v60  ;;  %v2217_v48 = vpop.xlane.xlu0 %2216  ;;  %v6420_v24 = vpop.eup %6419  ;;  %v3135_v18 = vadd.f32 %v3071_v57, %v3007_v63  ;;  %5912 = vmatmul.mubr.f32.gmra.mxu1 %v6418_v49 }
 0x2c8   : > { %v8662_v44 = vmul.f32 0.0078125, %v2217_v48  ;;  %v2215_v27 = vpop.xlane.xlu1 %2214  ;;  %v6422_v17 = vpop.eup %6421  ;;  %6431 = vtanh.f32 %v3136_v25  ;;  %v2878_v9 = vmul.f32 %v8577_v10, %v6420_v24  ;;  %v2750_v56 = vadd.f32 1e-05, %v2686_v40  ;;  %5914 = vmatprep.mubr.f32.mxu1 %v6416_v59 }
 0x2c9   : > { %v2749_v37 = vadd.f32 1e-05, %v2685_v3  ;;  %6433 = vtanh.f32 %v3135_v18  ;;  %v2877_v61 = vmul.f32 %v8577_v10, %v6422_v17  ;;  %v8666_v5 = vmul.f32 0.0078125, %v2215_v27  ;;  %v10486_v18 = vld [vmem:[#allocation7_spill] sm:$0xff] }
 0x2ca   : > { %v2942_v28 = vmul.f32 %v2878_v9, %v8614_v0  ;;  %6435 = vrsqrt.f32 %v2750_v56  ;;  %v3074_v26 = vmul.f32 %v2878_v9, %v8164_v52  ;;  %v2624_v14 = vmul.f32 %v8662_v44, %v8662_v44 }
 0x2cb   : > { %v2473_v39 = vpop.xlane.xlu0 %2472  ;;  %v2941_v8 = vmul.f32 %v2877_v61, %v8618_v46  ;;  %6437 = vrsqrt.f32 %v2749_v37  ;;  %v2623_v16 = vmul.f32 %v8666_v5, %v8666_v5  ;;  %v3073_v11 = vmul.f32 %v2877_v61, %v10485_v36 }
 0x2cc   : > { %v2471_v4 = vpop.xlane.xlu1 %2470  ;;  %v3010_v51 = vsub.f32 %v8591_v22, %v2942_v28  ;;  %v2560_v29 = vmul.f32 0.0078125, %v2473_v39 }
 0x2cd   : > { %v2559_v31 = vmul.f32 0.0078125, %v2471_v4  ;;  %v6424_v6 = vpop.eup %6423  ;;  %v3009_v0 = vsub.f32 %v8591_v22, %v2941_v8  ;;  %v10487_v8 = vld [vmem:[#allocation8_spill] sm:$0xff] }
 0x2ce   : > { %v6426_v52 = vpop.eup %6425  ;;  %v3138_v34 = vadd.f32 %v3074_v26, %v3010_v51  ;;  %v2688_v46 = vsub.f32 %v2560_v29, %v2624_v14 }
 0x2cf   : > { %v2687_v45 = vsub.f32 %v2559_v31, %v2623_v16  ;;  %v2221_v12 = vpop.xlane.xlu0 %2220  ;;  %v6428_v60 = vpop.eup %6427  ;;  %v3137_v32 = vadd.f32 %v3073_v11, %v3009_v0  ;;  %5915 = vmatmul.mubr.f32.gmra.mxu1 %v6426_v52 }
 0x2d0   : > { %v8678_v53 = vmul.f32 0.0078125, %v2221_v12  ;;  %v2219_v59 = vpop.xlane.xlu1 %2218  ;;  %v6430_v63 = vpop.eup %6429  ;;  %6439 = vtanh.f32 %v3138_v34  ;;  %v2880_v57 = vmul.f32 %v8577_v10, %v6428_v60  ;;  %v2752_v49 = vadd.f32 1e-05, %v2688_v46  ;;  %5917 = vmatprep.mubr.f32.mxu1 %v6424_v6 }
 0x2d1   : > { %v2751_v25 = vadd.f32 1e-05, %v2687_v45  ;;  %6441 = vtanh.f32 %v3137_v32  ;;  %v2879_v40 = vmul.f32 %v8577_v10, %v6430_v63  ;;  %v8682_v3 = vmul.f32 0.0078125, %v2219_v59  ;;  %v10488_v59 = vld [vmem:[#allocation9_spill] sm:$0xff] }
 0x2d2   : > { %v2944_v48 = vmul.f32 %v2880_v57, %v8630_v50  ;;  %6443 = vrsqrt.f32 %v2752_v49  ;;  %v3076_v27 = vmul.f32 %v2880_v57, %v10486_v18  ;;  %v2626_v9 = vmul.f32 %v8678_v53, %v8678_v53 }
 0x2d3   : > { %v2477_v24 = vpop.xlane.xlu0 %2476  ;;  %v2943_v17 = vmul.f32 %v2879_v40, %v8634_v13  ;;  %6445 = vrsqrt.f32 %v2751_v25  ;;  %v2625_v61 = vmul.f32 %v8682_v3, %v8682_v3  ;;  %v3075_v14 = vmul.f32 %v2879_v40, %v10487_v8 }
 0x2d4   : > { %v2475_v56 = vpop.xlane.xlu1 %2474  ;;  %v3012_v37 = vsub.f32 %v8591_v22, %v2944_v48  ;;  %v2562_v28 = vmul.f32 0.0078125, %v2477_v24 }
 0x2d5   : > { %v2561_v39 = vmul.f32 0.0078125, %v2475_v56  ;;  %v6432_v26 = vpop.eup %6431  ;;  %v3011_v50 = vsub.f32 %v8591_v22, %v2943_v17  ;;  %v10489_v17 = vld [vmem:[#allocation10_spill] sm:$0xff] }
 0x2d6   : > { %v6434_v4 = vpop.eup %6433  ;;  %v3140_v51 = vadd.f32 %v3076_v27, %v3012_v37  ;;  %v2690_v13 = vsub.f32 %v2562_v28, %v2626_v9 }
 0x2d7   : > { %v2689_v16 = vsub.f32 %v2561_v39, %v2625_v61  ;;  %v2225_v29 = vpop.xlane.xlu0 %2224  ;;  %v6436_v31 = vpop.eup %6435  ;;  %v3139_v6 = vadd.f32 %v3075_v14, %v3011_v50  ;;  %5918 = vmatmul.mubr.f32.gmra.mxu1 %v6434_v4 }
 0x2d8   : > { %v8694_v0 = vmul.f32 0.0078125, %v2225_v29  ;;  %v2223_v36 = vpop.xlane.xlu1 %2222  ;;  %v6438_v11 = vpop.eup %6437  ;;  %6447 = vtanh.f32 %v3140_v51  ;;  %v2882_v52 = vmul.f32 %v8577_v10, %v6436_v31  ;;  %v2754_v34 = vadd.f32 1e-05, %v2690_v13  ;;  %5920 = vmatprep.mubr.f32.mxu1 %v6432_v26 }
 0x2d9   : > { %v2753_v46 = vadd.f32 1e-05, %v2689_v16  ;;  %6449 = vtanh.f32 %v3139_v6  ;;  %v2881_v45 = vmul.f32 %v8577_v10, %v6438_v11  ;;  %v8698_v12 = vmul.f32 0.0078125, %v2223_v36  ;;  %v10490_v36 = vld [vmem:[#allocation11_spill] sm:$0xff] }
 0x2da   : > { %v2946_v60 = vmul.f32 %v2882_v52, %v8646_v23  ;;  %6451 = vrsqrt.f32 %v2754_v34  ;;  %v3078_v63 = vmul.f32 %v2882_v52, %v10488_v59  ;;  %v2628_v49 = vmul.f32 %v8694_v0, %v8694_v0 }
 0x2db   : > { %v2481_v32 = vpop.xlane.xlu0 %2480  ;;  %v2945_v57 = vmul.f32 %v2881_v45, %v8650_v38  ;;  %6453 = vrsqrt.f32 %v2753_v46  ;;  %v2627_v48 = vmul.f32 %v8698_v12, %v8698_v12  ;;  %v3077_v9 = vmul.f32 %v2881_v45, %v10489_v17 }
 0x2dc   : > { %v2479_v25 = vpop.xlane.xlu1 %2478  ;;  %v3014_v40 = vsub.f32 %v8591_v22, %v2946_v60  ;;  %v2564_v24 = vmul.f32 0.0078125, %v2481_v32 }
 0x2dd   : > { %v2563_v18 = vmul.f32 0.0078125, %v2479_v25  ;;  %v6440_v27 = vpop.eup %6439  ;;  %v3013_v23 = vsub.f32 %v8591_v22, %v2945_v57  ;;  %v10491_v57 = vld [vmem:[#allocation12_spill] sm:$0xff] }
 0x2de   : > { %v6442_v56 = vpop.eup %6441  ;;  %v3142_v37 = vadd.f32 %v3078_v63, %v3014_v40  ;;  %v2692_v38 = vsub.f32 %v2564_v24, %v2628_v49 }
 0x2df   : > { %v2691_v61 = vsub.f32 %v2563_v18, %v2627_v48  ;;  %v2229_v28 = vpop.xlane.xlu0 %2228  ;;  %v6444_v39 = vpop.eup %6443  ;;  %v3141_v26 = vadd.f32 %v3077_v9, %v3013_v23  ;;  %5921 = vmatmul.mubr.f32.gmra.mxu1 %v6442_v56 }
 0x2e0   : > { %v8710_v50 = vmul.f32 0.0078125, %v2229_v28  ;;  %v2227_v8 = vpop.xlane.xlu1 %2226  ;;  %v6446_v14 = vpop.eup %6445  ;;  %6455 = vtanh.f32 %v3142_v37  ;;  %v2884_v4 = vmul.f32 %v8577_v10, %v6444_v39  ;;  %v2756_v51 = vadd.f32 1e-05, %v2692_v38  ;;  %5923 = vmatprep.mubr.f32.mxu1 %v6440_v27 }
 0x2e1   : > { %v2755_v13 = vadd.f32 1e-05, %v2691_v61  ;;  %6457 = vtanh.f32 %v3141_v26  ;;  %v2883_v16 = vmul.f32 %v8577_v10, %v6446_v14  ;;  %v8714_v29 = vmul.f32 0.0078125, %v2227_v8  ;;  %v10492_v8 = vld [vmem:[#allocation14_spill] sm:$0xff] }
 0x2e2   : > { %v2948_v31 = vmul.f32 %v2884_v4, %v8662_v44  ;;  %6459 = vrsqrt.f32 %v2756_v51  ;;  %v3080_v11 = vmul.f32 %v2884_v4, %v10490_v36  ;;  %v2630_v34 = vmul.f32 %v8710_v50, %v8710_v50 }
 0x2e3   : > { %v2485_v6 = vpop.xlane.xlu0 %2484  ;;  %v2947_v52 = vmul.f32 %v2883_v16, %v8666_v5  ;;  %6461 = vrsqrt.f32 %v2755_v13  ;;  %v2629_v60 = vmul.f32 %v8714_v29, %v8714_v29  ;;  %v3079_v49 = vmul.f32 %v2883_v16, %v10491_v57 }
 0x2e4   : > { %v2483_v46 = vpop.xlane.xlu1 %2482  ;;  %v3016_v45 = vsub.f32 %v8591_v22, %v2948_v31  ;;  %v2566_v32 = vmul.f32 0.0078125, %v2485_v6 }
 0x2e5   : > { %v2565_v59 = vmul.f32 0.0078125, %v2483_v46  ;;  %v6448_v63 = vpop.eup %6447  ;;  %v3015_v44 = vsub.f32 %v8591_v22, %v2947_v52  ;;  %v10493_v52 = vld [vmem:[#allocation13_spill] sm:$0xff] }
 0x2e6   : > { %v6450_v25 = vpop.eup %6449  ;;  %v3144_v40 = vadd.f32 %v3080_v11, %v3016_v45  ;;  %v2694_v5 = vsub.f32 %v2566_v32, %v2630_v34 }
 0x2e7   : > { %v2693_v48 = vsub.f32 %v2565_v59, %v2629_v60  ;;  %v2233_v24 = vpop.xlane.xlu0 %2232  ;;  %v6452_v18 = vpop.eup %6451  ;;  %v3143_v27 = vadd.f32 %v3079_v49, %v3015_v44  ;;  %5924 = vmatmul.mubr.f32.gmra.mxu1 %v6450_v25 }
 0x2e8   : > { %v8726_v23 = vmul.f32 0.0078125, %v2233_v24  ;;  %v2231_v17 = vpop.xlane.xlu1 %2230  ;;  %v6454_v9 = vpop.eup %6453  ;;  %6463 = vtanh.f32 %v3144_v40  ;;  %v2886_v56 = vmul.f32 %v8577_v10, %v6452_v18  ;;  %v2758_v37 = vadd.f32 1e-05, %v2694_v5  ;;  %5926 = vmatprep.mubr.f32.mxu1 %v6448_v63 }
 0x2e9   : > { %v2757_v38 = vadd.f32 1e-05, %v2693_v48  ;;  %6465 = vtanh.f32 %v3143_v27  ;;  %v2885_v61 = vmul.f32 %v8577_v10, %v6454_v9  ;;  %v8730_v28 = vmul.f32 0.0078125, %v2231_v17  ;;  %v10494_v17 = vld [vmem:[#allocation16_spill] sm:$0xff] }
 0x2ea   : > { %v2950_v39 = vmul.f32 %v2886_v56, %v8678_v53  ;;  %6467 = vrsqrt.f32 %v2758_v37  ;;  %v3082_v14 = vmul.f32 %v2886_v56, %v10492_v8  ;;  %v2632_v51 = vmul.f32 %v8726_v23, %v8726_v23 }
 0x2eb   : > { %v2489_v26 = vpop.xlane.xlu0 %2488  ;;  %v2949_v4 = vmul.f32 %v2885_v61, %v8682_v3  ;;  %6469 = vrsqrt.f32 %v2757_v38  ;;  %v2631_v31 = vmul.f32 %v8730_v28, %v8730_v28  ;;  %v3081_v34 = vmul.f32 %v2885_v61, %v10493_v52 }
 0x2ec   : > { %v2487_v13 = vpop.xlane.xlu1 %2486  ;;  %v3018_v16 = vsub.f32 %v8591_v22, %v2950_v39  ;;  %v2568_v6 = vmul.f32 0.0078125, %v2489_v26 }
 0x2ed   : > { %v2567_v36 = vmul.f32 0.0078125, %v2487_v13  ;;  %v6456_v11 = vpop.eup %6455  ;;  %v3017_v53 = vsub.f32 %v8591_v22, %v2949_v4  ;;  %v10495_v4 = vld [vmem:[#allocation15_spill] sm:$0xff] }
 0x2ee   : > { %v6458_v46 = vpop.eup %6457  ;;  %v3146_v45 = vadd.f32 %v3082_v14, %v3018_v16  ;;  %v2696_v3 = vsub.f32 %v2568_v6, %v2632_v51 }
 0x2ef   : > { %v2695_v60 = vsub.f32 %v2567_v36, %v2631_v31  ;;  %v2237_v32 = vpop.xlane.xlu0 %2236  ;;  %v6460_v59 = vpop.eup %6459  ;;  %v3145_v63 = vadd.f32 %v3081_v34, %v3017_v53  ;;  %5927 = vmatmul.mubr.f32.gmra.mxu1 %v6458_v46 }
 0x2f0   : > { %v8742_v44 = vmul.f32 0.0078125, %v2237_v32  ;;  %v2235_v57 = vpop.xlane.xlu1 %2234  ;;  %v6462_v49 = vpop.eup %6461  ;;  %6471 = vtanh.f32 %v3146_v45  ;;  %v2888_v25 = vmul.f32 %v8577_v10, %v6460_v59  ;;  %v2760_v40 = vadd.f32 1e-05, %v2696_v3  ;;  %5929 = vmatprep.mubr.f32.mxu1 %v6456_v11 }
 0x2f1   : > { %v2759_v5 = vadd.f32 1e-05, %v2695_v60  ;;  %6473 = vtanh.f32 %v3145_v63  ;;  %v2887_v48 = vmul.f32 %v8577_v10, %v6462_v49  ;;  %v8746_v24 = vmul.f32 0.0078125, %v2235_v57 }
 0x2f2   : > { %v2952_v18 = vmul.f32 %v2888_v25, %v8694_v0  ;;  %6475 = vrsqrt.f32 %v2760_v40  ;;  %v3084_v9 = vmul.f32 %v2888_v25, %v10494_v17  ;;  %v2634_v37 = vmul.f32 %v8742_v44, %v8742_v44 }
 0x2f3   : > { %v2493_v27 = vpop.xlane.xlu0 %2492  ;;  %v2951_v56 = vmul.f32 %v2887_v48, %v8698_v12  ;;  %6477 = vrsqrt.f32 %v2759_v5  ;;  %v2633_v39 = vmul.f32 %v8746_v24, %v8746_v24  ;;  %v3083_v51 = vmul.f32 %v2887_v48, %v10495_v4 }
 0x2f4   : > { %v2491_v38 = vpop.xlane.xlu1 %2490  ;;  %v3020_v61 = vsub.f32 %v8591_v22, %v2952_v18  ;;  %v2570_v26 = vmul.f32 0.0078125, %v2493_v27 }
 0x2f5   : > { %v2569_v8 = vmul.f32 0.0078125, %v2491_v38  ;;  %v6464_v14 = vpop.eup %6463  ;;  %v3019_v0 = vsub.f32 %v8591_v22, %v2951_v56 }
 0x2f6   : > { %v6466_v13 = vpop.eup %6465  ;;  %v3148_v16 = vadd.f32 %v3084_v9, %v3020_v61  ;;  %v2698_v12 = vsub.f32 %v2570_v26, %v2634_v37  ;;  %v10496_v9 = vld [vmem:[#allocation17_spill] sm:$0xff] }
 0x2f7   : > { %v2697_v31 = vsub.f32 %v2569_v8, %v2633_v39  ;;  %v2241_v6 = vpop.xlane.xlu0 %2240  ;;  %v6468_v36 = vpop.eup %6467  ;;  %v3147_v11 = vadd.f32 %v3083_v51, %v3019_v0  ;;  %5930 = vmatmul.mubr.f32.gmra.mxu1 %v6466_v13 }
 0x2f8   : > { %v8758_v53 = vmul.f32 0.0078125, %v2241_v6  ;;  %v2239_v52 = vpop.xlane.xlu1 %2238  ;;  %v6470_v34 = vpop.eup %6469  ;;  %6479 = vtanh.f32 %v3148_v16  ;;  %v2890_v46 = vmul.f32 %v8577_v10, %v6468_v36  ;;  %v2762_v45 = vadd.f32 1e-05, %v2698_v12  ;;  %5932 = vmatprep.mubr.f32.mxu1 %v6464_v14 }
 0x2f9   : > { %v2761_v3 = vadd.f32 1e-05, %v2697_v31  ;;  %6481 = vtanh.f32 %v3147_v11  ;;  %v2889_v60 = vmul.f32 %v8577_v10, %v6470_v34  ;;  %v8762_v32 = vmul.f32 0.0078125, %v2239_v52 }
 0x2fa   : > { %v2954_v59 = vmul.f32 %v2890_v46, %v8710_v50  ;;  %6483 = vrsqrt.f32 %v2762_v45  ;;  %v3086_v57 = vmul.f32 %v2890_v46, %v8305_v35  ;;  %v2636_v25 = vmul.f32 %v8758_v53, %v8758_v53 }
 0x2fb   : > { %v2497_v63 = vpop.xlane.xlu0 %2496  ;;  %v2953_v49 = vmul.f32 %v2889_v60, %v8714_v29  ;;  %6485 = vrsqrt.f32 %v2761_v3  ;;  %v2635_v48 = vmul.f32 %v8762_v32, %v8762_v32  ;;  %v3085_v56 = vmul.f32 %v2889_v60, %v10496_v9 }
 0x2fc   : > { %v2495_v40 = vpop.xlane.xlu1 %2494  ;;  %v3022_v5 = vsub.f32 %v8591_v22, %v2954_v59  ;;  %v2572_v18 = vmul.f32 0.0078125, %v2497_v63 }
 0x2fd   : > { %v2571_v27 = vmul.f32 0.0078125, %v2495_v40  ;;  %v6472_v17 = vpop.eup %6471  ;;  %v3021_v50 = vsub.f32 %v8591_v22, %v2953_v49 }
 0x2fe   : > { %v6474_v35 = vpop.eup %6473  ;;  %v3150_v37 = vadd.f32 %v3086_v57, %v3022_v5  ;;  %v2700_v29 = vsub.f32 %v2572_v18, %v2636_v25 }
 0x2ff   : > { %v2699_v38 = vsub.f32 %v2571_v27, %v2635_v48  ;;  %v2247_v61 = vpop.xlane.xlu0 %2246  ;;  %v6476_v39 = vpop.eup %6475  ;;  %v3149_v26 = vadd.f32 %v3085_v56, %v3021_v50  ;;  %5933 = vmatmul.mubr.f32.gmra.mxu1 %v6474_v35 }
 0x300   : > { %v2243_v8 = vpop.xlane.xlu1 %2242  ;;  %v6478_v14 = vpop.eup %6477  ;;  %6487 = vtanh.f32 %v3150_v37  ;;  %v2892_v0 = vmul.f32 %v8577_v10, %v6476_v39  ;;  %v2764_v4 = vadd.f32 1e-05, %v2700_v29  ;;  %5935 = vmatprep.mubr.f32.mxu1 %v6472_v17  ;;  %v8781_v11 = vmul.f32 0.0078125, %v2247_v61 }
 0x301   : > { %v2763_v51 = vadd.f32 1e-05, %v2699_v38  ;;  %6489 = vtanh.f32 %v3149_v26  ;;  %v2891_v13 = vmul.f32 %v8577_v10, %v6478_v14  ;;  %v8776_v16 = vmul.f32 0.0078125, %v2243_v8 }
 0x302   : > { %v2956_v12 = vmul.f32 %v2892_v0, %v8726_v23  ;;  %6491 = vrsqrt.f32 %v2764_v4  ;;  %v3088_v6 = vmul.f32 %v2892_v0, %v8345_v47  ;;  %v2639_v40 = vmul.f32 %v8781_v11, %v8781_v11 }
 0x303   : > { %v2245_v31 = vpop.xlane.xlu0 %2244  ;;  %v2955_v36 = vmul.f32 %v2891_v13, %v8730_v28  ;;  %6493 = vrsqrt.f32 %v2763_v51  ;;  %v2637_v46 = vmul.f32 %v8776_v16, %v8776_v16  ;;  %v3087_v59 = vmul.f32 %v2891_v13, %v8320_v42 }
 0x304   : > { %v2499_v52 = vpop.xlane.xlu1 %2498  ;;  %v3024_v34 = vsub.f32 %v8591_v22, %v2956_v12  ;;  %v8786_v45 = vmul.f32 0.0078125, %v2245_v31 }
 0x305   : > { %v2573_v3 = vmul.f32 0.0078125, %v2499_v52  ;;  %v6480_v60 = vpop.eup %6479  ;;  %v3023_v23 = vsub.f32 %v8591_v22, %v2955_v36 }
 0x306   : > { %v6482_v47 = vpop.eup %6481  ;;  %v3152_v63 = vadd.f32 %v3088_v6, %v3024_v34  ;;  %v2638_v5 = vmul.f32 %v8786_v45, %v8786_v45 }
 0x307   : > { %v2701_v28 = vsub.f32 %v2573_v3, %v2637_v46  ;;  %v2501_v57 = vpop.xlane.xlu0 %2500  ;;  %v6484_v49 = vpop.eup %6483  ;;  %v3151_v25 = vadd.f32 %v3087_v59, %v3023_v23  ;;  %5936 = vmatmul.mubr.f32.gmra.mxu1 %v6482_v47 }
 0x308   : > { %v2574_v48 = vmul.f32 0.0078125, %v2501_v57  ;;  %v2503_v18 = vpop.xlane.xlu1 %2502  ;;  %v6486_v27 = vpop.eup %6485  ;;  %6495 = vtanh.f32 %v3152_v63  ;;  %v2894_v17 = vmul.f32 %v8577_v10, %v6484_v49  ;;  %5938 = vmatprep.mubr.f32.mxu1 %v6480_v60 }
 0x309   : > { %v2765_v42 = vadd.f32 1e-05, %v2701_v28  ;;  %v2575_v50 = vmul.f32 0.0078125, %v2503_v18  ;;  %6497 = vtanh.f32 %v3151_v25  ;;  %v2893_v9 = vmul.f32 %v8577_v10, %v6486_v27 }
 0x30a   : > { %v2702_v56 = vsub.f32 %v2574_v48, %v2638_v5  ;;  %v2958_v35 = vmul.f32 %v2894_v17, %v8742_v44  ;;  %v3090_v14 = vmul.f32 %v2894_v17, %v8371_v30 }
 0x30b   : > { %6499 = vrsqrt.f32 %v2765_v42  ;;  %v2703_v37 = vsub.f32 %v2575_v50, %v2639_v40  ;;  %v2251_v29 = vpop.xlane.xlu0 %2250  ;;  %v2957_v38 = vmul.f32 %v2893_v9, %v8746_v24  ;;  %v3089_v44 = vmul.f32 %v2893_v9, %v8360_v21 }
 0x30c   : > { %v2766_v61 = vadd.f32 1e-05, %v2702_v56  ;;  %v8798_v39 = vmul.f32 0.0078125, %v2251_v29  ;;  %v2507_v26 = vpop.xlane.xlu1 %2506  ;;  %v3026_v8 = vsub.f32 %v8591_v22, %v2958_v35 }
 0x30d   : > { %v2767_v0 = vadd.f32 1e-05, %v2703_v37  ;;  %v2577_v4 = vmul.f32 0.0078125, %v2507_v26  ;;  %v6488_v51 = vpop.eup %6487  ;;  %v3025_v13 = vsub.f32 %v8591_v22, %v2957_v38 }
 0x30e   : > { %6501 = vrsqrt.f32 %v2766_v61  ;;  %v2641_v12 = vmul.f32 %v8798_v39, %v8798_v39  ;;  %v6490_v24 = vpop.eup %6489  ;;  %v3154_v31 = vadd.f32 %v3090_v14, %v3026_v8 }
 0x30f   : > { %6503 = vrsqrt.f32 %v2767_v0  ;;  %v2249_v6 = vpop.xlane.xlu0 %2248  ;;  %v6492_v36 = vpop.eup %6491  ;;  %v3153_v52 = vadd.f32 %v3089_v44, %v3025_v13  ;;  %5939 = vmatmul.mubr.f32.gmra.mxu1 %v6490_v24 }
 0x310   : > { %v2705_v34 = vsub.f32 %v2577_v4, %v2641_v12  ;;  %v8806_v30 = vmul.f32 0.0078125, %v2249_v6  ;;  %v2255_v46 = vpop.xlane.xlu1 %2254  ;;  %v6494_v3 = vpop.eup %6493  ;;  %v2896_v60 = vmul.f32 %v8577_v10, %v6492_v36  ;;  %5941 = vmatprep.mubr.f32.mxu1 %v6488_v51 }
 0x311   : > { %v8809_v23 = vmul.f32 0.0078125, %v2255_v46  ;;  %6505 = vtanh.f32 %v3153_v52  ;;  %v2895_v21 = vmul.f32 %v8577_v10, %v6494_v3 }
 0x312   : > { %v2769_v59 = vadd.f32 1e-05, %v2705_v34  ;;  %6507 = vtanh.f32 %v3154_v31  ;;  %v2960_v47 = vmul.f32 %v2896_v60, %v8758_v53  ;;  %v2640_v57 = vmul.f32 %v8806_v30, %v8806_v30 }
 0x313   : > { %v2505_v63 = vpop.xlane.xlu0 %2504  ;;  %v2959_v28 = vmul.f32 %v2895_v21, %v8762_v32  ;;  %v3092_v5 = vmul.f32 %v2896_v60, %v8399_v54  ;;  %v2643_v48 = vmul.f32 %v8809_v23, %v8809_v23  ;;  %v3091_v17 = vmul.f32 %v2895_v21, %v8388_v15 }
 0x314   : > { %6509 = vrsqrt.f32 %v2769_v59  ;;  %v2576_v49 = vmul.f32 0.0078125, %v2505_v63  ;;  %v2511_v25 = vpop.xlane.xlu1 %2510  ;;  %v3028_v40 = vsub.f32 %v8591_v22, %v2960_v47 }
 0x315   : > { %v2579_v18 = vmul.f32 0.0078125, %v2511_v25  ;;  %v6496_v27 = vpop.eup %6495  ;;  %v3027_v53 = vsub.f32 %v8591_v22, %v2959_v28 }
 0x316   : > { %v2704_v32 = vsub.f32 %v2576_v49, %v2640_v57  ;;  %v6498_v42 = vpop.eup %6497  ;;  %v3156_v50 = vadd.f32 %v3092_v5, %v3028_v40 }
 0x317   : > { %v2707_v9 = vsub.f32 %v2579_v18, %v2643_v48  ;;  %v2253_v56 = vpop.xlane.xlu0 %2252  ;;  %v3155_v37 = vadd.f32 %v3091_v17, %v3027_v53  ;;  %5942 = vmatmul.mubr.f32.gmra.mxu1 %v6498_v42 }
 0x318   : > { %v6500_v35 = vpop.eup %6499  ;;  %v2768_v29 = vadd.f32 1e-05, %v2704_v32  ;;  %v8822_v38 = vmul.f32 0.0078125, %v2253_v56  ;;  %v2259_v54 = vpop.xlane.xlu1 %2258  ;;  %6511 = vtanh.f32 %v3156_v50  ;;  %5944 = vmatprep.mubr.f32.mxu1 %v6496_v27 }
 0x319   : > { %v2897_v61 = vmul.f32 %v8577_v10, %v6500_v35  ;;  %v2771_v26 = vadd.f32 1e-05, %v2707_v9  ;;  %v8825_v8 = vmul.f32 0.0078125, %v2259_v54  ;;  %6513 = vtanh.f32 %v3155_v37  ;;  %v8834_v10 = vld [vmem:[%s10416_s4 + $0x1] ss:$0 sm:$0xff] }
 0x31a   : > { %6515 = vrsqrt.f32 %v2768_v29  ;;  %v2642_v0 = vmul.f32 %v8822_v38, %v8822_v38 }
 0x31b   : > { %v6502_v15 = vpop.eup %6501  ;;  %v2961_v14 = vmul.f32 %v2897_v61, %v8776_v16  ;;  %v2509_v4 = vpop.xlane.xlu0 %2508  ;;  %v3093_v13 = vmul.f32 %v2897_v61, %v8418_v55  ;;  %6517 = vrsqrt.f32 %v2771_v26  ;;  %v2645_v6 = vmul.f32 %v8825_v8, %v8825_v8 }
 0x31c   : > { %v6504_v51 = vpop.eup %6503  ;;  %v2898_v44 = vmul.f32 %v8834_v10, %v6502_v15  ;;  %v2578_v12 = vmul.f32 0.0078125, %v2509_v4  ;;  %v2515_v24 = vpop.xlane.xlu1 %2514 }
 0x31d   : > { %v3029_v16 = vsub.f32 %v8591_v22, %v2961_v14  ;;  %v2899_v31 = vmul.f32 %v8834_v10, %v6504_v51  ;;  %v2581_v36 = vmul.f32 0.0078125, %v2515_v24  ;;  %v8847_v22 = vld [vmem:[%s10416_s4 + $0x2] ss:$0 sm:$0xff] }
 0x31e   : > { %v2962_v55 = vmul.f32 %v2898_v44, %v8786_v45  ;;  %v2706_v52 = vsub.f32 %v2578_v12, %v2642_v0  ;;  %v6506_v34 = vpop.eup %6505  ;;  %v3094_v3 = vmul.f32 %v2898_v44, %v8433_v62 }
 0x31f   : > { %v3157_v46 = vadd.f32 %v3093_v13, %v3029_v16  ;;  %v2963_v60 = vmul.f32 %v2899_v31, %v8781_v11  ;;  %v2709_v21 = vsub.f32 %v2581_v36, %v2645_v6  ;;  %v2257_v59 = vpop.xlane.xlu0 %2256  ;;  %v6508_v47 = vpop.eup %6507  ;;  %v3095_v28 = vmul.f32 %v2899_v31, %v8425_v33  ;;  %5945 = vmatmul.mubr.f32.gmra.mxu1 %v6506_v34  ;;  %v8856_v11 = vld [vmem:[%s10416_s4 + $0x3] ss:$0 sm:$0xff] }
 0x320   : > { %v3030_v63 = vsub.f32 %v8847_v22, %v2962_v55  ;;  %v2770_v45 = vadd.f32 1e-05, %v2706_v52  ;;  %v8851_v57 = vmul.f32 0.0078125, %v2257_v59  ;;  %v2263_v49 = vpop.xlane.xlu1 %2262  ;;  %v5874_v62 = vpop.f32.mrf.mxu0  ;;  %5947 = vmatprep.mubr.f32.mxu1 %v6508_v47 }
 0x321   : > { %v6510_v25 = vpop.eup %6509  ;;  %6519 = vtanh.f32 %v3157_v46  ;;  %v3031_v40 = vsub.f32 %v8847_v22, %v2963_v60  ;;  %v2773_v5 = vadd.f32 1e-05, %v2709_v21  ;;  %v8859_v48 = vmul.f32 0.0078125, %v2263_v49 }
 0x322   : > { %v3158_v33 = vadd.f32 %v3094_v3, %v3030_v63  ;;  %v2901_v18 = vmul.f32 %v8834_v10, %v6510_v25  ;;  %6521 = vrsqrt.f32 %v2770_v45  ;;  %v3319_v27 = vpop.f32.mrf.mxu0  ;;  %v8863_v17 = vadd.f32 %v5874_v62, %v8856_v11 }
 0x323   : > { %v3159_v53 = vadd.f32 %v3095_v28, %v3031_v40  ;;  %6523 = vrsqrt.f32 %v2773_v5  ;;  %v2513_v32 = vpop.xlane.xlu0 %2512  ;;  %v2644_v42 = vmul.f32 %v8851_v57, %v8851_v57  ;;  %v8868_v50 = vadd.f32 %v8856_v11, %v3319_v27 }
 0x324   : > { %6525 = vtanh.f32 %v3158_v33  ;;  %v2519_v9 = vpop.xlane.xlu1 %2518  ;;  %v2647_v56 = vmul.f32 %v8859_v48, %v8859_v48  ;;  %3642 = vadd.xlane.f32.xlu1 %v8863_v17  ;;  %v2580_v35 = vmul.f32 0.0078125, %v2513_v32  ;;  %v2965_v54 = vmul.f32 %v2901_v18, %v8798_v39 }
 0x325   : > { %6527 = vtanh.f32 %v3159_v53  ;;  %v2583_v37 = vmul.f32 0.0078125, %v2519_v9  ;;  %v6512_v29 = vpop.eup %6511  ;;  %3640 = vadd.xlane.f32.xlu0 %v8868_v50  ;;  %v3833_v14 = vmul.f32 %v8863_v17, %v8863_v17  ;;  %v3832_v13 = vmul.f32 %v8868_v50, %v8868_v50 }
 0x326   : > { %v6514_v61 = vpop.eup %6513  ;;  %v2708_v26 = vsub.f32 %v2580_v35, %v2644_v42  ;;  %v3033_v16 = vsub.f32 %v8847_v22, %v2965_v54  ;;  %v3097_v55 = vmul.f32 %v2901_v18, %v8456_v19 }
 0x327   : > { %v2711_v15 = vsub.f32 %v2583_v37, %v2647_v56  ;;  %v2261_v0 = vpop.xlane.xlu0 %2260  ;;  %v6516_v4 = vpop.eup %6515  ;;  %5948 = vmatmul.mubr.f32.gmra.mxu1 %v6514_v61 }
 0x328   : > { %v8877_v51 = vmul.f32 0.0078125, %v2261_v0  ;;  %v6518_v44 = vpop.eup %6517  ;;  %v2900_v12 = vmul.f32 %v8834_v10, %v6516_v4  ;;  %v2772_v39 = vadd.f32 1e-05, %v2708_v26  ;;  %3898 = vadd.xlane.f32.xlu1 %v3833_v14  ;;  %5950 = vmatprep.mubr.f32.mxu1 %v6512_v29  ;;  %v3161_v47 = vadd.f32 %v3097_v55, %v3033_v16 }
 0x329   : > { %v2775_v24 = vadd.f32 1e-05, %v2711_v15  ;;  %v2903_v31 = vmul.f32 %v8834_v10, %v6518_v44  ;;  %3896 = vadd.xlane.f32.xlu0 %v3832_v13 }
 0x32a   : > { %v2964_v6 = vmul.f32 %v2900_v12, %v8806_v30  ;;  %6529 = vrsqrt.f32 %v2772_v39  ;;  %v2646_v52 = vmul.f32 %v8877_v51, %v8877_v51  ;;  %v3096_v60 = vmul.f32 %v2900_v12, %v8474_v2 }
 0x32b   : > { %v2517_v36 = vpop.xlane.xlu0 %2516  ;;  %6531 = vrsqrt.f32 %v2775_v24  ;;  %v5877_v46 = vpop.f32.mrf.mxu0  ;;  %v2967_v21 = vmul.f32 %v2903_v31, %v8809_v23  ;;  %v3099_v32 = vmul.f32 %v2903_v31, %v8481_v7 }
 0x32c   : > { %v2582_v34 = vmul.f32 0.0078125, %v2517_v36  ;;  %v3032_v3 = vsub.f32 %v8847_v22, %v2964_v6  ;;  %v8892_v59 = vadd.f32 %v5877_v46, %v8856_v11 }
 0x32d   : > { %v3329_v28 = vpop.f32.mrf.mxu0  ;;  %v3035_v5 = vsub.f32 %v8847_v22, %v2967_v21 }
 0x32e   : > { %v6520_v30 = vpop.eup %6519  ;;  %v2710_v63 = vsub.f32 %v2582_v34, %v2646_v52  ;;  %v3160_v45 = vadd.f32 %v3096_v60, %v3032_v3  ;;  %v8895_v49 = vadd.f32 %v8856_v11, %v3329_v28  ;;  %3646 = vadd.xlane.f32.xlu1 %v8892_v59  ;;  %v5880_v23 = vpop.f32.mrf.mxu1  ;;  %v3835_v33 = vmul.f32 %v8892_v59, %v8892_v59 }
 0x32f   : > { %v6522_v19 = vpop.eup %6521  ;;  %5951 = vmatmul.mubr.f32.gmra.mxu1 %v6520_v30  ;;  %v3163_v37 = vadd.f32 %v3099_v32, %v3035_v5  ;;  %v8911_v29 = vadd.f32 %v5880_v23, %v8856_v11 }
 0x330   : > { %v6524_v62 = vpop.eup %6523  ;;  %v2902_v2 = vmul.f32 %v8834_v10, %v6522_v19  ;;  %v2774_v25 = vadd.f32 1e-05, %v2710_v63  ;;  %6533 = vtanh.f32 %v3160_v45  ;;  %3644 = vadd.xlane.f32.xlu0 %v8895_v49  ;;  %v3834_v42 = vmul.f32 %v8895_v49, %v8895_v49  ;;  %v3339_v35 = vpop.f32.mrf.mxu1 }
 0x331   : > { %v6526_v40 = vpop.eup %6525  ;;  %6535 = vtanh.f32 %v3161_v47  ;;  %v2905_v53 = vmul.f32 %v8834_v10, %v6524_v62  ;;  %v8915_v7 = vadd.f32 %v8856_v11, %v3339_v35  ;;  %v3837_v14 = vmul.f32 %v8911_v29, %v8911_v29 }
 0x332   : > { %v6528_v18 = vpop.eup %6527  ;;  %v2966_v27 = vmul.f32 %v2902_v2, %v8822_v38  ;;  %5953 = vmatprep.mubr.f32.mxu1 %v6526_v40  ;;  %6537 = vrsqrt.f32 %v2774_v25  ;;  %3902 = vadd.xlane.f32.xlu1 %v3835_v33  ;;  %v3098_v56 = vmul.f32 %v2902_v2, %v8502_v20 }
 0x333   : > { %5954 = vmatmul.mubr.f32.gmra.mxu1 %v6528_v18  ;;  %v2969_v54 = vmul.f32 %v2905_v53, %v8825_v8  ;;  %v3836_v13 = vmul.f32 %v8915_v7, %v8915_v7  ;;  %v3101_v44 = vmul.f32 %v2905_v53, %v8509_v43 }
 0x334   : > { %v3034_v9 = vsub.f32 %v8847_v22, %v2966_v27  ;;  %3900 = vadd.xlane.f32.xlu0 %v3834_v42 }
 0x335   : > { %v3037_v0 = vsub.f32 %v8847_v22, %v2969_v54 }
 0x336   : > { %v3162_v38 = vadd.f32 %v3098_v56, %v3034_v9  ;;  %3650 = vadd.xlane.f32.xlu1 %v8911_v29  ;;  %v5883_v26 = vpop.f32.mrf.mxu1 }
 0x337   : > { %v6530_v61 = vpop.eup %6529  ;;  %v8931_v16 = vadd.f32 %v5883_v26, %v8856_v11  ;;  %v3165_v6 = vadd.f32 %v3101_v44, %v3037_v0 }
 0x338   : > { %6539 = vtanh.f32 %v3162_v38  ;;  %v6532_v15 = vpop.eup %6531  ;;  %v2904_v20 = vmul.f32 %v8834_v10, %v6530_v61  ;;  %3648 = vadd.xlane.f32.xlu0 %v8915_v7  ;;  %v3349_v12 = vpop.f32.mrf.mxu1 }
 0x339   : > { %6541 = vtanh.f32 %v3163_v37  ;;  %v2907_v8 = vmul.f32 %v8834_v10, %v6532_v15  ;;  %v8935_v52 = vadd.f32 %v8856_v11, %v3349_v12  ;;  %v3839_v46 = vmul.f32 %v8931_v16, %v8931_v16 }
 0x33a   : > { %v2968_v4 = vmul.f32 %v2904_v20, %v8851_v57  ;;  %3906 = vadd.xlane.f32.xlu1 %v3837_v14  ;;  %v3100_v24 = vmul.f32 %v2904_v20, %v8530_v41 }
 0x33b   : > { %v2971_v36 = vmul.f32 %v2907_v8, %v8859_v48  ;;  %v3838_v60 = vmul.f32 %v8935_v52, %v8935_v52  ;;  %v3103_v21 = vmul.f32 %v2907_v8, %v8537_v1 }
 0x33c   : > { %v3036_v39 = vsub.f32 %v8847_v22, %v2968_v4  ;;  %3904 = vadd.xlane.f32.xlu0 %v3836_v13 }
 0x33d   : > { %v6534_v31 = vpop.eup %6533  ;;  %v3039_v48 = vsub.f32 %v8847_v22, %v2971_v36 }
 0x33e   : > { %v6536_v57 = vpop.eup %6535  ;;  %v3164_v55 = vadd.f32 %v3100_v24, %v3036_v39  ;;  %5956 = vmatprep.mubr.f32.mxu1 %v6534_v31  ;;  %3654 = vadd.xlane.f32.xlu1 %v8931_v16  ;;  %v5886_v34 = vpop.f32.mrf.mxu1 }
 0x33f   : > { %v6538_v43 = vpop.eup %6537  ;;  %5957 = vmatmul.mubr.f32.gmra.mxu1 %v6536_v57  ;;  %v8950_v28 = vadd.f32 %v5886_v34, %v8856_v11  ;;  %v3167_v45 = vadd.f32 %v3103_v21, %v3039_v48 }
 0x340   : > { %6543 = vtanh.f32 %v3164_v55  ;;  %v2906_v41 = vmul.f32 %v8834_v10, %v6538_v43  ;;  %3652 = vadd.xlane.f32.xlu0 %v8935_v52  ;;  %v3359_v30 = vpop.f32.mrf.mxu1 }
 0x341   : > { %6545 = vtanh.f32 %v3165_v6  ;;  %v8953_v62 = vadd.f32 %v8856_v11, %v3359_v30 }
 0x342   : > { %v2970_v3 = vmul.f32 %v2906_v41, %v8877_v51  ;;  %3910 = vadd.xlane.f32.xlu1 %v3839_v46  ;;  %v3102_v63 = vmul.f32 %v2906_v41, %v8558_v58  ;;  %v3841_v58 = vmul.f32 %v8950_v28, %v8950_v28 }
 0x344   : > { %v3038_v10 = vsub.f32 %v8847_v22, %v2970_v3  ;;  %3908 = vadd.xlane.f32.xlu0 %v3838_v60  ;;  %v3840_v22 = vmul.f32 %v8953_v62, %v8953_v62 }
 0x345   : > { %v6540_v47 = vpop.eup %6539 }
 0x346   : > { %v6542_v19 = vpop.eup %6541  ;;  %5959 = vmatprep.mubr.f32.mxu1 %v6540_v47  ;;  %v3166_v51 = vadd.f32 %v3102_v63, %v3038_v10  ;;  %3658 = vadd.xlane.f32.xlu1 %v8950_v28 }
 0x347   : > { %5960 = vmatmul.mubr.f32.gmra.mxu1 %v6542_v19  ;;  %v5889_v1 = vpop.f32.mrf.mxu1 }
 0x348   : > { %6547 = vtanh.f32 %v3166_v51  ;;  %3656 = vadd.xlane.f32.xlu0 %v8953_v62  ;;  %v8962_v25 = vadd.f32 %v5889_v1, %v8856_v11 }
 0x349   : > { %6549 = vtanh.f32 %v3167_v45  ;;  %v3369_v2 = vpop.f32.mrf.mxu1 }
 0x34a   : > { %3914 = vadd.xlane.f32.xlu1 %v3841_v58  ;;  %v8965_v5 = vadd.f32 %v8856_v11, %v3369_v2  ;;  %v3843_v18 = vmul.f32 %v8962_v25, %v8962_v25 }
 0x34c   : > { %3912 = vadd.xlane.f32.xlu0 %v3840_v22  ;;  %v3842_v27 = vmul.f32 %v8965_v5, %v8965_v5 }
 0x34d   : > { %v6544_v23 = vpop.eup %6543 }
 0x34e   : > { %v6546_v40 = vpop.eup %6545  ;;  %5962 = vmatprep.mubr.f32.mxu1 %v6544_v23  ;;  %3662 = vadd.xlane.f32.xlu1 %v8962_v25 }
 0x34f   : > { %v5892_v33 = vpop.f32.mrf.mxu1  ;;  %5963 = vmatmul.mubr.f32.gmra.mxu1 %v6546_v40 }
 0x350   : > { %3660 = vadd.xlane.f32.xlu0 %v8965_v5  ;;  %v8974_v32 = vadd.f32 %v5892_v33, %v8856_v11 }
 0x351   : > { %v3379_v53 = vpop.f32.mrf.mxu1 }
 0x352   : > { %3918 = vadd.xlane.f32.xlu1 %v3843_v18  ;;  %v8977_v56 = vadd.f32 %v8856_v11, %v3379_v53  ;;  %v3845_v37 = vmul.f32 %v8974_v32, %v8974_v32 }
 0x354   : > { %3916 = vadd.xlane.f32.xlu0 %v3842_v27  ;;  %v3844_v38 = vmul.f32 %v8977_v56, %v8977_v56 }
 0x355   : > { %v6548_v42 = vpop.eup %6547 }
 0x356   : > { %v6550_v9 = vpop.eup %6549  ;;  %5965 = vmatprep.mubr.f32.mxu1 %v6548_v42  ;;  %3666 = vadd.xlane.f32.xlu1 %v8974_v32 }
 0x357   : > { %v5895_v35 = vpop.f32.mrf.mxu1  ;;  %5966 = vmatmul.mubr.f32.gmra.mxu1 %v6550_v9 }
 0x358   : > { %3664 = vadd.xlane.f32.xlu0 %v8977_v56  ;;  %v8986_v61 = vadd.f32 %v5895_v35, %v8856_v11 }
 0x359   : > { %v3389_v54 = vpop.f32.mrf.mxu1 }
 0x35a   : > { %3922 = vadd.xlane.f32.xlu1 %v3845_v37  ;;  %v8989_v26 = vadd.f32 %v8856_v11, %v3389_v54  ;;  %v3847_v20 = vmul.f32 %v8986_v61, %v8986_v61 }
 0x35c   : > { %3920 = vadd.xlane.f32.xlu0 %v3844_v38  ;;  %v3846_v14 = vmul.f32 %v8989_v26, %v8989_v26 }
 0x35e   : > { %3670 = vadd.xlane.f32.xlu1 %v8986_v61 }
 0x35f   : > { %v5898_v15 = vpop.f32.mrf.mxu1 }
 0x360   : > { %3668 = vadd.xlane.f32.xlu0 %v8989_v26  ;;  %v8998_v8 = vadd.f32 %v5898_v15, %v8856_v11 }
 0x361   : > { %v3399_v0 = vpop.f32.mrf.mxu1 }
 0x362   : > { %3926 = vadd.xlane.f32.xlu1 %v3847_v20  ;;  %v9001_v4 = vadd.f32 %v8856_v11, %v3399_v0  ;;  %v3849_v44 = vmul.f32 %v8998_v8, %v8998_v8 }
 0x364   : > { %3924 = vadd.xlane.f32.xlu0 %v3846_v14  ;;  %v3848_v12 = vmul.f32 %v9001_v4, %v9001_v4 }
 0x366   : > { %3674 = vadd.xlane.f32.xlu1 %v8998_v8 }
 0x367   : > { %v5901_v13 = vpop.f32.mrf.mxu1 }
 0x368   : > { %3672 = vadd.xlane.f32.xlu0 %v9001_v4  ;;  %v9010_v24 = vadd.f32 %v5901_v13, %v8856_v11 }
 0x369   : > { %v3409_v39 = vpop.f32.mrf.mxu1 }
 0x36a   : > { %3930 = vadd.xlane.f32.xlu1 %v3849_v44  ;;  %v9013_v31 = vadd.f32 %v8856_v11, %v3409_v39  ;;  %v3851_v36 = vmul.f32 %v9010_v24, %v9010_v24 }
 0x36c   : > { %3928 = vadd.xlane.f32.xlu0 %v3848_v12  ;;  %v3850_v57 = vmul.f32 %v9013_v31, %v9013_v31 }
 0x36e   : > { %3678 = vadd.xlane.f32.xlu1 %v9010_v24 }
 0x36f   : > { %v5904_v6 = vpop.f32.mrf.mxu1 }
 0x370   : > { %3676 = vadd.xlane.f32.xlu0 %v9013_v31  ;;  %v9022_v43 = vadd.f32 %v5904_v6, %v8856_v11 }
 0x371   : > { %v3419_v55 = vpop.f32.mrf.mxu1 }
 0x372   : > { %3934 = vadd.xlane.f32.xlu1 %v3851_v36  ;;  %10497 = vst [vmem:[#allocation6_spill] sm:$0xff] %v9022_v43  ;;  %v9025_v34 = vadd.f32 %v8856_v11, %v3419_v55  ;;  %v3853_v46 = vmul.f32 %v9022_v43, %v9022_v43 }
 0x374   : > { %3932 = vadd.xlane.f32.xlu0 %v3850_v57  ;;  %10498 = vst [vmem:[#allocation7_spill] sm:$0xff] %v9025_v34  ;;  %v3852_v48 = vmul.f32 %v9025_v34, %v9025_v34 }
 0x376   : > { %3682 = vadd.xlane.f32.xlu1 %v9022_v43 }
 0x377   : > { %v5907_v41 = vpop.f32.mrf.mxu1 }
 0x378   : > { %3680 = vadd.xlane.f32.xlu0 %v9025_v34  ;;  %v9034_v60 = vadd.f32 %v5907_v41, %v8856_v11 }
 0x379   : > { %v3429_v3 = vpop.f32.mrf.mxu1 }
 0x37a   : > { %3938 = vadd.xlane.f32.xlu1 %v3853_v46  ;;  %10499 = vst [vmem:[#allocation8_spill] sm:$0xff] %v9034_v60  ;;  %v9037_v21 = vadd.f32 %v8856_v11, %v3429_v3  ;;  %v3855_v47 = vmul.f32 %v9034_v60, %v9034_v60 }
 0x37c   : > { %3936 = vadd.xlane.f32.xlu0 %v3852_v48  ;;  %10500 = vst [vmem:[#allocation9_spill] sm:$0xff] %v9037_v21  ;;  %v3854_v10 = vmul.f32 %v9037_v21, %v9037_v21 }
 0x37e   : > { %3686 = vadd.xlane.f32.xlu1 %v9034_v60 }
 0x37f   : > { %v5910_v30 = vpop.f32.mrf.mxu1 }
 0x380   : > { %3684 = vadd.xlane.f32.xlu0 %v9037_v21  ;;  %v9046_v19 = vadd.f32 %v5910_v30, %v8856_v11 }
 0x381   : > { %v3439_v63 = vpop.f32.mrf.mxu1 }
 0x382   : > { %3942 = vadd.xlane.f32.xlu1 %v3855_v47  ;;  %10501 = vst [vmem:[#allocation10_spill] sm:$0xff] %v9046_v19  ;;  %v9049_v45 = vadd.f32 %v8856_v11, %v3439_v63  ;;  %v3857_v58 = vmul.f32 %v9046_v19, %v9046_v19 }
 0x384   : > { %3940 = vadd.xlane.f32.xlu0 %v3854_v10  ;;  %10502 = vst [vmem:[#allocation11_spill] sm:$0xff] %v9049_v45  ;;  %v3856_v2 = vmul.f32 %v9049_v45, %v9049_v45 }
 0x386   : > { %3690 = vadd.xlane.f32.xlu1 %v9046_v19 }
 0x387   : > { %v5913_v51 = vpop.f32.mrf.mxu1 }
 0x388   : > { %v9053_v1 = vadd.f32 %v5913_v51, %v8856_v11  ;;  %3688 = vadd.xlane.f32.xlu0 %v9049_v45 }
 0x389   : > { %v3449_v22 = vpop.f32.mrf.mxu1 }
 0x38a   : > { %10503 = vst [vmem:[#allocation12_spill] sm:$0xff] %v9053_v1  ;;  %3694 = vadd.xlane.f32.xlu1 %v9053_v1  ;;  %v9062_v40 = vadd.f32 %v8856_v11, %v3449_v22  ;;  %v3859_v53 = vmul.f32 %v9053_v1, %v9053_v1 }
 0x38c   : > { %3946 = vadd.xlane.f32.xlu0 %v3857_v58  ;;  %10504 = vst [vmem:[#allocation14_spill] sm:$0xff] %v9062_v40  ;;  %v3858_v18 = vmul.f32 %v9062_v40, %v9062_v40 }
 0x38f   : > { %v5916_v23 = vpop.f32.mrf.mxu1 }
 0x390   : > { %v9065_v33 = vadd.f32 %v5916_v23, %v8856_v11  ;;  %3944 = vadd.xlane.f32.xlu0 %v3856_v2 }
 0x391   : > { %v3459_v27 = vpop.f32.mrf.mxu1 }
 0x392   : > { %10505 = vst [vmem:[#allocation13_spill] sm:$0xff] %v9065_v33  ;;  %3698 = vadd.xlane.f32.xlu1 %v9065_v33  ;;  %v9074_v9 = vadd.f32 %v8856_v11, %v3459_v27  ;;  %v3861_v54 = vmul.f32 %v9065_v33, %v9065_v33 }
 0x394   : > { %3692 = vadd.xlane.f32.xlu0 %v9062_v40  ;;  %10506 = vst [vmem:[#allocation16_spill] sm:$0xff] %v9074_v9  ;;  %v3860_v37 = vmul.f32 %v9074_v9, %v9074_v9 }
 0x396   : > { %3948 = vadd.xlane.f32.xlu1 %v3858_v18 }
 0x397   : > { %v5919_v42 = vpop.f32.mrf.mxu1 }
 0x398   : > { %v9077_v35 = vadd.f32 %v5919_v42, %v8856_v11  ;;  %3950 = vadd.xlane.f32.xlu0 %v3859_v53 }
 0x399   : > { %v3469_v38 = vpop.f32.mrf.mxu1 }
 0x39a   : > { %10507 = vst [vmem:[#allocation15_spill] sm:$0xff] %v9077_v35  ;;  %3702 = vadd.xlane.f32.xlu1 %v9077_v35  ;;  %v9086_v20 = vadd.f32 %v8856_v11, %v3469_v38  ;;  %v3863_v44 = vmul.f32 %v9077_v35, %v9077_v35 }
 0x39c   : > { %3696 = vadd.xlane.f32.xlu0 %v9074_v9  ;;  %10508 = vst [vmem:[#allocation17_spill] sm:$0xff] %v9086_v20  ;;  %v3862_v0 = vmul.f32 %v9086_v20, %v9086_v20 }
 0x39e   : > { %3952 = vadd.xlane.f32.xlu1 %v3860_v37 }
 0x39f   : > { %v5922_v15 = vpop.f32.mrf.mxu1 }
 0x3a0   : > { %v9089_v14 = vadd.f32 %v5922_v15, %v8856_v11  ;;  %3954 = vadd.xlane.f32.xlu0 %v3861_v54 }
 0x3a1   : > { %v3479_v13 = vpop.f32.mrf.mxu1 }
 0x3a2   : > { %10509 = vst [vmem:[#allocation18_spill] sm:$0xff] %v9089_v14  ;;  %3706 = vadd.xlane.f32.xlu1 %v9089_v14  ;;  %v9098_v39 = vadd.f32 %v8856_v11, %v3479_v13  ;;  %v3865_v46 = vmul.f32 %v9089_v14, %v9089_v14 }
 0x3a4   : > { %3700 = vadd.xlane.f32.xlu0 %v9086_v20  ;;  %10510 = vst [vmem:[#allocation19_spill] sm:$0xff] %v9098_v39  ;;  %v3864_v36 = vmul.f32 %v9098_v39, %v9098_v39 }
 0x3a6   : > { %3956 = vadd.xlane.f32.xlu1 %v3862_v0 }
 0x3a7   : > { %v5925_v12 = vpop.f32.mrf.mxu1 }
 0x3a8   : > { %v9101_v6 = vadd.f32 %v5925_v12, %v8856_v11  ;;  %3958 = vadd.xlane.f32.xlu0 %v3863_v44 }
 0x3a9   : > { %v3489_v57 = vpop.f32.mrf.mxu1 }
 0x3aa   : > { %10511 = vst [vmem:[#allocation20_spill] sm:$0xff] %v9101_v6  ;;  %3710 = vadd.xlane.f32.xlu1 %v9101_v6  ;;  %v9110_v30 = vadd.f32 %v8856_v11, %v3489_v57  ;;  %v3867_v18 = vmul.f32 %v9101_v6, %v9101_v6 }
 0x3ac   : > { %3704 = vadd.xlane.f32.xlu0 %v9098_v39  ;;  %10512 = vst [vmem:[#allocation21_spill] sm:$0xff] %v9110_v30  ;;  %v3866_v22 = vmul.f32 %v9110_v30, %v9110_v30 }
 0x3ad   : > { %v3643_v55 = vpop.xlane.xlu1 %3642 }
 0x3ae   : > { %3960 = vadd.xlane.f32.xlu1 %v3864_v36  ;;  %v3641_v41 = vpop.xlane.xlu0 %3640 }
 0x3af   : > { %v3768_v48 = vmul.f32 0.0078125, %v3641_v41  ;;  %v5928_v3 = vpop.f32.mrf.mxu1 }
 0x3b0   : > { %v9113_v47 = vadd.f32 %v5928_v3, %v8856_v11  ;;  %3962 = vadd.xlane.f32.xlu0 %v3865_v46 }
 0x3b1   : > { %v4088_v63 = vmul.f32 %v3768_v48, %v3768_v48  ;;  %v3899_v51 = vpop.xlane.xlu1 %3898  ;;  %v3499_v2 = vpop.f32.mrf.mxu1 }
 0x3b2   : > { %10513 = vst [vmem:[#allocation22_spill] sm:$0xff] %v9113_v47  ;;  %3714 = vadd.xlane.f32.xlu1 %v9113_v47  ;;  %v3897_v10 = vpop.xlane.xlu0 %3896  ;;  %v9125_v54 = vadd.f32 %v8856_v11, %v3499_v2  ;;  %v3869_v57 = vmul.f32 %v9113_v47, %v9113_v47 }
 0x3b3   : > { %v4024_v58 = vmul.f32 0.0078125, %v3897_v10 }
 0x3b4   : > { %3708 = vadd.xlane.f32.xlu0 %v9110_v30  ;;  %10515 = vst [vmem:[#allocation24_spill] sm:$0xff] %v9125_v54 }
 0x3b5   : > { %v4152_v23 = vsub.f32 %v4024_v58, %v4088_v63 }
 0x3b6   : > { %3964 = vadd.xlane.f32.xlu1 %v3866_v22  ;;  %v3868_v22 = vmul.f32 %v9125_v54, %v9125_v54 }
 0x3b7   : > { %v4216_v27 = vadd.f32 1e-05, %v4152_v23  ;;  %v5931_v53 = vpop.f32.mrf.mxu1  ;;  %v3647_v42 = vpop.xlane.xlu1 %3646  ;;  %v9141_v23 = vmul.f32 0.0078125, %v3643_v55 }
 0x3b8   : > { %v9122_v37 = vadd.f32 %v5931_v53, %v8856_v11  ;;  %3966 = vadd.xlane.f32.xlu0 %v3867_v18  ;;  %v9173_v30 = vmul.f32 0.0078125, %v3647_v42 }
 0x3b9   : > { %6551 = vrsqrt.f32 %v4216_v27  ;;  %v3645_v38 = vpop.xlane.xlu0 %3644  ;;  %v3509_v13 = vpop.f32.mrf.mxu1 }
 0x3ba   : > { %10514 = vst [vmem:[#allocation23_spill] sm:$0xff] %v9122_v37  ;;  %3718 = vadd.xlane.f32.xlu1 %v9122_v37  ;;  %v9128_v15 = vmul.f32 0.0078125, %v3645_v38  ;;  %v9146_v38 = vld [vmem:[%s10416_s4 + $0x4] ss:$0 sm:$0xff] }
 0x3bb   : > { %v3903_v0 = vpop.xlane.xlu1 %3902 }
 0x3bc   : > { %3712 = vadd.xlane.f32.xlu0 %v9125_v54  ;;  %v4090_v12 = vmul.f32 %v9128_v15, %v9128_v15  ;;  %v4027_v20 = vmul.f32 0.0078125, %v3903_v0 }
 0x3bd   : > { %v3901_v44 = vpop.xlane.xlu0 %3900 }
 0x3be   : > { %v4026_v36 = vmul.f32 0.0078125, %v3901_v44  ;;  %v9149_v44 = vadd.f32 %v8856_v11, %v3509_v13 }
 0x3bf   : > { %v5934_v41 = vpop.f32.mrf.mxu1  ;;  %v3651_v46 = vpop.xlane.xlu1 %3650 }
 0x3c0   : > { %v4154_v3 = vsub.f32 %v4026_v36, %v4090_v12  ;;  %v9136_v10 = vadd.f32 %v5934_v41, %v8856_v11  ;;  %3970 = vadd.xlane.f32.xlu0 %v3869_v57  ;;  %10517 = vst [vmem:[#allocation26_spill] sm:$0xff] %v9149_v44  ;;  %v4025_v12 = vmul.f32 0.0078125, %v3899_v51  ;;  %v3871_v51 = vmul.f32 %v9122_v37, %v9122_v37 }
 0x3c1   : > { %v3649_v63 = vpop.xlane.xlu0 %3648  ;;  %v3519_v18 = vpop.f32.mrf.mxu1 }
 0x3c2   : > { %10516 = vst [vmem:[#allocation25_spill] sm:$0xff] %v9136_v10  ;;  %v4218_v58 = vadd.f32 1e-05, %v4154_v3  ;;  %3722 = vadd.xlane.f32.xlu1 %v9136_v10  ;;  %v9155_v55 = vadd.f32 %v8856_v11, %v3519_v18  ;;  %v9169_v18 = vld [vmem:[%s10416_s4 + $0x5] ss:$0 sm:$0xff] }
 0x3c3   : > { %v3907_v2 = vpop.xlane.xlu1 %3906 }
 0x3c4   : > { %6553 = vrsqrt.f32 %v4218_v58  ;;  %3968 = vadd.xlane.f32.xlu0 %v3868_v22  ;;  %10518 = vst [vmem:[#allocation27_spill] sm:$0xff] %v9155_v55  ;;  %v4089_v58 = vmul.f32 %v9141_v23, %v9141_v23 }
 0x3c5   : > { %v3905_v27 = vpop.xlane.xlu0 %3904 }
 0x3c6   : > { %v6552_v53 = vpop.eup %6551 }
 0x3c7   : > { %v4348_v36 = vmul.f32 %v6552_v53, %v9146_v38  ;;  %v5937_v57 = vpop.f32.mrf.mxu1  ;;  %v9152_v41 = vpop.xlane.xlu1 %3654  ;;  %v4153_v53 = vsub.f32 %v4025_v12, %v4089_v58  ;;  %v3870_v12 = vmul.f32 %v9149_v44, %v9149_v44 }
 0x3c8   : > { %v9158_v3 = vadd.f32 %v5937_v57, %v8856_v11  ;;  %3716 = vadd.xlane.f32.xlu0 %v9149_v44 }
 0x3c9   : > { %v4412_v22 = vmul.f32 %v4348_v36, %v3768_v48  ;;  %v3653_v13 = vpop.xlane.xlu0 %3652  ;;  %v4544_v47 = vmul.f32 %v4348_v36, %v8868_v50  ;;  %v3872_v48 = vmul.f32 %v9155_v55, %v9155_v55  ;;  %v3529_v6 = vpop.f32.mrf.mxu1  ;;  %v4217_v58 = vadd.f32 1e-05, %v4153_v53 }
 0x3ca   : > { %10519 = vst [vmem:[#allocation28_spill] sm:$0xff] %v9158_v3  ;;  %3726 = vadd.xlane.f32.xlu1 %v9158_v3  ;;  %v4091_v50 = vmul.f32 %v9173_v30, %v9173_v30  ;;  %v9184_v42 = vadd.f32 %v8856_v11, %v3529_v6  ;;  %v9191_v53 = vmul.f32 0.0078125, %v3649_v63  ;;  %v9197_v6 = vmul.f32 0.0078125, %v3651_v46 }
 0x3cb   : > { %v3911_v57 = vpop.xlane.xlu1 %3910  ;;  %v4480_v54 = vsub.f32 %v9169_v18, %v4412_v22  ;;  %6555 = vrsqrt.f32 %v4217_v58  ;;  %v3873_v58 = vmul.f32 %v9136_v10, %v9136_v10 }
 0x3cc   : > { %3974 = vadd.xlane.f32.xlu0 %v3871_v51  ;;  %10520 = vst [vmem:[#allocation29_spill] sm:$0xff] %v9184_v42  ;;  %v4155_v0 = vsub.f32 %v4027_v20, %v4091_v50 }
 0x3cd   : > { %v3909_v39 = vpop.xlane.xlu0 %3908  ;;  %v9177_v37 = vadd.f32 %v4544_v47, %v4480_v54 }
 0x3ce   : > { %3976 = vadd.xlane.f32.xlu1 %v3872_v48  ;;  %v4219_v50 = vadd.f32 1e-05, %v4155_v0 }
 0x3cf   : > { %v5940_v14 = vpop.f32.mrf.mxu1  ;;  %v3659_v22 = vpop.xlane.xlu1 %3658 }
 0x3d0   : > { %v9187_v36 = vadd.f32 %v5940_v14, %v8856_v11  ;;  %3972 = vadd.xlane.f32.xlu0 %v3870_v12  ;;  %v3874_v14 = vmul.f32 %v9184_v42, %v9184_v42  ;;  %v4028_v12 = vmul.f32 0.0078125, %v3905_v27  ;;  %6557 = vrsqrt.f32 %v4219_v50 }
 0x3d1   : > { %v6554_v47 = vpop.eup %6553  ;;  %v3657_v54 = vpop.xlane.xlu0 %3656  ;;  %v4031_v50 = vmul.f32 0.0078125, %v3911_v57  ;;  %v9240_v57 = vmul.f32 0.0078125, %v3659_v22 }
 0x3d2   : > { %10521 = vst [vmem:[#allocation30_spill] sm:$0xff] %v9187_v36  ;;  %v4350_v51 = vmul.f32 %v6554_v47, %v9146_v38  ;;  %3730 = vadd.xlane.f32.xlu1 %v9187_v36  ;;  %v3539_v9 = vpop.f32.mrf.mxu1  ;;  %v4029_v47 = vmul.f32 0.0078125, %v3907_v2  ;;  %v9217_v2 = vmul.f32 0.0078125, %v3653_v13 }
 0x3d3   : > { %v3915_v48 = vpop.xlane.xlu1 %3914  ;;  %v9208_v27 = vadd.f32 %v8856_v11, %v3539_v9  ;;  %v9223_v9 = vmul.f32 0.0078125, %v9152_v41 }
 0x3d4   : > { %v4414_v44 = vmul.f32 %v4350_v51, %v9128_v15  ;;  %3720 = vadd.xlane.f32.xlu0 %v9155_v55  ;;  %v4092_v15 = vmul.f32 %v9191_v53, %v9191_v53  ;;  %v4546_v46 = vmul.f32 %v4350_v51, %v8895_v49  ;;  %v4094_v13 = vmul.f32 %v9217_v2, %v9217_v2 }
 0x3d5   : > { %v3913_v20 = vpop.xlane.xlu0 %3912  ;;  %10522 = vst [vmem:[#allocation31_spill] sm:$0xff] %v9208_v27  ;;  %v4033_v1 = vmul.f32 0.0078125, %v3915_v48  ;;  %v3877_v48 = vmul.f32 %v9187_v36, %v9187_v36 }
 0x3d6   : > { %3980 = vadd.xlane.f32.xlu1 %v3874_v14  ;;  %v4482_v63 = vsub.f32 %v9169_v18, %v4414_v44  ;;  %v4093_v14 = vmul.f32 %v9197_v6, %v9197_v6  ;;  %v4156_v44 = vsub.f32 %v4028_v12, %v4092_v15  ;;  %v3876_v12 = vmul.f32 %v9208_v27, %v9208_v27 }
 0x3d7   : > { %v5943_v55 = vpop.f32.mrf.mxu1  ;;  %v9204_v40 = vpop.xlane.xlu1 %3662  ;;  %v3875_v15 = vmul.f32 %v9158_v3, %v9158_v3 }
 0x3d8   : > { %v9211_v0 = vadd.f32 %v5943_v55, %v8856_v11  ;;  %3978 = vadd.xlane.f32.xlu0 %v3873_v58  ;;  %v9215_v35 = vadd.f32 %v4546_v46, %v4482_v63  ;;  %v4157_v49 = vsub.f32 %v4029_v47, %v4093_v14  ;;  %v4030_v55 = vmul.f32 0.0078125, %v3909_v39  ;;  %v6556_v14 = vpop.eup %6555 }
 0x3d9   : > { %v3661_v10 = vpop.xlane.xlu0 %3660  ;;  %v4220_v58 = vadd.f32 1e-05, %v4156_v44  ;;  %v9232_v46 = vmul.f32 0.0078125, %v3657_v54  ;;  %v3549_v41 = vpop.f32.mrf.mxu1  ;;  %v4349_v33 = vmul.f32 %v6556_v14, %v9146_v38  ;;  %v9268_v36 = vmul.f32 0.0078125, %v9204_v40 }
 0x3da   : > { %10523 = vst [vmem:[#allocation32_spill] sm:$0xff] %v9211_v0  ;;  %3734 = vadd.xlane.f32.xlu1 %v9211_v0  ;;  %v4221_v47 = vadd.f32 1e-05, %v4157_v49  ;;  %v4158_v44 = vsub.f32 %v4030_v55, %v4094_v13  ;;  %v3879_v45 = vmul.f32 %v9211_v0, %v9211_v0 }
 0x3db   : > { %v9220_v51 = vpop.xlane.xlu1 %3918  ;;  %6559 = vrsqrt.f32 %v4220_v58  ;;  %v4096_v21 = vmul.f32 %v9232_v46, %v9232_v46 }
 0x3dc   : > { %3724 = vadd.xlane.f32.xlu0 %v9184_v42  ;;  %v4095_v42 = vmul.f32 %v9223_v9, %v9223_v9  ;;  %6561 = vrsqrt.f32 %v4221_v47  ;;  %v4222_v13 = vadd.f32 1e-05, %v4158_v44 }
 0x3dd   : > { %v3917_v63 = vpop.xlane.xlu0 %3916  ;;  %v6558_v47 = vpop.eup %6557 }
 0x3de   : > { %3984 = vadd.xlane.f32.xlu1 %v3876_v12  ;;  %v4032_v12 = vmul.f32 0.0078125, %v3913_v20  ;;  %v4159_v54 = vsub.f32 %v4031_v50, %v4095_v42  ;;  %v9256_v50 = vmul.f32 0.0078125, %v3661_v10  ;;  %6563 = vrsqrt.f32 %v4222_v13 }
 0x3df   : > { %v9234_v39 = vpop.xlane.xlu1 %3666  ;;  %v5946_v3 = vpop.f32.mrf.mxu1  ;;  %v4034_v0 = vmul.f32 0.0078125, %v3917_v63 }
 0x3e0   : > { %3982 = vadd.xlane.f32.xlu0 %v3875_v15  ;;  %v9248_v15 = vadd.f32 %v8856_v11, %v3549_v41  ;;  %v9251_v22 = vadd.f32 %v5946_v3, %v8856_v11  ;;  %v4160_v42 = vsub.f32 %v4032_v12, %v4096_v21  ;;  %v4223_v58 = vadd.f32 1e-05, %v4159_v54 }
 0x3e1   : > { %v3665_v49 = vpop.xlane.xlu0 %3664  ;;  %v4413_v41 = vmul.f32 %v4349_v33, %v9141_v23  ;;  %v3559_v14 = vpop.f32.mrf.mxu1 }
 0x3e2   : > { %3990 = vadd.xlane.f32.xlu1 %v3879_v45  ;;  %10524 = vst [vmem:[#allocation33_spill] sm:$0xff] %v9248_v15  ;;  %10525 = vst [vmem:[#allocation34_spill] sm:$0xff] %v9251_v22  ;;  %v4097_v45 = vmul.f32 %v9240_v57, %v9240_v57  ;;  %v3878_v21 = vmul.f32 %v9248_v15, %v9248_v15  ;;  %v4224_v10 = vadd.f32 1e-05, %v4160_v42  ;;  %6565 = vrsqrt.f32 %v4223_v58 }
 0x3e3   : > { %v9245_v55 = vpop.xlane.xlu1 %3922  ;;  %v4481_v63 = vsub.f32 %v9169_v18, %v4413_v41  ;;  %v3881_v58 = vmul.f32 %v9251_v22, %v9251_v22  ;;  %v9284_v41 = vadd.f32 %v8856_v11, %v3559_v14 }
 0x3e4   : > { %3728 = vadd.xlane.f32.xlu0 %v9208_v27  ;;  %v4161_v3 = vsub.f32 %v4033_v1, %v4097_v45  ;;  %v4351_v27 = vmul.f32 %v6558_v47, %v9146_v38  ;;  %v4098_v1 = vmul.f32 %v9256_v50, %v9256_v50  ;;  %v4035_v45 = vmul.f32 0.0078125, %v9220_v51 }
 0x3e5   : > { %v3921_v20 = vpop.xlane.xlu0 %3920  ;;  %6567 = vrsqrt.f32 %v4224_v10  ;;  %v4545_v47 = vmul.f32 %v4349_v33, %v8863_v17  ;;  %10526 = vst [vmem:[#allocation35_spill] sm:$0xff] %v9284_v41 }
 0x3e6   : > { %3738 = vadd.xlane.f32.xlu1 %v9251_v22  ;;  %v4225_v23 = vadd.f32 1e-05, %v4161_v3  ;;  %v4162_v42 = vsub.f32 %v4034_v0, %v4098_v1  ;;  %v4415_v3 = vmul.f32 %v4351_v27, %v9173_v30  ;;  %v9293_v30 = vmul.f32 0.0078125, %v3665_v49 }
 0x3e7   : > { %v9262_v44 = vpop.xlane.xlu1 %3670  ;;  %v5949_v12 = vpop.f32.mrf.mxu1  ;;  %v4609_v1 = vadd.f32 %v4545_v47, %v4481_v63  ;;  %v3880_v63 = vmul.f32 %v9284_v41, %v9284_v41 }
 0x3e8   : > { %3986 = vadd.xlane.f32.xlu0 %v3877_v48  ;;  %v6560_v34 = vpop.eup %6559  ;;  %6569 = vrsqrt.f32 %v4225_v23  ;;  %v9289_v17 = vadd.f32 %v5949_v12, %v8856_v11  ;;  %v9298_v23 = vmul.f32 0.0078125, %v9234_v39  ;;  %v4483_v11 = vsub.f32 %v9169_v18, %v4415_v3 }
 0x3e9   : > { %v3669_v54 = vpop.xlane.xlu0 %3668  ;;  %v3569_v40 = vpop.f32.mrf.mxu1  ;;  %v4352_v33 = vmul.f32 %v6560_v34, %v9146_v38  ;;  %6571 = vtanh.f32 %v9177_v37 }
 0x3ea   : > { %3988 = vadd.xlane.f32.xlu1 %v3878_v21  ;;  %v4099_v21 = vmul.f32 %v9268_v36, %v9268_v36  ;;  %v6562_v10 = vpop.eup %6561  ;;  %10527 = vst [vmem:[#allocation36_spill] sm:$0xff] %v9289_v17  ;;  %6573 = vtanh.f32 %v4609_v1  ;;  %v3883_v47 = vmul.f32 %v9289_v17, %v9289_v17  ;;  %v4101_v1 = vmul.f32 %v9298_v23, %v9298_v23 }
 0x3eb   : > { %v9272_v13 = vpop.xlane.xlu1 %3926  ;;  %v4353_v12 = vmul.f32 %v6562_v10, %v9146_v38  ;;  %v6564_v37 = vpop.eup %6563  ;;  %v4416_v3 = vmul.f32 %v4352_v33, %v9191_v53  ;;  %v9328_v10 = vmul.f32 0.0078125, %v3669_v54 }
 0x3ec   : > { %3732 = vadd.xlane.f32.xlu0 %v9248_v15  ;;  %v4163_v22 = vsub.f32 %v4035_v45, %v4099_v21  ;;  %v4226_v15 = vadd.f32 1e-05, %v4162_v42  ;;  %v4036_v45 = vmul.f32 0.0078125, %v3921_v20  ;;  %v4547_v42 = vmul.f32 %v4351_v27, %v8892_v59  ;;  %v9322_v59 = vld [vmem:[%s10416_s4 + $0x3] ss:$0 sm:$0xff] }
 0x3ed   : > { %v3925_v48 = vpop.xlane.xlu0 %3924  ;;  %v4100_v20 = vmul.f32 %v9293_v30, %v9293_v30  ;;  %v9325_v27 = vadd.f32 %v9322_v59, %v3569_v40  ;;  %v4417_v53 = vmul.f32 %v4353_v12, %v9197_v6  ;;  %v4484_v6 = vsub.f32 %v9169_v18, %v4416_v3 }
 0x3ee   : > { %3994 = vadd.xlane.f32.xlu1 %v3881_v58  ;;  %v4227_v39 = vadd.f32 1e-05, %v4163_v22  ;;  %6575 = vrsqrt.f32 %v4226_v15  ;;  %v4037_v58 = vmul.f32 0.0078125, %v9245_v55  ;;  %v4611_v55 = vadd.f32 %v4547_v42, %v4483_v11 }
 0x3ef   : > { %v5952_v0 = vpop.f32.mrf.mxu1  ;;  %v9286_v51 = vpop.xlane.xlu1 %3674  ;;  %10528 = vst [vmem:[#allocation37_spill] sm:$0xff] %v9325_v27  ;;  %v4164_v22 = vsub.f32 %v4036_v45, %v4100_v20  ;;  %v4038_v40 = vmul.f32 0.0078125, %v3925_v48  ;;  %v4548_v48 = vmul.f32 %v4352_v33, %v8915_v7 }
 0x3f0   : > { %3736 = vadd.xlane.f32.xlu0 %v9284_v41  ;;  %v6566_v15 = vpop.eup %6565  ;;  %v4354_v41 = vmul.f32 %v6564_v37, %v9146_v38  ;;  %6577 = vrsqrt.f32 %v4227_v39  ;;  %v4165_v19 = vsub.f32 %v4037_v58, %v4101_v1  ;;  %v9334_v60 = vadd.f32 %v9322_v59, %v5952_v0 }
 0x3f1   : > { %v9295_v14 = vpop.xlane.xlu0 %3672  ;;  %v3579_v34 = vpop.f32.mrf.mxu1  ;;  %v4355_v54 = vmul.f32 %v6566_v15, %v9146_v38  ;;  %6579 = vtanh.f32 %v4611_v55  ;;  %v4228_v39 = vadd.f32 1e-05, %v4164_v22  ;;  %v4102_v0 = vmul.f32 %v9328_v10, %v9328_v10 }
 0x3f2   : > { %3742 = vadd.xlane.f32.xlu1 %v9289_v17  ;;  %10529 = vst [vmem:[#allocation38_spill] sm:$0xff] %v9334_v60  ;;  %v6568_v45 = vpop.eup %6567  ;;  %v9342_v42 = vadd.f32 %v9322_v59, %v3579_v34  ;;  %6581 = vtanh.f32 %v9215_v35  ;;  %v4418_v3 = vmul.f32 %v4354_v41, %v9217_v2  ;;  %v4229_v20 = vadd.f32 1e-05, %v4165_v19 }
 0x3f3   : > { %v9306_v49 = vpop.xlane.xlu1 %3930  ;;  %v3882_v34 = vmul.f32 %v9325_v27, %v9325_v27  ;;  %v4485_v1 = vsub.f32 %v9169_v18, %v4417_v53  ;;  %v4356_v55 = vmul.f32 %v6568_v45, %v9146_v38  ;;  %v9358_v15 = vmul.f32 0.0078125, %v9262_v44 }
 0x3f4   : > { %3992 = vadd.xlane.f32.xlu0 %v3880_v63  ;;  %v5955_v63 = vpop.f32.mrf.mxu1  ;;  %10530 = vst [vmem:[#allocation39_spill] sm:$0xff] %v9342_v42  ;;  %v4166_v22 = vsub.f32 %v4038_v40, %v4102_v0  ;;  %v4612_v7 = vadd.f32 %v4548_v48, %v4484_v6  ;;  %v4419_v33 = vmul.f32 %v4355_v54, %v9223_v9  ;;  %6583 = vrsqrt.f32 %v4228_v39 }
 0x3f5   : > { %v9315_v21 = vpop.xlane.xlu0 %3928  ;;  %v6570_v37 = vpop.eup %6569  ;;  %v9364_v19 = vadd.f32 %v9322_v59, %v5955_v63  ;;  %v4549_v53 = vmul.f32 %v4353_v12, %v8911_v29  ;;  %v4039_v44 = vmul.f32 0.0078125, %v9272_v13  ;;  %6585 = vrsqrt.f32 %v4229_v20  ;;  %v9382_v29 = vld [vmem:[%s10416_s4 + $0x6] ss:$0 sm:$0xff] }
 0x3f6   : > { %3998 = vadd.xlane.f32.xlu1 %v3883_v47  ;;  %v3589_v58 = vpop.f32.mrf.mxu1  ;;  %v9371_v45 = vmul.f32 %v6570_v37, %v9146_v38  ;;  %v3885_v63 = vmul.f32 %v9334_v60, %v9334_v60  ;;  %v4486_v12 = vsub.f32 %v9169_v18, %v4418_v3  ;;  %v4420_v13 = vmul.f32 %v4356_v55, %v9232_v46 }
 0x3f7   : > { %v9330_v17 = vpop.xlane.xlu1 %3678  ;;  %10531 = vst [vmem:[#allocation40_spill] sm:$0xff] %v9364_v19  ;;  %v9367_v2 = vadd.f32 %v9322_v59, %v3589_v58  ;;  %v4613_v39 = vadd.f32 %v4549_v53, %v4485_v1  ;;  %v4103_v58 = vmul.f32 %v9358_v15, %v9358_v15  ;;  %v4230_v48 = vadd.f32 1e-05, %v4166_v22 }
 0x3f8   : > { %3740 = vadd.xlane.f32.xlu0 %v9325_v27  ;;  %v6572_v27 = vpop.eup %6571  ;;  %6587 = vtanh.f32 %v4612_v7  ;;  %v3887_v20 = vmul.f32 %v9364_v19, %v9364_v19  ;;  %v4550_v3 = vmul.f32 %v4354_v41, %v8935_v52  ;;  %v4487_v1 = vsub.f32 %v9169_v18, %v4419_v33 }
 0x3f9   : > { %v9337_v11 = vpop.xlane.xlu0 %3676  ;;  %10532 = vst [vmem:[#allocation41_spill] sm:$0xff] %v9367_v2  ;;  %v6574_v9 = vpop.eup %6573  ;;  %v4421_v46 = vmul.f32 %v9371_v45, %v9240_v57  ;;  %v4167_v53 = vsub.f32 %v4039_v44, %v4103_v58  ;;  %v9400_v22 = vmul.f32 0.0078125, %v9295_v14  ;;  %6589 = vtanh.f32 %v4613_v39 }
 0x3fa   : > { %3746 = vadd.xlane.f32.xlu1 %v9334_v60  ;;  %v4614_v43 = vadd.f32 %v4550_v3, %v4486_v12  ;;  %v4551_v52 = vmul.f32 %v4355_v54, %v8931_v16  ;;  %6591 = vrsqrt.f32 %v4230_v48  ;;  %v9410_v57 = vmul.f32 0.0078125, %v9286_v51 }
 0x3fb   : > { %v9347_v47 = vpop.xlane.xlu1 %3934  ;;  %v6576_v0 = vpop.eup %6575  ;;  %v4040_v14 = vmul.f32 0.0078125, %v9315_v21  ;;  %v4488_v44 = vsub.f32 %v9169_v18, %v4420_v13  ;;  %v4552_v16 = vmul.f32 %v4356_v55, %v8953_v62  ;;  %v4231_v51 = vadd.f32 1e-05, %v4167_v53 }
 0x3fc   : > { %3744 = vadd.xlane.f32.xlu0 %v9342_v42  ;;  %v4615_v54 = vadd.f32 %v4551_v52, %v4487_v1  ;;  %v4104_v21 = vmul.f32 %v9400_v22, %v9400_v22  ;;  %v4041_v39 = vmul.f32 0.0078125, %v9306_v49  ;;  %v9435_v62 = vmul.f32 0.0078125, %v9337_v11 }
 0x3fd   : > { %v9360_v35 = vpop.xlane.xlu0 %3932  ;;  %v6578_v41 = vpop.eup %6577  ;;  %v3884_v55 = vmul.f32 %v9342_v42, %v9342_v42  ;;  %v4105_v49 = vmul.f32 %v9410_v57, %v9410_v57  ;;  %6593 = vtanh.f32 %v4614_v43  ;;  %v4553_v11 = vmul.f32 %v9371_v45, %v8950_v28 }
 0x3fe   : > { %3996 = vadd.xlane.f32.xlu1 %v3882_v34  ;;  %v9393_v34 = vmul.f32 %v6572_v27, %v9382_v29  ;;  %v4358_v27 = vmul.f32 %v6576_v0, %v9146_v38  ;;  %v6580_v12 = vpop.eup %6579  ;;  %v4168_v3 = vsub.f32 %v4040_v14, %v4104_v21  ;;  %v4042_v53 = vmul.f32 0.0078125, %v9360_v35 }
 0x3ff   : > { %v5958_v40 = vpop.f32.mrf.mxu1  ;;  %v9374_v6 = vpop.xlane.xlu1 %3682  ;;  %6595 = vtanh.f32 %v4615_v54  ;;  %v4169_v52 = vsub.f32 %v4041_v39, %v4105_v49  ;;  %v9453_v43 = vmul.f32 %v6580_v12, %v9382_v29 }
 0x400   : > { %3748 = vadd.xlane.f32.xlu0 %v9367_v2  ;;  %v6582_v48 = vpop.eup %6581  ;;  %6597 = vrsqrt.f32 %v4231_v51  ;;  %v4043_v51 = vmul.f32 0.0078125, %v9347_v47  ;;  %v4554_v12 = vmul.f32 %v4358_v27, %v8965_v5 }
 0x401   : > { %v9388_v37 = vpop.xlane.xlu0 %3680  ;;  %v3599_v60 = vpop.f32.mrf.mxu1 }
 0x402   : > { %4002 = vadd.xlane.f32.xlu1 %v3885_v63  ;;  %v9405_v63 = vmul.f32 %v6574_v9, %v9382_v29  ;;  %v9417_v9 = vadd.f32 %v9322_v59, %v5958_v40  ;;  %v9420_v0 = vadd.f32 %v9322_v59, %v3599_v60  ;;  %v4489_v40 = vsub.f32 %v9169_v18, %v4421_v46 }
 0x403   : > { %v9402_v7 = vpop.xlane.xlu1 %3938  ;;  %v9431_v60 = vmul.f32 %v6578_v41, %v9146_v38  ;;  %v4616_v46 = vadd.f32 %v4552_v16, %v4488_v44  ;;  %v9450_v41 = vmul.f32 0.0078125, %v9330_v17  ;;  %v6584_v44 = vpop.eup %6583  ;;  %v4106_v16 = vmul.f32 %v9435_v62, %v9435_v62 }
 0x404   : > { %4006 = vadd.xlane.f32.xlu0 %v3887_v20  ;;  %10533 = vst [vmem:[#allocation42_spill] sm:$0xff] %v9417_v9  ;;  %10534 = vst [vmem:[#allocation43_spill] sm:$0xff] %v9420_v0  ;;  %v4422_v20 = vmul.f32 %v4358_v27, %v9256_v50  ;;  %v3889_v50 = vmul.f32 %v9417_v9, %v9417_v9  ;;  %v4617_v45 = vadd.f32 %v4553_v11, %v4489_v40  ;;  %v6586_v54 = vpop.eup %6585 }
 0x405   : > { %v9413_v33 = vpop.xlane.xlu0 %3936  ;;  %v9457_v35 = vmul.f32 %v9431_v60, %v9268_v36  ;;  %v4232_v17 = vadd.f32 1e-05, %v4168_v3  ;;  %6599 = vtanh.f32 %v4616_v46  ;;  %v4170_v49 = vsub.f32 %v4042_v53, %v4106_v16 }
 0x406   : > { %3750 = vadd.xlane.f32.xlu1 %v9364_v19  ;;  %v4490_v28 = vsub.f32 %v9169_v18, %v4422_v20  ;;  %v9467_v36 = vmul.f32 0.0078125, %v9374_v6  ;;  %v4360_v47 = vmul.f32 %v6584_v44, %v9146_v38  ;;  %v4233_v40 = vadd.f32 1e-05, %v4169_v52 }
 0x407   : > { %v5961_v58 = vpop.f32.mrf.mxu1  ;;  %v9427_v13 = vpop.xlane.xlu1 %3686  ;;  %v4107_v3 = vmul.f32 %v9450_v41, %v9450_v41  ;;  %v3886_v27 = vmul.f32 %v9367_v2, %v9367_v2  ;;  %v4361_v6 = vmul.f32 %v6586_v54, %v9146_v38  ;;  %6601 = vtanh.f32 %v4617_v45 }
 0x408   : > { %3752 = vadd.xlane.f32.xlu0 %v9420_v0  ;;  %v9470_v42 = vadd.f32 %v9322_v59, %v5961_v58  ;;  %v4045_v58 = vmul.f32 0.0078125, %v9402_v7  ;;  %v4618_v46 = vadd.f32 %v4554_v12, %v4490_v28  ;;  %6603 = vrsqrt.f32 %v4232_v17 }
 0x409   : > { %v9442_v1 = vpop.xlane.xlu0 %3684  ;;  %v3609_v14 = vpop.f32.mrf.mxu1  ;;  %v4234_v54 = vadd.f32 1e-05, %v4170_v49  ;;  %v4109_v7 = vmul.f32 %v9467_v36, %v9467_v36  ;;  %v4491_v45 = vsub.f32 %v9169_v18, %v9457_v35  ;;  %v4424_v17 = vmul.f32 %v4360_v47, %v9293_v30 }
 0x40a   : > { %4000 = vadd.xlane.f32.xlu1 %v3884_v55  ;;  %v6588_v55 = vpop.eup %6587  ;;  %10535 = vst [vmem:[#allocation44_spill] sm:$0xff] %v9470_v42  ;;  %v9473_v20 = vadd.f32 %v9322_v59, %v3609_v14  ;;  %v9487_v14 = vmul.f32 %v6582_v48, %v9382_v29  ;;  %v3891_v28 = vmul.f32 %v9470_v42, %v9470_v42  ;;  %6605 = vrsqrt.f32 %v4233_v40 }
 0x40b   : > { %v3943_v21 = vpop.xlane.xlu1 %3942  ;;  %v6590_v53 = vpop.eup %6589  ;;  %v9490_v44 = vmul.f32 %v6588_v55, %v9382_v29  ;;  %v9500_v48 = vmul.f32 0.0078125, %v9427_v13  ;;  %v4555_v12 = vmul.f32 %v9431_v60, %v8962_v25  ;;  %v4425_v55 = vmul.f32 %v4361_v6, %v9298_v23 }
 0x40c   : > { %4010 = vadd.xlane.f32.xlu0 %v3889_v50  ;;  %v4171_v50 = vsub.f32 %v4043_v51, %v4107_v3  ;;  %v6592_v16 = vpop.eup %6591  ;;  %v4173_v49 = vsub.f32 %v4045_v58, %v4109_v7  ;;  %6607 = vtanh.f32 %v4618_v46  ;;  %v4556_v3 = vmul.f32 %v4360_v47, %v8977_v56 }
 0x40d   : > { %v9463_v39 = vpop.xlane.xlu0 %3940  ;;  %v9508_v30 = vmul.f32 0.0078125, %v9388_v37  ;;  %v4047_v40 = vmul.f32 0.0078125, %v3943_v21  ;;  %v6594_v2 = vpop.eup %6593  ;;  %6609 = vrsqrt.f32 %v4234_v54  ;;  %v4044_v60 = vmul.f32 0.0078125, %v9413_v33 }
 0x40e   : > { %3754 = vadd.xlane.f32.xlu1 %v9417_v9  ;;  %v4235_v35 = vadd.f32 1e-05, %v4171_v50  ;;  %v6596_v56 = vpop.eup %6595  ;;  %v4111_v37 = vmul.f32 %v9500_v48, %v9500_v48  ;;  %v4492_v58 = vsub.f32 %v9169_v18, %v4424_v17  ;;  %v4237_v50 = vadd.f32 1e-05, %v4173_v49 }
 0x40f   : > { %v5964_v5 = vpop.f32.mrf.mxu1  ;;  %v3691_v11 = vpop.xlane.xlu1 %3690  ;;  %v4493_v54 = vsub.f32 %v9169_v18, %v4425_v55  ;;  %v4108_v33 = vmul.f32 %v9508_v30, %v9508_v30 }
 0x410   : > { %3756 = vadd.xlane.f32.xlu0 %v9473_v20  ;;  %v9511_v9 = vadd.f32 %v9322_v59, %v5964_v5  ;;  %v9513_v25 = vmul.f32 0.0078125, %v3691_v11  ;;  %v4619_v5 = vadd.f32 %v4555_v12, %v4491_v45  ;;  %v6598_v46 = vpop.eup %6597  ;;  %6611 = vrsqrt.f32 %v4235_v35 }
 0x411   : > { %v9484_v52 = vpop.xlane.xlu0 %3688  ;;  %v3619_v51 = vpop.f32.mrf.mxu1  ;;  %v4175_v7 = vsub.f32 %v4047_v40, %v4111_v37  ;;  %v9534_v12 = vmul.f32 0.0078125, %v9442_v1  ;;  %v9541_v35 = vmul.f32 %v6598_v46, %v9146_v38  ;;  %v4172_v40 = vsub.f32 %v4044_v60, %v4108_v33 }
 0x412   : > { %4004 = vadd.xlane.f32.xlu1 %v3886_v27  ;;  %v4362_v27 = vmul.f32 %v6592_v16, %v9146_v38  ;;  %10536 = vst [vmem:[#allocation45_spill] sm:$0xff] %v9513_v25  ;;  %v9516_v23 = vadd.f32 %v9322_v59, %v3619_v51  ;;  %v3888_v16 = vmul.f32 %v9420_v0, %v9420_v0  ;;  %v6600_v17 = vpop.eup %6599  ;;  %6613 = vrsqrt.f32 %v4237_v50 }
 0x413   : > { %v3695_v21 = vpop.xlane.xlu1 %3694  ;;  %v4557_v51 = vmul.f32 %v4361_v6, %v8974_v32  ;;  %v4113_v49 = vmul.f32 %v9513_v25, %v9513_v25  ;;  %v3893_v55 = vmul.f32 %v9511_v9, %v9511_v9  ;;  %v9544_v32 = vmul.f32 %v6590_v53, %v9382_v29 }
 0x414   : > { %4014 = vadd.xlane.f32.xlu0 %v3891_v28  ;;  %v4426_v45 = vmul.f32 %v4362_v27, %v9328_v10  ;;  %v4620_v10 = vadd.f32 %v4556_v3, %v4492_v58  ;;  %v4046_v1 = vmul.f32 0.0078125, %v9463_v39  ;;  %v9548_v25 = vmul.f32 %v6594_v2, %v9382_v29 }
 0x415   : > { %v3947_v13 = vpop.xlane.xlu0 %3946  ;;  %v4621_v0 = vadd.f32 %v4557_v51, %v4493_v54  ;;  %v9551_v60 = vmul.f32 %v6596_v56, %v9382_v29  ;;  %6615 = vtanh.f32 %v4619_v5  ;;  %v4110_v53 = vmul.f32 %v9534_v12, %v9534_v12 }
 0x416   : > { %3758 = vadd.xlane.f32.xlu1 %v9470_v42  ;;  %v4049_v11 = vmul.f32 0.0078125, %v3947_v13  ;;  %v4239_v42 = vadd.f32 1e-05, %v4175_v7  ;;  %v9555_v3 = vmul.f32 0.0078125, %v3695_v21  ;;  %v4494_v58 = vsub.f32 %v9169_v18, %v4426_v45 }
 0x417   : > { %v9522_v47 = vpop.f32.mrf.mxu1  ;;  %v9564_v2 = vmul.f32 %v9541_v35, %v9358_v15  ;;  %v4236_v56 = vadd.f32 1e-05, %v4172_v40  ;;  %6617 = vtanh.f32 %v4620_v10  ;;  %v4558_v5 = vmul.f32 %v4362_v27, %v8989_v26 }
 0x418   : > { %3760 = vadd.xlane.f32.xlu0 %v9516_v23  ;;  %v4177_v6 = vsub.f32 %v4049_v11, %v4113_v49  ;;  %v4174_v54 = vsub.f32 %v4046_v1, %v4110_v53  ;;  %v3890_v33 = vmul.f32 %v9473_v20, %v9473_v20  ;;  %6619 = vtanh.f32 %v4621_v0 }
 0x419   : > { %v3945_v28 = vpop.xlane.xlu0 %3944  ;;  %v3629_v13 = vpop.f32.mrf.mxu1  ;;  %6621 = vrsqrt.f32 %v4239_v42  ;;  %v9572_v15 = vmul.f32 0.0078125, %v9484_v52  ;;  %v9575_v49 = vmul.f32 %v6600_v17, %v9382_v29  ;;  %v4115_v26 = vmul.f32 %v9555_v3, %v9555_v3 }
 0x41a   : > { %4008 = vadd.xlane.f32.xlu1 %v3888_v16  ;;  %v6602_v16 = vpop.eup %6601  ;;  %v9558_v39 = vadd.f32 %v9322_v59, %v3629_v13  ;;  %v4241_v21 = vadd.f32 1e-05, %v4177_v6  ;;  %v4622_v0 = vadd.f32 %v4558_v5, %v4494_v58  ;;  %6623 = vrsqrt.f32 %v4236_v56 }
 0x41b   : > { %v3699_v37 = vpop.xlane.xlu1 %3698  ;;  %v6604_v46 = vpop.eup %6603  ;;  %v4048_v13 = vmul.f32 0.0078125, %v3945_v28  ;;  %v9584_v10 = vmul.f32 %v6602_v16, %v9382_v29  ;;  %v4238_v17 = vadd.f32 1e-05, %v4174_v54  ;;  %v9588_v1 = vadd.f32 %v9322_v59, %v9522_v47 }
 0x41c   : > { %4018 = vadd.xlane.f32.xlu0 %v3893_v55  ;;  %v6606_v11 = vpop.eup %6605  ;;  %v4364_v51 = vmul.f32 %v6604_v46, %v9146_v38  ;;  %v3894_v55 = vmul.f32 %v9558_v39, %v9558_v39  ;;  %6625 = vrsqrt.f32 %v4241_v21  ;;  %v4495_v16 = vsub.f32 %v9169_v18, %v9564_v2 }
 0x41d   : > { %v3693_v19 = vpop.xlane.xlu0 %3692  ;;  %v6608_v7 = vpop.eup %6607  ;;  %v4365_v46 = vmul.f32 %v6606_v11, %v9146_v38  ;;  %v9597_v5 = vmul.f32 0.0078125, %v3699_v37  ;;  %6627 = vtanh.f32 %v4622_v0  ;;  %v3892_v2 = vmul.f32 %v9516_v23, %v9516_v23 }
 0x41e   : > { %3762 = vadd.xlane.f32.xlu1 %v9511_v9  ;;  %v6610_v40 = vpop.eup %6609  ;;  %v9581_v42 = vmul.f32 0.0078125, %v3693_v19  ;;  %v4428_v53 = vmul.f32 %v4364_v51, %v9400_v22  ;;  %v4112_v19 = vmul.f32 %v9572_v15, %v9572_v15  ;;  %6629 = vrsqrt.f32 %v4238_v17 }
 0x41f   : > { %v3949_v50 = vpop.xlane.xlu1 %3948  ;;  %v6612_v58 = vpop.eup %6611  ;;  %v4366_v56 = vmul.f32 %v6610_v40, %v9146_v38  ;;  %v9608_v37 = vmul.f32 %v6608_v7, %v9382_v29  ;;  %v4117_v7 = vmul.f32 %v9597_v5, %v9597_v5 }
 0x420   : > { %3764 = vadd.xlane.f32.xlu0 %v9558_v39  ;;  %v4176_v47 = vsub.f32 %v4048_v13, %v4112_v19  ;;  %v4114_v22 = vmul.f32 %v9581_v42, %v9581_v42  ;;  %v4050_v11 = vmul.f32 0.0078125, %v3949_v50  ;;  %v4367_v50 = vmul.f32 %v6612_v58, %v9146_v38 }
 0x421   : > { %v3951_v45 = vpop.xlane.xlu0 %3950 }
 0x422   : > { %4012 = vadd.xlane.f32.xlu1 %v3890_v33  ;;  %v4051_v27 = vmul.f32 0.0078125, %v3951_v45  ;;  %v4559_v33 = vmul.f32 %v9541_v35, %v8986_v61  ;;  %v6614_v45 = vpop.eup %6613  ;;  %v4560_v61 = vmul.f32 %v4364_v51, %v9001_v4  ;;  %v4240_v35 = vadd.f32 1e-05, %v4176_v47 }
 0x423   : > { %v3703_v52 = vpop.xlane.xlu1 %3702  ;;  %v9615_v0 = vpop.eup %6615  ;;  %v4178_v13 = vsub.f32 %v4050_v11, %v4114_v22  ;;  %v4431_v51 = vmul.f32 %v4367_v50, %v9450_v41  ;;  %v4561_v11 = vmul.f32 %v4365_v46, %v8998_v8  ;;  %v4562_v41 = vmul.f32 %v4366_v56, %v9013_v31 }
 0x424   : > { %v4179_v6 = vsub.f32 %v4051_v27, %v4115_v26  ;;  %4020 = vadd.xlane.f32.xlu0 %v3894_v55  ;;  %v4429_v26 = vmul.f32 %v4365_v46, %v9410_v57  ;;  %v4496_v55 = vsub.f32 %v9169_v18, %v4428_v53  ;;  %v9623_v19 = vpop.eup %6617  ;;  %v9626_v53 = vmul.f32 %v6614_v45, %v9146_v38 }
 0x425   : > { %v3697_v28 = vpop.xlane.xlu0 %3696  ;;  %v4623_v58 = vadd.f32 %v4559_v33, %v4495_v16  ;;  %v9631_v4 = vpop.eup %6619  ;;  %v4242_v16 = vadd.f32 1e-05, %v4178_v13  ;;  %v4563_v13 = vmul.f32 %v4367_v50, %v9010_v24  ;;  %v9668_v24 = vld [vmem:[%s10416_s4 + $0x5] ss:$0 sm:$0xff] }
 0x426   : > { %v4243_v59 = vadd.f32 1e-05, %v4179_v6  ;;  %3766 = vadd.xlane.f32.xlu1 %v9588_v1  ;;  %v9602_v54 = vmul.f32 0.0078125, %v3697_v28  ;;  %v3895_v28 = vmul.f32 %v9588_v1, %v9588_v1  ;;  %v4624_v47 = vadd.f32 %v4560_v61, %v4496_v55 }
 0x427   : > { %v3953_v21 = vpop.xlane.xlu1 %3952  ;;  %v4497_v22 = vsub.f32 %v9169_v18, %v4429_v26  ;;  %v4433_v26 = vmul.f32 %v9626_v53, %v9467_v36 }
 0x428   : > { %4805 = vadd.xlane.f32.xlu0 %v9393_v34  ;;  %6631 = vrsqrt.f32 %v4243_v59  ;;  %v4430_v34 = vmul.f32 %v4366_v56, %v9435_v62  ;;  %v4116_v57 = vmul.f32 %v9602_v54, %v9602_v54  ;;  %v4052_v17 = vmul.f32 0.0078125, %v3953_v21  ;;  %v6622_v21 = vpop.eup %6621 }
 0x429   : > { %v3955_v27 = vpop.xlane.xlu0 %3954  ;;  %6633 = vrsqrt.f32 %v4240_v35  ;;  %v6624_v55 = vpop.eup %6623  ;;  %v4625_v61 = vadd.f32 %v4561_v11, %v4497_v22  ;;  %v4499_v35 = vsub.f32 %v9169_v18, %v4431_v51  ;;  %v4501_v50 = vsub.f32 %v9668_v24, %v4433_v26 }
 0x42a   : > { %4016 = vadd.xlane.f32.xlu1 %v3892_v2  ;;  %v4053_v40 = vmul.f32 0.0078125, %v3955_v27  ;;  %v9636_v2 = vmul.f32 0.0078125, %v3703_v52  ;;  %v4498_v27 = vsub.f32 %v9169_v18, %v4430_v34  ;;  %v4180_v33 = vsub.f32 %v4052_v17, %v4116_v57  ;;  %v6626_v46 = vpop.eup %6625 }
 0x42b   : > { %v3707_v6 = vpop.xlane.xlu1 %3706  ;;  %v4371_v34 = vmul.f32 %v6622_v21, %v9146_v38  ;;  %v9653_v57 = vpop.eup %6627  ;;  %v9658_v38 = vld [vmem:[%s10416_s4 + $0x4] ss:$0 sm:$0xff]  ;;  %v9674_v22 = vmul.f32 %v9615_v0, %v9382_v29  ;;  %v4627_v11 = vadd.f32 %v4563_v13, %v4499_v35  ;;  %v9701_v35 = vmul.f32 %v9631_v4, %v9382_v29 }
 0x42c   : > { %v4181_v62 = vsub.f32 %v4053_v40, %v4117_v7  ;;  %4809 = vadd.xlane.f32.xlu0 %v9487_v14  ;;  %v4119_v31 = vmul.f32 %v9636_v2, %v9636_v2  ;;  %v4626_v56 = vadd.f32 %v4562_v41, %v4498_v27  ;;  %v4244_v18 = vadd.f32 1e-05, %v4180_v33 }
 0x42d   : > { %v3701_v59 = vpop.xlane.xlu0 %3700  ;;  %v4435_v51 = vmul.f32 %v4371_v34, %v9500_v48 }
 0x42e   : > { %v4245_v45 = vadd.f32 1e-05, %v4181_v62  ;;  %4022 = vadd.xlane.f32.xlu1 %v3895_v28  ;;  %v9638_v14 = vmul.f32 0.0078125, %v3701_v59 }
 0x42f   : > { %v3957_v7 = vpop.xlane.xlu1 %3956 }
 0x430   : > { %6635 = vrsqrt.f32 %v4245_v45  ;;  %v4118_v8 = vmul.f32 %v9638_v14, %v9638_v14  ;;  %v4054_v52 = vmul.f32 0.0078125, %v3957_v7  ;;  %4813 = vadd.xlane.f32.xlu0 %v9490_v44  ;;  %v9661_v44 = vmul.f32 %v9658_v38, %v6624_v55  ;;  %v10537_v45 = vld [vmem:[#allocation6_spill] sm:$0xff]  ;;  %v10538_v7 = vld [vmem:[#allocation45_spill] sm:$0xff] }
 0x431   : > { %v3959_v40 = vpop.xlane.xlu0 %3958  ;;  %6637 = vtanh.f32 %v4623_v58  ;;  %v6630_v58 = vpop.eup %6629  ;;  %v4565_v27 = vmul.f32 %v9626_v53, %v10537_v45 }
 0x432   : > { %4807 = vadd.xlane.f32.xlu1 %v9405_v63  ;;  %v4055_v36 = vmul.f32 0.0078125, %v3959_v40  ;;  %6639 = vrsqrt.f32 %v4242_v16  ;;  %v4182_v17 = vsub.f32 %v4054_v52, %v4118_v8  ;;  %v4373_v63 = vmul.f32 %v9658_v38, %v6626_v46 }
 0x433   : > { %v3711_v62 = vpop.xlane.xlu1 %3710  ;;  %6641 = vtanh.f32 %v4624_v47  ;;  %v4432_v48 = vmul.f32 %v9661_v44, %v9508_v30  ;;  %v4629_v55 = vadd.f32 %v4565_v27, %v4501_v50  ;;  %v4503_v8 = vsub.f32 %v9668_v24, %v4435_v51 }
 0x434   : > { %v4183_v28 = vsub.f32 %v4055_v36, %v4119_v31  ;;  %4817 = vadd.xlane.f32.xlu0 %v9548_v25  ;;  %6643 = vtanh.f32 %v4625_v61  ;;  %v9676_v25 = vmul.f32 0.0078125, %v3707_v6  ;;  %v4246_v16 = vadd.f32 1e-05, %v4182_v17  ;;  %v10539_v31 = vld [vmem:[#allocation8_spill] sm:$0xff] }
 0x435   : > { %v3705_v59 = vpop.xlane.xlu0 %3704  ;;  %v6632_v21 = vpop.eup %6631  ;;  %6645 = vtanh.f32 %v4626_v56  ;;  %v4437_v41 = vmul.f32 %v4373_v63, %v10538_v7  ;;  %v4567_v36 = vmul.f32 %v4371_v34, %v10539_v31 }
 0x436   : > { %v4247_v47 = vadd.f32 1e-05, %v4183_v28  ;;  %4811 = vadd.xlane.f32.xlu1 %v9453_v43  ;;  %6647 = vrsqrt.f32 %v4244_v18  ;;  %v9683_v33 = vmul.f32 0.0078125, %v3705_v59  ;;  %v9688_v43 = vmul.f32 %v9658_v38, %v6630_v58  ;;  %v6634_v56 = vpop.eup %6633 }
 0x437   : > { %v3961_v0 = vpop.xlane.xlu1 %3960  ;;  %v4375_v53 = vmul.f32 %v9658_v38, %v6632_v21  ;;  %v4121_v52 = vmul.f32 %v9676_v25, %v9676_v25  ;;  %v4500_v18 = vsub.f32 %v9668_v24, %v4432_v48  ;;  %v4631_v58 = vadd.f32 %v4567_v36, %v4503_v8 }
 0x438   : > { %6649 = vrsqrt.f32 %v4247_v47  ;;  %v4056_v6 = vmul.f32 0.0078125, %v3961_v0  ;;  %4821 = vadd.xlane.f32.xlu0 %v9575_v49  ;;  %v4120_v30 = vmul.f32 %v9683_v33, %v9683_v33  ;;  %v4753_v49 = vmul.f32 %v9623_v19, %v9382_v29 }
 0x439   : > { %v3963_v26 = vpop.xlane.xlu0 %3962  ;;  %6651 = vtanh.f32 %v4627_v11  ;;  %v4434_v17 = vmul.f32 %v9688_v43, %v9534_v12  ;;  %v4439_v28 = vmul.f32 %v4375_v53, %v9555_v3  ;;  %v9711_v59 = vmul.f32 0.0078125, %v3711_v62  ;;  %v10540_v11 = vld [vmem:[#allocation10_spill] sm:$0xff]  ;;  %v10541_v3 = vld [vmem:[#allocation7_spill] sm:$0xff] }
 0x43a   : > { %4815 = vadd.xlane.f32.xlu1 %v9544_v32  ;;  %v4057_v46 = vmul.f32 0.0078125, %v3963_v26  ;;  %6653 = vrsqrt.f32 %v4246_v16  ;;  %v4184_v40 = vsub.f32 %v4056_v6, %v4120_v30  ;;  %v4505_v32 = vsub.f32 %v9668_v24, %v4437_v41 }
 0x43b   : > { %v3715_v61 = vpop.xlane.xlu1 %3714  ;;  %6655 = vtanh.f32 %v4629_v55  ;;  %v4569_v21 = vmul.f32 %v4373_v63, %v10540_v11  ;;  %v4372_v47 = vmul.f32 %v9658_v38, %v6634_v56  ;;  %v4564_v27 = vmul.f32 %v9661_v44, %v10541_v3 }
 0x43c   : > { %v4185_v13 = vsub.f32 %v4057_v46, %v4121_v52  ;;  %4825 = vadd.xlane.f32.xlu0 %v9608_v37  ;;  %v4248_v50 = vadd.f32 1e-05, %v4184_v40  ;;  %v4755_v62 = vmul.f32 %v9653_v57, %v9382_v29  ;;  %v4507_v6 = vsub.f32 %v9668_v24, %v4439_v28  ;;  %v10542_v40 = vld [vmem:[#allocation12_spill] sm:$0xff] }
 0x43d   : > { %v6636_v19 = vpop.eup %6635  ;;  %v3709_v4 = vpop.xlane.xlu0 %3708  ;;  %v4633_v0 = vadd.f32 %v4569_v21, %v4505_v32  ;;  %v4628_v41 = vadd.f32 %v4564_v27, %v4500_v18  ;;  %v4123_v30 = vmul.f32 %v9711_v59, %v9711_v59  ;;  %v4502_v26 = vsub.f32 %v9668_v24, %v4434_v17  ;;  %v10543_v17 = vld [vmem:[#allocation9_spill] sm:$0xff] }
 0x43e   : > { %v6638_v51 = vpop.eup %6637  ;;  %v4377_v34 = vmul.f32 %v9658_v38, %v6636_v19  ;;  %v4249_v37 = vadd.f32 1e-05, %v4185_v13  ;;  %4819 = vadd.xlane.f32.xlu1 %v9551_v60  ;;  %6657 = vrsqrt.f32 %v4248_v50  ;;  %v9716_v45 = vmul.f32 0.0078125, %v3709_v4 }
 0x43f   : > { %v3965_v12 = vpop.xlane.xlu1 %3964  ;;  %v6640_v48 = vpop.eup %6639  ;;  %v4436_v52 = vmul.f32 %v4372_v47, %v9572_v15  ;;  %v4571_v31 = vmul.f32 %v4375_v53, %v10542_v40  ;;  %v4756_v13 = vmul.f32 %v6638_v51, %v9382_v29  ;;  %v4566_v15 = vmul.f32 %v9688_v43, %v10543_v17 }
 0x440   : > { %6659 = vrsqrt.f32 %v4249_v37  ;;  %v4058_v16 = vmul.f32 0.0078125, %v3965_v12  ;;  %4829 = vadd.xlane.f32.xlu0 %v4753_v49  ;;  %v6642_v60 = vpop.eup %6641  ;;  %v4122_v63 = vmul.f32 %v9716_v45, %v9716_v45  ;;  %v4441_v44 = vmul.f32 %v4377_v34, %v9597_v5 }
 0x441   : > { %v3967_v7 = vpop.xlane.xlu0 %3966  ;;  %6661 = vtanh.f32 %v4631_v58  ;;  %v9725_v55 = vpop.eup %6643  ;;  %v4374_v46 = vmul.f32 %v9658_v38, %v6640_v48  ;;  %v4757_v5 = vmul.f32 %v6642_v60, %v9382_v29  ;;  %v4635_v19 = vadd.f32 %v4571_v31, %v4507_v6  ;;  %v10546_v6 = vld [vmem:[#allocation15_spill] sm:$0xff] }
 0x442   : > { %4823 = vadd.xlane.f32.xlu1 %v9584_v10  ;;  %v4059_v57 = vmul.f32 0.0078125, %v3967_v7  ;;  %v6646_v8 = vpop.eup %6645  ;;  %v4186_v49 = vsub.f32 %v4058_v16, %v4122_v63  ;;  %6663 = vtanh.f32 %v4633_v0  ;;  %v9740_v50 = vmul.f32 0.0078125, %v3715_v61  ;;  %v10544_v61 = vld [vmem:[#allocation13_spill] sm:$0xff] }
 0x443   : > { %v6648_v36 = vpop.eup %6647  ;;  %6665 = vtanh.f32 %v4628_v41  ;;  %v4509_v4 = vsub.f32 %v9668_v24, %v4441_v44  ;;  %v4438_v51 = vmul.f32 %v4374_v46, %v9581_v42  ;;  %v4630_v37 = vadd.f32 %v4566_v15, %v4502_v26  ;;  %v10545_v42 = vld [vmem:[#allocation11_spill] sm:$0xff]  ;;  %v3719_v7 = vpop.xlane.xlu1 %3718 }
 0x444   : > { %v4187_v56 = vsub.f32 %v4059_v57, %v4123_v30  ;;  %4833 = vadd.xlane.f32.xlu0 %v4755_v62  ;;  %v4250_v32 = vadd.f32 1e-05, %v4186_v49  ;;  %v4504_v11 = vsub.f32 %v9668_v24, %v4436_v52  ;;  %v4376_v43 = vmul.f32 %v9658_v38, %v6648_v36  ;;  %v10547_v36 = vld [vmem:[#allocation14_spill] sm:$0xff] }
 0x445   : > { %v6650_v10 = vpop.eup %6649  ;;  %v3713_v18 = vpop.xlane.xlu0 %3712  ;;  %v4573_v3 = vmul.f32 %v4377_v34, %v10544_v61  ;;  %v4759_v16 = vmul.f32 %v6646_v8, %v9382_v29  ;;  %v4568_v62 = vmul.f32 %v4372_v47, %v10545_v42  ;;  %v4125_v0 = vmul.f32 %v9740_v50, %v9740_v50  ;;  %v10549_v61 = vld [vmem:[#allocation18_spill] sm:$0xff] }
 0x446   : > { %v4379_v28 = vmul.f32 %v9658_v38, %v6650_v10  ;;  %v4251_v53 = vadd.f32 1e-05, %v4187_v56  ;;  %4827 = vadd.xlane.f32.xlu1 %v9674_v22  ;;  %v9744_v58 = vpop.eup %6651  ;;  %6667 = vrsqrt.f32 %v4250_v32  ;;  %v9751_v27 = vmul.f32 0.0078125, %v3713_v18 }
 0x447   : > { %v6654_v21 = vpop.eup %6653  ;;  %v4632_v41 = vadd.f32 %v4568_v62, %v4504_v11  ;;  %v4506_v30 = vsub.f32 %v9668_v24, %v4438_v51  ;;  %v4440_v47 = vmul.f32 %v4376_v43, %v9602_v54  ;;  %v4570_v56 = vmul.f32 %v4374_v46, %v10547_v36 }
 0x448   : > { %v4443_v12 = vmul.f32 %v4379_v28, %v9636_v2  ;;  %6669 = vrsqrt.f32 %v4251_v53  ;;  %4837 = vadd.xlane.f32.xlu0 %v4757_v5  ;;  %v6656_v22 = vpop.eup %6655  ;;  %v4637_v2 = vadd.f32 %v4573_v3, %v4509_v4  ;;  %v4378_v34 = vmul.f32 %v9658_v38, %v6654_v21 }
 0x449   : > { %v3971_v48 = vpop.xlane.xlu0 %3970  ;;  %6671 = vtanh.f32 %v4635_v19  ;;  %v4575_v44 = vmul.f32 %v4379_v28, %v10546_v6  ;;  %v4762_v8 = vmul.f32 %v6656_v22, %v9382_v29  ;;  %v4124_v49 = vmul.f32 %v9751_v27, %v9751_v27 }
 0x44a   : > { %4831 = vadd.xlane.f32.xlu1 %v9701_v35  ;;  %v4061_v60 = vmul.f32 0.0078125, %v3971_v48  ;;  %v4511_v63 = vsub.f32 %v9668_v24, %v4443_v12  ;;  %6673 = vtanh.f32 %v4630_v37  ;;  %v4442_v18 = vmul.f32 %v4378_v34, %v9638_v14  ;;  %v10548_v37 = vld [vmem:[#allocation16_spill] sm:$0xff] }
 0x44b   : > { %v6658_v57 = vpop.eup %6657  ;;  %6675 = vtanh.f32 %v4637_v2  ;;  %v9770_v19 = vpop.xlane.xlu1 %3722  ;;  %v4758_v17 = vmul.f32 %v9725_v55, %v9382_v29  ;;  %v4634_v15 = vadd.f32 %v4570_v56, %v4506_v30  ;;  %v4508_v53 = vsub.f32 %v9668_v24, %v4440_v47 }
 0x44c   : > { %v4189_v26 = vsub.f32 %v4061_v60, %v4125_v0  ;;  %4841 = vadd.xlane.f32.xlu0 %v4759_v16  ;;  %v4380_v52 = vmul.f32 %v9658_v38, %v6658_v57  ;;  %v4639_v31 = vadd.f32 %v4575_v44, %v4511_v63  ;;  %6677 = vtanh.f32 %v4632_v41 }
 0x44d   : > { %v6660_v35 = vpop.eup %6659  ;;  %v3969_v40 = vpop.xlane.xlu0 %3968  ;;  %v4572_v11 = vmul.f32 %v4376_v43, %v10548_v37  ;;  %v9779_v55 = vmul.f32 0.0078125, %v3719_v7  ;;  %v4510_v48 = vsub.f32 %v9668_v24, %v4442_v18  ;;  %v10550_v7 = vld [vmem:[#allocation17_spill] sm:$0xff]  ;;  %v10552_v18 = vld [vmem:[#allocation20_spill] sm:$0xff] }
 0x44e   : > { %v6662_v5 = vpop.eup %6661  ;;  %v4381_v10 = vmul.f32 %v9658_v38, %v6660_v35  ;;  %v4253_v32 = vadd.f32 1e-05, %v4189_v26  ;;  %4835 = vadd.xlane.f32.xlu1 %v4756_v13  ;;  %v4060_v54 = vmul.f32 0.0078125, %v3969_v40  ;;  %v4444_v13 = vmul.f32 %v4380_v52, %v9683_v33  ;;  %v10551_v35 = vld [vmem:[#allocation19_spill] sm:$0xff] }
 0x44f   : > { %v6664_v4 = vpop.eup %6663  ;;  %v4764_v14 = vmul.f32 %v6662_v5, %v9382_v29  ;;  %v4760_v33 = vmul.f32 %v9744_v58, %v9382_v29  ;;  %v4636_v62 = vadd.f32 %v4572_v11, %v4508_v53  ;;  %v4574_v41 = vmul.f32 %v4378_v34, %v10550_v7 }
 0x450   : > { %v4445_v28 = vmul.f32 %v4381_v10, %v9676_v25  ;;  %6679 = vrsqrt.f32 %v4253_v32  ;;  %v4188_v46 = vsub.f32 %v4060_v54, %v4124_v49  ;;  %4847 = vadd.xlane.f32.xlu0 %v4762_v8  ;;  %v6666_v21 = vpop.eup %6665  ;;  %v4577_v3 = vmul.f32 %v4381_v10, %v10549_v61 }
 0x451   : > { %v3717_v51 = vpop.xlane.xlu0 %3716  ;;  %6681 = vtanh.f32 %v4639_v31  ;;  %v4766_v43 = vmul.f32 %v6664_v4, %v9382_v29  ;;  %v4512_v58 = vsub.f32 %v9668_v24, %v4444_v13  ;;  %v4127_v30 = vmul.f32 %v9779_v55, %v9779_v55 }
 0x452   : > { %v4252_v12 = vadd.f32 1e-05, %v4188_v46  ;;  %4839 = vadd.xlane.f32.xlu1 %v4758_v17  ;;  %v4513_v25 = vsub.f32 %v9668_v24, %v4445_v28  ;;  %6683 = vtanh.f32 %v4634_v15  ;;  %v9790_v2 = vmul.f32 0.0078125, %v3717_v51  ;;  %v10553_v46 = vld [vmem:[#allocation21_spill] sm:$0xff] }
 0x453   : > { %v9783_v22 = vpop.xlane.xlu1 %3726  ;;  %v6668_v16 = vpop.eup %6667  ;;  %v4638_v8 = vadd.f32 %v4574_v41, %v4510_v48  ;;  %v4576_v49 = vmul.f32 %v4380_v52, %v10551_v35  ;;  %v4761_v31 = vmul.f32 %v6666_v21, %v9382_v29  ;;  %v9817_v11 = vmul.f32 0.0078125, %v9770_v19 }
 0x454   : > { %6685 = vrsqrt.f32 %v4252_v12  ;;  %4851 = vadd.xlane.f32.xlu0 %v4764_v14  ;;  %v4641_v42 = vadd.f32 %v4577_v3, %v4513_v25  ;;  %v4382_v60 = vmul.f32 %v9658_v38, %v6668_v16  ;;  %v4126_v56 = vmul.f32 %v9790_v2, %v9790_v2 }
 0x455   : > { %v6670_v0 = vpop.eup %6669  ;;  %v3975_v63 = vpop.xlane.xlu0 %3974  ;;  %v4640_v32 = vadd.f32 %v4576_v49, %v4512_v58 }
 0x456   : > { %v6672_v6 = vpop.eup %6671  ;;  %v4383_v44 = vmul.f32 %v9658_v38, %v6670_v0  ;;  %4843 = vadd.xlane.f32.xlu1 %v4760_v33  ;;  %v4063_v57 = vmul.f32 0.0078125, %v3975_v63  ;;  %6687 = vtanh.f32 %v4641_v42  ;;  %v4446_v47 = vmul.f32 %v4382_v60, %v9716_v45 }
 0x457   : > { %v3977_v26 = vpop.xlane.xlu1 %3976  ;;  %6689 = vtanh.f32 %v4636_v62  ;;  %v6674_v36 = vpop.eup %6673  ;;  %v4768_v10 = vmul.f32 %v6672_v6, %v9382_v29  ;;  %v4578_v53 = vmul.f32 %v4382_v60, %v10553_v46  ;;  %v9813_v29 = vld [vmem:[%s10416_s4 + $0x6] ss:$0 sm:$0xff]  ;;  %v4129_v63 = vmul.f32 %v9817_v11, %v9817_v11 }
 0x458   : > { %v4447_v40 = vmul.f32 %v4383_v44, %v9711_v59  ;;  %v4191_v34 = vsub.f32 %v4063_v57, %v4127_v30  ;;  %4855 = vadd.xlane.f32.xlu0 %v4766_v43  ;;  %v4514_v45 = vsub.f32 %v9668_v24, %v4446_v47  ;;  %v4579_v17 = vmul.f32 %v4383_v44, %v10552_v18  ;;  %v6676_v15 = vpop.eup %6675  ;;  %v10554_v47 = vld [vmem:[#allocation22_spill] sm:$0xff] }
 0x459   : > { %v3973_v5 = vpop.xlane.xlu0 %3972  ;;  %6691 = vtanh.f32 %v4638_v8  ;;  %v6678_v4 = vpop.eup %6677  ;;  %v4763_v51 = vmul.f32 %v9813_v29, %v6674_v36  ;;  %v4770_v48 = vmul.f32 %v9813_v29, %v6676_v15  ;;  %v4064_v62 = vmul.f32 0.0078125, %v3977_v26 }
 0x45a   : > { %v4255_v54 = vadd.f32 1e-05, %v4191_v34  ;;  %4845 = vadd.xlane.f32.xlu1 %v4761_v31  ;;  %v4062_v52 = vmul.f32 0.0078125, %v3973_v5  ;;  %v4515_v59 = vsub.f32 %v9668_v24, %v4447_v40  ;;  %v4642_v12 = vadd.f32 %v4578_v53, %v4514_v45 }
 0x45b   : > { %v9807_v28 = vpop.xlane.xlu1 %3730  ;;  %v4765_v43 = vmul.f32 %v9813_v29, %v6678_v4  ;;  %v9836_v31 = vmul.f32 0.0078125, %v9783_v22 }
 0x45c   : > { %6693 = vrsqrt.f32 %v4255_v54  ;;  %v4190_v13 = vsub.f32 %v4062_v52, %v4126_v56  ;;  %4859 = vadd.xlane.f32.xlu0 %v4768_v10  ;;  %v4643_v14 = vadd.f32 %v4579_v17, %v4515_v59  ;;  %v10555_v52 = vld [vmem:[#allocation24_spill] sm:$0xff] }
 0x45d   : > { %v6680_v37 = vpop.eup %6679  ;;  %v3721_v21 = vpop.xlane.xlu0 %3720  ;;  %6695 = vtanh.f32 %v4640_v32 }
 0x45e   : > { %v6682_v25 = vpop.eup %6681  ;;  %v4385_v61 = vmul.f32 %v9658_v38, %v6680_v37  ;;  %v4254_v3 = vadd.f32 1e-05, %v4190_v13  ;;  %4849 = vadd.xlane.f32.xlu1 %v4763_v51  ;;  %v9820_v33 = vmul.f32 0.0078125, %v3721_v21  ;;  %6697 = vtanh.f32 %v4643_v14 }
 0x45f   : > { %v3981_v16 = vpop.xlane.xlu1 %3980  ;;  %v6684_v42 = vpop.eup %6683  ;;  %v4772_v41 = vmul.f32 %v9813_v29, %v6682_v25  ;;  %v4131_v51 = vmul.f32 %v9836_v31, %v9836_v31 }
 0x460   : > { %v4449_v19 = vmul.f32 %v4385_v61, %v9740_v50  ;;  %6699 = vrsqrt.f32 %v4254_v3  ;;  %v4128_v0 = vmul.f32 %v9820_v33, %v9820_v33  ;;  %4863 = vadd.xlane.f32.xlu0 %v4770_v48  ;;  %v4581_v26 = vmul.f32 %v4385_v61, %v10554_v47 }
 0x461   : > { %v6686_v60 = vpop.eup %6685  ;;  %v3979_v7 = vpop.xlane.xlu0 %3978  ;;  %6701 = vtanh.f32 %v4642_v12  ;;  %v4767_v40 = vmul.f32 %v9813_v29, %v6684_v42  ;;  %v4066_v22 = vmul.f32 0.0078125, %v3981_v16 }
 0x462   : > { %v4384_v58 = vmul.f32 %v9658_v38, %v6686_v60  ;;  %v4192_v6 = vsub.f32 %v4064_v62, %v4128_v0  ;;  %4853 = vadd.xlane.f32.xlu1 %v4765_v43  ;;  %v4065_v44 = vmul.f32 0.0078125, %v3979_v7  ;;  %v4517_v50 = vsub.f32 %v9668_v24, %v4449_v19 }
 0x463   : > { %v6688_v30 = vpop.eup %6687  ;;  %v3735_v57 = vpop.xlane.xlu1 %3734  ;;  %v9856_v62 = vmul.f32 0.0078125, %v9807_v28 }
 0x464   : > { %v4448_v8 = vmul.f32 %v4384_v58, %v9751_v27  ;;  %v4256_v35 = vadd.f32 1e-05, %v4192_v6  ;;  %v4193_v49 = vsub.f32 %v4065_v44, %v4129_v63  ;;  %4867 = vadd.xlane.f32.xlu0 %v4772_v41  ;;  %v6690_v34 = vpop.eup %6689  ;;  %v4645_v56 = vadd.f32 %v4581_v26, %v4517_v50  ;;  %v10556_v50 = vld [vmem:[#allocation23_spill] sm:$0xff] }
 0x465   : > { %v3725_v36 = vpop.xlane.xlu0 %3724  ;;  %v4774_v32 = vmul.f32 %v9813_v29, %v6688_v30  ;;  %v9841_v45 = vmul.f32 0.0078125, %v3735_v57  ;;  %v4580_v59 = vmul.f32 %v4384_v58, %v10555_v52  ;;  %v4769_v15 = vmul.f32 %v9813_v29, %v6690_v34 }
 0x466   : > { %6703 = vrsqrt.f32 %v4256_v35  ;;  %v4257_v5 = vadd.f32 1e-05, %v4193_v49  ;;  %4857 = vadd.xlane.f32.xlu1 %v4767_v40  ;;  %v9838_v10 = vmul.f32 0.0078125, %v3725_v36  ;;  %v4516_v54 = vsub.f32 %v9668_v24, %v4448_v8  ;;  %v6692_v18 = vpop.eup %6691 }
 0x467   : > { %v3985_v27 = vpop.xlane.xlu1 %3984  ;;  %6705 = vtanh.f32 %v4645_v56  ;;  %v4135_v12 = vmul.f32 %v9841_v45, %v9841_v45  ;;  %v4771_v61 = vmul.f32 %v9813_v29, %v6692_v18  ;;  %v4133_v34 = vmul.f32 %v9856_v62, %v9856_v62 }
 0x468   : > { %6707 = vrsqrt.f32 %v4257_v5  ;;  %v4130_v17 = vmul.f32 %v9838_v10, %v9838_v10  ;;  %4871 = vadd.xlane.f32.xlu0 %v4774_v32  ;;  %v4644_v4 = vadd.f32 %v4580_v59, %v4516_v54  ;;  %v4068_v26 = vmul.f32 0.0078125, %v3985_v27  ;;  %v10557_v54 = vld [vmem:[#allocation26_spill] sm:$0xff] }
 0x469   : > { %v6694_v46 = vpop.eup %6693  ;;  %v3983_v53 = vpop.xlane.xlu0 %3982 }
 0x46a   : > { %v6696_v13 = vpop.eup %6695  ;;  %v4387_v14 = vmul.f32 %v9658_v38, %v6694_v46  ;;  %v4194_v37 = vsub.f32 %v4066_v22, %v4130_v17  ;;  %4861 = vadd.xlane.f32.xlu1 %v4769_v15  ;;  %v4067_v21 = vmul.f32 0.0078125, %v3983_v53  ;;  %6709 = vtanh.f32 %v4644_v4 }
 0x46b   : > { %v3991_v25 = vpop.xlane.xlu1 %3990  ;;  %v6698_v3 = vpop.eup %6697  ;;  %v4773_v47 = vmul.f32 %v9813_v29, %v6696_v13 }
 0x46c   : > { %v4451_v48 = vmul.f32 %v4387_v14, %v9779_v55  ;;  %v4258_v16 = vadd.f32 1e-05, %v4194_v37  ;;  %v4195_v43 = vsub.f32 %v4067_v21, %v4131_v51  ;;  %v4071_v42 = vmul.f32 0.0078125, %v3991_v25  ;;  %v10558_v37 = vld [vmem:[#allocation27_spill] sm:$0xff] }
 0x46d   : > { %v6700_v19 = vpop.eup %6699  ;;  %v3729_v0 = vpop.xlane.xlu0 %3728  ;;  %v4776_v60 = vmul.f32 %v9813_v29, %v6698_v3  ;;  %v4583_v30 = vmul.f32 %v4387_v14, %v10556_v50 }
 0x46e   : > { %v6702_v63 = vpop.eup %6701  ;;  %v4386_v7 = vmul.f32 %v9658_v38, %v6700_v19  ;;  %6711 = vrsqrt.f32 %v4258_v16  ;;  %v4259_v41 = vadd.f32 1e-05, %v4195_v43  ;;  %v4199_v58 = vsub.f32 %v4071_v42, %v4135_v12  ;;  %4865 = vadd.xlane.f32.xlu1 %v4771_v61 }
 0x46f   : > { %v9860_v6 = vmul.f32 0.0078125, %v3729_v0  ;;  %v3739_v55 = vpop.xlane.xlu1 %3738  ;;  %4875 = vadd.xlane.f32.xlu0 %v4776_v60  ;;  %v4519_v44 = vsub.f32 %v9668_v24, %v4451_v48  ;;  %v4775_v49 = vmul.f32 %v9813_v29, %v6702_v63 }
 0x470   : > { %v4450_v28 = vmul.f32 %v4386_v7, %v9790_v2  ;;  %6713 = vrsqrt.f32 %v4259_v41  ;;  %v4263_v57 = vadd.f32 1e-05, %v4199_v58  ;;  %v9872_v32 = vmul.f32 0.0078125, %v3739_v55 }
 0x471   : > { %v4132_v8 = vmul.f32 %v9860_v6, %v9860_v6  ;;  %v3987_v35 = vpop.xlane.xlu0 %3986  ;;  %v4647_v40 = vadd.f32 %v4583_v30, %v4519_v44  ;;  %v4582_v52 = vmul.f32 %v4386_v7, %v10557_v54 }
 0x472   : > { %6715 = vrsqrt.f32 %v4263_v57  ;;  %4869 = vadd.xlane.f32.xlu1 %v4773_v47  ;;  %v4069_v36 = vmul.f32 0.0078125, %v3987_v35  ;;  %v4518_v2 = vsub.f32 %v9668_v24, %v4450_v28  ;;  %v4137_v12 = vmul.f32 %v9872_v32, %v9872_v32 }
 0x473   : > { %v6704_v56 = vpop.eup %6703  ;;  %v4196_v5 = vsub.f32 %v4068_v26, %v4132_v8  ;;  %v3989_v27 = vpop.xlane.xlu1 %3988  ;;  %4873 = vadd.xlane.f32.xlu0 %v4775_v49  ;;  %6717 = vtanh.f32 %v4647_v40 }
 0x474   : > { %v6706_v59 = vpop.eup %6705  ;;  %v4388_v18 = vmul.f32 %v9658_v38, %v6704_v56  ;;  %v4197_v22 = vsub.f32 %v4069_v36, %v4133_v34  ;;  %v4646_v4 = vadd.f32 %v4582_v52, %v4518_v2  ;;  %v4070_v43 = vmul.f32 0.0078125, %v3989_v27  ;;  %v10560_v2 = vld [vmem:[#allocation29_spill] sm:$0xff] }
 0x475   : > { %v6708_v17 = vpop.eup %6707  ;;  %v4260_v15 = vadd.f32 1e-05, %v4196_v5  ;;  %v3733_v46 = vpop.xlane.xlu0 %3732  ;;  %v4778_v53 = vmul.f32 %v9813_v29, %v6706_v59 }
 0x476   : > { %v4452_v13 = vmul.f32 %v4388_v18, %v9820_v33  ;;  %v4389_v51 = vmul.f32 %v9658_v38, %v6708_v17  ;;  %v4261_v14 = vadd.f32 1e-05, %v4197_v22  ;;  %v4584_v21 = vmul.f32 %v4388_v18, %v10558_v37 }
 0x477   : > { %6719 = vrsqrt.f32 %v4260_v15  ;;  %v9882_v25 = vmul.f32 0.0078125, %v3733_v46  ;;  %v3995_v61 = vpop.xlane.xlu1 %3994  ;;  %4879 = vadd.xlane.f32.xlu0 %v4778_v53  ;;  %v6710_v3 = vpop.eup %6709 }
 0x478   : > { %v4520_v48 = vsub.f32 %v9668_v24, %v4452_v13  ;;  %v4453_v16 = vmul.f32 %v4389_v51, %v9817_v11  ;;  %6721 = vrsqrt.f32 %v4261_v14  ;;  %v4073_v33 = vmul.f32 0.0078125, %v3995_v61  ;;  %v10559_v11 = vld [vmem:[#allocation25_spill] sm:$0xff] }
 0x479   : > { %v4134_v42 = vmul.f32 %v9882_v25, %v9882_v25  ;;  %v3737_v19 = vpop.xlane.xlu0 %3736  ;;  %v4777_v0 = vmul.f32 %v9813_v29, %v6710_v3  ;;  %6723 = vtanh.f32 %v4646_v4  ;;  %v4585_v50 = vmul.f32 %v4389_v51, %v10559_v11 }
 0x47a   : > { %v4648_v60 = vadd.f32 %v4584_v21, %v4520_v48  ;;  %v4201_v63 = vsub.f32 %v4073_v33, %v4137_v12  ;;  %v9889_v7 = vmul.f32 0.0078125, %v3737_v19  ;;  %v4521_v41 = vsub.f32 %v9668_v24, %v4453_v16  ;;  %v10561_v21 = vld [vmem:[#allocation28_spill] sm:$0xff] }
 0x47b   : > { %v6712_v58 = vpop.eup %6711  ;;  %v4198_v55 = vsub.f32 %v4070_v43, %v4134_v42  ;;  %v3743_v44 = vpop.xlane.xlu1 %3742  ;;  %4877 = vadd.xlane.f32.xlu1 %v4777_v0 }
 0x47c   : > { %6725 = vtanh.f32 %v4648_v60  ;;  %v4390_v30 = vmul.f32 %v9658_v38, %v6712_v58  ;;  %v4265_v28 = vadd.f32 1e-05, %v4201_v63  ;;  %v9894_v26 = vmul.f32 0.0078125, %v3743_v44 }
 0x47d   : > { %v6714_v57 = vpop.eup %6713  ;;  %v4262_v47 = vadd.f32 1e-05, %v4198_v55  ;;  %v3993_v8 = vpop.xlane.xlu0 %3992  ;;  %v4649_v35 = vadd.f32 %v4585_v50, %v4521_v41  ;;  %v4136_v34 = vmul.f32 %v9889_v7, %v9889_v7 }
 0x47e   : > { %v4454_v49 = vmul.f32 %v4390_v30, %v9838_v10  ;;  %v4391_v40 = vmul.f32 %v9658_v38, %v6714_v57  ;;  %6727 = vrsqrt.f32 %v4265_v28  ;;  %v4586_v56 = vmul.f32 %v4390_v30, %v10560_v2  ;;  %v10562_v30 = vld [vmem:[#allocation31_spill] sm:$0xff]  ;;  %v10563_v57 = vld [vmem:[#allocation32_spill] sm:$0xff] }
 0x47f   : > { %v6716_v36 = vpop.eup %6715  ;;  %6729 = vrsqrt.f32 %v4262_v47  ;;  %v4139_v5 = vmul.f32 %v9894_v26, %v9894_v26  ;;  %v4072_v27 = vmul.f32 0.0078125, %v3993_v8  ;;  %v3999_v54 = vpop.xlane.xlu1 %3998 }
 0x480   : > { %v6718_v52 = vpop.eup %6717  ;;  %v4522_v59 = vsub.f32 %v9668_v24, %v4454_v49  ;;  %v4455_v10 = vmul.f32 %v4391_v40, %v9836_v31  ;;  %v4395_v18 = vmul.f32 %v9658_v38, %v6716_v36  ;;  %v4075_v22 = vmul.f32 0.0078125, %v3999_v54 }
 0x481   : > { %v4200_v17 = vsub.f32 %v4072_v27, %v4136_v34  ;;  %v3741_v15 = vpop.xlane.xlu0 %3740  ;;  %v4780_v46 = vmul.f32 %v9813_v29, %v6718_v52  ;;  %6731 = vtanh.f32 %v4649_v35  ;;  %v4587_v12 = vmul.f32 %v4391_v40, %v10561_v21  ;;  %v10564_v34 = vld [vmem:[#allocation30_spill] sm:$0xff] }
 0x482   : > { %v4650_v53 = vadd.f32 %v4586_v56, %v4522_v59  ;;  %v4203_v4 = vsub.f32 %v4075_v22, %v4139_v5  ;;  %v4459_v13 = vmul.f32 %v4395_v18, %v9841_v45  ;;  %v4523_v37 = vsub.f32 %v9668_v24, %v4455_v10 }
 0x483   : > { %v4264_v51 = vadd.f32 1e-05, %v4200_v17  ;;  %v3747_v14 = vpop.xlane.xlu1 %3746  ;;  %4883 = vadd.xlane.f32.xlu0 %v4780_v46  ;;  %v9910_v3 = vmul.f32 0.0078125, %v3741_v15  ;;  %v4591_v47 = vmul.f32 %v4395_v18, %v10563_v57 }
 0x484   : > { %v6720_v31 = vpop.eup %6719  ;;  %6733 = vtanh.f32 %v4650_v53  ;;  %v4267_v61 = vadd.f32 1e-05, %v4203_v4  ;;  %v4651_v43 = vadd.f32 %v4587_v12, %v4523_v37  ;;  %v4527_v63 = vsub.f32 %v9668_v24, %v4459_v13 }
 0x485   : > { %v6722_v48 = vpop.eup %6721  ;;  %v4392_v16 = vmul.f32 %v9658_v38, %v6720_v31  ;;  %6735 = vrsqrt.f32 %v4264_v51  ;;  %v3745_v33 = vpop.xlane.xlu0 %3744  ;;  %v4138_v58 = vmul.f32 %v9910_v3, %v9910_v3  ;;  %v9920_v55 = vmul.f32 0.0078125, %v3747_v14 }
 0x486   : > { %v6724_v42 = vpop.eup %6723  ;;  %v4393_v45 = vmul.f32 %v9658_v38, %v6722_v48  ;;  %6737 = vrsqrt.f32 %v4267_v61  ;;  %v4655_v56 = vadd.f32 %v4591_v47, %v4527_v63  ;;  %v9934_v4 = vmul.f32 0.0078125, %v3745_v33  ;;  %v10566_v48 = vld [vmem:[#allocation34_spill] sm:$0xff] }
 0x487   : > { %v4456_v19 = vmul.f32 %v4392_v16, %v9860_v6  ;;  %v3997_v0 = vpop.xlane.xlu1 %3996  ;;  %v4779_v60 = vmul.f32 %v9813_v29, %v6724_v42  ;;  %6739 = vtanh.f32 %v4651_v43  ;;  %v4588_v28 = vmul.f32 %v4392_v16, %v10562_v30 }
 0x488   : > { %v4457_v41 = vmul.f32 %v4393_v45, %v9856_v62  ;;  %v4074_v44 = vmul.f32 0.0078125, %v3997_v0  ;;  %v4589_v36 = vmul.f32 %v4393_v45, %v10564_v34  ;;  %v4141_v54 = vmul.f32 %v9920_v55, %v9920_v55  ;;  %v10568_v34 = vld [vmem:[#allocation36_spill] sm:$0xff] }
 0x489   : > { %v6726_v11 = vpop.eup %6725  ;;  %v4524_v50 = vsub.f32 %v9668_v24, %v4456_v19  ;;  %4881 = vadd.xlane.f32.xlu1 %v4779_v60  ;;  %v3749_v6 = vpop.xlane.xlu0 %3748 }
 0x48a   : > { %v4202_v8 = vsub.f32 %v4074_v44, %v4138_v58  ;;  %v4781_v35 = vmul.f32 %v9813_v29, %v6726_v11  ;;  %v4525_v62 = vsub.f32 %v9668_v24, %v4457_v41  ;;  %v4140_v11 = vmul.f32 %v9934_v4, %v9934_v4 }
 0x48b   : > { %v6728_v49 = vpop.eup %6727  ;;  %v4652_v40 = vadd.f32 %v4588_v28, %v4524_v50  ;;  %v4003_v2 = vpop.xlane.xlu1 %4002 }
 0x48c   : > { %v6730_v5 = vpop.eup %6729  ;;  %v4397_v27 = vmul.f32 %v9658_v38, %v6728_v49  ;;  %v4266_v52 = vadd.f32 1e-05, %v4202_v8  ;;  %v4077_v59 = vmul.f32 0.0078125, %v4003_v2  ;;  %v4653_v22 = vadd.f32 %v4589_v36, %v4525_v62 }
 0x48d   : > { %6741 = vtanh.f32 %v4652_v40  ;;  %v4394_v10 = vmul.f32 %v9658_v38, %v6730_v5  ;;  %4885 = vadd.xlane.f32.xlu1 %v4781_v35  ;;  %v4007_v18 = vpop.xlane.xlu0 %4006  ;;  %v9953_v35 = vmul.f32 0.0078125, %v3749_v6  ;;  %v10567_v40 = vld [vmem:[#allocation35_spill] sm:$0xff] }
 0x48e   : > { %v6732_v17 = vpop.eup %6731  ;;  %v4461_v15 = vmul.f32 %v4397_v27, %v9872_v32  ;;  %6743 = vrsqrt.f32 %v4266_v52  ;;  %v4205_v46 = vsub.f32 %v4077_v59, %v4141_v54  ;;  %v10565_v32 = vld [vmem:[#allocation33_spill] sm:$0xff]  ;;  %v4593_v16 = vmul.f32 %v4397_v27, %v10566_v48 }
 0x48f   : > { %v4458_v53 = vmul.f32 %v4394_v10, %v9882_v25  ;;  %v3751_v13 = vpop.xlane.xlu1 %3750  ;;  %v4782_v51 = vmul.f32 %v9813_v29, %v6732_v17  ;;  %6745 = vtanh.f32 %v4655_v56  ;;  %v4590_v61 = vmul.f32 %v4394_v10, %v10565_v32 }
 0x490   : > { %v4269_v14 = vadd.f32 1e-05, %v4205_v46  ;;  %v9937_v37 = vmul.f32 0.0078125, %v3751_v13  ;;  %6747 = vtanh.f32 %v4653_v22  ;;  %v4529_v21 = vsub.f32 %v9668_v24, %v4461_v15 }
 0x491   : > { %v6734_v12 = vpop.eup %6733  ;;  %v4526_v31 = vsub.f32 %v9668_v24, %v4458_v53  ;;  %4887 = vadd.xlane.f32.xlu0 %v4782_v51  ;;  %v3753_v25 = vpop.xlane.xlu0 %3752  ;;  %v4079_v43 = vmul.f32 0.0078125, %v4007_v18  ;;  %v4142_v53 = vmul.f32 %v9953_v35, %v9953_v35 }
 0x492   : > { %v6736_v33 = vpop.eup %6735  ;;  %6749 = vrsqrt.f32 %v4269_v14  ;;  %v4143_v42 = vmul.f32 %v9937_v37, %v9937_v37  ;;  %v4783_v45 = vmul.f32 %v9813_v29, %v6734_v12  ;;  %v4657_v41 = vadd.f32 %v4593_v16, %v4529_v21 }
 0x493   : > { %v6738_v19 = vpop.eup %6737  ;;  %v4654_v0 = vadd.f32 %v4590_v61, %v4526_v31  ;;  %v4396_v60 = vmul.f32 %v9658_v38, %v6736_v33  ;;  %v4001_v63 = vpop.xlane.xlu1 %4000  ;;  %v5063_v12 = vlaneseq  ;;  %v9977_v16 = vmul.f32 0.0078125, %v3753_v25 }
 0x494   : > { %v6740_v58 = vpop.eup %6739  ;;  %v4399_v44 = vmul.f32 %v9658_v38, %v6738_v19  ;;  %v4207_v50 = vsub.f32 %v4079_v43, %v4143_v42  ;;  %v4076_v30 = vmul.f32 0.0078125, %v4001_v63  ;;  %4889 = vadd.xlane.f32.xlu1 %v4783_v45 }
 0x495   : > { %6751 = vtanh.f32 %v4654_v0  ;;  %v4460_v28 = vmul.f32 %v4396_v60, %v9889_v7  ;;  %v4011_v57 = vpop.xlane.xlu0 %4010  ;;  %v4784_v47 = vmul.f32 %v9813_v29, %v6740_v58  ;;  %v4592_v38 = vmul.f32 %v4396_v60, %v10567_v40  ;;  %v10569_v60 = vld [vmem:[#allocation37_spill] sm:$0xff] }
 0x496   : > { %v4463_v8 = vmul.f32 %v4399_v44, %v9894_v26  ;;  %v4271_v62 = vadd.f32 1e-05, %v4207_v50  ;;  %v4204_v49 = vsub.f32 %v4076_v30, %v4140_v11  ;;  %v4595_v36 = vmul.f32 %v4399_v44, %v10568_v34  ;;  %v9994_v58 = vld [vmem:[%s10416_s4 + $0x5] ss:$0 sm:$0xff] }
 0x497   : > { %v3755_v2 = vpop.xlane.xlu1 %3754  ;;  %4891 = vadd.xlane.f32.xlu0 %v4784_v47  ;;  %6753 = vtanh.f32 %v4657_v41  ;;  %v4528_v56 = vsub.f32 %v9668_v24, %v4460_v28  ;;  %v4081_v52 = vmul.f32 0.0078125, %v4011_v57  ;;  %v9987_v41 = vand.u32 127, %v5063_v12 }
 0x498   : > { %6755 = vrsqrt.f32 %v4271_v62  ;;  %v4268_v7 = vadd.f32 1e-05, %v4204_v49  ;;  %v9958_v5 = vmul.f32 0.0078125, %v3755_v2  ;;  %v4531_v27 = vsub.f32 %v9668_v24, %v4463_v8  ;;  %v9969_v24 = vld [vmem:[%s10416_s4 + $0x4] ss:$0 sm:$0xff]  ;;  %v10570_v2 = vld [vmem:[#allocation38_spill] sm:$0xff] }
 0x499   : > { %v9961_v26 = vpop.xlane.xlu0 %3756  ;;  %v4656_v6 = vadd.f32 %v4592_v38, %v4528_v56  ;;  %v9989_v25 = vshrl.u32 %v5063_v12, 7  ;;  %v5076_v62 = vadd.s32 4294967280, %v9987_v41  ;;  %v4144_v40 = vmul.f32 %v9977_v16, %v9977_v16 }
 0x49a   : > { %v6742_v54 = vpop.eup %6741  ;;  %6757 = vrsqrt.f32 %v4268_v7  ;;  %v4145_v59 = vmul.f32 %v9958_v5, %v9958_v5  ;;  %v4659_v10 = vadd.f32 %v4595_v36, %v4531_v27 }
 0x49b   : > { %v6744_v18 = vpop.eup %6743  ;;  %v4005_v22 = vpop.xlane.xlu1 %4004  ;;  %v4785_v17 = vmul.f32 %v9813_v29, %v6742_v54  ;;  %6759 = vtanh.f32 %v4656_v6  ;;  %v10008_v6 = vstv %s9974_s17  ;;  %s6881_s17 = scalar_lea.vmem %s6880_s16, 128 }
 0x49c   : > { %v6746_v15 = vpop.eup %6745  ;;  %v4398_v46 = vmul.f32 %v9969_v24, %v6744_v18  ;;  %v4209_v13 = vsub.f32 %v4081_v52, %v4145_v59  ;;  %v4078_v51 = vmul.f32 0.0078125, %v4005_v22  ;;  %6761 = vtanh.f32 %v4659_v10  ;;  %p6883_p1 = scmp.lt.s32.totalorder %s6881_s17, %s6875_s13 }
 0x49d   : > { %v6748_v14 = vpop.eup %6747  ;;  %4893 = vadd.xlane.f32.xlu1 %v4785_v17  ;;  %v4015_v21 = vpop.xlane.xlu0 %4014  ;;  %v4788_v42 = vmul.f32 %v9813_v29, %v6746_v15  ;;  %v10013_v10 = vsub.s32 %v9987_v41, %v9989_v25  ;;  %v10016_v17 = vsub.s32 %v5076_v62, %v9989_v25 }
 0x49e   : > { %v4462_v31 = vmul.f32 %v4398_v46, %v9910_v3  ;;  %v4273_v32 = vadd.f32 1e-05, %v4209_v13  ;;  %v4206_v61 = vsub.f32 %v4078_v51, %v4142_v53  ;;  %v4786_v43 = vmul.f32 %v9813_v29, %v6748_v14  ;;  %p6884_p2 = por %p6883_p1, %p6882_p0 }
 0x49f   : > { %v6750_v48 = vpop.eup %6749  ;;  %v3759_v33 = vpop.xlane.xlu1 %3758  ;;  %v4594_v63 = vmul.f32 %v4398_v46, %v10569_v60  ;;  %v4083_v30 = vmul.f32 0.0078125, %v4015_v21  ;;  %v5090_v46 = vadd.s32 4294967264, %v9987_v41  ;;  %v5069_v53 = vadd.s32 4294967288, %v9987_v41 }
 0x4a0   : > { %v4401_v45 = vmul.f32 %v9969_v24, %v6750_v48  ;;  %6763 = vrsqrt.f32 %v4273_v32  ;;  %v4270_v19 = vadd.f32 1e-05, %v4206_v61  ;;  %v9982_v0 = vmul.f32 0.0078125, %v3759_v33  ;;  %4895 = vadd.xlane.f32.xlu0 %v4786_v43  ;;  %v10571_v43 = vld [vmem:[#allocation40_spill] sm:$0xff]  ;;  %p6885_p3 = pnand %p6884_p2, %p6878_p13 }
 0x4a1   : > { %4899 = vadd.xlane.f32.xlu1 %v4788_v42  ;;  %v9985_v3 = vpop.xlane.xlu0 %3760  ;;  %v4530_v44 = vsub.f32 %v9994_v58, %v4462_v31  ;;  %v10023_v21 = vmul.f32 0.0078125, %v9961_v26  ;;  %v10041_v62 = vsub.s32 %v5090_v46, %v9989_v25  ;;  %v5083_v46 = vadd.s32 4294967272, %v9987_v41 }
 0x4a2   : > { %v6752_v11 = vpop.eup %6751  ;;  %v4465_v50 = vmul.f32 %v4401_v45, %v9920_v55  ;;  %6765 = vrsqrt.f32 %v4270_v19  ;;  %v4147_v28 = vmul.f32 %v9982_v0, %v9982_v0  ;;  %v4597_v56 = vmul.f32 %v4401_v45, %v10570_v2 }
 0x4a3   : > { %v4009_v57 = vpop.xlane.xlu1 %4008  ;;  %v4787_v47 = vmul.f32 %v9813_v29, %v6752_v11  ;;  %v4658_v8 = vadd.f32 %v4594_v63, %v4530_v44  ;;  %v4146_v11 = vmul.f32 %v10023_v21, %v10023_v21 }
 0x4a4   : > { %v6754_v49 = vpop.eup %6753  ;;  %v4211_v38 = vsub.f32 %v4083_v30, %v4147_v28  ;;  %v4080_v34 = vmul.f32 0.0078125, %v4009_v57  ;;  %v4533_v55 = vsub.f32 %v9994_v58, %v4465_v50 }
 0x4a5   : > { %v6756_v36 = vpop.eup %6755  ;;  %v4790_v7 = vmul.f32 %v9813_v29, %v6754_v49  ;;  %4897 = vadd.xlane.f32.xlu1 %v4787_v47  ;;  %v4019_v27 = vpop.xlane.xlu0 %4018  ;;  %6767 = vtanh.f32 %v4658_v8  ;;  %v10044_v49 = vsub.s32 %v5069_v53, %v9989_v25 }
 0x4a6   : > { %v4403_v54 = vmul.f32 %v9969_v24, %v6756_v36  ;;  %v4275_v52 = vadd.f32 1e-05, %v4211_v38  ;;  %v4208_v59 = vsub.f32 %v4080_v34, %v4144_v40  ;;  %v4661_v15 = vadd.f32 %v4597_v56, %v4533_v55 }
 0x4a7   : > { %v6758_v18 = vpop.eup %6757  ;;  %4903 = vadd.xlane.f32.xlu0 %v4790_v7  ;;  %v3763_v22 = vpop.xlane.xlu1 %3762  ;;  %v4085_v45 = vmul.f32 0.0078125, %v4019_v27  ;;  %v10048_v36 = vmul.f32 0.0078125, %v9985_v3  ;;  %v5104_v27 = vadd.s32 4294967248, %v9987_v41  ;;  %v5118_v3 = vadd.s32 4294967232, %v9987_v41 }
 0x4a8   : > { %v6760_v13 = vpop.eup %6759  ;;  %v4467_v51 = vmul.f32 %v4403_v54, %v9937_v37  ;;  %v4400_v14 = vmul.f32 %v9969_v24, %v6758_v18  ;;  %6769 = vrsqrt.f32 %v4275_v52  ;;  %v4272_v12 = vadd.f32 1e-05, %v4208_v59 }
 0x4a9   : > { %v10025_v31 = vmul.f32 0.0078125, %v3763_v22  ;;  %v3765_v32 = vpop.xlane.xlu0 %3764  ;;  %v4789_v61 = vmul.f32 %v9813_v29, %v6760_v13  ;;  %6771 = vtanh.f32 %v4661_v15  ;;  %v6762_v48 = vpop.eup %6761  ;;  %v4599_v42 = vmul.f32 %v4403_v54, %v10571_v43 }
 0x4aa   : > { %v4535_v33 = vsub.f32 %v9994_v58, %v4467_v51  ;;  %v4464_v37 = vmul.f32 %v4400_v14, %v9934_v4  ;;  %6773 = vrsqrt.f32 %v4272_v12  ;;  %v10033_v19 = vmul.f32 0.0078125, %v3765_v32  ;;  %v10572_v4 = vld [vmem:[#allocation39_spill] sm:$0xff]  ;;  %v10573_v51 = vld [vmem:[#allocation42_spill] sm:$0xff] }
 0x4ab   : > { %v4149_v26 = vmul.f32 %v10025_v31, %v10025_v31  ;;  %v4013_v60 = vpop.xlane.xlu1 %4012  ;;  %4901 = vadd.xlane.f32.xlu1 %v4789_v61  ;;  %v4792_v63 = vmul.f32 %v9813_v29, %v6762_v48  ;;  %v4596_v57 = vmul.f32 %v4400_v14, %v10572_v4 }
 0x4ac   : > { %v4663_v44 = vadd.f32 %v4599_v42, %v4535_v33  ;;  %v4082_v50 = vmul.f32 0.0078125, %v4013_v60  ;;  %v4532_v30 = vsub.f32 %v9994_v58, %v4464_v37  ;;  %v4150_v56 = vmul.f32 %v10033_v19, %v10033_v19 }
 0x4ad   : > { %v6764_v28 = vpop.eup %6763  ;;  %v4213_v47 = vsub.f32 %v4085_v45, %v4149_v26  ;;  %4907 = vadd.xlane.f32.xlu0 %v4792_v63  ;;  %v4021_v8 = vpop.xlane.xlu0 %4020  ;;  %v5097_v33 = vadd.s32 4294967256, %v9987_v41  ;;  %v10574_v26 = vld [vmem:[#allocation41_spill] sm:$0xff] }
 0x4ae   : > { %6775 = vtanh.f32 %v4663_v44  ;;  %v4405_v40 = vmul.f32 %v9969_v24, %v6764_v28  ;;  %v4210_v38 = vsub.f32 %v4082_v50, %v4146_v11  ;;  %v4086_v34 = vmul.f32 0.0078125, %v4021_v8 }
 0x4af   : > { %v6766_v55 = vpop.eup %6765  ;;  %v4277_v2 = vadd.f32 1e-05, %v4213_v47  ;;  %v3767_v7 = vpop.xlane.xlu1 %3766  ;;  %v4660_v18 = vadd.f32 %v4596_v57, %v4532_v30  ;;  %v10069_v44 = vsub.s32 %v5104_v27, %v9989_v25  ;;  %v10073_v28 = vsub.s32 %v5083_v46, %v9989_v25 }
 0x4b0   : > { %v4469_v54 = vmul.f32 %v4405_v40, %v9958_v5  ;;  %v4402_v52 = vmul.f32 %v9969_v24, %v6766_v55  ;;  %v4274_v59 = vadd.f32 1e-05, %v4210_v38  ;;  %v4214_v22 = vsub.f32 %v4086_v34, %v4150_v56 }
 0x4b1   : > { %6777 = vrsqrt.f32 %v4277_v2  ;;  %v4806_v15 = vpop.xlane.xlu0 %4805  ;;  %v4601_v14 = vmul.f32 %v4405_v40, %v10573_v51  ;;  %v4148_v5 = vmul.f32 %v10048_v36, %v10048_v36  ;;  %v10077_v47 = vsub.s32 %v5118_v3, %v9989_v25 }
 0x4b2   : > { %v6768_v53 = vpop.eup %6767  ;;  %v4537_v13 = vsub.f32 %v9994_v58, %v4469_v54  ;;  %v4466_v12 = vmul.f32 %v4402_v52, %v9953_v35  ;;  %6779 = vrsqrt.f32 %v4274_v59  ;;  %v4278_v32 = vadd.f32 1e-05, %v4214_v22 }
 0x4b3   : > { %v4017_v61 = vpop.xlane.xlu1 %4016  ;;  %v4791_v48 = vmul.f32 %v9813_v29, %v6768_v53  ;;  %6781 = vtanh.f32 %v4660_v18  ;;  %v4598_v60 = vmul.f32 %v4402_v52, %v10574_v26  ;;  %v10066_v35 = vmul.f32 0.0078125, %v3767_v7  ;;  %v10575_v18 = vld [vmem:[#allocation44_spill] sm:$0xff] }
 0x4b4   : > { %v4665_v43 = vadd.f32 %v4601_v14, %v4537_v13  ;;  %v4084_v42 = vmul.f32 0.0078125, %v4017_v61  ;;  %v4534_v37 = vsub.f32 %v9994_v58, %v4466_v12  ;;  %6783 = vrsqrt.f32 %v4278_v32 }
 0x4b5   : > { %v6770_v45 = vpop.eup %6769  ;;  %4905 = vadd.xlane.f32.xlu1 %v4791_v48  ;;  %v4810_v63 = vpop.xlane.xlu0 %4809  ;;  %v5132_v8 = vadd.s32 4294967216, %v9987_v41  ;;  %v10082_v2 = vsub.s32 %v5097_v33, %v9989_v25  ;;  %v5111_v56 = vadd.s32 4294967240, %v9987_v41  ;;  %v4151_v27 = vmul.f32 %v10066_v35, %v10066_v35 }
 0x4b6   : > { %v6772_v11 = vpop.eup %6771  ;;  %6785 = vtanh.f32 %v4665_v43  ;;  %v4407_v50 = vmul.f32 %v9969_v24, %v6770_v45  ;;  %v4212_v30 = vsub.f32 %v4084_v42, %v4148_v5  ;;  %v4662_v40 = vadd.f32 %v4598_v60, %v4534_v37 }
 0x4b7   : > { %v4023_v4 = vpop.xlane.xlu1 %4022  ;;  %v4794_v57 = vmul.f32 %v9813_v29, %v6772_v11  ;;  %v6774_v38 = vpop.eup %6773  ;;  %v4935_v22 = vadd.f32 %v10008_v6, %v4806_v15  ;;  %v4937_v53 = vadd.f32 %v10008_v6, %v4810_v63  ;;  %v10094_v14 = vsub.s32 %v5132_v8, %v9989_v25  ;;  %v10576_v15 = vld [vmem:[#allocation43_spill] sm:$0xff] }
 0x4b8   : > { %v4471_v34 = vmul.f32 %v4407_v50, %v9982_v0  ;;  %v4276_v55 = vadd.f32 1e-05, %v4212_v30  ;;  %v4404_v7 = vmul.f32 %v9969_v24, %v6774_v38  ;;  %v4087_v54 = vmul.f32 0.0078125, %v4023_v4 }
 0x4b9   : > { %4911 = vadd.xlane.f32.xlu0 %v4794_v57  ;;  %v4814_v52 = vpop.xlane.xlu0 %4813  ;;  %6787 = vtanh.f32 %v4662_v40  ;;  %v4603_v0 = vmul.f32 %v4407_v50, %v10575_v18  ;;  %v5146_v61 = vadd.s32 4294967200, %v9987_v41  ;;  %v5068_v45 = vrot.slane %v4935_v22, %v10013_v10 }
 0x4ba   : > { %v4539_v59 = vsub.f32 %v9994_v58, %v4471_v34  ;;  %6789 = vrsqrt.f32 %v4276_v55  ;;  %v4468_v3 = vmul.f32 %v4404_v7, %v9977_v16  ;;  %v4215_v13 = vsub.f32 %v4087_v54, %v4151_v27 }
 0x4bb   : > { %v6776_v46 = vpop.eup %6775  ;;  %v4808_v51 = vpop.xlane.xlu1 %4807  ;;  %v4600_v48 = vmul.f32 %v4404_v7, %v10576_v15  ;;  %v10101_v16 = vsub.s32 %v5111_v56, %v9989_v25  ;;  %v4939_v26 = vadd.f32 %v10008_v6, %v4814_v52  ;;  %v5080_v50 = vrot.slane %v4937_v53, %v10016_v17 }
 0x4bc   : > { %v4667_v12 = vadd.f32 %v4603_v0, %v4539_v59  ;;  %v4936_v5 = vadd.f32 %v10008_v6, %v4808_v51  ;;  %v4796_v32 = vmul.f32 %v9813_v29, %v6776_v46  ;;  %v4279_v33 = vadd.f32 1e-05, %v4215_v13 }
 0x4bd   : > { %v4818_v43 = vpop.xlane.xlu0 %4817  ;;  %v4536_v42 = vsub.f32 %v9994_v58, %v4468_v3  ;;  %v10113_v38 = vsub.s32 %v5146_v61, %v9989_v25  ;;  %v5094_v59 = vrot.slane %v4939_v26, %v10041_v62 }
 0x4be   : > { %v6778_v37 = vpop.eup %6777  ;;  %6791 = vtanh.f32 %v4667_v12  ;;  %v5073_v60 = vrot.slane %v4936_v5, %v10044_v49  ;;  %4915 = vadd.xlane.f32.xlu0 %v4796_v32  ;;  %v4941_v56 = vadd.f32 %v10008_v6, %v4818_v43 }
 0x4bf   : > { %v6780_v63 = vpop.eup %6779  ;;  %v4409_v11 = vmul.f32 %v9969_v24, %v6778_v37  ;;  %6793 = vrsqrt.f32 %v4279_v33  ;;  %v4812_v30 = vpop.xlane.xlu1 %4811  ;;  %v4664_v4 = vadd.f32 %v4600_v48, %v4536_v42 }
 0x4c0   : > { %v4406_v57 = vmul.f32 %v9969_v24, %v6780_v63  ;;  %v5075_v8 = vsel %vm5074_vm1, %v5073_v60, %v5068_v45  ;;  %v4938_v40 = vadd.f32 %v10008_v6, %v4812_v30  ;;  %v6782_v34 = vpop.eup %6781  ;;  %v5108_v15 = vrot.slane %v4941_v56, %v10069_v44 }
 0x4c1   : > { %v4473_v55 = vmul.f32 %v4409_v11, %v10025_v31  ;;  %v5082_v7 = vsel %vm5081_vm2, %v5080_v50, %v5075_v8  ;;  %v4822_v27 = vpop.xlane.xlu0 %4821  ;;  %6795 = vtanh.f32 %v4664_v4  ;;  %v6784_v54 = vpop.eup %6783  ;;  %v4793_v0 = vmul.f32 %v9813_v29, %v6782_v34 }
 0x4c2   : > { %v4470_v52 = vmul.f32 %v4406_v57, %v10023_v21  ;;  %v5087_v18 = vrot.slane %v4938_v40, %v10073_v28  ;;  %v4605_v31 = vmul.f32 %v4409_v11, %v9511_v9  ;;  %v4602_v3 = vmul.f32 %v4406_v57, %v9473_v20 }
 0x4c3   : > { %v6786_v22 = vpop.eup %6785  ;;  %v4541_v46 = vsub.f32 %v9994_v58, %v4473_v55  ;;  %v4410_v53 = vmul.f32 %v9969_v24, %v6784_v54  ;;  %v4816_v13 = vpop.xlane.xlu1 %4815  ;;  %4909 = vadd.xlane.f32.xlu1 %v4793_v0  ;;  %v5125_v20 = vadd.s32 4294967224, %v9987_v41  ;;  %v4943_v33 = vadd.f32 %v10008_v6, %v4822_v27 }
 0x4c4   : > { %v5089_v51 = vsel %vm5088_vm3, %v5087_v18, %v5082_v7  ;;  %v4940_v21 = vadd.f32 %v10008_v6, %v4816_v13  ;;  %v4798_v12 = vmul.f32 %v9813_v29, %v6786_v22  ;;  %v4538_v5 = vsub.f32 %v9994_v58, %v4470_v52 }
 0x4c5   : > { %v4669_v32 = vadd.f32 %v4605_v31, %v4541_v46  ;;  %v4474_v61 = vmul.f32 %v4410_v53, %v10033_v19  ;;  %v4826_v9 = vpop.xlane.xlu0 %4825  ;;  %v5096_v43 = vsel %vm5095_vm4, %v5094_v59, %v5089_v51  ;;  %v4606_v45 = vmul.f32 %v4410_v53, %v9558_v39  ;;  %v10140_v19 = vld [vmem:[%s10416_s4 + $0x6] ss:$0 sm:$0xff] }
 0x4c6   : > { %v6788_v48 = vpop.eup %6787  ;;  %v5101_v42 = vrot.slane %v4940_v21, %v10082_v2  ;;  %4919 = vadd.xlane.f32.xlu0 %v4798_v12  ;;  %v4666_v37 = vadd.f32 %v4602_v3, %v4538_v5  ;;  %v10149_v57 = vsub.s32 %v5125_v20, %v9989_v25  ;;  %v4945_v34 = vadd.f32 %v10008_v6, %v4826_v9 }
 0x4c7   : > { %v6790_v29 = vpop.eup %6789  ;;  %6797 = vtanh.f32 %v4669_v32  ;;  %v4820_v26 = vpop.xlane.xlu1 %4819  ;;  %v4795_v60 = vmul.f32 %v10140_v19, %v6788_v48  ;;  %v4542_v63 = vsub.f32 %v9994_v58, %v4474_v61  ;;  %v5139_v56 = vadd.s32 4294967208, %v9987_v41 }
 0x4c8   : > { %v4408_v11 = vmul.f32 %v9969_v24, %v6790_v29  ;;  %v5103_v50 = vsel %vm5102_vm5, %v5101_v42, %v5096_v43  ;;  %v4942_v30 = vadd.f32 %v10008_v6, %v4820_v26  ;;  %6799 = vtanh.f32 %v4666_v37 }
 0x4c9   : > { %v5110_v4 = vsel %vm5109_vm6, %v5108_v15, %v5103_v50  ;;  %4913 = vadd.xlane.f32.xlu1 %v4795_v60  ;;  %v4830_v39 = vpop.xlane.xlu0 %4829  ;;  %v4670_v8 = vadd.f32 %v4606_v45, %v4542_v63  ;;  %v5122_v27 = vrot.slane %v4943_v33, %v10077_v47  ;;  %v5160_v52 = vadd.s32 4294967184, %v9987_v41 }
 0x4ca   : > { %v4472_v40 = vmul.f32 %v4408_v11, %v10048_v36  ;;  %v5115_v55 = vrot.slane %v4942_v30, %v10101_v16  ;;  %v4604_v22 = vmul.f32 %v4408_v11, %v9516_v23  ;;  %v5136_v51 = vrot.slane %v4945_v34, %v10094_v14 }
 0x4cb   : > { %v6792_v7 = vpop.eup %6791  ;;  %v4824_v54 = vpop.xlane.xlu1 %4823  ;;  %6801 = vtanh.f32 %v4670_v8  ;;  %v10167_v12 = vsub.s32 %v5139_v56, %v9989_v25  ;;  %v5153_v5 = vadd.s32 4294967192, %v9987_v41  ;;  %v5167_v29 = vadd.s32 4294967176, %v9987_v41 }
 0x4cc   : > { %v6794_v59 = vpop.eup %6793  ;;  %v5117_v18 = vsel %vm5116_vm7, %v5115_v55, %v5110_v4  ;;  %v4944_v0 = vadd.f32 %v10008_v6, %v4824_v54  ;;  %v4800_v36 = vmul.f32 %v10140_v19, %v6792_v7  ;;  %v4540_v53 = vsub.f32 %v9994_v58, %v4472_v40 }
 0x4cd   : > { %v4411_v46 = vmul.f32 %v9969_v24, %v6794_v59  ;;  %v5124_v31 = vsel %vm5123_vm8, %v5122_v27, %v5117_v18  ;;  %v4834_v3 = vpop.xlane.xlu0 %4833  ;;  %v4947_v24 = vadd.f32 %v10008_v6, %v4830_v39  ;;  %v10180_v37 = vsub.s32 %v5153_v5, %v9989_v25 }
 0x4ce   : > { %v6796_v13 = vpop.eup %6795  ;;  %v5129_v21 = vrot.slane %v4944_v0, %v10149_v57  ;;  %4923 = vadd.xlane.f32.xlu0 %v4800_v36  ;;  %v4668_v15 = vadd.f32 %v4604_v22, %v4540_v53  ;;  %v10185_v26 = vsub.s32 %v5160_v52, %v9989_v25  ;;  %v10194_v40 = vsub.s32 %v5167_v29, %v9989_v25 }
 0x4cf   : > { %v4475_v23 = vmul.f32 %v4411_v46, %v10066_v35  ;;  %v4828_v32 = vpop.xlane.xlu1 %4827  ;;  %v4797_v61 = vmul.f32 %v10140_v19, %v6796_v13  ;;  %v4607_v48 = vmul.f32 %v4411_v46, %v9588_v1  ;;  %v5150_v45 = vrot.slane %v4947_v24, %v10113_v38 }
 0x4d0   : > { %v5131_v9 = vsel %vm5130_vm9, %v5129_v21, %v5124_v31  ;;  %v4946_v20 = vadd.f32 %v10008_v6, %v4828_v32  ;;  %6803 = vtanh.f32 %v4668_v15  ;;  %v4949_v1 = vadd.f32 %v10008_v6, %v4834_v3 }
 0x4d1   : > { %v5138_v33 = vsel %vm5137_vm10, %v5136_v51, %v5131_v9  ;;  %4917 = vadd.xlane.f32.xlu1 %v4797_v61  ;;  %v4838_v43 = vpop.xlane.xlu0 %4837  ;;  %v4543_v35 = vsub.f32 %v9994_v58, %v4475_v23 }
 0x4d2   : > { %v5143_v42 = vrot.slane %v4946_v20, %v10167_v12  ;;  %v5164_v34 = vrot.slane %v4949_v1, %v10185_v26  ;;  %v4951_v25 = vadd.f32 %v10008_v6, %v4838_v43 }
 0x4d3   : > { %v4832_v60 = vpop.xlane.xlu1 %4831  ;;  %v4671_v63 = vadd.f32 %v4607_v48, %v4543_v35 }
 0x4d4   : > { %v6798_v11 = vpop.eup %6797  ;;  %v5145_v58 = vsel %vm5144_vm11, %v5143_v42, %v5138_v33  ;;  %v4948_v50 = vadd.f32 %v10008_v6, %v4832_v60  ;;  %v5177_v13 = vrot.slane %v4951_v25, %v10013_v10 }
 0x4d5   : > { %v5152_v30 = vsel %vm5151_vm12, %v5150_v45, %v5145_v58  ;;  %v4802_v4 = vmul.f32 %v10140_v19, %v6798_v11  ;;  %v4842_v41 = vpop.xlane.xlu0 %4841  ;;  %6805 = vtanh.f32 %v4671_v63  ;;  %v6800_v39 = vpop.eup %6799 }
 0x4d6   : > { %v5157_v8 = vrot.slane %v4948_v50, %v10180_v37  ;;  %v4799_v56 = vmul.f32 %v10140_v19, %v6800_v39  ;;  %v4953_v36 = vadd.f32 %v10008_v6, %v4842_v41 }
 0x4d7   : > { %4927 = vadd.xlane.f32.xlu0 %v4802_v4  ;;  %v4836_v55 = vpop.xlane.xlu1 %4835 }
 0x4d8   : > { %v6802_v7 = vpop.eup %6801  ;;  %v5159_v27 = vsel %vm5158_vm13, %v5157_v8, %v5152_v30  ;;  %v4950_v54 = vadd.f32 %v10008_v6, %v4836_v55  ;;  %4921 = vadd.xlane.f32.xlu1 %v4799_v56  ;;  %v5186_v21 = vrot.slane %v4953_v36, %v10016_v17 }
 0x4d9   : > { %v5166_v52 = vsel %vm5165_vm14, %v5164_v34, %v5159_v27  ;;  %v4848_v59 = vpop.xlane.xlu0 %4847  ;;  %v4803_v18 = vmul.f32 %v10140_v19, %v6802_v7 }
 0x4da   : > { %v5171_v0 = vrot.slane %v4950_v54, %v10194_v40  ;;  %v4956_v48 = vadd.f32 %v10008_v6, %v4848_v59 }
 0x4db   : > { %v4840_v22 = vpop.xlane.xlu1 %4839  ;;  %4929 = vadd.xlane.f32.xlu0 %v4803_v18 }
 0x4dc   : > { %v10206_v46 = vsel %vm5172_vm15, %v5171_v0, %v5166_v52  ;;  %v4952_v31 = vadd.f32 %v10008_v6, %v4840_v22  ;;  %v5201_v45 = vrot.slane %v4956_v48, %v10082_v2 }
 0x4dd   : > { %v4852_v3 = vpop.xlane.xlu0 %4851  ;;  %v6804_v53 = vpop.eup %6803 }
 0x4de   : > { %v5181_v51 = vrot.slane %v4952_v31, %v10044_v49  ;;  %v4801_v23 = vmul.f32 %v10140_v19, %v6804_v53  ;;  %v4958_v1 = vadd.f32 %v10008_v6, %v4852_v3 }
 0x4df   : > { %v4844_v5 = vpop.xlane.xlu1 %4843 }
 0x4e0   : > { %v5182_v24 = vsel %vm5074_vm1, %v5181_v51, %v5177_v13  ;;  %v4954_v32 = vadd.f32 %v10008_v6, %v4844_v5  ;;  %4925 = vadd.xlane.f32.xlu1 %v4801_v23  ;;  %v5211_v30 = vrot.slane %v4958_v1, %v10101_v16 }
 0x4e1   : > { %v5187_v61 = vsel %vm5081_vm2, %v5186_v21, %v5182_v24  ;;  %v4856_v20 = vpop.xlane.xlu0 %4855 }
 0x4e2   : > { %v6806_v15 = vpop.eup %6805  ;;  %v5191_v9 = vrot.slane %v4954_v32, %v10073_v28  ;;  %v4960_v4 = vadd.f32 %v10008_v6, %v4856_v20 }
 0x4e3   : > { %v4846_v33 = vpop.xlane.xlu1 %4845  ;;  %v4804_v43 = vmul.f32 %v10140_v19, %v6806_v15 }
 0x4e4   : > { %v5192_v35 = vsel %vm5088_vm3, %v5191_v9, %v5187_v61  ;;  %v4955_v42 = vadd.f32 %v10008_v6, %v4846_v33  ;;  %v5221_v7 = vrot.slane %v4960_v4, %v10149_v57 }
 0x4e5   : > { %4931 = vadd.xlane.f32.xlu1 %v4804_v43  ;;  %v4860_v11 = vpop.xlane.xlu0 %4859 }
 0x4e6   : > { %v5196_v29 = vrot.slane %v4955_v42, %v10041_v62  ;;  %v4962_v27 = vadd.f32 %v10008_v6, %v4860_v11 }
 0x4e7   : > { %v4850_v60 = vpop.xlane.xlu1 %4849 }
 0x4e8   : > { %v5197_v63 = vsel %vm5095_vm4, %v5196_v29, %v5192_v35  ;;  %v4957_v58 = vadd.f32 %v10008_v6, %v4850_v60  ;;  %v5231_v0 = vrot.slane %v4962_v27, %v10167_v12 }
 0x4e9   : > { %v5202_v50 = vsel %vm5102_vm5, %v5201_v45, %v5197_v63  ;;  %v4864_v55 = vpop.xlane.xlu0 %4863 }
 0x4ea   : > { %v5206_v19 = vrot.slane %v4957_v58, %v10069_v44  ;;  %v4964_v36 = vadd.f32 %v10008_v6, %v4864_v55 }
 0x4eb   : > { %v4854_v41 = vpop.xlane.xlu1 %4853 }
 0x4ec   : > { %v5207_v39 = vsel %vm5109_vm6, %v5206_v19, %v5202_v50  ;;  %v4959_v8 = vadd.f32 %v10008_v6, %v4854_v41  ;;  %v5241_v21 = vrot.slane %v4964_v36, %v10180_v37 }
 0x4ed   : > { %v5212_v34 = vsel %vm5116_vm7, %v5211_v30, %v5207_v39  ;;  %v4868_v31 = vpop.xlane.xlu0 %4867 }
 0x4ee   : > { %v5216_v56 = vrot.slane %v4959_v8, %v10077_v47  ;;  %v4966_v5 = vadd.f32 %v10008_v6, %v4868_v31 }
 0x4ef   : > { %v4858_v54 = vpop.xlane.xlu1 %4857 }
 0x4f0   : > { %v5217_v52 = vsel %vm5123_vm8, %v5216_v56, %v5212_v34  ;;  %v4961_v59 = vadd.f32 %v10008_v6, %v4858_v54  ;;  %v5251_v9 = vrot.slane %v4966_v5, %v10194_v40 }
 0x4f1   : > { %v5222_v18 = vsel %vm5130_vm9, %v5221_v7, %v5217_v52  ;;  %v4872_v43 = vpop.xlane.xlu0 %4871 }
 0x4f2   : > { %v5226_v25 = vrot.slane %v4961_v59, %v10094_v14  ;;  %v4968_v8 = vadd.f32 %v10008_v6, %v4872_v43 }
 0x4f3   : > { %v4862_v22 = vpop.xlane.xlu1 %4861 }
 0x4f4   : > { %v5227_v3 = vsel %vm5137_vm10, %v5226_v25, %v5222_v18  ;;  %v4963_v53 = vadd.f32 %v10008_v6, %v4862_v22  ;;  %v5260_v27 = vrot.slane %v4968_v8, %v10044_v49 }
 0x4f5   : > { %v5232_v13 = vsel %vm5144_vm11, %v5231_v0, %v5227_v3 }
 0x4f6   : > { %v5236_v51 = vrot.slane %v4963_v53, %v10113_v38 }
 0x4f7   : > { %v4866_v23 = vpop.xlane.xlu1 %4865 }
 0x4f8   : > { %v5237_v24 = vsel %vm5151_vm12, %v5236_v51, %v5232_v13  ;;  %v4965_v32 = vadd.f32 %v10008_v6, %v4866_v23  ;;  %v4876_v35 = vpop.xlane.xlu0 %4875 }
 0x4f9   : > { %v5242_v61 = vsel %vm5158_vm13, %v5241_v21, %v5237_v24  ;;  %v4970_v18 = vadd.f32 %v10008_v6, %v4876_v35 }
 0x4fa   : > { %v5246_v15 = vrot.slane %v4965_v32, %v10185_v26 }
 0x4fb   : > { %v4870_v42 = vpop.xlane.xlu1 %4869  ;;  %v5270_v13 = vrot.slane %v4970_v18, %v10073_v28 }
 0x4fc   : > { %v5247_v20 = vsel %vm5165_vm14, %v5246_v15, %v5242_v61  ;;  %v4874_v45 = vpop.xlane.xlu0 %4873 }
 0x4fd   : > { %v5252_v48 = vsel %vm5172_vm15, %v5251_v9, %v5247_v20  ;;  %v4969_v34 = vadd.f32 %v10008_v6, %v4874_v45 }
 0x4fe   : > { %v10256_v33 = vsel %vm5411_vm0, %v5252_v48, %v10206_v46  ;;  %v4967_v46 = vadd.f32 %v10008_v6, %v4870_v42 }
 0x4ff   : > { %v5265_v54 = vrot.slane %v4969_v34, %v10016_v17 }
 0x500   : > { %v4880_v60 = vpop.xlane.xlu0 %4879  ;;  %v5256_v56 = vrot.slane %v4967_v46, %v10013_v10 }
 0x501   : > { %v4972_v51 = vadd.f32 %v10008_v6, %v4880_v60 }
 0x502   : > { %v5261_v25 = vsel %vm5074_vm1, %v5260_v27, %v5256_v56 }
 0x503   : > { %v5266_v36 = vsel %vm5081_vm2, %v5265_v54, %v5261_v25  ;;  %v5280_v20 = vrot.slane %v4972_v51, %v10082_v2 }
 0x504   : > { %v4878_v29 = vpop.xlane.xlu1 %4877  ;;  %v5271_v24 = vsel %vm5088_vm3, %v5270_v13, %v5266_v36 }
 0x505   : > { %v4971_v52 = vadd.f32 %v10008_v6, %v4878_v29 }
 0x507   : > { %v5275_v22 = vrot.slane %v4971_v52, %v10041_v62 }
 0x509   : > { %v5276_v32 = vsel %vm5095_vm4, %v5275_v22, %v5271_v24 }
 0x50a   : > { %v5281_v60 = vsel %vm5102_vm5, %v5280_v20, %v5276_v32 }
 0x50c   : > { %v4884_v11 = vpop.xlane.xlu0 %4883 }
 0x50d   : > { %v4974_v35 = vadd.f32 %v10008_v6, %v4884_v11 }
 0x512   : > { %v4882_v1 = vpop.xlane.xlu1 %4881 }
 0x513   : > { %v4973_v31 = vadd.f32 %v10008_v6, %v4882_v1 }
 0x515   : > { %v5285_v61 = vrot.slane %v4973_v31, %v10069_v44 }
 0x516   : > { %v4886_v63 = vpop.xlane.xlu1 %4885 }
 0x517   : > { %v4975_v42 = vadd.f32 %v10008_v6, %v4886_v63 }
 0x51a   : > { %v4888_v50 = vpop.xlane.xlu0 %4887 }
 0x51d   : > { %v4890_v58 = vpop.xlane.xlu1 %4889 }
 0x51e   : > { %v4977_v54 = vadd.f32 %v10008_v6, %v4890_v58 }
 0x520   : > { %v10260_v30 = vpop.xlane.xlu0 %4891  ;;  %v5305_v31 = vrot.slane %v4977_v54, %v10094_v14 }
 0x521   : > { %v4978_v36 = vadd.f32 %v10008_v6, %v10260_v30 }
 0x526   : > { %v10258_v19 = vpop.xlane.xlu1 %4893 }
 0x529   : > { %v10264_v41 = vpop.xlane.xlu0 %4895 }
 0x52a   : > { %v10262_v4 = vpop.xlane.xlu1 %4899 }
 0x52e   : > { %v10267_v39 = vpop.xlane.xlu1 %4897 }
 0x530   : > { %v4904_v55 = vpop.xlane.xlu0 %4903 }
 0x531   : > { %v4984_v5 = vadd.f32 %v10008_v6, %v4904_v55  ;;  %v5295_v55 = vrot.slane %v4975_v42, %v10077_v47 }
 0x533   : > { %v5339_v29 = vrot.slane %v4984_v5, %v10044_v49  ;;  %v5290_v49 = vrot.slane %v4974_v35, %v10101_v16  ;;  %v5310_v5 = vrot.slane %v4978_v36, %v10167_v12 }
 0x534   : > { %v4902_v7 = vpop.xlane.xlu1 %4901 }
 0x535   : > { %v4983_v3 = vadd.f32 %v10008_v6, %v4902_v7 }
 0x536   : > { %v4908_v59 = vpop.xlane.xlu0 %4907 }
 0x537   : > { %v5335_v15 = vrot.slane %v4983_v3, %v10013_v10  ;;  %v4986_v45 = vadd.f32 %v10008_v6, %v4908_v59  ;;  %v5286_v10 = vsel %vm5109_vm6, %v5285_v61, %v5281_v60  ;;  %v4979_v3 = vadd.f32 %v10008_v6, %v10258_v19 }
 0x538   : > { %v5291_v52 = vsel %vm5116_vm7, %v5290_v49, %v5286_v10 }
 0x539   : > { %v5340_v46 = vsel %vm5074_vm1, %v5339_v29, %v5335_v15  ;;  %v5349_v56 = vrot.slane %v4986_v45, %v10073_v28  ;;  %v5296_v28 = vsel %vm5123_vm8, %v5295_v55, %v5291_v52  ;;  %v5315_v61 = vrot.slane %v4979_v3, %v10113_v38 }
 0x53a   : > { %v4981_v15 = vadd.f32 %v10008_v6, %v10267_v39  ;;  %v4982_v29 = vadd.f32 %v10008_v6, %v10262_v4  ;;  %vm5413_vm1 = vcmask 1042434  }
 0x53c   : > { %v5325_v39 = vrot.slane %v4981_v15, %v10185_v26 }
 0x53e   : > { %v4906_v0 = vpop.xlane.xlu1 %4905 }
 0x53f   : > { %v4985_v21 = vadd.f32 %v10008_v6, %v4906_v0 }
 0x541   : > { %v5344_v48 = vrot.slane %v4985_v21, %v10016_v17  ;;  %v4976_v17 = vadd.f32 %v10008_v6, %v4888_v50 }
 0x542   : > { %v4912_v53 = vpop.xlane.xlu0 %4911 }
 0x543   : > { %v5345_v34 = vsel %vm5081_vm2, %v5344_v48, %v5340_v46  ;;  %v4988_v7 = vadd.f32 %v10008_v6, %v4912_v53  ;;  %vm5415_vm2 = vcmask 1043459  }
 0x544   : > { %v5350_v50 = vsel %vm5088_vm3, %v5349_v56, %v5345_v34  ;;  %v5330_v34 = vrot.slane %v4982_v29, %v10194_v40 }
 0x545   : > { %v5359_v58 = vrot.slane %v4988_v7, %v10082_v2 }
 0x547   : > { %v4916_v9 = vpop.xlane.xlu0 %4915 }
 0x548   : > { %v4990_v22 = vadd.f32 %v10008_v6, %v4916_v9 }
 0x54a   : > { %v5369_v19 = vrot.slane %v4990_v22, %v10101_v16 }
 0x54c   : > { %v4910_v23 = vpop.xlane.xlu1 %4909 }
 0x54d   : > { %v4987_v43 = vadd.f32 %v10008_v6, %v4910_v23  ;;  %v4980_v23 = vadd.f32 %v10008_v6, %v10264_v41 }
 0x54f   : > { %v4920_v8 = vpop.xlane.xlu0 %4919  ;;  %v5354_v11 = vrot.slane %v4987_v43, %v10041_v62  ;;  %v5300_v62 = vrot.slane %v4976_v17, %v10149_v57  ;;  %v5320_v16 = vrot.slane %v4980_v23, %v10180_v37 }
 0x550   : > { %v4992_v24 = vadd.f32 %v10008_v6, %v4920_v8 }
 0x551   : > { %v5355_v18 = vsel %vm5095_vm4, %v5354_v11, %v5350_v50  ;;  %v5301_v51 = vsel %vm5130_vm9, %v5300_v62, %v5296_v28 }
 0x552   : > { %v4914_v1 = vpop.xlane.xlu1 %4913  ;;  %v5360_v53 = vsel %vm5102_vm5, %v5359_v58, %v5355_v18  ;;  %v5306_v32 = vsel %vm5137_vm10, %v5305_v31, %v5301_v51  ;;  %v5379_v48 = vrot.slane %v4992_v24, %v10149_v57 }
 0x553   : > { %v4989_v63 = vadd.f32 %v10008_v6, %v4914_v1  ;;  %v5311_v41 = vsel %vm5144_vm11, %v5310_v5, %v5306_v32 }
 0x554   : > { %v5316_v42 = vsel %vm5151_vm12, %v5315_v61, %v5311_v41 }
 0x555   : > { %v5364_v25 = vrot.slane %v4989_v63, %v10069_v44  ;;  %v5321_v46 = vsel %vm5158_vm13, %v5320_v16, %v5316_v42 }
 0x556   : > { %v5326_v17 = vsel %vm5165_vm14, %v5325_v39, %v5321_v46 }
 0x557   : > { %v4924_v59 = vpop.xlane.xlu0 %4923  ;;  %v5365_v21 = vsel %vm5109_vm6, %v5364_v25, %v5360_v53 }
 0x558   : > { %v4994_v43 = vadd.f32 %v10008_v6, %v4924_v59 }
 0x55a   : > { %v4918_v27 = vpop.xlane.xlu1 %4917  ;;  %v5389_v8 = vrot.slane %v4994_v43, %v10167_v12 }
 0x55b   : > { %v4991_v0 = vadd.f32 %v10008_v6, %v4918_v27  ;;  %v5331_v27 = vsel %vm5172_vm15, %v5330_v34, %v5326_v17 }
 0x55c   : > { %v5414_v54 = vsel %vm5413_vm1, %v5331_v27, %v10256_v33 }
 0x55d   : > { %v5374_v30 = vrot.slane %v4991_v0, %v10077_v47  ;;  %v5370_v47 = vsel %vm5116_vm7, %v5369_v19, %v5365_v21 }
 0x55f   : > { %v5375_v9 = vsel %vm5123_vm8, %v5374_v30, %v5370_v47 }
 0x560   : > { %v4928_v13 = vpop.xlane.xlu0 %4927 }
 0x561   : > { %v4922_v44 = vpop.xlane.xlu1 %4921  ;;  %v4996_v45 = vadd.f32 %v10008_v6, %v4928_v13 }
 0x562   : > { %v4993_v2 = vadd.f32 %v10008_v6, %v4922_v44 }
 0x563   : > { %v5399_v11 = vrot.slane %v4996_v45, %v10180_v37 }
 0x564   : > { %v5384_v20 = vrot.slane %v4993_v2, %v10094_v14  ;;  %v4930_v35 = vpop.xlane.xlu0 %4929  ;;  %v5380_v14 = vsel %vm5130_vm9, %v5379_v48, %v5375_v9 }
 0x565   : > { %v4997_v57 = vadd.f32 %v10008_v6, %v4930_v35 }
 0x566   : > { %v5385_v60 = vsel %vm5137_vm10, %v5384_v20, %v5380_v14 }
 0x567   : > { %v5390_v63 = vsel %vm5144_vm11, %v5389_v8, %v5385_v60  ;;  %v5404_v55 = vrot.slane %v4997_v57, %v10185_v26 }
 0x569   : > { %v4926_v1 = vpop.xlane.xlu1 %4925 }
 0x56a   : > { %v4995_v10 = vadd.f32 %v10008_v6, %v4926_v1 }
 0x56c   : > { %v5394_v4 = vrot.slane %v4995_v10, %v10113_v38 }
 0x56e   : > { %v4932_v49 = vpop.xlane.xlu1 %4931  ;;  %v5395_v56 = vsel %vm5151_vm12, %v5394_v4, %v5390_v63 }
 0x56f   : > { %v4998_v7 = vadd.f32 %v10008_v6, %v4932_v49  ;;  %v5400_v12 = vsel %vm5158_vm13, %v5399_v11, %v5395_v56 }
 0x570   : > { %v5405_v37 = vsel %vm5165_vm14, %v5404_v55, %v5400_v12 }
 0x571   : > { %v5409_v38 = vrot.slane %v4998_v7, %v10194_v40 }
 0x573   : > { %v5410_v26 = vsel %vm5172_vm15, %v5409_v38, %v5405_v37 }
 0x574   : > { %v5416_v6 = vsel %vm5415_vm2, %v5410_v26, %v5414_v54 }
 0x575   : > { %5418 = vst [vmem:[%s246_s5] sm:$0xf] %v5416_v6 }
 0x576   : > { %6888 = shalt.err (!%p6885_p3)
}
 0x577   : > { %s6889_s10 = scalar_lea.hbm %s10375_s11, 64  ;;  %s6893_s19 = scalar_lea.hbm %s10418_s6, 128 }
 0x578   : > { %p6890_p4 = scmp.ne.s32.totalorder %s10375_s11, %s6889_s10  ;;  %p6894_p9 = scmp.lt.s32.totalorder %s10375_s11, %s10418_s6 }
 0x579   : > { %p6895_p10 = scmp.lt.s32.totalorder %s6893_s19, %s6889_s10 }
 0x57a   : > { %p6891_p7 = pnand %p6890_p4, %p7011_p5 }
 0x57b   : > { %p6896_p11 = por %p6895_p10, %p6894_p9 }
 0x57c   : > { %p6892_p8 = pneg %p6891_p7 }
 0x57e   : > { %p6897_p12 = pnand %p6896_p11, %p6892_p8 }
 0x580   : > { %6900 = shalt.err (!%p6897_p12)
}
 0x581   : > { %6000 = dma.vmem_to_hbm [thread:$0]  (%p7011_p5), %s5434_s27, 64, %s10375_s11, %s5420_s12  }
 0x582 PF: > { %p6006_p13 = scmp.ge.s32.totalorder %s6935_s26, 2  ;;  %s5445_s22 = sand.u32 1, %s6923_s23  }
 0x583   : > { %s5446_s5 = scalar_lea.sflag [#allocation4], %s5445_s22 }
 0x584   : > { %p6003_p0 = pnand %p6006_p13, %p7015_p6 }
 0x586   : > { %p6004_p1 = pneg %p6003_p0 }
 0x588   : > { %6918 = dma.done.wait (%p6004_p1), %s5446_s5, 64  }
 0x589   : > { %6920 = vsyncadd (%p6004_p1), %s5446_s5, 4294967232  ;;  %p17_p2 = scmp.ge.s32.totalorder %s6999_s28, 4   ;;  %s10577_s23 = smov %s6927_s24 }
 0x58a   : > { %s10578_s24 = smov %s6931_s25  ;;  %s10579_s25 = smov %s7009_s7 }
 0x58b   : > { %s10580_s26 = smov %s6999_s28  ;;  %19 = sbr.rel (!%p17_p2) target bundleno = 5 (0x5), region = 79 }
 0x590   :  { %5451 = vsyncpa [#allocation4], 1 }
 0x591   :  { %5453 = vsyncpa [#allocation4 + $0x1], 1 }

</bundles_post_ra>
